<compile_context>
chip_gen: v7x
topology: tpu7x:2x2x1
jax: 0.10.0
libtpu: 0.0.40
codegen_flags: <defaults>
</compile_context>

<pallas_src>
import functools

import jax
import jax.numpy as jnp
from jax.experimental import pallas as pl
from jax.experimental.pallas import tpu as pltpu


NP = 128                      # lane-dense padded output-channel width

# ---- static architecture constants (GRDN with Cstd=8) ----------------------
CSTD = 8
G = CSTD                      # RDB growth
ENC_CH = [2, 2, 4, 8, 8, 16]
ENC_STRIDE = [1, 1, 2, 2, 2]
DEC_CH = [16, 8, 8, 4, 2, 2]
DEC_UP = [True, True, True, False, False]
CCBAM = CSTD // 4 if CSTD // 4 > 0 else 1
HIDDEN = max(CCBAM // 16, 1)  # TODO(synk): reduction_ratio=16 > Ccbam; clamped to >=1.


# ---------------------------------------------------------------------------
# Pallas kernels: matmul + bias (+ ReLU) (+ fused residual)
# ---------------------------------------------------------------------------

def _mm_kernel(x_ref, w_ref, b_ref, o_ref, *, relu):
    acc = jnp.dot(x_ref[...], w_ref[...], preferred_element_type=jnp.float32)
    acc = acc + b_ref[...]
    if relu:
        acc = jnp.maximum(acc, 0.0)
    o_ref[...] = acc.astype(o_ref.dtype)


def _mm_res_kernel(x_ref, w_ref, b_ref, r_ref, o_ref, *, relu):
    acc = jnp.dot(x_ref[...], w_ref[...], preferred_element_type=jnp.float32)
    acc = acc + b_ref[...]
    if relu:
        acc = jnp.maximum(acc, 0.0)
    acc = acc + r_ref[...].astype(jnp.float32)      # fused residual add
    o_ref[...] = acc.astype(o_ref.dtype)


def _choose_tm(M):
    """Tile that divides M exactly (no row padding), >=2 grid steps if possible."""
    if M % 8 != 0:
        return M
    for tm in (1024, 512, 256, 128, 64, 32, 16, 8):
        if M % tm == 0 and M // tm >= 2:
            return tm
    return M


@functools.lru_cache(maxsize=None)
def _build_mm(M, K, tm, relu, has_res, out_dtype_name):
    out_dtype = jnp.dtype(out_dtype_name)
    kernel = functools.partial(_mm_res_kernel if has_res else _mm_kernel, relu=relu)
    in_specs = [
        pl.BlockSpec((tm, K), lambda i: (i, 0)),
        pl.BlockSpec((K, NP), lambda i: (0, 0)),
        pl.BlockSpec((1, NP), lambda i: (0, 0)),
    ]
    if has_res:
        in_specs.append(pl.BlockSpec((tm, NP), lambda i: (i, 0)))
    return pl.pallas_call(
        kernel,
        out_shape=jax.ShapeDtypeStruct((M, NP), out_dtype),
        grid_spec=pltpu.PrefetchScalarGridSpec(
            num_scalar_prefetch=0,
            grid=(M // tm,),
            in_specs=in_specs,
            out_specs=pl.BlockSpec((tm, NP), lambda i: (i, 0)),
        ),
        compiler_params=pltpu.CompilerParams(
            dimension_semantics=("parallel",),
            vmem_limit_bytes=32 * 1024 * 1024,
        ),
    )


def matmul_bias(x, w, b, relu=False, residual=None, out_dtype=jnp.bfloat16):
    """x: [M,K] (any float) ; w: [K,128] bf16 ; b: [1,128] f32 ;
    residual: optional [M,128] (padded-channel activation).  Returns [M,128]."""
    M, K = x.shape
    x = x.astype(jnp.bfloat16)
    tm = _choose_tm(M)
    f = _build_mm(M, K, tm, bool(relu), residual is not None,
                  jnp.dtype(out_dtype).name)
    if residual is None:
        return f(x, w, b)
    return f(x, w, b, residual.astype(jnp.bfloat16))


# ---------------------------------------------------------------------------
# Conv wrappers (im2col glue + Pallas matmul)
# ---------------------------------------------------------------------------

def _im2col(x, k, stride=1):
    """x is already spatially padded.  Returns ([M, k^3*C], (N,Do,Ho,Wo))."""
    N, D, H, W, C = x.shape
    Do = (D - k) // stride + 1
    Ho = (H - k) // stride + 1
    Wo = (W - k) // stride + 1
    if k == 1:
        xs = x if stride == 1 else x[:, ::stride, ::stride, ::stride, :]
        return xs.reshape(N * Do * Ho * Wo, C), (N, Do, Ho, Wo)
    slabs = [x[:, kd:kd + (Do - 1) * stride + 1:stride,
                 kh:kh + (Ho - 1) * stride + 1:stride,
                 kw:kw + (Wo - 1) * stride + 1:stride, :]
             for kd in range(k) for kh in range(k) for kw in range(k)]
    patches = jnp.concatenate(slabs, axis=-1)
    return patches.reshape(N * Do * Ho * Wo, k * k * k * C), (N, Do, Ho, Wo)


def crop(a, c):
    """Crop a padded-channel activation (..., 128) to its true channel count."""
    return a[..., :c]


def conv3d(x, p, k, stride=1, pad=0, relu=False, residual=None):
    """x: NDHWC with true channels.  Returns NDHW x 128 (padded channels, bf16).
    The padded channel columns are exactly zero (weights/bias zero-padded), so
    the output can be reused directly as a fused residual elsewhere."""
    x = x.astype(jnp.bfloat16)
    if pad:
        x = jnp.pad(x, ((0, 0), (pad, pad), (pad, pad), (pad, pad), (0, 0)))
    patches, (N, Do, Ho, Wo) = _im2col(x, k, stride)
    res2d = None
    if residual is not None:
        res2d = residual.reshape(N * Do * Ho * Wo, NP)
    out = matmul_bias(patches, p["w"], p["b"], relu=relu, residual=res2d)
    return out.reshape(N, Do, Ho, Wo, NP)


def conv_transpose3d(x, p, cout, relu=False):
    """ConvTranspose3d(stride=2, k=3, p=1, output_padding=1) as a sub-pixel
    2x2x2-tap stride-1 conv whose 8*cout output columns are the 8 parities.
    x: (N,S,S,S,Cin) true channels -> (N,2S,2S,2S,cout).
    # TODO(synk): real torch ConvTranspose3d checkpoints would need the kernel
    # flip + (Cin,Cout) weight transpose folded in before _subpixel_weight."""
    x = x.astype(jnp.bfloat16)
    N, D, H, W, C = x.shape
    xp = jnp.pad(x, ((0, 0), (0, 1), (0, 1), (0, 1), (0, 0)))
    patches, _ = _im2col(xp, k=2, stride=1)                 # (N*D*H*W, 8*C)
    out = matmul_bias(patches, p["w"], p["b"], relu=relu)   # (N*D*H*W, 128)
    out = out[:, :8 * cout].reshape(N, D, H, W, 2, 2, 2, cout)
    out = out.transpose(0, 1, 4, 2, 5, 3, 6, 7).reshape(N, 2 * D, 2 * H, 2 * W, cout)
    return out


# ---------------------------------------------------------------------------
# Parameters (deterministic synthetic init; shapes follow GRDN.__init__)
# Weights are stored pre-reshaped to (K, 128) bf16, bias (1, 128) f32.
# ---------------------------------------------------------------------------

def _pad_wb(w2d, b1d):
    K, C = w2d.shape
    wp = jnp.zeros((K, NP), jnp.bfloat16).at[:, :C].set(w2d.astype(jnp.bfloat16))
    bp = jnp.zeros((1, NP), jnp.float32).at[0, :C].set(b1d.astype(jnp.float32))
    return {"w": wp, "b": bp}


def _conv_param(key, k, cin, cout):
    kw, kb = jax.random.split(key)
    scale = (k * k * k * cin) ** -0.5
    w = jax.random.normal(kw, (k, k, k, cin, cout), jnp.float32) * scale
    b = jax.random.normal(kb, (cout,), jnp.float32) * 0.01
    return _pad_wb(w.reshape(k * k * k * cin, cout), b)


def _dense_param(key, cin, cout):
    kw, _ = jax.random.split(key)
    w = jax.random.normal(kw, (cin, cout), jnp.float32) * cin ** -0.5
    b = jnp.zeros((cout,), jnp.float32)
    return _pad_wb(w, b)


def _subpixel_weight(w):
    """Fold a 3x3x3 transposed-conv (dilation form) into a 2x2x2-tap stride-1
    conv weight of shape (8*Cin, 8*Cout); column block p = output parity."""
    cin, cout = w.shape[3], w.shape[4]
    zero = jnp.zeros((cin, cout), w.dtype)
    even = {0: 1}          # tap-offset j -> original kernel index (even parity)
    odd = {0: 0, 1: 2}     # odd parity
    cols = []
    for pz in (0, 1):
        for py in (0, 1):
            for px in (0, 1):
                mz = odd if pz else even
                my = odd if py else even
                mx = odd if px else even
                rows = []
                for jz in (0, 1):
                    for jy in (0, 1):
                        for jx in (0, 1):
                            if jz in mz and jy in my and jx in mx:
                                rows.append(w[mz[jz], my[jy], mx[jx]])
                            else:
                                rows.append(zero)
                cols.append(jnp.concatenate(rows, axis=0))      # (8*cin, cout)
    return jnp.concatenate(cols, axis=1)                        # (8*cin, 8*cout)


def _deconv_param(key, cin, cout):
    kw, kb = jax.random.split(key)
    scale = (27 * cin) ** -0.5
    w = jax.random.normal(kw, (3, 3, 3, cin, cout), jnp.float32) * scale
    b = jax.random.normal(kb, (cout,), jnp.float32) * 0.01
    return _pad_wb(_subpixel_weight(w), jnp.tile(b, 8))


def init_params(key):
    keys = iter(jax.random.split(key, 128))
    nk = lambda: next(keys)

    params = {}
    params["conv1"] = _conv_param(nk(), 1, 1, 2)

    # TODO(synk): GenCAE encoder/decoder Block internals (middle channels,
    # norm/activation placement) are not in the provided source; using
    # conv3x3(+ReLU) with channels [2,2,4,8,8,16] and strides [1,1,2,2,2].
    params["down"] = [_conv_param(nk(), 3, ENC_CH[i], ENC_CH[i + 1]) for i in range(5)]

    params["conv2"] = _conv_param(nk(), 3, 16, CSTD)

    def rdb():
        # TODO(synk): RDB_kwargs / _DenseBlock internals not provided; using a
        # 2-layer residual dense block (growth=Cstd) with 1x1 local fusion.
        return {"dense": [_conv_param(nk(), 3, CSTD, G),
                          _conv_param(nk(), 3, CSTD + G, G)],
                "fuse": _conv_param(nk(), 1, CSTD + 2 * G, CSTD)}

    def grdb():
        return {"rdbs": [rdb() for _ in range(4)],
                "conv1x1": _conv_param(nk(), 1, 4 * CSTD, CSTD)}

    # grdb4 is built (as in __init__) but unused in forward, matching PyTorch.
    params["grdb"] = [grdb() for _ in range(4)]

    params["conv2a"] = _conv_param(nk(), 3, CSTD, 16)

    ups = []
    for i in range(5):
        if DEC_UP[i]:
            ups.append(_deconv_param(nk(), DEC_CH[i], DEC_CH[i + 1]))
        else:
            ups.append(_conv_param(nk(), 3, DEC_CH[i], DEC_CH[i + 1]))
    params["up"] = ups

    params["conv3"] = _conv_param(nk(), 3, 2, CCBAM)
    params["cbam"] = {
        "mlp1": _dense_param(nk(), CCBAM, HIDDEN),
        "mlp2": _dense_param(nk(), HIDDEN, CCBAM),
        "spatial": _conv_param(nk(), 3, 2, 1),
    }
    params["conv4"] = _conv_param(nk(), 1, CCBAM, 1)
    return params


# ---------------------------------------------------------------------------
# Forward pass
# ---------------------------------------------------------------------------

def run_rdb(rp, xpad):
    x = crop(xpad, CSTD)
    feats = [x]
    for dp in rp["dense"]:
        h = conv3d(jnp.concatenate(feats, axis=-1), dp, k=3, stride=1, pad=1, relu=True)
        feats.append(crop(h, G))
    cat = jnp.concatenate(feats, axis=-1)
    # x + fuse(cat): residual fused into the matmul epilogue.
    return conv3d(cat, rp["fuse"], k=1, residual=xpad)


def run_grdb(gp, xpad):
    res = []
    h = xpad
    for rp in gp["rdbs"]:
        h = run_rdb(rp, h)
        res.append(crop(h, CSTD))
    cat = jnp.concatenate(res, axis=-1)                       # channels (dim=1 NCDHW)
    return conv3d(cat, gp["conv1x1"], k=1, residual=xpad)     # x + conv1x1(cat)


def run_cbam(cp, xpad):
    x = crop(xpad, CCBAM).astype(jnp.float32)                 # (N,D,H,W,Ccbam)
    N = x.shape[0]
    # Channel gate: global avg/max pooling left to XLA (tiny, per perf review),
    # MLP batched over {avg, max} in a single (2N, C) matrix per layer.
    avg = jnp.mean(x, axis=(1, 2, 3))
    mx = jnp.max(x, axis=(1, 2, 3))
    pooled = jnp.concatenate([avg, mx], axis=0)               # (2N, Ccbam)
    h1 = crop(matmul_bias(pooled, cp["mlp1"]["w"], cp["mlp1"]["b"],
                          relu=True, out_dtype=jnp.float32), HIDDEN)
    h2 = crop(matmul_bias(h1, cp["mlp2"]["w"], cp["mlp2"]["b"],
                          out_dtype=jnp.float32), CCBAM)      # (2N, Ccbam)
    att = jax.nn.sigmoid(h2[:N] + h2[N:])                     # (N, Ccbam)
    x = x * att[:, None, None, None, :]
    # Spatial gate: concat(channel-max, channel-mean) -> conv3x3 -> sigmoid.
    comp = jnp.concatenate([jnp.max(x, axis=-1, keepdims=True),
                            jnp.mean(x, axis=-1, keepdims=True)], axis=-1)
    s = crop(conv3d(comp, cp["spatial"], k=3, stride=1, pad=1), 1).astype(jnp.float32)
    # TODO(synk): original CBAM SpatialGate has a BatchNorm after this conv; omitted.
    return x * jax.nn.sigmoid(s)


@jax.jit
def grdn_forward(params, x_ncdhw):
    x = jnp.transpose(x_ncdhw, (0, 2, 3, 4, 1))               # NCDHW -> NDHWC
    h = crop(conv3d(x, params["conv1"], k=1), 2)
    for p, cout, s in zip(params["down"], ENC_CH[1:], ENC_STRIDE):     # encoder
        h = crop(conv3d(h, p, k=3, stride=s, pad=1, relu=True), cout)
    h = conv3d(h, params["conv2"], k=3, stride=1, pad=1)      # padded, CSTD true ch
    for gi in range(3):                                       # forward uses grdb1..3
        h = run_grdb(params["grdb"][gi], h)
    h = crop(conv3d(crop(h, CSTD), params["conv2a"], k=3, stride=1, pad=1), 16)
    for p, up, cout in zip(params["up"], DEC_UP, DEC_CH[1:]): # decoder / upsample
        if up:
            h = conv_transpose3d(h, p, cout, relu=True)
        else:
            h = crop(conv3d(h, p, k=3, stride=1, pad=1, relu=True), cout)
    h = conv3d(h, params["conv3"], k=3, stride=1, pad=1)      # padded, CCBAM true ch
    h = run_cbam(params["cbam"], h)
    h = crop(conv3d(h, params["conv4"], k=1), 1).astype(jnp.float32)
    out = h + x                                               # final skip connection
    return jnp.transpose(out, (0, 4, 1, 2, 3))                # back to NCDHW


if __name__ == "__main__":
    key = jax.random.PRNGKey(0)
    pkey, xkey = jax.random.split(key)
    params = init_params(pkey)
    x = jax.random.normal(xkey, (2, 1, 16, 16, 16), jnp.float32)   # NCDHW, 1 channel
    out = grdn_forward(params, x)
    out = jax.block_until_ready(out)
    assert out.shape == x.shape and out.dtype == jnp.float32
    assert bool(jnp.all(jnp.isfinite(out)))
    print("KERNEL_OK")
</pallas_src>

<mosaic_0001>
module attributes {stable_mosaic.version = 11 : i64} {
  func.func @_mm_kernel(%arg0: i32, %arg1: memref<1024x1xbf16, #tpu.memory_space<vmem>>, %arg2: memref<1x128xbf16, #tpu.memory_space<vmem>>, %arg3: memref<1x128xf32, #tpu.memory_space<vmem>>, %arg4: memref<1024x128xbf16, #tpu.memory_space<vmem>>) attributes {dimension_semantics = [#tpu.dimension_semantics<parallel>], iteration_bounds = array<i64: 8>, scalar_prefetch = 0 : i64, scratch_operands = 0 : i64, tpu.core_type = #tpu.core_type<tc>, window_params = [{transform_indices = @transform_0, window_bounds = array<i64: 1024, 1>}, {pipeline_mode = #tpu.pipeline_mode<synchronous>, transform_indices = @transform_1, window_bounds = array<i64: 1, 128>}, {pipeline_mode = #tpu.pipeline_mode<synchronous>, transform_indices = @transform_2, window_bounds = array<i64: 1, 128>}, {transform_indices = @transform_3, window_bounds = array<i64: 1024, 128>}]} {
    %c0 = arith.constant 0 : index
    %c0_0 = arith.constant 0 : index
    %0 = vector.load %arg1[%c0, %c0_0] : memref<1024x1xbf16, #tpu.memory_space<vmem>>, vector<1024x1xbf16>
    %c0_1 = arith.constant 0 : index
    %c0_2 = arith.constant 0 : index
    %1 = vector.load %arg2[%c0_1, %c0_2] : memref<1x128xbf16, #tpu.memory_space<vmem>>, vector<1x128xbf16>
    %cst = arith.constant dense<0.000000e+00> : vector<1024x128xf32>
    %2 = tpu.matmul %0, %1, %cst {dimension_numbers = #tpu.dot_dimension_numbers<[1], [0], [0], [1], [0, 0, 1, 1], [], []>} : vector<1024x1xbf16>, vector<1x128xbf16>, vector<1024x128xf32> -> vector<1024x128xf32>
    %c0_3 = arith.constant 0 : index
    %c0_4 = arith.constant 0 : index
    %3 = vector.load %arg3[%c0_3, %c0_4] : memref<1x128xf32, #tpu.memory_space<vmem>>, vector<1x128xf32>
    %4 = vector.broadcast %3 : vector<1x128xf32> to vector<1024x128xf32>
    %5 = arith.addf %2, %4 : vector<1024x128xf32>
    %6 = arith.truncf %5 : vector<1024x128xf32> to vector<1024x128xbf16>
    %c0_5 = arith.constant 0 : index
    %c0_6 = arith.constant 0 : index
    %7 = vector.load %arg4[%c0_5, %c0_6] : memref<1024x128xbf16, #tpu.memory_space<vmem>>, vector<1024x128xbf16>
    tpu.vector_store %arg4[%c0_5, %c0_6], %6 {strides = array<i32>} : memref<1024x128xbf16, #tpu.memory_space<vmem>>, vector<1024x128xbf16>,
    return
  }
  func.func @transform_0(%arg0: i32) -> (i32, i32) {
    %c0_i32 = arith.constant 0 : i32
    %c0_i32_0 = arith.constant 0 : i32
    return %arg0, %c0_i32 : i32, i32
  }
  func.func @transform_1(%arg0: i32) -> (i32, i32) {
    %c0_i32 = arith.constant 0 : i32
    %c0_i32_0 = arith.constant 0 : i32
    %c0_i32_1 = arith.constant 0 : i32
    return %c0_i32, %c0_i32_0 : i32, i32
  }
  func.func @transform_2(%arg0: i32) -> (i32, i32) {
    %c0_i32 = arith.constant 0 : i32
    %c0_i32_0 = arith.constant 0 : i32
    %c0_i32_1 = arith.constant 0 : i32
    return %c0_i32, %c0_i32_0 : i32, i32
  }
  func.func @transform_3(%arg0: i32) -> (i32, i32) {
    %c0_i32 = arith.constant 0 : i32
    %c0_i32_0 = arith.constant 0 : i32
    return %arg0, %c0_i32 : i32, i32
  }
}

module attributes {stable_mosaic.version = 11 : i64} {
  func.func @_mm_kernel(%arg0: i32, %arg1: memref<1024x54xbf16, #tpu.memory_space<vmem>>, %arg2: memref<54x128xbf16, #tpu.memory_space<vmem>>, %arg3: memref<1x128xf32, #tpu.memory_space<vmem>>, %arg4: memref<1024x128xbf16, #tpu.memory_space<vmem>>) attributes {dimension_semantics = [#tpu.dimension_semantics<parallel>], iteration_bounds = array<i64: 8>, scalar_prefetch = 0 : i64, scratch_operands = 0 : i64, tpu.core_type = #tpu.core_type<tc>, window_params = [{transform_indices = @transform_0, window_bounds = array<i64: 1024, 54>}, {pipeline_mode = #tpu.pipeline_mode<synchronous>, transform_indices = @transform_1, window_bounds = array<i64: 54, 128>}, {pipeline_mode = #tpu.pipeline_mode<synchronous>, transform_indices = @transform_2, window_bounds = array<i64: 1, 128>}, {transform_indices = @transform_3, window_bounds = array<i64: 1024, 128>}]} {
    %c0 = arith.constant 0 : index
    %c0_0 = arith.constant 0 : index
    %0 = vector.load %arg1[%c0, %c0_0] : memref<1024x54xbf16, #tpu.memory_space<vmem>>, vector<1024x54xbf16>
    %c0_1 = arith.constant 0 : index
    %c0_2 = arith.constant 0 : index
    %1 = vector.load %arg2[%c0_1, %c0_2] : memref<54x128xbf16, #tpu.memory_space<vmem>>, vector<54x128xbf16>
    %cst = arith.constant dense<0.000000e+00> : vector<1024x128xf32>
    %2 = tpu.matmul %0, %1, %cst {dimension_numbers = #tpu.dot_dimension_numbers<[1], [0], [0], [1], [0, 0, 1, 1], [], []>} : vector<1024x54xbf16>, vector<54x128xbf16>, vector<1024x128xf32> -> vector<1024x128xf32>
    %c0_3 = arith.constant 0 : index
    %c0_4 = arith.constant 0 : index
    %3 = vector.load %arg3[%c0_3, %c0_4] : memref<1x128xf32, #tpu.memory_space<vmem>>, vector<1x128xf32>
    %4 = vector.broadcast %3 : vector<1x128xf32> to vector<1024x128xf32>
    %5 = arith.addf %2, %4 : vector<1024x128xf32>
    %cst_5 = arith.constant 0.000000e+00 : f32
    %6 = vector.broadcast %cst_5 : f32 to vector<1024x128xf32>
    %7 = arith.maximumf %5, %6 : vector<1024x128xf32>
    %8 = arith.truncf %7 : vector<1024x128xf32> to vector<1024x128xbf16>
    %c0_6 = arith.constant 0 : index
    %c0_7 = arith.constant 0 : index
    %9 = vector.load %arg4[%c0_6, %c0_7] : memref<1024x128xbf16, #tpu.memory_space<vmem>>, vector<1024x128xbf16>
    tpu.vector_store %arg4[%c0_6, %c0_7], %8 {strides = array<i32>} : memref<1024x128xbf16, #tpu.memory_space<vmem>>, vector<1024x128xbf16>,
    return
  }
  func.func @transform_0(%arg0: i32) -> (i32, i32) {
    %c0_i32 = arith.constant 0 : i32
    %c0_i32_0 = arith.constant 0 : i32
    return %arg0, %c0_i32 : i32, i32
  }
  func.func @transform_1(%arg0: i32) -> (i32, i32) {
    %c0_i32 = arith.constant 0 : i32
    %c0_i32_0 = arith.constant 0 : i32
    %c0_i32_1 = arith.constant 0 : i32
    return %c0_i32, %c0_i32_0 : i32, i32
  }
  func.func @transform_2(%arg0: i32) -> (i32, i32) {
    %c0_i32 = arith.constant 0 : i32
    %c0_i32_0 = arith.constant 0 : i32
    %c0_i32_1 = arith.constant 0 : i32
    return %c0_i32, %c0_i32_0 : i32, i32
  }
  func.func @transform_3(%arg0: i32) -> (i32, i32) {
    %c0_i32 = arith.constant 0 : i32
    %c0_i32_0 = arith.constant 0 : i32
    return %arg0, %c0_i32 : i32, i32
  }
}

module attributes {stable_mosaic.version = 11 : i64} {
  func.func @_mm_kernel(%arg0: i32, %arg1: memref<512x108xbf16, #tpu.memory_space<vmem>>, %arg2: memref<108x128xbf16, #tpu.memory_space<vmem>>, %arg3: memref<1x128xf32, #tpu.memory_space<vmem>>, %arg4: memref<512x128xbf16, #tpu.memory_space<vmem>>) attributes {dimension_semantics = [#tpu.dimension_semantics<parallel>], iteration_bounds = array<i64: 2>, scalar_prefetch = 0 : i64, scratch_operands = 0 : i64, tpu.core_type = #tpu.core_type<tc>, window_params = [{transform_indices = @transform_0, window_bounds = array<i64: 512, 108>}, {pipeline_mode = #tpu.pipeline_mode<synchronous>, transform_indices = @transform_1, window_bounds = array<i64: 108, 128>}, {pipeline_mode = #tpu.pipeline_mode<synchronous>, transform_indices = @transform_2, window_bounds = array<i64: 1, 128>}, {transform_indices = @transform_3, window_bounds = array<i64: 512, 128>}]} {
    %c0 = arith.constant 0 : index
    %c0_0 = arith.constant 0 : index
    %0 = vector.load %arg1[%c0, %c0_0] : memref<512x108xbf16, #tpu.memory_space<vmem>>, vector<512x108xbf16>
    %c0_1 = arith.constant 0 : index
    %c0_2 = arith.constant 0 : index
    %1 = vector.load %arg2[%c0_1, %c0_2] : memref<108x128xbf16, #tpu.memory_space<vmem>>, vector<108x128xbf16>
    %cst = arith.constant dense<0.000000e+00> : vector<512x128xf32>
    %2 = tpu.matmul %0, %1, %cst {dimension_numbers = #tpu.dot_dimension_numbers<[1], [0], [0], [1], [0, 0, 1, 1], [], []>} : vector<512x108xbf16>, vector<108x128xbf16>, vector<512x128xf32> -> vector<512x128xf32>
    %c0_3 = arith.constant 0 : index
    %c0_4 = arith.constant 0 : index
    %3 = vector.load %arg3[%c0_3, %c0_4] : memref<1x128xf32, #tpu.memory_space<vmem>>, vector<1x128xf32>
    %4 = vector.broadcast %3 : vector<1x128xf32> to vector<512x128xf32>
    %5 = arith.addf %2, %4 : vector<512x128xf32>
    %cst_5 = arith.constant 0.000000e+00 : f32
    %6 = vector.broadcast %cst_5 : f32 to vector<512x128xf32>
    %7 = arith.maximumf %5, %6 : vector<512x128xf32>
    %8 = arith.truncf %7 : vector<512x128xf32> to vector<512x128xbf16>
    %c0_6 = arith.constant 0 : index
    %c0_7 = arith.constant 0 : index
    %9 = vector.load %arg4[%c0_6, %c0_7] : memref<512x128xbf16, #tpu.memory_space<vmem>>, vector<512x128xbf16>
    tpu.vector_store %arg4[%c0_6, %c0_7], %8 {strides = array<i32>} : memref<512x128xbf16, #tpu.memory_space<vmem>>, vector<512x128xbf16>,
    return
  }
  func.func @transform_0(%arg0: i32) -> (i32, i32) {
    %c0_i32 = arith.constant 0 : i32
    %c0_i32_0 = arith.constant 0 : i32
    return %arg0, %c0_i32 : i32, i32
  }
  func.func @transform_1(%arg0: i32) -> (i32, i32) {
    %c0_i32 = arith.constant 0 : i32
    %c0_i32_0 = arith.constant 0 : i32
    %c0_i32_1 = arith.constant 0 : i32
    return %c0_i32, %c0_i32_0 : i32, i32
  }
  func.func @transform_2(%arg0: i32) -> (i32, i32) {
    %c0_i32 = arith.constant 0 : i32
    %c0_i32_0 = arith.constant 0 : i32
    %c0_i32_1 = arith.constant 0 : i32
    return %c0_i32, %c0_i32_0 : i32, i32
  }
  func.func @transform_3(%arg0: i32) -> (i32, i32) {
    %c0_i32 = arith.constant 0 : i32
    %c0_i32_0 = arith.constant 0 : i32
    return %arg0, %c0_i32 : i32, i32
  }
}

module attributes {stable_mosaic.version = 11 : i64} {
  func.func @_mm_kernel(%arg0: i32, %arg1: memref<64x216xbf16, #tpu.memory_space<vmem>>, %arg2: memref<216x128xbf16, #tpu.memory_space<vmem>>, %arg3: memref<1x128xf32, #tpu.memory_space<vmem>>, %arg4: memref<64x128xbf16, #tpu.memory_space<vmem>>) attributes {dimension_semantics = [#tpu.dimension_semantics<parallel>], iteration_bounds = array<i64: 2>, scalar_prefetch = 0 : i64, scratch_operands = 0 : i64, tpu.core_type = #tpu.core_type<tc>, window_params = [{transform_indices = @transform_0, window_bounds = array<i64: 64, 216>}, {pipeline_mode = #tpu.pipeline_mode<synchronous>, transform_indices = @transform_1, window_bounds = array<i64: 216, 128>}, {pipeline_mode = #tpu.pipeline_mode<synchronous>, transform_indices = @transform_2, window_bounds = array<i64: 1, 128>}, {transform_indices = @transform_3, window_bounds = array<i64: 64, 128>}]} {
    %c0 = arith.constant 0 : index
    %c0_0 = arith.constant 0 : index
    %0 = vector.load %arg1[%c0, %c0_0] : memref<64x216xbf16, #tpu.memory_space<vmem>>, vector<64x216xbf16>
    %c0_1 = arith.constant 0 : index
    %c0_2 = arith.constant 0 : index
    %1 = vector.load %arg2[%c0_1, %c0_2] : memref<216x128xbf16, #tpu.memory_space<vmem>>, vector<216x128xbf16>
    %cst = arith.constant dense<0.000000e+00> : vector<64x128xf32>
    %2 = tpu.matmul %0, %1, %cst {dimension_numbers = #tpu.dot_dimension_numbers<[1], [0], [0], [1], [0, 0, 1, 1], [], []>} : vector<64x216xbf16>, vector<216x128xbf16>, vector<64x128xf32> -> vector<64x128xf32>
    %c0_3 = arith.constant 0 : index
    %c0_4 = arith.constant 0 : index
    %3 = vector.load %arg3[%c0_3, %c0_4] : memref<1x128xf32, #tpu.memory_space<vmem>>, vector<1x128xf32>
    %4 = vector.broadcast %3 : vector<1x128xf32> to vector<64x128xf32>
    %5 = arith.addf %2, %4 : vector<64x128xf32>
    %cst_5 = arith.constant 0.000000e+00 : f32
    %6 = vector.broadcast %cst_5 : f32 to vector<64x128xf32>
    %7 = arith.maximumf %5, %6 : vector<64x128xf32>
    %8 = arith.truncf %7 : vector<64x128xf32> to vector<64x128xbf16>
    %c0_6 = arith.constant 0 : index
    %c0_7 = arith.constant 0 : index
    %9 = vector.load %arg4[%c0_6, %c0_7] : memref<64x128xbf16, #tpu.memory_space<vmem>>, vector<64x128xbf16>
    tpu.vector_store %arg4[%c0_6, %c0_7], %8 {strides = array<i32>} : memref<64x128xbf16, #tpu.memory_space<vmem>>, vector<64x128xbf16>,
    return
  }
  func.func @transform_0(%arg0: i32) -> (i32, i32) {
    %c0_i32 = arith.constant 0 : i32
    %c0_i32_0 = arith.constant 0 : i32
    return %arg0, %c0_i32 : i32, i32
  }
  func.func @transform_1(%arg0: i32) -> (i32, i32) {
    %c0_i32 = arith.constant 0 : i32
    %c0_i32_0 = arith.constant 0 : i32
    %c0_i32_1 = arith.constant 0 : i32
    return %c0_i32, %c0_i32_0 : i32, i32
  }
  func.func @transform_2(%arg0: i32) -> (i32, i32) {
    %c0_i32 = arith.constant 0 : i32
    %c0_i32_0 = arith.constant 0 : i32
    %c0_i32_1 = arith.constant 0 : i32
    return %c0_i32, %c0_i32_0 : i32, i32
  }
  func.func @transform_3(%arg0: i32) -> (i32, i32) {
    %c0_i32 = arith.constant 0 : i32
    %c0_i32_0 = arith.constant 0 : i32
    return %arg0, %c0_i32 : i32, i32
  }
}

module attributes {stable_mosaic.version = 11 : i64} {
  func.func @_mm_kernel(%arg0: i32, %arg1: memref<8x216xbf16, #tpu.memory_space<vmem>>, %arg2: memref<216x128xbf16, #tpu.memory_space<vmem>>, %arg3: memref<1x128xf32, #tpu.memory_space<vmem>>, %arg4: memref<8x128xbf16, #tpu.memory_space<vmem>>) attributes {dimension_semantics = [#tpu.dimension_semantics<parallel>], iteration_bounds = array<i64: 2>, scalar_prefetch = 0 : i64, scratch_operands = 0 : i64, tpu.core_type = #tpu.core_type<tc>, window_params = [{transform_indices = @transform_0, window_bounds = array<i64: 8, 216>}, {pipeline_mode = #tpu.pipeline_mode<synchronous>, transform_indices = @transform_1, window_bounds = array<i64: 216, 128>}, {pipeline_mode = #tpu.pipeline_mode<synchronous>, transform_indices = @transform_2, window_bounds = array<i64: 1, 128>}, {transform_indices = @transform_3, window_bounds = array<i64: 8, 128>}]} {
    %c0 = arith.constant 0 : index
    %c0_0 = arith.constant 0 : index
    %0 = vector.load %arg1[%c0, %c0_0] : memref<8x216xbf16, #tpu.memory_space<vmem>>, vector<8x216xbf16>
    %c0_1 = arith.constant 0 : index
    %c0_2 = arith.constant 0 : index
    %1 = vector.load %arg2[%c0_1, %c0_2] : memref<216x128xbf16, #tpu.memory_space<vmem>>, vector<216x128xbf16>
    %cst = arith.constant dense<0.000000e+00> : vector<8x128xf32>
    %2 = tpu.matmul %0, %1, %cst {dimension_numbers = #tpu.dot_dimension_numbers<[1], [0], [0], [1], [0, 0, 1, 1], [], []>} : vector<8x216xbf16>, vector<216x128xbf16>, vector<8x128xf32> -> vector<8x128xf32>
    %c0_3 = arith.constant 0 : index
    %c0_4 = arith.constant 0 : index
    %3 = vector.load %arg3[%c0_3, %c0_4] : memref<1x128xf32, #tpu.memory_space<vmem>>, vector<1x128xf32>
    %4 = vector.broadcast %3 : vector<1x128xf32> to vector<8x128xf32>
    %5 = arith.addf %2, %4 : vector<8x128xf32>
    %cst_5 = arith.constant 0.000000e+00 : f32
    %6 = vector.broadcast %cst_5 : f32 to vector<8x128xf32>
    %7 = arith.maximumf %5, %6 : vector<8x128xf32>
    %8 = arith.truncf %7 : vector<8x128xf32> to vector<8x128xbf16>
    %c0_6 = arith.constant 0 : index
    %c0_7 = arith.constant 0 : index
    %9 = vector.load %arg4[%c0_6, %c0_7] : memref<8x128xbf16, #tpu.memory_space<vmem>>, vector<8x128xbf16>
    tpu.vector_store %arg4[%c0_6, %c0_7], %8 {strides = array<i32>} : memref<8x128xbf16, #tpu.memory_space<vmem>>, vector<8x128xbf16>,
    return
  }
  func.func @transform_0(%arg0: i32) -> (i32, i32) {
    %c0_i32 = arith.constant 0 : i32
    %c0_i32_0 = arith.constant 0 : i32
    return %arg0, %c0_i32 : i32, i32
  }
  func.func @transform_1(%arg0: i32) -> (i32, i32) {
    %c0_i32 = arith.constant 0 : i32
    %c0_i32_0 = arith.constant 0 : i32
    %c0_i32_1 = arith.constant 0 : i32
    return %c0_i32, %c0_i32_0 : i32, i32
  }
  func.func @transform_2(%arg0: i32) -> (i32, i32) {
    %c0_i32 = arith.constant 0 : i32
    %c0_i32_0 = arith.constant 0 : i32
    %c0_i32_1 = arith.constant 0 : i32
    return %c0_i32, %c0_i32_0 : i32, i32
  }
  func.func @transform_3(%arg0: i32) -> (i32, i32) {
    %c0_i32 = arith.constant 0 : i32
    %c0_i32_0 = arith.constant 0 : i32
    return %arg0, %c0_i32 : i32, i32
  }
}

module attributes {stable_mosaic.version = 11 : i64} {
  func.func @_mm_kernel(%arg0: i32, %arg1: memref<8x432xbf16, #tpu.memory_space<vmem>>, %arg2: memref<432x128xbf16, #tpu.memory_space<vmem>>, %arg3: memref<1x128xf32, #tpu.memory_space<vmem>>, %arg4: memref<8x128xbf16, #tpu.memory_space<vmem>>) attributes {dimension_semantics = [#tpu.dimension_semantics<parallel>], iteration_bounds = array<i64: 2>, scalar_prefetch = 0 : i64, scratch_operands = 0 : i64, tpu.core_type = #tpu.core_type<tc>, window_params = [{transform_indices = @transform_0, window_bounds = array<i64: 8, 432>}, {pipeline_mode = #tpu.pipeline_mode<synchronous>, transform_indices = @transform_1, window_bounds = array<i64: 432, 128>}, {pipeline_mode = #tpu.pipeline_mode<synchronous>, transform_indices = @transform_2, window_bounds = array<i64: 1, 128>}, {transform_indices = @transform_3, window_bounds = array<i64: 8, 128>}]} {
    %c0 = arith.constant 0 : index
    %c0_0 = arith.constant 0 : index
    %0 = vector.load %arg1[%c0, %c0_0] : memref<8x432xbf16, #tpu.memory_space<vmem>>, vector<8x432xbf16>
    %c0_1 = arith.constant 0 : index
    %c0_2 = arith.constant 0 : index
    %1 = vector.load %arg2[%c0_1, %c0_2] : memref<432x128xbf16, #tpu.memory_space<vmem>>, vector<432x128xbf16>
    %cst = arith.constant dense<0.000000e+00> : vector<8x128xf32>
    %2 = tpu.matmul %0, %1, %cst {dimension_numbers = #tpu.dot_dimension_numbers<[1], [0], [0], [1], [0, 0, 1, 1], [], []>} : vector<8x432xbf16>, vector<432x128xbf16>, vector<8x128xf32> -> vector<8x128xf32>
    %c0_3 = arith.constant 0 : index
    %c0_4 = arith.constant 0 : index
    %3 = vector.load %arg3[%c0_3, %c0_4] : memref<1x128xf32, #tpu.memory_space<vmem>>, vector<1x128xf32>
    %4 = vector.broadcast %3 : vector<1x128xf32> to vector<8x128xf32>
    %5 = arith.addf %2, %4 : vector<8x128xf32>
    %6 = arith.truncf %5 : vector<8x128xf32> to vector<8x128xbf16>
    %c0_5 = arith.constant 0 : index
    %c0_6 = arith.constant 0 : index
    %7 = vector.load %arg4[%c0_5, %c0_6] : memref<8x128xbf16, #tpu.memory_space<vmem>>, vector<8x128xbf16>
    tpu.vector_store %arg4[%c0_5, %c0_6], %6 {strides = array<i32>} : memref<8x128xbf16, #tpu.memory_space<vmem>>, vector<8x128xbf16>,
    return
  }
  func.func @transform_0(%arg0: i32) -> (i32, i32) {
    %c0_i32 = arith.constant 0 : i32
    %c0_i32_0 = arith.constant 0 : i32
    return %arg0, %c0_i32 : i32, i32
  }
  func.func @transform_1(%arg0: i32) -> (i32, i32) {
    %c0_i32 = arith.constant 0 : i32
    %c0_i32_0 = arith.constant 0 : i32
    %c0_i32_1 = arith.constant 0 : i32
    return %c0_i32, %c0_i32_0 : i32, i32
  }
  func.func @transform_2(%arg0: i32) -> (i32, i32) {
    %c0_i32 = arith.constant 0 : i32
    %c0_i32_0 = arith.constant 0 : i32
    %c0_i32_1 = arith.constant 0 : i32
    return %c0_i32, %c0_i32_0 : i32, i32
  }
  func.func @transform_3(%arg0: i32) -> (i32, i32) {
    %c0_i32 = arith.constant 0 : i32
    %c0_i32_0 = arith.constant 0 : i32
    return %arg0, %c0_i32 : i32, i32
  }
}

module attributes {stable_mosaic.version = 11 : i64} {
  func.func @_mm_kernel(%arg0: i32, %arg1: memref<8x432xbf16, #tpu.memory_space<vmem>>, %arg2: memref<432x128xbf16, #tpu.memory_space<vmem>>, %arg3: memref<1x128xf32, #tpu.memory_space<vmem>>, %arg4: memref<8x128xbf16, #tpu.memory_space<vmem>>) attributes {dimension_semantics = [#tpu.dimension_semantics<parallel>], iteration_bounds = array<i64: 2>, scalar_prefetch = 0 : i64, scratch_operands = 0 : i64, tpu.core_type = #tpu.core_type<tc>, window_params = [{transform_indices = @transform_0, window_bounds = array<i64: 8, 432>}, {pipeline_mode = #tpu.pipeline_mode<synchronous>, transform_indices = @transform_1, window_bounds = array<i64: 432, 128>}, {pipeline_mode = #tpu.pipeline_mode<synchronous>, transform_indices = @transform_2, window_bounds = array<i64: 1, 128>}, {transform_indices = @transform_3, window_bounds = array<i64: 8, 128>}]} {
    %c0 = arith.constant 0 : index
    %c0_0 = arith.constant 0 : index
    %0 = vector.load %arg1[%c0, %c0_0] : memref<8x432xbf16, #tpu.memory_space<vmem>>, vector<8x432xbf16>
    %c0_1 = arith.constant 0 : index
    %c0_2 = arith.constant 0 : index
    %1 = vector.load %arg2[%c0_1, %c0_2] : memref<432x128xbf16, #tpu.memory_space<vmem>>, vector<432x128xbf16>
    %cst = arith.constant dense<0.000000e+00> : vector<8x128xf32>
    %2 = tpu.matmul %0, %1, %cst {dimension_numbers = #tpu.dot_dimension_numbers<[1], [0], [0], [1], [0, 0, 1, 1], [], []>} : vector<8x432xbf16>, vector<432x128xbf16>, vector<8x128xf32> -> vector<8x128xf32>
    %c0_3 = arith.constant 0 : index
    %c0_4 = arith.constant 0 : index
    %3 = vector.load %arg3[%c0_3, %c0_4] : memref<1x128xf32, #tpu.memory_space<vmem>>, vector<1x128xf32>
    %4 = vector.broadcast %3 : vector<1x128xf32> to vector<8x128xf32>
    %5 = arith.addf %2, %4 : vector<8x128xf32>
    %cst_5 = arith.constant 0.000000e+00 : f32
    %6 = vector.broadcast %cst_5 : f32 to vector<8x128xf32>
    %7 = arith.maximumf %5, %6 : vector<8x128xf32>
    %8 = arith.truncf %7 : vector<8x128xf32> to vector<8x128xbf16>
    %c0_6 = arith.constant 0 : index
    %c0_7 = arith.constant 0 : index
    %9 = vector.load %arg4[%c0_6, %c0_7] : memref<8x128xbf16, #tpu.memory_space<vmem>>, vector<8x128xbf16>
    tpu.vector_store %arg4[%c0_6, %c0_7], %8 {strides = array<i32>} : memref<8x128xbf16, #tpu.memory_space<vmem>>, vector<8x128xbf16>,
    return
  }
  func.func @transform_0(%arg0: i32) -> (i32, i32) {
    %c0_i32 = arith.constant 0 : i32
    %c0_i32_0 = arith.constant 0 : i32
    return %arg0, %c0_i32 : i32, i32
  }
  func.func @transform_1(%arg0: i32) -> (i32, i32) {
    %c0_i32 = arith.constant 0 : i32
    %c0_i32_0 = arith.constant 0 : i32
    %c0_i32_1 = arith.constant 0 : i32
    return %c0_i32, %c0_i32_0 : i32, i32
  }
  func.func @transform_2(%arg0: i32) -> (i32, i32) {
    %c0_i32 = arith.constant 0 : i32
    %c0_i32_0 = arith.constant 0 : i32
    %c0_i32_1 = arith.constant 0 : i32
    return %c0_i32, %c0_i32_0 : i32, i32
  }
  func.func @transform_3(%arg0: i32) -> (i32, i32) {
    %c0_i32 = arith.constant 0 : i32
    %c0_i32_0 = arith.constant 0 : i32
    return %arg0, %c0_i32 : i32, i32
  }
}

module attributes {stable_mosaic.version = 11 : i64} {
  func.func @_mm_res_kernel(%arg0: i32, %arg1: memref<8x24xbf16, #tpu.memory_space<vmem>>, %arg2: memref<24x128xbf16, #tpu.memory_space<vmem>>, %arg3: memref<1x128xf32, #tpu.memory_space<vmem>>, %arg4: memref<8x128xbf16, #tpu.memory_space<vmem>>, %arg5: memref<8x128xbf16, #tpu.memory_space<vmem>>) attributes {dimension_semantics = [#tpu.dimension_semantics<parallel>], iteration_bounds = array<i64: 2>, scalar_prefetch = 0 : i64, scratch_operands = 0 : i64, tpu.core_type = #tpu.core_type<tc>, window_params = [{transform_indices = @transform_0, window_bounds = array<i64: 8, 24>}, {pipeline_mode = #tpu.pipeline_mode<synchronous>, transform_indices = @transform_1, window_bounds = array<i64: 24, 128>}, {pipeline_mode = #tpu.pipeline_mode<synchronous>, transform_indices = @transform_2, window_bounds = array<i64: 1, 128>}, {transform_indices = @transform_3, window_bounds = array<i64: 8, 128>}, {transform_indices = @transform_4, window_bounds = array<i64: 8, 128>}]} {
    %c0 = arith.constant 0 : index
    %c0_0 = arith.constant 0 : index
    %0 = vector.load %arg1[%c0, %c0_0] : memref<8x24xbf16, #tpu.memory_space<vmem>>, vector<8x24xbf16>
    %c0_1 = arith.constant 0 : index
    %c0_2 = arith.constant 0 : index
    %1 = vector.load %arg2[%c0_1, %c0_2] : memref<24x128xbf16, #tpu.memory_space<vmem>>, vector<24x128xbf16>
    %cst = arith.constant dense<0.000000e+00> : vector<8x128xf32>
    %2 = tpu.matmul %0, %1, %cst {dimension_numbers = #tpu.dot_dimension_numbers<[1], [0], [0], [1], [0, 0, 1, 1], [], []>} : vector<8x24xbf16>, vector<24x128xbf16>, vector<8x128xf32> -> vector<8x128xf32>
    %c0_3 = arith.constant 0 : index
    %c0_4 = arith.constant 0 : index
    %3 = vector.load %arg3[%c0_3, %c0_4] : memref<1x128xf32, #tpu.memory_space<vmem>>, vector<1x128xf32>
    %4 = vector.broadcast %3 : vector<1x128xf32> to vector<8x128xf32>
    %5 = arith.addf %2, %4 : vector<8x128xf32>
    %c0_5 = arith.constant 0 : index
    %c0_6 = arith.constant 0 : index
    %6 = vector.load %arg4[%c0_5, %c0_6] : memref<8x128xbf16, #tpu.memory_space<vmem>>, vector<8x128xbf16>
    %7 = arith.extf %6 : vector<8x128xbf16> to vector<8x128xf32>
    %8 = arith.addf %5, %7 : vector<8x128xf32>
    %9 = arith.truncf %8 : vector<8x128xf32> to vector<8x128xbf16>
    %c0_7 = arith.constant 0 : index
    %c0_8 = arith.constant 0 : index
    %10 = vector.load %arg5[%c0_7, %c0_8] : memref<8x128xbf16, #tpu.memory_space<vmem>>, vector<8x128xbf16>
    tpu.vector_store %arg5[%c0_7, %c0_8], %9 {strides = array<i32>} : memref<8x128xbf16, #tpu.memory_space<vmem>>, vector<8x128xbf16>,
    return
  }
  func.func @transform_0(%arg0: i32) -> (i32, i32) {
    %c0_i32 = arith.constant 0 : i32
    %c0_i32_0 = arith.constant 0 : i32
    return %arg0, %c0_i32 : i32, i32
  }
  func.func @transform_1(%arg0: i32) -> (i32, i32) {
    %c0_i32 = arith.constant 0 : i32
    %c0_i32_0 = arith.constant 0 : i32
    %c0_i32_1 = arith.constant 0 : i32
    return %c0_i32, %c0_i32_0 : i32, i32
  }
  func.func @transform_2(%arg0: i32) -> (i32, i32) {
    %c0_i32 = arith.constant 0 : i32
    %c0_i32_0 = arith.constant 0 : i32
    %c0_i32_1 = arith.constant 0 : i32
    return %c0_i32, %c0_i32_0 : i32, i32
  }
  func.func @transform_3(%arg0: i32) -> (i32, i32) {
    %c0_i32 = arith.constant 0 : i32
    %c0_i32_0 = arith.constant 0 : i32
    return %arg0, %c0_i32 : i32, i32
  }
  func.func @transform_4(%arg0: i32) -> (i32, i32) {
    %c0_i32 = arith.constant 0 : i32
    %c0_i32_0 = arith.constant 0 : i32
    return %arg0, %c0_i32 : i32, i32
  }
}

module attributes {stable_mosaic.version = 11 : i64} {
  func.func @_mm_res_kernel(%arg0: i32, %arg1: memref<8x32xbf16, #tpu.memory_space<vmem>>, %arg2: memref<32x128xbf16, #tpu.memory_space<vmem>>, %arg3: memref<1x128xf32, #tpu.memory_space<vmem>>, %arg4: memref<8x128xbf16, #tpu.memory_space<vmem>>, %arg5: memref<8x128xbf16, #tpu.memory_space<vmem>>) attributes {dimension_semantics = [#tpu.dimension_semantics<parallel>], iteration_bounds = array<i64: 2>, scalar_prefetch = 0 : i64, scratch_operands = 0 : i64, tpu.core_type = #tpu.core_type<tc>, window_params = [{transform_indices = @transform_0, window_bounds = array<i64: 8, 32>}, {pipeline_mode = #tpu.pipeline_mode<synchronous>, transform_indices = @transform_1, window_bounds = array<i64: 32, 128>}, {pipeline_mode = #tpu.pipeline_mode<synchronous>, transform_indices = @transform_2, window_bounds = array<i64: 1, 128>}, {transform_indices = @transform_3, window_bounds = array<i64: 8, 128>}, {transform_indices = @transform_4, window_bounds = array<i64: 8, 128>}]} {
    %c0 = arith.constant 0 : index
    %c0_0 = arith.constant 0 : index
    %0 = vector.load %arg1[%c0, %c0_0] : memref<8x32xbf16, #tpu.memory_space<vmem>>, vector<8x32xbf16>
    %c0_1 = arith.constant 0 : index
    %c0_2 = arith.constant 0 : index
    %1 = vector.load %arg2[%c0_1, %c0_2] : memref<32x128xbf16, #tpu.memory_space<vmem>>, vector<32x128xbf16>
    %cst = arith.constant dense<0.000000e+00> : vector<8x128xf32>
    %2 = tpu.matmul %0, %1, %cst {dimension_numbers = #tpu.dot_dimension_numbers<[1], [0], [0], [1], [0, 0, 1, 1], [], []>} : vector<8x32xbf16>, vector<32x128xbf16>, vector<8x128xf32> -> vector<8x128xf32>
    %c0_3 = arith.constant 0 : index
    %c0_4 = arith.constant 0 : index
    %3 = vector.load %arg3[%c0_3, %c0_4] : memref<1x128xf32, #tpu.memory_space<vmem>>, vector<1x128xf32>
    %4 = vector.broadcast %3 : vector<1x128xf32> to vector<8x128xf32>
    %5 = arith.addf %2, %4 : vector<8x128xf32>
    %c0_5 = arith.constant 0 : index
    %c0_6 = arith.constant 0 : index
    %6 = vector.load %arg4[%c0_5, %c0_6] : memref<8x128xbf16, #tpu.memory_space<vmem>>, vector<8x128xbf16>
    %7 = arith.extf %6 : vector<8x128xbf16> to vector<8x128xf32>
    %8 = arith.addf %5, %7 : vector<8x128xf32>
    %9 = arith.truncf %8 : vector<8x128xf32> to vector<8x128xbf16>
    %c0_7 = arith.constant 0 : index
    %c0_8 = arith.constant 0 : index
    %10 = vector.load %arg5[%c0_7, %c0_8] : memref<8x128xbf16, #tpu.memory_space<vmem>>, vector<8x128xbf16>
    tpu.vector_store %arg5[%c0_7, %c0_8], %9 {strides = array<i32>} : memref<8x128xbf16, #tpu.memory_space<vmem>>, vector<8x128xbf16>,
    return
  }
  func.func @transform_0(%arg0: i32) -> (i32, i32) {
    %c0_i32 = arith.constant 0 : i32
    %c0_i32_0 = arith.constant 0 : i32
    return %arg0, %c0_i32 : i32, i32
  }
  func.func @transform_1(%arg0: i32) -> (i32, i32) {
    %c0_i32 = arith.constant 0 : i32
    %c0_i32_0 = arith.constant 0 : i32
    %c0_i32_1 = arith.constant 0 : i32
    return %c0_i32, %c0_i32_0 : i32, i32
  }
  func.func @transform_2(%arg0: i32) -> (i32, i32) {
    %c0_i32 = arith.constant 0 : i32
    %c0_i32_0 = arith.constant 0 : i32
    %c0_i32_1 = arith.constant 0 : i32
    return %c0_i32, %c0_i32_0 : i32, i32
  }
  func.func @transform_3(%arg0: i32) -> (i32, i32) {
    %c0_i32 = arith.constant 0 : i32
    %c0_i32_0 = arith.constant 0 : i32
    return %arg0, %c0_i32 : i32, i32
  }
  func.func @transform_4(%arg0: i32) -> (i32, i32) {
    %c0_i32 = arith.constant 0 : i32
    %c0_i32_0 = arith.constant 0 : i32
    return %arg0, %c0_i32 : i32, i32
  }
}

module attributes {stable_mosaic.version = 11 : i64} {
  func.func @_mm_res_kernel(%arg0: i32, %arg1: memref<8x32xbf16, #tpu.memory_space<vmem>>, %arg2: memref<32x128xbf16, #tpu.memory_space<vmem>>, %arg3: memref<1x128xf32, #tpu.memory_space<vmem>>, %arg4: memref<8x128xbf16, #tpu.memory_space<vmem>>, %arg5: memref<8x128xbf16, #tpu.memory_space<vmem>>) attributes {dimension_semantics = [#tpu.dimension_semantics<parallel>], iteration_bounds = array<i64: 2>, scalar_prefetch = 0 : i64, scratch_operands = 0 : i64, tpu.core_type = #tpu.core_type<tc>, window_params = [{transform_indices = @transform_0, window_bounds = array<i64: 8, 32>}, {pipeline_mode = #tpu.pipeline_mode<synchronous>, transform_indices = @transform_1, window_bounds = array<i64: 32, 128>}, {pipeline_mode = #tpu.pipeline_mode<synchronous>, transform_indices = @transform_2, window_bounds = array<i64: 1, 128>}, {transform_indices = @transform_3, window_bounds = array<i64: 8, 128>}, {transform_indices = @transform_4, window_bounds = array<i64: 8, 128>}]} {
    %c0 = arith.constant 0 : index
    %c0_0 = arith.constant 0 : index
    %0 = vector.load %arg1[%c0, %c0_0] : memref<8x32xbf16, #tpu.memory_space<vmem>>, vector<8x32xbf16>
    %c0_1 = arith.constant 0 : index
    %c0_2 = arith.constant 0 : index
    %1 = vector.load %arg2[%c0_1, %c0_2] : memref<32x128xbf16, #tpu.memory_space<vmem>>, vector<32x128xbf16>
    %cst = arith.constant dense<0.000000e+00> : vector<8x128xf32>
    %2 = tpu.matmul %0, %1, %cst {dimension_numbers = #tpu.dot_dimension_numbers<[1], [0], [0], [1], [0, 0, 1, 1], [], []>} : vector<8x32xbf16>, vector<32x128xbf16>, vector<8x128xf32> -> vector<8x128xf32>
    %c0_3 = arith.constant 0 : index
    %c0_4 = arith.constant 0 : index
    %3 = vector.load %arg3[%c0_3, %c0_4] : memref<1x128xf32, #tpu.memory_space<vmem>>, vector<1x128xf32>
    %4 = vector.broadcast %3 : vector<1x128xf32> to vector<8x128xf32>
    %5 = arith.addf %2, %4 : vector<8x128xf32>
    %c0_5 = arith.constant 0 : index
    %c0_6 = arith.constant 0 : index
    %6 = vector.load %arg4[%c0_5, %c0_6] : memref<8x128xbf16, #tpu.memory_space<vmem>>, vector<8x128xbf16>
    %7 = arith.extf %6 : vector<8x128xbf16> to vector<8x128xf32>
    %8 = arith.addf %5, %7 : vector<8x128xf32>
    %9 = arith.truncf %8 : vector<8x128xf32> to vector<8x128xbf16>
    %c0_7 = arith.constant 0 : index
    %c0_8 = arith.constant 0 : index
    %10 = vector.load %arg5[%c0_7, %c0_8] : memref<8x128xbf16, #tpu.memory_space<vmem>>, vector<8x128xbf16>
    tpu.vector_store %arg5[%c0_7, %c0_8], %9 {strides = array<i32>} : memref<8x128xbf16, #tpu.memory_space<vmem>>, vector<8x128xbf16>,
    return
  }
  func.func @transform_0(%arg0: i32) -> (i32, i32) {
    %c0_i32 = arith.constant 0 : i32
    %c0_i32_0 = arith.constant 0 : i32
    return %arg0, %c0_i32 : i32, i32
  }
  func.func @transform_1(%arg0: i32) -> (i32, i32) {
    %c0_i32 = arith.constant 0 : i32
    %c0_i32_0 = arith.constant 0 : i32
    %c0_i32_1 = arith.constant 0 : i32
    return %c0_i32, %c0_i32_0 : i32, i32
  }
  func.func @transform_2(%arg0: i32) -> (i32, i32) {
    %c0_i32 = arith.constant 0 : i32
    %c0_i32_0 = arith.constant 0 : i32
    %c0_i32_1 = arith.constant 0 : i32
    return %c0_i32, %c0_i32_0 : i32, i32
  }
  func.func @transform_3(%arg0: i32) -> (i32, i32) {
    %c0_i32 = arith.constant 0 : i32
    %c0_i32_0 = arith.constant 0 : i32
    return %arg0, %c0_i32 : i32, i32
  }
  func.func @transform_4(%arg0: i32) -> (i32, i32) {
    %c0_i32 = arith.constant 0 : i32
    %c0_i32_0 = arith.constant 0 : i32
    return %arg0, %c0_i32 : i32, i32
  }
}

module attributes {stable_mosaic.version = 11 : i64} {
  func.func @_mm_kernel(%arg0: i32, %arg1: memref<8x216xbf16, #tpu.memory_space<vmem>>, %arg2: memref<216x128xbf16, #tpu.memory_space<vmem>>, %arg3: memref<1x128xf32, #tpu.memory_space<vmem>>, %arg4: memref<8x128xbf16, #tpu.memory_space<vmem>>) attributes {dimension_semantics = [#tpu.dimension_semantics<parallel>], iteration_bounds = array<i64: 2>, scalar_prefetch = 0 : i64, scratch_operands = 0 : i64, tpu.core_type = #tpu.core_type<tc>, window_params = [{transform_indices = @transform_0, window_bounds = array<i64: 8, 216>}, {pipeline_mode = #tpu.pipeline_mode<synchronous>, transform_indices = @transform_1, window_bounds = array<i64: 216, 128>}, {pipeline_mode = #tpu.pipeline_mode<synchronous>, transform_indices = @transform_2, window_bounds = array<i64: 1, 128>}, {transform_indices = @transform_3, window_bounds = array<i64: 8, 128>}]} {
    %c0 = arith.constant 0 : index
    %c0_0 = arith.constant 0 : index
    %0 = vector.load %arg1[%c0, %c0_0] : memref<8x216xbf16, #tpu.memory_space<vmem>>, vector<8x216xbf16>
    %c0_1 = arith.constant 0 : index
    %c0_2 = arith.constant 0 : index
    %1 = vector.load %arg2[%c0_1, %c0_2] : memref<216x128xbf16, #tpu.memory_space<vmem>>, vector<216x128xbf16>
    %cst = arith.constant dense<0.000000e+00> : vector<8x128xf32>
    %2 = tpu.matmul %0, %1, %cst {dimension_numbers = #tpu.dot_dimension_numbers<[1], [0], [0], [1], [0, 0, 1, 1], [], []>} : vector<8x216xbf16>, vector<216x128xbf16>, vector<8x128xf32> -> vector<8x128xf32>
    %c0_3 = arith.constant 0 : index
    %c0_4 = arith.constant 0 : index
    %3 = vector.load %arg3[%c0_3, %c0_4] : memref<1x128xf32, #tpu.memory_space<vmem>>, vector<1x128xf32>
    %4 = vector.broadcast %3 : vector<1x128xf32> to vector<8x128xf32>
    %5 = arith.addf %2, %4 : vector<8x128xf32>
    %6 = arith.truncf %5 : vector<8x128xf32> to vector<8x128xbf16>
    %c0_5 = arith.constant 0 : index
    %c0_6 = arith.constant 0 : index
    %7 = vector.load %arg4[%c0_5, %c0_6] : memref<8x128xbf16, #tpu.memory_space<vmem>>, vector<8x128xbf16>
    tpu.vector_store %arg4[%c0_5, %c0_6], %6 {strides = array<i32>} : memref<8x128xbf16, #tpu.memory_space<vmem>>, vector<8x128xbf16>,
    return
  }
  func.func @transform_0(%arg0: i32) -> (i32, i32) {
    %c0_i32 = arith.constant 0 : i32
    %c0_i32_0 = arith.constant 0 : i32
    return %arg0, %c0_i32 : i32, i32
  }
  func.func @transform_1(%arg0: i32) -> (i32, i32) {
    %c0_i32 = arith.constant 0 : i32
    %c0_i32_0 = arith.constant 0 : i32
    %c0_i32_1 = arith.constant 0 : i32
    return %c0_i32, %c0_i32_0 : i32, i32
  }
  func.func @transform_2(%arg0: i32) -> (i32, i32) {
    %c0_i32 = arith.constant 0 : i32
    %c0_i32_0 = arith.constant 0 : i32
    %c0_i32_1 = arith.constant 0 : i32
    return %c0_i32, %c0_i32_0 : i32, i32
  }
  func.func @transform_3(%arg0: i32) -> (i32, i32) {
    %c0_i32 = arith.constant 0 : i32
    %c0_i32_0 = arith.constant 0 : i32
    return %arg0, %c0_i32 : i32, i32
  }
}

module attributes {stable_mosaic.version = 11 : i64} {
  func.func @_mm_kernel(%arg0: i32, %arg1: memref<8x128xbf16, #tpu.memory_space<vmem>>, %arg2: memref<128x128xbf16, #tpu.memory_space<vmem>>, %arg3: memref<1x128xf32, #tpu.memory_space<vmem>>, %arg4: memref<8x128xbf16, #tpu.memory_space<vmem>>) attributes {dimension_semantics = [#tpu.dimension_semantics<parallel>], iteration_bounds = array<i64: 2>, scalar_prefetch = 0 : i64, scratch_operands = 0 : i64, tpu.core_type = #tpu.core_type<tc>, window_params = [{transform_indices = @transform_0, window_bounds = array<i64: 8, 128>}, {pipeline_mode = #tpu.pipeline_mode<synchronous>, transform_indices = @transform_1, window_bounds = array<i64: 128, 128>}, {pipeline_mode = #tpu.pipeline_mode<synchronous>, transform_indices = @transform_2, window_bounds = array<i64: 1, 128>}, {transform_indices = @transform_3, window_bounds = array<i64: 8, 128>}]} {
    %c0 = arith.constant 0 : index
    %c0_0 = arith.constant 0 : index
    %0 = vector.load %arg1[%c0, %c0_0] : memref<8x128xbf16, #tpu.memory_space<vmem>>, vector<8x128xbf16>
    %c0_1 = arith.constant 0 : index
    %c0_2 = arith.constant 0 : index
    %1 = vector.load %arg2[%c0_1, %c0_2] : memref<128x128xbf16, #tpu.memory_space<vmem>>, vector<128x128xbf16>
    %cst = arith.constant dense<0.000000e+00> : vector<8x128xf32>
    %2 = tpu.matmul %0, %1, %cst {dimension_numbers = #tpu.dot_dimension_numbers<[1], [0], [0], [1], [0, 0, 1, 1], [], []>} : vector<8x128xbf16>, vector<128x128xbf16>, vector<8x128xf32> -> vector<8x128xf32>
    %c0_3 = arith.constant 0 : index
    %c0_4 = arith.constant 0 : index
    %3 = vector.load %arg3[%c0_3, %c0_4] : memref<1x128xf32, #tpu.memory_space<vmem>>, vector<1x128xf32>
    %4 = vector.broadcast %3 : vector<1x128xf32> to vector<8x128xf32>
    %5 = arith.addf %2, %4 : vector<8x128xf32>
    %cst_5 = arith.constant 0.000000e+00 : f32
    %6 = vector.broadcast %cst_5 : f32 to vector<8x128xf32>
    %7 = arith.maximumf %5, %6 : vector<8x128xf32>
    %8 = arith.truncf %7 : vector<8x128xf32> to vector<8x128xbf16>
    %c0_6 = arith.constant 0 : index
    %c0_7 = arith.constant 0 : index
    %9 = vector.load %arg4[%c0_6, %c0_7] : memref<8x128xbf16, #tpu.memory_space<vmem>>, vector<8x128xbf16>
    tpu.vector_store %arg4[%c0_6, %c0_7], %8 {strides = array<i32>} : memref<8x128xbf16, #tpu.memory_space<vmem>>, vector<8x128xbf16>,
    return
  }
  func.func @transform_0(%arg0: i32) -> (i32, i32) {
    %c0_i32 = arith.constant 0 : i32
    %c0_i32_0 = arith.constant 0 : i32
    return %arg0, %c0_i32 : i32, i32
  }
  func.func @transform_1(%arg0: i32) -> (i32, i32) {
    %c0_i32 = arith.constant 0 : i32
    %c0_i32_0 = arith.constant 0 : i32
    %c0_i32_1 = arith.constant 0 : i32
    return %c0_i32, %c0_i32_0 : i32, i32
  }
  func.func @transform_2(%arg0: i32) -> (i32, i32) {
    %c0_i32 = arith.constant 0 : i32
    %c0_i32_0 = arith.constant 0 : i32
    %c0_i32_1 = arith.constant 0 : i32
    return %c0_i32, %c0_i32_0 : i32, i32
  }
  func.func @transform_3(%arg0: i32) -> (i32, i32) {
    %c0_i32 = arith.constant 0 : i32
    %c0_i32_0 = arith.constant 0 : i32
    return %arg0, %c0_i32 : i32, i32
  }
}

module attributes {stable_mosaic.version = 11 : i64} {
  func.func @_mm_kernel(%arg0: i32, %arg1: memref<64x64xbf16, #tpu.memory_space<vmem>>, %arg2: memref<64x128xbf16, #tpu.memory_space<vmem>>, %arg3: memref<1x128xf32, #tpu.memory_space<vmem>>, %arg4: memref<64x128xbf16, #tpu.memory_space<vmem>>) attributes {dimension_semantics = [#tpu.dimension_semantics<parallel>], iteration_bounds = array<i64: 2>, scalar_prefetch = 0 : i64, scratch_operands = 0 : i64, tpu.core_type = #tpu.core_type<tc>, window_params = [{transform_indices = @transform_0, window_bounds = array<i64: 64, 64>}, {pipeline_mode = #tpu.pipeline_mode<synchronous>, transform_indices = @transform_1, window_bounds = array<i64: 64, 128>}, {pipeline_mode = #tpu.pipeline_mode<synchronous>, transform_indices = @transform_2, window_bounds = array<i64: 1, 128>}, {transform_indices = @transform_3, window_bounds = array<i64: 64, 128>}]} {
    %c0 = arith.constant 0 : index
    %c0_0 = arith.constant 0 : index
    %0 = vector.load %arg1[%c0, %c0_0] : memref<64x64xbf16, #tpu.memory_space<vmem>>, vector<64x64xbf16>
    %c0_1 = arith.constant 0 : index
    %c0_2 = arith.constant 0 : index
    %1 = vector.load %arg2[%c0_1, %c0_2] : memref<64x128xbf16, #tpu.memory_space<vmem>>, vector<64x128xbf16>
    %cst = arith.constant dense<0.000000e+00> : vector<64x128xf32>
    %2 = tpu.matmul %0, %1, %cst {dimension_numbers = #tpu.dot_dimension_numbers<[1], [0], [0], [1], [0, 0, 1, 1], [], []>} : vector<64x64xbf16>, vector<64x128xbf16>, vector<64x128xf32> -> vector<64x128xf32>
    %c0_3 = arith.constant 0 : index
    %c0_4 = arith.constant 0 : index
    %3 = vector.load %arg3[%c0_3, %c0_4] : memref<1x128xf32, #tpu.memory_space<vmem>>, vector<1x128xf32>
    %4 = vector.broadcast %3 : vector<1x128xf32> to vector<64x128xf32>
    %5 = arith.addf %2, %4 : vector<64x128xf32>
    %cst_5 = arith.constant 0.000000e+00 : f32
    %6 = vector.broadcast %cst_5 : f32 to vector<64x128xf32>
    %7 = arith.maximumf %5, %6 : vector<64x128xf32>
    %8 = arith.truncf %7 : vector<64x128xf32> to vector<64x128xbf16>
    %c0_6 = arith.constant 0 : index
    %c0_7 = arith.constant 0 : index
    %9 = vector.load %arg4[%c0_6, %c0_7] : memref<64x128xbf16, #tpu.memory_space<vmem>>, vector<64x128xbf16>
    tpu.vector_store %arg4[%c0_6, %c0_7], %8 {strides = array<i32>} : memref<64x128xbf16, #tpu.memory_space<vmem>>, vector<64x128xbf16>,
    return
  }
  func.func @transform_0(%arg0: i32) -> (i32, i32) {
    %c0_i32 = arith.constant 0 : i32
    %c0_i32_0 = arith.constant 0 : i32
    return %arg0, %c0_i32 : i32, i32
  }
  func.func @transform_1(%arg0: i32) -> (i32, i32) {
    %c0_i32 = arith.constant 0 : i32
    %c0_i32_0 = arith.constant 0 : i32
    %c0_i32_1 = arith.constant 0 : i32
    return %c0_i32, %c0_i32_0 : i32, i32
  }
  func.func @transform_2(%arg0: i32) -> (i32, i32) {
    %c0_i32 = arith.constant 0 : i32
    %c0_i32_0 = arith.constant 0 : i32
    %c0_i32_1 = arith.constant 0 : i32
    return %c0_i32, %c0_i32_0 : i32, i32
  }
  func.func @transform_3(%arg0: i32) -> (i32, i32) {
    %c0_i32 = arith.constant 0 : i32
    %c0_i32_0 = arith.constant 0 : i32
    return %arg0, %c0_i32 : i32, i32
  }
}

module attributes {stable_mosaic.version = 11 : i64} {
  func.func @_mm_kernel(%arg0: i32, %arg1: memref<512x64xbf16, #tpu.memory_space<vmem>>, %arg2: memref<64x128xbf16, #tpu.memory_space<vmem>>, %arg3: memref<1x128xf32, #tpu.memory_space<vmem>>, %arg4: memref<512x128xbf16, #tpu.memory_space<vmem>>) attributes {dimension_semantics = [#tpu.dimension_semantics<parallel>], iteration_bounds = array<i64: 2>, scalar_prefetch = 0 : i64, scratch_operands = 0 : i64, tpu.core_type = #tpu.core_type<tc>, window_params = [{transform_indices = @transform_0, window_bounds = array<i64: 512, 64>}, {pipeline_mode = #tpu.pipeline_mode<synchronous>, transform_indices = @transform_1, window_bounds = array<i64: 64, 128>}, {pipeline_mode = #tpu.pipeline_mode<synchronous>, transform_indices = @transform_2, window_bounds = array<i64: 1, 128>}, {transform_indices = @transform_3, window_bounds = array<i64: 512, 128>}]} {
    %c0 = arith.constant 0 : index
    %c0_0 = arith.constant 0 : index
    %0 = vector.load %arg1[%c0, %c0_0] : memref<512x64xbf16, #tpu.memory_space<vmem>>, vector<512x64xbf16>
    %c0_1 = arith.constant 0 : index
    %c0_2 = arith.constant 0 : index
    %1 = vector.load %arg2[%c0_1, %c0_2] : memref<64x128xbf16, #tpu.memory_space<vmem>>, vector<64x128xbf16>
    %cst = arith.constant dense<0.000000e+00> : vector<512x128xf32>
    %2 = tpu.matmul %0, %1, %cst {dimension_numbers = #tpu.dot_dimension_numbers<[1], [0], [0], [1], [0, 0, 1, 1], [], []>} : vector<512x64xbf16>, vector<64x128xbf16>, vector<512x128xf32> -> vector<512x128xf32>
    %c0_3 = arith.constant 0 : index
    %c0_4 = arith.constant 0 : index
    %3 = vector.load %arg3[%c0_3, %c0_4] : memref<1x128xf32, #tpu.memory_space<vmem>>, vector<1x128xf32>
    %4 = vector.broadcast %3 : vector<1x128xf32> to vector<512x128xf32>
    %5 = arith.addf %2, %4 : vector<512x128xf32>
    %cst_5 = arith.constant 0.000000e+00 : f32
    %6 = vector.broadcast %cst_5 : f32 to vector<512x128xf32>
    %7 = arith.maximumf %5, %6 : vector<512x128xf32>
    %8 = arith.truncf %7 : vector<512x128xf32> to vector<512x128xbf16>
    %c0_6 = arith.constant 0 : index
    %c0_7 = arith.constant 0 : index
    %9 = vector.load %arg4[%c0_6, %c0_7] : memref<512x128xbf16, #tpu.memory_space<vmem>>, vector<512x128xbf16>
    tpu.vector_store %arg4[%c0_6, %c0_7], %8 {strides = array<i32>} : memref<512x128xbf16, #tpu.memory_space<vmem>>, vector<512x128xbf16>,
    return
  }
  func.func @transform_0(%arg0: i32) -> (i32, i32) {
    %c0_i32 = arith.constant 0 : i32
    %c0_i32_0 = arith.constant 0 : i32
    return %arg0, %c0_i32 : i32, i32
  }
  func.func @transform_1(%arg0: i32) -> (i32, i32) {
    %c0_i32 = arith.constant 0 : i32
    %c0_i32_0 = arith.constant 0 : i32
    %c0_i32_1 = arith.constant 0 : i32
    return %c0_i32, %c0_i32_0 : i32, i32
  }
  func.func @transform_2(%arg0: i32) -> (i32, i32) {
    %c0_i32 = arith.constant 0 : i32
    %c0_i32_0 = arith.constant 0 : i32
    %c0_i32_1 = arith.constant 0 : i32
    return %c0_i32, %c0_i32_0 : i32, i32
  }
  func.func @transform_3(%arg0: i32) -> (i32, i32) {
    %c0_i32 = arith.constant 0 : i32
    %c0_i32_0 = arith.constant 0 : i32
    return %arg0, %c0_i32 : i32, i32
  }
}

module attributes {stable_mosaic.version = 11 : i64} {
  func.func @_mm_kernel(%arg0: i32, %arg1: memref<1024x108xbf16, #tpu.memory_space<vmem>>, %arg2: memref<108x128xbf16, #tpu.memory_space<vmem>>, %arg3: memref<1x128xf32, #tpu.memory_space<vmem>>, %arg4: memref<1024x128xbf16, #tpu.memory_space<vmem>>) attributes {dimension_semantics = [#tpu.dimension_semantics<parallel>], iteration_bounds = array<i64: 8>, scalar_prefetch = 0 : i64, scratch_operands = 0 : i64, tpu.core_type = #tpu.core_type<tc>, window_params = [{transform_indices = @transform_0, window_bounds = array<i64: 1024, 108>}, {pipeline_mode = #tpu.pipeline_mode<synchronous>, transform_indices = @transform_1, window_bounds = array<i64: 108, 128>}, {pipeline_mode = #tpu.pipeline_mode<synchronous>, transform_indices = @transform_2, window_bounds = array<i64: 1, 128>}, {transform_indices = @transform_3, window_bounds = array<i64: 1024, 128>}]} {
    %c0 = arith.constant 0 : index
    %c0_0 = arith.constant 0 : index
    %0 = vector.load %arg1[%c0, %c0_0] : memref<1024x108xbf16, #tpu.memory_space<vmem>>, vector<1024x108xbf16>
    %c0_1 = arith.constant 0 : index
    %c0_2 = arith.constant 0 : index
    %1 = vector.load %arg2[%c0_1, %c0_2] : memref<108x128xbf16, #tpu.memory_space<vmem>>, vector<108x128xbf16>
    %cst = arith.constant dense<0.000000e+00> : vector<1024x128xf32>
    %2 = tpu.matmul %0, %1, %cst {dimension_numbers = #tpu.dot_dimension_numbers<[1], [0], [0], [1], [0, 0, 1, 1], [], []>} : vector<1024x108xbf16>, vector<108x128xbf16>, vector<1024x128xf32> -> vector<1024x128xf32>
    %c0_3 = arith.constant 0 : index
    %c0_4 = arith.constant 0 : index
    %3 = vector.load %arg3[%c0_3, %c0_4] : memref<1x128xf32, #tpu.memory_space<vmem>>, vector<1x128xf32>
    %4 = vector.broadcast %3 : vector<1x128xf32> to vector<1024x128xf32>
    %5 = arith.addf %2, %4 : vector<1024x128xf32>
    %cst_5 = arith.constant 0.000000e+00 : f32
    %6 = vector.broadcast %cst_5 : f32 to vector<1024x128xf32>
    %7 = arith.maximumf %5, %6 : vector<1024x128xf32>
    %8 = arith.truncf %7 : vector<1024x128xf32> to vector<1024x128xbf16>
    %c0_6 = arith.constant 0 : index
    %c0_7 = arith.constant 0 : index
    %9 = vector.load %arg4[%c0_6, %c0_7] : memref<1024x128xbf16, #tpu.memory_space<vmem>>, vector<1024x128xbf16>
    tpu.vector_store %arg4[%c0_6, %c0_7], %8 {strides = array<i32>} : memref<1024x128xbf16, #tpu.memory_space<vmem>>, vector<1024x128xbf16>,
    return
  }
  func.func @transform_0(%arg0: i32) -> (i32, i32) {
    %c0_i32 = arith.constant 0 : i32
    %c0_i32_0 = arith.constant 0 : i32
    return %arg0, %c0_i32 : i32, i32
  }
  func.func @transform_1(%arg0: i32) -> (i32, i32) {
    %c0_i32 = arith.constant 0 : i32
    %c0_i32_0 = arith.constant 0 : i32
    %c0_i32_1 = arith.constant 0 : i32
    return %c0_i32, %c0_i32_0 : i32, i32
  }
  func.func @transform_2(%arg0: i32) -> (i32, i32) {
    %c0_i32 = arith.constant 0 : i32
    %c0_i32_0 = arith.constant 0 : i32
    %c0_i32_1 = arith.constant 0 : i32
    return %c0_i32, %c0_i32_0 : i32, i32
  }
  func.func @transform_3(%arg0: i32) -> (i32, i32) {
    %c0_i32 = arith.constant 0 : i32
    %c0_i32_0 = arith.constant 0 : i32
    return %arg0, %c0_i32 : i32, i32
  }
}

module attributes {stable_mosaic.version = 11 : i64} {
  func.func @_mm_kernel(%arg0: i32, %arg1: memref<1024x54xbf16, #tpu.memory_space<vmem>>, %arg2: memref<54x128xbf16, #tpu.memory_space<vmem>>, %arg3: memref<1x128xf32, #tpu.memory_space<vmem>>, %arg4: memref<1024x128xbf16, #tpu.memory_space<vmem>>) attributes {dimension_semantics = [#tpu.dimension_semantics<parallel>], iteration_bounds = array<i64: 8>, scalar_prefetch = 0 : i64, scratch_operands = 0 : i64, tpu.core_type = #tpu.core_type<tc>, window_params = [{transform_indices = @transform_0, window_bounds = array<i64: 1024, 54>}, {pipeline_mode = #tpu.pipeline_mode<synchronous>, transform_indices = @transform_1, window_bounds = array<i64: 54, 128>}, {pipeline_mode = #tpu.pipeline_mode<synchronous>, transform_indices = @transform_2, window_bounds = array<i64: 1, 128>}, {transform_indices = @transform_3, window_bounds = array<i64: 1024, 128>}]} {
    %c0 = arith.constant 0 : index
    %c0_0 = arith.constant 0 : index
    %0 = vector.load %arg1[%c0, %c0_0] : memref<1024x54xbf16, #tpu.memory_space<vmem>>, vector<1024x54xbf16>
    %c0_1 = arith.constant 0 : index
    %c0_2 = arith.constant 0 : index
    %1 = vector.load %arg2[%c0_1, %c0_2] : memref<54x128xbf16, #tpu.memory_space<vmem>>, vector<54x128xbf16>
    %cst = arith.constant dense<0.000000e+00> : vector<1024x128xf32>
    %2 = tpu.matmul %0, %1, %cst {dimension_numbers = #tpu.dot_dimension_numbers<[1], [0], [0], [1], [0, 0, 1, 1], [], []>} : vector<1024x54xbf16>, vector<54x128xbf16>, vector<1024x128xf32> -> vector<1024x128xf32>
    %c0_3 = arith.constant 0 : index
    %c0_4 = arith.constant 0 : index
    %3 = vector.load %arg3[%c0_3, %c0_4] : memref<1x128xf32, #tpu.memory_space<vmem>>, vector<1x128xf32>
    %4 = vector.broadcast %3 : vector<1x128xf32> to vector<1024x128xf32>
    %5 = arith.addf %2, %4 : vector<1024x128xf32>
    %6 = arith.truncf %5 : vector<1024x128xf32> to vector<1024x128xbf16>
    %c0_5 = arith.constant 0 : index
    %c0_6 = arith.constant 0 : index
    %7 = vector.load %arg4[%c0_5, %c0_6] : memref<1024x128xbf16, #tpu.memory_space<vmem>>, vector<1024x128xbf16>
    tpu.vector_store %arg4[%c0_5, %c0_6], %6 {strides = array<i32>} : memref<1024x128xbf16, #tpu.memory_space<vmem>>, vector<1024x128xbf16>,
    return
  }
  func.func @transform_0(%arg0: i32) -> (i32, i32) {
    %c0_i32 = arith.constant 0 : i32
    %c0_i32_0 = arith.constant 0 : i32
    return %arg0, %c0_i32 : i32, i32
  }
  func.func @transform_1(%arg0: i32) -> (i32, i32) {
    %c0_i32 = arith.constant 0 : i32
    %c0_i32_0 = arith.constant 0 : i32
    %c0_i32_1 = arith.constant 0 : i32
    return %c0_i32, %c0_i32_0 : i32, i32
  }
  func.func @transform_2(%arg0: i32) -> (i32, i32) {
    %c0_i32 = arith.constant 0 : i32
    %c0_i32_0 = arith.constant 0 : i32
    %c0_i32_1 = arith.constant 0 : i32
    return %c0_i32, %c0_i32_0 : i32, i32
  }
  func.func @transform_3(%arg0: i32) -> (i32, i32) {
    %c0_i32 = arith.constant 0 : i32
    %c0_i32_0 = arith.constant 0 : i32
    return %arg0, %c0_i32 : i32, i32
  }
}

module attributes {stable_mosaic.version = 11 : i64} {
  func.func @_mm_kernel(%arg0: i32, %arg1: memref<4x2xbf16, #tpu.memory_space<vmem>>, %arg2: memref<2x128xbf16, #tpu.memory_space<vmem>>, %arg3: memref<1x128xf32, #tpu.memory_space<vmem>>, %arg4: memref<4x128xf32, #tpu.memory_space<vmem>>) attributes {dimension_semantics = [#tpu.dimension_semantics<parallel>], iteration_bounds = array<i64: 1>, scalar_prefetch = 0 : i64, scratch_operands = 0 : i64, tpu.core_type = #tpu.core_type<tc>, window_params = [{transform_indices = @transform_0, window_bounds = array<i64: 4, 2>}, {pipeline_mode = #tpu.pipeline_mode<synchronous>, transform_indices = @transform_1, window_bounds = array<i64: 2, 128>}, {pipeline_mode = #tpu.pipeline_mode<synchronous>, transform_indices = @transform_2, window_bounds = array<i64: 1, 128>}, {transform_indices = @transform_3, window_bounds = array<i64: 4, 128>}]} {
    %c0 = arith.constant 0 : index
    %c0_0 = arith.constant 0 : index
    %0 = vector.load %arg1[%c0, %c0_0] : memref<4x2xbf16, #tpu.memory_space<vmem>>, vector<4x2xbf16>
    %c0_1 = arith.constant 0 : index
    %c0_2 = arith.constant 0 : index
    %1 = vector.load %arg2[%c0_1, %c0_2] : memref<2x128xbf16, #tpu.memory_space<vmem>>, vector<2x128xbf16>
    %cst = arith.constant dense<0.000000e+00> : vector<4x128xf32>
    %2 = tpu.matmul %0, %1, %cst {dimension_numbers = #tpu.dot_dimension_numbers<[1], [0], [0], [1], [0, 0, 1, 1], [], []>} : vector<4x2xbf16>, vector<2x128xbf16>, vector<4x128xf32> -> vector<4x128xf32>
    %c0_3 = arith.constant 0 : index
    %c0_4 = arith.constant 0 : index
    %3 = vector.load %arg3[%c0_3, %c0_4] : memref<1x128xf32, #tpu.memory_space<vmem>>, vector<1x128xf32>
    %4 = vector.broadcast %3 : vector<1x128xf32> to vector<4x128xf32>
    %5 = arith.addf %2, %4 : vector<4x128xf32>
    %cst_5 = arith.constant 0.000000e+00 : f32
    %6 = vector.broadcast %cst_5 : f32 to vector<4x128xf32>
    %7 = arith.maximumf %5, %6 : vector<4x128xf32>
    %c0_6 = arith.constant 0 : index
    %c0_7 = arith.constant 0 : index
    %8 = vector.load %arg4[%c0_6, %c0_7] : memref<4x128xf32, #tpu.memory_space<vmem>>, vector<4x128xf32>
    tpu.vector_store %arg4[%c0_6, %c0_7], %7 {strides = array<i32>} : memref<4x128xf32, #tpu.memory_space<vmem>>, vector<4x128xf32>,
    return
  }
  func.func @transform_0(%arg0: i32) -> (i32, i32) {
    %c0_i32 = arith.constant 0 : i32
    %c0_i32_0 = arith.constant 0 : i32
    return %arg0, %c0_i32 : i32, i32
  }
  func.func @transform_1(%arg0: i32) -> (i32, i32) {
    %c0_i32 = arith.constant 0 : i32
    %c0_i32_0 = arith.constant 0 : i32
    %c0_i32_1 = arith.constant 0 : i32
    return %c0_i32, %c0_i32_0 : i32, i32
  }
  func.func @transform_2(%arg0: i32) -> (i32, i32) {
    %c0_i32 = arith.constant 0 : i32
    %c0_i32_0 = arith.constant 0 : i32
    %c0_i32_1 = arith.constant 0 : i32
    return %c0_i32, %c0_i32_0 : i32, i32
  }
  func.func @transform_3(%arg0: i32) -> (i32, i32) {
    %c0_i32 = arith.constant 0 : i32
    %c0_i32_0 = arith.constant 0 : i32
    return %arg0, %c0_i32 : i32, i32
  }
}

module attributes {stable_mosaic.version = 11 : i64} {
  func.func @_mm_kernel(%arg0: i32, %arg1: memref<4x1xbf16, #tpu.memory_space<vmem>>, %arg2: memref<1x128xbf16, #tpu.memory_space<vmem>>, %arg3: memref<1x128xf32, #tpu.memory_space<vmem>>, %arg4: memref<4x128xf32, #tpu.memory_space<vmem>>) attributes {dimension_semantics = [#tpu.dimension_semantics<parallel>], iteration_bounds = array<i64: 1>, scalar_prefetch = 0 : i64, scratch_operands = 0 : i64, tpu.core_type = #tpu.core_type<tc>, window_params = [{transform_indices = @transform_0, window_bounds = array<i64: 4, 1>}, {pipeline_mode = #tpu.pipeline_mode<synchronous>, transform_indices = @transform_1, window_bounds = array<i64: 1, 128>}, {pipeline_mode = #tpu.pipeline_mode<synchronous>, transform_indices = @transform_2, window_bounds = array<i64: 1, 128>}, {transform_indices = @transform_3, window_bounds = array<i64: 4, 128>}]} {
    %c0 = arith.constant 0 : index
    %c0_0 = arith.constant 0 : index
    %0 = vector.load %arg1[%c0, %c0_0] : memref<4x1xbf16, #tpu.memory_space<vmem>>, vector<4x1xbf16>
    %c0_1 = arith.constant 0 : index
    %c0_2 = arith.constant 0 : index
    %1 = vector.load %arg2[%c0_1, %c0_2] : memref<1x128xbf16, #tpu.memory_space<vmem>>, vector<1x128xbf16>
    %cst = arith.constant dense<0.000000e+00> : vector<4x128xf32>
    %2 = tpu.matmul %0, %1, %cst {dimension_numbers = #tpu.dot_dimension_numbers<[1], [0], [0], [1], [0, 0, 1, 1], [], []>} : vector<4x1xbf16>, vector<1x128xbf16>, vector<4x128xf32> -> vector<4x128xf32>
    %c0_3 = arith.constant 0 : index
    %c0_4 = arith.constant 0 : index
    %3 = vector.load %arg3[%c0_3, %c0_4] : memref<1x128xf32, #tpu.memory_space<vmem>>, vector<1x128xf32>
    %4 = vector.broadcast %3 : vector<1x128xf32> to vector<4x128xf32>
    %5 = arith.addf %2, %4 : vector<4x128xf32>
    %c0_5 = arith.constant 0 : index
    %c0_6 = arith.constant 0 : index
    %6 = vector.load %arg4[%c0_5, %c0_6] : memref<4x128xf32, #tpu.memory_space<vmem>>, vector<4x128xf32>
    tpu.vector_store %arg4[%c0_5, %c0_6], %5 {strides = array<i32>} : memref<4x128xf32, #tpu.memory_space<vmem>>, vector<4x128xf32>,
    return
  }
  func.func @transform_0(%arg0: i32) -> (i32, i32) {
    %c0_i32 = arith.constant 0 : i32
    %c0_i32_0 = arith.constant 0 : i32
    return %arg0, %c0_i32 : i32, i32
  }
  func.func @transform_1(%arg0: i32) -> (i32, i32) {
    %c0_i32 = arith.constant 0 : i32
    %c0_i32_0 = arith.constant 0 : i32
    %c0_i32_1 = arith.constant 0 : i32
    return %c0_i32, %c0_i32_0 : i32, i32
  }
  func.func @transform_2(%arg0: i32) -> (i32, i32) {
    %c0_i32 = arith.constant 0 : i32
    %c0_i32_0 = arith.constant 0 : i32
    %c0_i32_1 = arith.constant 0 : i32
    return %c0_i32, %c0_i32_0 : i32, i32
  }
  func.func @transform_3(%arg0: i32) -> (i32, i32) {
    %c0_i32 = arith.constant 0 : i32
    %c0_i32_0 = arith.constant 0 : i32
    return %arg0, %c0_i32 : i32, i32
  }
}

module attributes {stable_mosaic.version = 11 : i64} {
  func.func @_mm_kernel(%arg0: i32, %arg1: memref<1024x54xbf16, #tpu.memory_space<vmem>>, %arg2: memref<54x128xbf16, #tpu.memory_space<vmem>>, %arg3: memref<1x128xf32, #tpu.memory_space<vmem>>, %arg4: memref<1024x128xbf16, #tpu.memory_space<vmem>>) attributes {dimension_semantics = [#tpu.dimension_semantics<parallel>], iteration_bounds = array<i64: 8>, scalar_prefetch = 0 : i64, scratch_operands = 0 : i64, tpu.core_type = #tpu.core_type<tc>, window_params = [{transform_indices = @transform_0, window_bounds = array<i64: 1024, 54>}, {pipeline_mode = #tpu.pipeline_mode<synchronous>, transform_indices = @transform_1, window_bounds = array<i64: 54, 128>}, {pipeline_mode = #tpu.pipeline_mode<synchronous>, transform_indices = @transform_2, window_bounds = array<i64: 1, 128>}, {transform_indices = @transform_3, window_bounds = array<i64: 1024, 128>}]} {
    %c0 = arith.constant 0 : index
    %c0_0 = arith.constant 0 : index
    %0 = vector.load %arg1[%c0, %c0_0] : memref<1024x54xbf16, #tpu.memory_space<vmem>>, vector<1024x54xbf16>
    %c0_1 = arith.constant 0 : index
    %c0_2 = arith.constant 0 : index
    %1 = vector.load %arg2[%c0_1, %c0_2] : memref<54x128xbf16, #tpu.memory_space<vmem>>, vector<54x128xbf16>
    %cst = arith.constant dense<0.000000e+00> : vector<1024x128xf32>
    %2 = tpu.matmul %0, %1, %cst {dimension_numbers = #tpu.dot_dimension_numbers<[1], [0], [0], [1], [0, 0, 1, 1], [], []>} : vector<1024x54xbf16>, vector<54x128xbf16>, vector<1024x128xf32> -> vector<1024x128xf32>
    %c0_3 = arith.constant 0 : index
    %c0_4 = arith.constant 0 : index
    %3 = vector.load %arg3[%c0_3, %c0_4] : memref<1x128xf32, #tpu.memory_space<vmem>>, vector<1x128xf32>
    %4 = vector.broadcast %3 : vector<1x128xf32> to vector<1024x128xf32>
    %5 = arith.addf %2, %4 : vector<1024x128xf32>
    %6 = arith.truncf %5 : vector<1024x128xf32> to vector<1024x128xbf16>
    %c0_5 = arith.constant 0 : index
    %c0_6 = arith.constant 0 : index
    %7 = vector.load %arg4[%c0_5, %c0_6] : memref<1024x128xbf16, #tpu.memory_space<vmem>>, vector<1024x128xbf16>
    tpu.vector_store %arg4[%c0_5, %c0_6], %6 {strides = array<i32>} : memref<1024x128xbf16, #tpu.memory_space<vmem>>, vector<1024x128xbf16>,
    return
  }
  func.func @transform_0(%arg0: i32) -> (i32, i32) {
    %c0_i32 = arith.constant 0 : i32
    %c0_i32_0 = arith.constant 0 : i32
    return %arg0, %c0_i32 : i32, i32
  }
  func.func @transform_1(%arg0: i32) -> (i32, i32) {
    %c0_i32 = arith.constant 0 : i32
    %c0_i32_0 = arith.constant 0 : i32
    %c0_i32_1 = arith.constant 0 : i32
    return %c0_i32, %c0_i32_0 : i32, i32
  }
  func.func @transform_2(%arg0: i32) -> (i32, i32) {
    %c0_i32 = arith.constant 0 : i32
    %c0_i32_0 = arith.constant 0 : i32
    %c0_i32_1 = arith.constant 0 : i32
    return %c0_i32, %c0_i32_0 : i32, i32
  }
  func.func @transform_3(%arg0: i32) -> (i32, i32) {
    %c0_i32 = arith.constant 0 : i32
    %c0_i32_0 = arith.constant 0 : i32
    return %arg0, %c0_i32 : i32, i32
  }
}

module attributes {stable_mosaic.version = 11 : i64} {
  func.func @_mm_kernel(%arg0: i32, %arg1: memref<1024x2xbf16, #tpu.memory_space<vmem>>, %arg2: memref<2x128xbf16, #tpu.memory_space<vmem>>, %arg3: memref<1x128xf32, #tpu.memory_space<vmem>>, %arg4: memref<1024x128xbf16, #tpu.memory_space<vmem>>) attributes {dimension_semantics = [#tpu.dimension_semantics<parallel>], iteration_bounds = array<i64: 8>, scalar_prefetch = 0 : i64, scratch_operands = 0 : i64, tpu.core_type = #tpu.core_type<tc>, window_params = [{transform_indices = @transform_0, window_bounds = array<i64: 1024, 2>}, {pipeline_mode = #tpu.pipeline_mode<synchronous>, transform_indices = @transform_1, window_bounds = array<i64: 2, 128>}, {pipeline_mode = #tpu.pipeline_mode<synchronous>, transform_indices = @transform_2, window_bounds = array<i64: 1, 128>}, {transform_indices = @transform_3, window_bounds = array<i64: 1024, 128>}]} {
    %c0 = arith.constant 0 : index
    %c0_0 = arith.constant 0 : index
    %0 = vector.load %arg1[%c0, %c0_0] : memref<1024x2xbf16, #tpu.memory_space<vmem>>, vector<1024x2xbf16>
    %c0_1 = arith.constant 0 : index
    %c0_2 = arith.constant 0 : index
    %1 = vector.load %arg2[%c0_1, %c0_2] : memref<2x128xbf16, #tpu.memory_space<vmem>>, vector<2x128xbf16>
    %cst = arith.constant dense<0.000000e+00> : vector<1024x128xf32>
    %2 = tpu.matmul %0, %1, %cst {dimension_numbers = #tpu.dot_dimension_numbers<[1], [0], [0], [1], [0, 0, 1, 1], [], []>} : vector<1024x2xbf16>, vector<2x128xbf16>, vector<1024x128xf32> -> vector<1024x128xf32>
    %c0_3 = arith.constant 0 : index
    %c0_4 = arith.constant 0 : index
    %3 = vector.load %arg3[%c0_3, %c0_4] : memref<1x128xf32, #tpu.memory_space<vmem>>, vector<1x128xf32>
    %4 = vector.broadcast %3 : vector<1x128xf32> to vector<1024x128xf32>
    %5 = arith.addf %2, %4 : vector<1024x128xf32>
    %6 = arith.truncf %5 : vector<1024x128xf32> to vector<1024x128xbf16>
    %c0_5 = arith.constant 0 : index
    %c0_6 = arith.constant 0 : index
    %7 = vector.load %arg4[%c0_5, %c0_6] : memref<1024x128xbf16, #tpu.memory_space<vmem>>, vector<1024x128xbf16>
    tpu.vector_store %arg4[%c0_5, %c0_6], %6 {strides = array<i32>} : memref<1024x128xbf16, #tpu.memory_space<vmem>>, vector<1024x128xbf16>,
    return
  }
  func.func @transform_0(%arg0: i32) -> (i32, i32) {
    %c0_i32 = arith.constant 0 : i32
    %c0_i32_0 = arith.constant 0 : i32
    return %arg0, %c0_i32 : i32, i32
  }
  func.func @transform_1(%arg0: i32) -> (i32, i32) {
    %c0_i32 = arith.constant 0 : i32
    %c0_i32_0 = arith.constant 0 : i32
    %c0_i32_1 = arith.constant 0 : i32
    return %c0_i32, %c0_i32_0 : i32, i32
  }
  func.func @transform_2(%arg0: i32) -> (i32, i32) {
    %c0_i32 = arith.constant 0 : i32
    %c0_i32_0 = arith.constant 0 : i32
    %c0_i32_1 = arith.constant 0 : i32
    return %c0_i32, %c0_i32_0 : i32, i32
  }
  func.func @transform_3(%arg0: i32) -> (i32, i32) {
    %c0_i32 = arith.constant 0 : i32
    %c0_i32_0 = arith.constant 0 : i32
    return %arg0, %c0_i32 : i32, i32
  }
}

</mosaic_0001>

<bundles_post_ra>
// kernel: grdn_forward.57
= control target key start
LH: loop header
LB: loop body
LE: loop exit
PB: predicated region body
PF: predicated region fallthrough
CT: control target
= control target key end

     0   :  { %s3149_s12 = smov 0   ;;  %s3505_s0 = inlined_call_operand.vmem [shape: bf16[8192,1], index: 0, kind: input, shape index: {}]   ;;  %s3506_s1 = inlined_call_operand.vmem [shape: bf16[1,128], index: 1, kind: input, shape index: {}]   ;;  %s3507_s2 = inlined_call_operand.vmem [shape: f32[1,128], index: 2, kind: input, shape index: {}]   ;;  %s3508_s3 = inlined_call_operand.vmem [shape: bf16[8192,128], index: 3, kind: output, shape index: {}]  }
   0x1 LB: > { %s2071_s13 = sadd.s32 4294967295, %s3126_s12   ;;  %p2075_p0 = scmp.ge.s32.totalorder %s3126_s12, 1  ;;  %s3126_s12 = sphi %s3149_s12, %s13_s12  }
   0x2   : > { %p138_p1 = scmp.lt.s32.totalorder %s3126_s12, 9 }
   0x4   : > { %p139_p2 = pnand %p2075_p0, %p138_p1 }
   0x5   : > { %v303_v0 = vld [vmem:[%s3506_s1] sm:$0x1] (!%p139_p2)  ;;  %vm824_vm0 = vcmask (!%p139_p2), 1040384   ;;  %s2076_s16 = sshll.u32 (!%p139_p2), %s2071_s13, 7  ;;  %v3128_v1 = vmov (!%p139_p2), 0   ;;  %vm631_vm1 = vcmask (!%p139_p2), 7168  }
   0x6   : > { %142 = sbr.rel (%p139_p2) target bundleno = 359 (0x167), region = 32  ;;  %v826_v2 = vsel (!%p139_p2), %vm824_vm0, 65535, %v3128_v1  ;;  %p163_p3 = scmp.lt.s32.totalorder (!%p139_p2), %s2076_s16, 1023 }
   0x7   : > { %v828_v3 = vand.u32 (!%p139_p2), %v826_v2, %v303_v0 }
   0x9   : > { %2915 = vmatprep.subr.bf16.mxu0 (!%p139_p2), %v828_v3  ;;  %3045 = vmatprep.subr.bf16.mxu1 (!%p139_p2), %v828_v3 }
   0xa   : > { %2916 = vmatpush3.bf16.msra.mxu0 (!%p139_p2), %v828_v3  ;;  %3046 = vmatpush3.bf16.msra.mxu1 (!%p139_p2), %v828_v3 }
   0xd   : > { %s3510_s16 = smov (!%p163_p3, %s2076_s16), 1023 }
   0xe   : > { %s2077_s17 = sshll.u32 %s3510_s16, 2 }
   0xf   : > { %s3168_s20 = scalar_lea.vmem %s3505_s0, %s2077_s17  ;;  %s3312_s25 = scalar_lea.vmem %s3508_s3, %s2077_s17 }
  0x10   : > { %v3056_v4 = vld [vmem:[%s3168_s20] sm:$0xff]   ;;  %v3058_v6 = vld [vmem:[%s3168_s20 + $0x8] sm:$0xff]   ;;  %v3060_v8 = vld [vmem:[%s3168_s20 + $0x10] sm:$0xff]  }
  0x11   : > { %v3057_v5 = vld [vmem:[%s3168_s20 + $0x100] sm:$0xff]   ;;  %2917 = vmatprep.mubr.msk.bf16.mxu0 %vm631_vm1, %v3056_v4  ;;  %v3059_v7 = vld [vmem:[%s3168_s20 + $0x108] sm:$0xff]   ;;  %v3061_v9 = vld [vmem:[%s3168_s20 + $0x110] sm:$0xff]  }
  0x12   : > { %2981 = vmatprep.mubr.msk.bf16.mxu1 %vm631_vm1, %v3057_v5  ;;  %2918 = vmatmul.mubr.msk.bf16.vlgmr.msra.gmra.mrb[0].mxu0 %vm631_vm1, %v3058_v6  ;;  %v3062_v10 = vld [vmem:[%s3168_s20 + $0x18] sm:$0xff]   ;;  %v3064_v12 = vld [vmem:[%s3168_s20 + $0x20] sm:$0xff]   ;;  %v3066_v14 = vld [vmem:[%s3168_s20 + $0x28] sm:$0xff]  }
  0x13   : > { %2982 = vmatmul.mubr.msk.bf16.vlgmr.msra.gmra.mrb[0].mxu1 %vm631_vm1, %v3059_v7  ;;  %2921 = vmatprep.mubr.msk.bf16.mxu0 %vm631_vm1, %v3060_v8  ;;  %v3063_v11 = vld [vmem:[%s3168_s20 + $0x118] sm:$0xff]   ;;  %v3065_v13 = vld [vmem:[%s3168_s20 + $0x120] sm:$0xff]   ;;  %v3067_v15 = vld [vmem:[%s3168_s20 + $0x128] sm:$0xff]  }
  0x14   : > { %2985 = vmatprep.mubr.msk.bf16.mxu1 %vm631_vm1, %v3061_v9  ;;  %v3068_v16 = vld [vmem:[%s3168_s20 + $0x30] sm:$0xff]   ;;  %v3070_v18 = vld [vmem:[%s3168_s20 + $0x38] sm:$0xff]   ;;  %v3072_v20 = vld [vmem:[%s3168_s20 + $0x40] sm:$0xff]  }
  0x15   : > { %v3069_v17 = vld [vmem:[%s3168_s20 + $0x130] sm:$0xff]   ;;  %v3071_v19 = vld [vmem:[%s3168_s20 + $0x138] sm:$0xff]   ;;  %v3073_v21 = vld [vmem:[%s3168_s20 + $0x140] sm:$0xff]  }
  0x16   : > { %v3074_v22 = vld [vmem:[%s3168_s20 + $0x48] sm:$0xff]   ;;  %v3076_v24 = vld [vmem:[%s3168_s20 + $0x50] sm:$0xff]   ;;  %v3078_v26 = vld [vmem:[%s3168_s20 + $0x58] sm:$0xff]  }
  0x17   : > { %v3075_v23 = vld [vmem:[%s3168_s20 + $0x148] sm:$0xff]   ;;  %v3077_v25 = vld [vmem:[%s3168_s20 + $0x150] sm:$0xff]   ;;  %v3079_v27 = vld [vmem:[%s3168_s20 + $0x158] sm:$0xff]  }
  0x18   : > { %v3080_v28 = vld [vmem:[%s3168_s20 + $0x60] sm:$0xff]   ;;  %v3082_v30 = vld [vmem:[%s3168_s20 + $0x68] sm:$0xff]   ;;  %v3084_v32 = vld [vmem:[%s3168_s20 + $0x70] sm:$0xff]  }
  0x19   : > { %v3081_v29 = vld [vmem:[%s3168_s20 + $0x160] sm:$0xff]   ;;  %v3083_v31 = vld [vmem:[%s3168_s20 + $0x168] sm:$0xff]   ;;  %v3085_v33 = vld [vmem:[%s3168_s20 + $0x170] sm:$0xff]  }
  0x1a   : > { %2922 = vmatmul.mubr.msk.bf16.gmra.mrb[4].mxu0 %vm631_vm1, %v3062_v10  ;;  %v3086_v34 = vld [vmem:[%s3168_s20 + $0x78] sm:$0xff]   ;;  %v3088_v36 = vld [vmem:[%s3168_s20 + $0x80] sm:$0xff]   ;;  %v3090_v38 = vld [vmem:[%s3168_s20 + $0x88] sm:$0xff]  }
  0x1b   : > { %2986 = vmatmul.mubr.msk.bf16.gmra.mrb[4].mxu1 %vm631_vm1, %v3063_v11  ;;  %2925 = vmatprep.mubr.msk.bf16.mxu0 %vm631_vm1, %v3064_v12  ;;  %v3087_v35 = vld [vmem:[%s3168_s20 + $0x178] sm:$0xff]   ;;  %v3089_v37 = vld [vmem:[%s3168_s20 + $0x180] sm:$0xff]   ;;  %v3091_v39 = vld [vmem:[%s3168_s20 + $0x188] sm:$0xff]  }
  0x1c   : > { %2989 = vmatprep.mubr.msk.bf16.mxu1 %vm631_vm1, %v3065_v13  ;;  %v3092_v40 = vld [vmem:[%s3168_s20 + $0x90] sm:$0xff]   ;;  %v3094_v42 = vld [vmem:[%s3168_s20 + $0x98] sm:$0xff]   ;;  %v3096_v44 = vld [vmem:[%s3168_s20 + $0xa0] sm:$0xff]  }
  0x1d   : > { %v3093_v41 = vld [vmem:[%s3168_s20 + $0x190] sm:$0xff]   ;;  %v3095_v43 = vld [vmem:[%s3168_s20 + $0x198] sm:$0xff]   ;;  %v3097_v45 = vld [vmem:[%s3168_s20 + $0x1a0] sm:$0xff]  }
  0x1e   : > { %v3098_v46 = vld [vmem:[%s3168_s20 + $0xa8] sm:$0xff]   ;;  %v3100_v48 = vld [vmem:[%s3168_s20 + $0xb0] sm:$0xff]   ;;  %v3102_v50 = vld [vmem:[%s3168_s20 + $0xb8] sm:$0xff]  }
  0x1f   : > { %v3099_v47 = vld [vmem:[%s3168_s20 + $0x1a8] sm:$0xff]   ;;  %v3101_v49 = vld [vmem:[%s3168_s20 + $0x1b0] sm:$0xff]   ;;  %v3103_v51 = vld [vmem:[%s3168_s20 + $0x1b8] sm:$0xff]  }
  0x20   : > { %v3104_v52 = vld [vmem:[%s3168_s20 + $0xc0] sm:$0xff]   ;;  %v3106_v54 = vld [vmem:[%s3168_s20 + $0xc8] sm:$0xff]   ;;  %v3108_v56 = vld [vmem:[%s3168_s20 + $0xd0] sm:$0xff]  }
  0x21   : > { %v3105_v53 = vld [vmem:[%s3168_s20 + $0x1c0] sm:$0xff]   ;;  %v3107_v55 = vld [vmem:[%s3168_s20 + $0x1c8] sm:$0xff]   ;;  %v3109_v57 = vld [vmem:[%s3168_s20 + $0x1d0] sm:$0xff]  }
  0x22   : > { %2926 = vmatmul.mubr.msk.bf16.gmra.mrb[8].mxu0 %vm631_vm1, %v3066_v14  ;;  %v3110_v58 = vld [vmem:[%s3168_s20 + $0xd8] sm:$0xff]   ;;  %v3112_v60 = vld [vmem:[%s3168_s20 + $0xe0] sm:$0xff]   ;;  %v3114_v62 = vld [vmem:[%s3168_s20 + $0xe8] sm:$0xff]  }
  0x23   : > { %2990 = vmatmul.mubr.msk.bf16.gmra.mrb[8].mxu1 %vm631_vm1, %v3067_v15  ;;  %2929 = vmatprep.mubr.msk.bf16.mxu0 %vm631_vm1, %v3068_v16  ;;  %v3111_v59 = vld [vmem:[%s3168_s20 + $0x1d8] sm:$0xff]   ;;  %v3113_v61 = vld [vmem:[%s3168_s20 + $0x1e0] sm:$0xff]   ;;  %v3115_v63 = vld [vmem:[%s3168_s20 + $0x1e8] sm:$0xff]  }
  0x24   : > { %2993 = vmatprep.mubr.msk.bf16.mxu1 %vm631_vm1, %v3069_v17  ;;  %v3116_v0 = vld [vmem:[%s3168_s20 + $0xf0] sm:$0xff]   ;;  %v3118_v2 = vld [vmem:[%s3168_s20 + $0xf8] sm:$0xff]   ;;  %v3301_v5 = vld [vmem:[%s3507_s2] ss:$0 sm:$0xff] }
  0x25   : > { %v3117_v1 = vld [vmem:[%s3168_s20 + $0x1f0] sm:$0xff]   ;;  %v3119_v3 = vld [vmem:[%s3168_s20 + $0x1f8] sm:$0xff]  }
  0x2a   : > { %2930 = vmatmul.mubr.msk.bf16.gmra.mrb[12].mxu0 %vm631_vm1, %v3070_v18 }
  0x2b   : > { %2994 = vmatmul.mubr.msk.bf16.gmra.mrb[12].mxu1 %vm631_vm1, %v3071_v19  ;;  %2933 = vmatprep.mubr.msk.bf16.mxu0 %vm631_vm1, %v3072_v20 }
  0x2c   : > { %2997 = vmatprep.mubr.msk.bf16.mxu1 %vm631_vm1, %v3073_v21 }
  0x32   : > { %2934 = vmatmul.mubr.msk.bf16.gmra.mrb[16].mxu0 %vm631_vm1, %v3074_v22 }
  0x33   : > { %2998 = vmatmul.mubr.msk.bf16.gmra.mrb[16].mxu1 %vm631_vm1, %v3075_v23  ;;  %2937 = vmatprep.mubr.msk.bf16.mxu0 %vm631_vm1, %v3076_v24 }
  0x34   : > { %3001 = vmatprep.mubr.msk.bf16.mxu1 %vm631_vm1, %v3077_v25 }
  0x3a   : > { %2938 = vmatmul.mubr.msk.bf16.gmra.mrb[20].mxu0 %vm631_vm1, %v3078_v26 }
  0x3b   : > { %3002 = vmatmul.mubr.msk.bf16.gmra.mrb[20].mxu1 %vm631_vm1, %v3079_v27  ;;  %2941 = vmatprep.mubr.msk.bf16.mxu0 %vm631_vm1, %v3080_v28 }
  0x3c   : > { %3005 = vmatprep.mubr.msk.bf16.mxu1 %vm631_vm1, %v3081_v29 }
  0x42   : > { %2942 = vmatmul.mubr.msk.bf16.gmra.mrb[24].mxu0 %vm631_vm1, %v3082_v30 }
  0x43   : > { %3006 = vmatmul.mubr.msk.bf16.gmra.mrb[24].mxu1 %vm631_vm1, %v3083_v31  ;;  %2945 = vmatprep.mubr.msk.bf16.mxu0 %vm631_vm1, %v3084_v32 }
  0x44   : > { %3009 = vmatprep.mubr.msk.bf16.mxu1 %vm631_vm1, %v3085_v33 }
  0x4a   : > { %2946 = vmatmul.mubr.msk.bf16.gmra.mrb[28].mxu0 %vm631_vm1, %v3086_v34 }
  0x4b   : > { %3010 = vmatmul.mubr.msk.bf16.gmra.mrb[28].mxu1 %vm631_vm1, %v3087_v35  ;;  %2949 = vmatprep.mubr.msk.bf16.mxu0 %vm631_vm1, %v3088_v36 }
  0x4c   : > { %3013 = vmatprep.mubr.msk.bf16.mxu1 %vm631_vm1, %v3089_v37 }
  0x52   : > { %2950 = vmatmul.mubr.msk.bf16.gmra.mrb[32].mxu0 %vm631_vm1, %v3090_v38 }
  0x53   : > { %3014 = vmatmul.mubr.msk.bf16.gmra.mrb[32].mxu1 %vm631_vm1, %v3091_v39  ;;  %2953 = vmatprep.mubr.msk.bf16.mxu0 %vm631_vm1, %v3092_v40 }
  0x54   : > { %3017 = vmatprep.mubr.msk.bf16.mxu1 %vm631_vm1, %v3093_v41 }
  0x5a   : > { %2954 = vmatmul.mubr.msk.bf16.gmra.mrb[36].mxu0 %vm631_vm1, %v3094_v42 }
  0x5b   : > { %3018 = vmatmul.mubr.msk.bf16.gmra.mrb[36].mxu1 %vm631_vm1, %v3095_v43  ;;  %2957 = vmatprep.mubr.msk.bf16.mxu0 %vm631_vm1, %v3096_v44 }
  0x5c   : > { %3021 = vmatprep.mubr.msk.bf16.mxu1 %vm631_vm1, %v3097_v45 }
  0x62   : > { %2958 = vmatmul.mubr.msk.bf16.gmra.mrb[40].mxu0 %vm631_vm1, %v3098_v46 }
  0x63   : > { %3022 = vmatmul.mubr.msk.bf16.gmra.mrb[40].mxu1 %vm631_vm1, %v3099_v47  ;;  %2961 = vmatprep.mubr.msk.bf16.mxu0 %vm631_vm1, %v3100_v48 }
  0x64   : > { %3025 = vmatprep.mubr.msk.bf16.mxu1 %vm631_vm1, %v3101_v49 }
  0x6a   : > { %2962 = vmatmul.mubr.msk.bf16.gmra.mrb[44].mxu0 %vm631_vm1, %v3102_v50 }
  0x6b   : > { %3026 = vmatmul.mubr.msk.bf16.gmra.mrb[44].mxu1 %vm631_vm1, %v3103_v51  ;;  %2965 = vmatprep.mubr.msk.bf16.mxu0 %vm631_vm1, %v3104_v52 }
  0x6c   : > { %3029 = vmatprep.mubr.msk.bf16.mxu1 %vm631_vm1, %v3105_v53 }
  0x72   : > { %2966 = vmatmul.mubr.msk.bf16.gmra.mrb[48].mxu0 %vm631_vm1, %v3106_v54 }
  0x73   : > { %3030 = vmatmul.mubr.msk.bf16.gmra.mrb[48].mxu1 %vm631_vm1, %v3107_v55  ;;  %2969 = vmatprep.mubr.msk.bf16.mxu0 %vm631_vm1, %v3108_v56 }
  0x74   : > { %3033 = vmatprep.mubr.msk.bf16.mxu1 %vm631_vm1, %v3109_v57 }
  0x7a   : > { %2970 = vmatmul.mubr.msk.bf16.gmra.mrb[52].mxu0 %vm631_vm1, %v3110_v58 }
  0x7b   : > { %3034 = vmatmul.mubr.msk.bf16.gmra.mrb[52].mxu1 %vm631_vm1, %v3111_v59  ;;  %2973 = vmatprep.mubr.msk.bf16.mxu0 %vm631_vm1, %v3112_v60 }
  0x7c   : > { %3037 = vmatprep.mubr.msk.bf16.mxu1 %vm631_vm1, %v3113_v61 }
  0x82   : > { %2974 = vmatmul.mubr.msk.bf16.gmra.mrb[56].mxu0 %vm631_vm1, %v3114_v62 }
  0x83   : > { %3038 = vmatmul.mubr.msk.bf16.gmra.mrb[56].mxu1 %vm631_vm1, %v3115_v63  ;;  %2977 = vmatprep.mubr.msk.bf16.mxu0 %vm631_vm1, %v3116_v0 }
  0x84   : > { %3041 = vmatprep.mubr.msk.bf16.mxu1 %vm631_vm1, %v3117_v1 }
  0x8a   : > { %2978 = vmatmul.mubr.msk.bf16.gmra.mrb[60].mxu0 %vm631_vm1, %v3118_v2 }
  0x8b   : > { %3042 = vmatmul.mubr.msk.bf16.gmra.mrb[60].mxu1 %vm631_vm1, %v3119_v3 }
  0xe5   : > { %v2919_v4 = vpop.f32.mrb[0].mxu0 }
  0xe6   : > { %v2983_v6 = vpop.f32.mrb[0].mxu1  ;;  %v864_v7 = vpop.f32.mrb[1].mxu0  ;;  %v873_v10 = vadd.f32 %v2919_v4, %v3301_v5 }
  0xe7   : > { %v1120_v8 = vpop.f32.mrb[1].mxu1  ;;  %v2920_v9 = vpop.f32.mrb[2].mxu0  ;;  %v1129_v14 = vadd.f32 %v2983_v6, %v3301_v5  ;;  %v865_v15 = vadd.f32 %v3301_v5, %v864_v7 }
  0xe8   : > { %v876_v11 = vadd.f32 %v2920_v9, %v3301_v5  ;;  %v2984_v12 = vpop.f32.mrb[2].mxu1  ;;  %v867_v13 = vpop.f32.mrb[3].mxu0  ;;  %v1121_v19 = vadd.f32 %v3301_v5, %v1120_v8 }
  0xe9   : > { %v1132_v16 = vadd.f32 %v2984_v12, %v3301_v5  ;;  %v868_v17 = vadd.f32 %v3301_v5, %v867_v13  ;;  %v1123_v18 = vpop.f32.mrb[3].mxu1 }
  0xea   : > { %v2475_v20 = vpack.c.bf16 %v876_v11, %v873_v10  ;;  %v1124_v21 = vadd.f32 %v3301_v5, %v1123_v18 }
  0xeb   : > { %v2635_v22 = vpack.c.bf16 %v1132_v16, %v1129_v14  ;;  %v2470_v23 = vpack.c.bf16 %v868_v17, %v865_v15 }
  0xec   : > { %2787 = vst [vmem:[%s3312_s25 + $0x8] sm:$0xff] %v2475_v20   ;;  %v2630_v24 = vpack.c.bf16 %v1124_v21, %v1121_v19 }
  0xed   : > { %2819 = vst [vmem:[%s3312_s25 + $0x108] sm:$0xff] %v2635_v22   ;;  %2471 = vst [vmem:[%s3312_s25] sm:$0xff] %v2470_v23   ;;  %v2923_v25 = vpop.f32.mrb[4].mxu0 }
  0xee   : > { %2818 = vst [vmem:[%s3312_s25 + $0x100] sm:$0xff] %v2630_v24   ;;  %v2987_v26 = vpop.f32.mrb[4].mxu1  ;;  %v880_v27 = vpop.f32.mrb[5].mxu0  ;;  %v889_v30 = vadd.f32 %v2923_v25, %v3301_v5 }
  0xef   : > { %v1136_v28 = vpop.f32.mrb[5].mxu1  ;;  %v2924_v29 = vpop.f32.mrb[6].mxu0  ;;  %v1145_v34 = vadd.f32 %v2987_v26, %v3301_v5  ;;  %v881_v35 = vadd.f32 %v3301_v5, %v880_v27 }
  0xf0   : > { %v892_v31 = vadd.f32 %v2924_v29, %v3301_v5  ;;  %v2988_v32 = vpop.f32.mrb[6].mxu1  ;;  %v883_v33 = vpop.f32.mrb[7].mxu0  ;;  %v1137_v39 = vadd.f32 %v3301_v5, %v1136_v28 }
  0xf1   : > { %v1148_v36 = vadd.f32 %v2988_v32, %v3301_v5  ;;  %v884_v37 = vadd.f32 %v3301_v5, %v883_v33  ;;  %v1139_v38 = vpop.f32.mrb[7].mxu1 }
  0xf2   : > { %v2485_v40 = vpack.c.bf16 %v892_v31, %v889_v30  ;;  %v1140_v41 = vadd.f32 %v3301_v5, %v1139_v38 }
  0xf3   : > { %v2645_v42 = vpack.c.bf16 %v1148_v36, %v1145_v34  ;;  %v2480_v43 = vpack.c.bf16 %v884_v37, %v881_v35 }
  0xf4   : > { %2789 = vst [vmem:[%s3312_s25 + $0x18] sm:$0xff] %v2485_v40   ;;  %v2640_v44 = vpack.c.bf16 %v1140_v41, %v1137_v39 }
  0xf5   : > { %2821 = vst [vmem:[%s3312_s25 + $0x118] sm:$0xff] %v2645_v42   ;;  %2788 = vst [vmem:[%s3312_s25 + $0x10] sm:$0xff] %v2480_v43   ;;  %v2927_v45 = vpop.f32.mrb[8].mxu0 }
  0xf6   : > { %2820 = vst [vmem:[%s3312_s25 + $0x110] sm:$0xff] %v2640_v44   ;;  %v2991_v46 = vpop.f32.mrb[8].mxu1  ;;  %v896_v47 = vpop.f32.mrb[9].mxu0  ;;  %v905_v50 = vadd.f32 %v2927_v45, %v3301_v5 }
  0xf7   : > { %v1152_v48 = vpop.f32.mrb[9].mxu1  ;;  %v2928_v49 = vpop.f32.mrb[10].mxu0  ;;  %v1161_v54 = vadd.f32 %v2991_v46, %v3301_v5  ;;  %v897_v55 = vadd.f32 %v3301_v5, %v896_v47 }
  0xf8   : > { %v908_v51 = vadd.f32 %v2928_v49, %v3301_v5  ;;  %v2992_v52 = vpop.f32.mrb[10].mxu1  ;;  %v899_v53 = vpop.f32.mrb[11].mxu0  ;;  %v1153_v59 = vadd.f32 %v3301_v5, %v1152_v48 }
  0xf9   : > { %v1164_v56 = vadd.f32 %v2992_v52, %v3301_v5  ;;  %v900_v57 = vadd.f32 %v3301_v5, %v899_v53  ;;  %v1155_v58 = vpop.f32.mrb[11].mxu1 }
  0xfa   : > { %v2495_v60 = vpack.c.bf16 %v908_v51, %v905_v50  ;;  %v1156_v61 = vadd.f32 %v3301_v5, %v1155_v58 }
  0xfb   : > { %v2655_v62 = vpack.c.bf16 %v1164_v56, %v1161_v54  ;;  %v2490_v63 = vpack.c.bf16 %v900_v57, %v897_v55 }
  0xfc   : > { %2791 = vst [vmem:[%s3312_s25 + $0x28] sm:$0xff] %v2495_v60   ;;  %v2650_v0 = vpack.c.bf16 %v1156_v61, %v1153_v59 }
  0xfd   : > { %2823 = vst [vmem:[%s3312_s25 + $0x128] sm:$0xff] %v2655_v62   ;;  %2790 = vst [vmem:[%s3312_s25 + $0x20] sm:$0xff] %v2490_v63   ;;  %v2931_v1 = vpop.f32.mrb[12].mxu0 }
  0xfe   : > { %2822 = vst [vmem:[%s3312_s25 + $0x120] sm:$0xff] %v2650_v0   ;;  %v2995_v2 = vpop.f32.mrb[12].mxu1  ;;  %v912_v3 = vpop.f32.mrb[13].mxu0  ;;  %v921_v7 = vadd.f32 %v2931_v1, %v3301_v5 }
  0xff   : > { %v1168_v4 = vpop.f32.mrb[13].mxu1  ;;  %v2932_v6 = vpop.f32.mrb[14].mxu0  ;;  %v1177_v11 = vadd.f32 %v2995_v2, %v3301_v5  ;;  %v913_v12 = vadd.f32 %v3301_v5, %v912_v3 }
 0x100   : > { %v924_v8 = vadd.f32 %v2932_v6, %v3301_v5  ;;  %v2996_v9 = vpop.f32.mrb[14].mxu1  ;;  %v915_v10 = vpop.f32.mrb[15].mxu0  ;;  %v1169_v16 = vadd.f32 %v3301_v5, %v1168_v4 }
 0x101   : > { %v1180_v13 = vadd.f32 %v2996_v9, %v3301_v5  ;;  %v916_v14 = vadd.f32 %v3301_v5, %v915_v10  ;;  %v1171_v15 = vpop.f32.mrb[15].mxu1 }
 0x102   : > { %v2505_v17 = vpack.c.bf16 %v924_v8, %v921_v7  ;;  %v1172_v18 = vadd.f32 %v3301_v5, %v1171_v15 }
 0x103   : > { %v2665_v19 = vpack.c.bf16 %v1180_v13, %v1177_v11  ;;  %v2500_v20 = vpack.c.bf16 %v916_v14, %v913_v12 }
 0x104   : > { %2793 = vst [vmem:[%s3312_s25 + $0x38] sm:$0xff] %v2505_v17   ;;  %v2660_v21 = vpack.c.bf16 %v1172_v18, %v1169_v16 }
 0x105   : > { %2825 = vst [vmem:[%s3312_s25 + $0x138] sm:$0xff] %v2665_v19   ;;  %2792 = vst [vmem:[%s3312_s25 + $0x30] sm:$0xff] %v2500_v20   ;;  %v2935_v22 = vpop.f32.mrb[16].mxu0 }
 0x106   : > { %2824 = vst [vmem:[%s3312_s25 + $0x130] sm:$0xff] %v2660_v21   ;;  %v2999_v23 = vpop.f32.mrb[16].mxu1  ;;  %v928_v24 = vpop.f32.mrb[17].mxu0  ;;  %v937_v27 = vadd.f32 %v2935_v22, %v3301_v5 }
 0x107   : > { %v1184_v25 = vpop.f32.mrb[17].mxu1  ;;  %v2936_v26 = vpop.f32.mrb[18].mxu0  ;;  %v1193_v31 = vadd.f32 %v2999_v23, %v3301_v5  ;;  %v929_v32 = vadd.f32 %v3301_v5, %v928_v24 }
 0x108   : > { %v940_v28 = vadd.f32 %v2936_v26, %v3301_v5  ;;  %v3000_v29 = vpop.f32.mrb[18].mxu1  ;;  %v931_v30 = vpop.f32.mrb[19].mxu0  ;;  %v1185_v36 = vadd.f32 %v3301_v5, %v1184_v25 }
 0x109   : > { %v1196_v33 = vadd.f32 %v3000_v29, %v3301_v5  ;;  %v932_v34 = vadd.f32 %v3301_v5, %v931_v30  ;;  %v1187_v35 = vpop.f32.mrb[19].mxu1 }
 0x10a   : > { %v2515_v37 = vpack.c.bf16 %v940_v28, %v937_v27  ;;  %v1188_v38 = vadd.f32 %v3301_v5, %v1187_v35 }
 0x10b   : > { %v2675_v39 = vpack.c.bf16 %v1196_v33, %v1193_v31  ;;  %v2510_v40 = vpack.c.bf16 %v932_v34, %v929_v32 }
 0x10c   : > { %2795 = vst [vmem:[%s3312_s25 + $0x48] sm:$0xff] %v2515_v37   ;;  %v2670_v41 = vpack.c.bf16 %v1188_v38, %v1185_v36 }
 0x10d   : > { %2827 = vst [vmem:[%s3312_s25 + $0x148] sm:$0xff] %v2675_v39   ;;  %2794 = vst [vmem:[%s3312_s25 + $0x40] sm:$0xff] %v2510_v40   ;;  %v2939_v42 = vpop.f32.mrb[20].mxu0 }
 0x10e   : > { %2826 = vst [vmem:[%s3312_s25 + $0x140] sm:$0xff] %v2670_v41   ;;  %v3003_v43 = vpop.f32.mrb[20].mxu1  ;;  %v944_v44 = vpop.f32.mrb[21].mxu0  ;;  %v953_v47 = vadd.f32 %v2939_v42, %v3301_v5 }
 0x10f   : > { %v1200_v45 = vpop.f32.mrb[21].mxu1  ;;  %v2940_v46 = vpop.f32.mrb[22].mxu0  ;;  %v1209_v51 = vadd.f32 %v3003_v43, %v3301_v5  ;;  %v945_v52 = vadd.f32 %v3301_v5, %v944_v44 }
 0x110   : > { %v956_v48 = vadd.f32 %v2940_v46, %v3301_v5  ;;  %v3004_v49 = vpop.f32.mrb[22].mxu1  ;;  %v947_v50 = vpop.f32.mrb[23].mxu0  ;;  %v1201_v56 = vadd.f32 %v3301_v5, %v1200_v45 }
 0x111   : > { %v1212_v53 = vadd.f32 %v3004_v49, %v3301_v5  ;;  %v948_v54 = vadd.f32 %v3301_v5, %v947_v50  ;;  %v1203_v55 = vpop.f32.mrb[23].mxu1 }
 0x112   : > { %v2525_v57 = vpack.c.bf16 %v956_v48, %v953_v47  ;;  %v1204_v58 = vadd.f32 %v3301_v5, %v1203_v55 }
 0x113   : > { %v2685_v59 = vpack.c.bf16 %v1212_v53, %v1209_v51  ;;  %v2520_v60 = vpack.c.bf16 %v948_v54, %v945_v52 }
 0x114   : > { %2797 = vst [vmem:[%s3312_s25 + $0x58] sm:$0xff] %v2525_v57   ;;  %v2680_v61 = vpack.c.bf16 %v1204_v58, %v1201_v56 }
 0x115   : > { %2829 = vst [vmem:[%s3312_s25 + $0x158] sm:$0xff] %v2685_v59   ;;  %2796 = vst [vmem:[%s3312_s25 + $0x50] sm:$0xff] %v2520_v60   ;;  %v2943_v62 = vpop.f32.mrb[24].mxu0 }
 0x116   : > { %2828 = vst [vmem:[%s3312_s25 + $0x150] sm:$0xff] %v2680_v61   ;;  %v3007_v63 = vpop.f32.mrb[24].mxu1  ;;  %v960_v0 = vpop.f32.mrb[25].mxu0  ;;  %v969_v3 = vadd.f32 %v2943_v62, %v3301_v5 }
 0x117   : > { %v1216_v1 = vpop.f32.mrb[25].mxu1  ;;  %v2944_v2 = vpop.f32.mrb[26].mxu0  ;;  %v1225_v8 = vadd.f32 %v3007_v63, %v3301_v5  ;;  %v961_v9 = vadd.f32 %v3301_v5, %v960_v0 }
 0x118   : > { %v972_v4 = vadd.f32 %v2944_v2, %v3301_v5  ;;  %v3008_v6 = vpop.f32.mrb[26].mxu1  ;;  %v963_v7 = vpop.f32.mrb[27].mxu0  ;;  %v1217_v13 = vadd.f32 %v3301_v5, %v1216_v1 }
 0x119   : > { %v1228_v10 = vadd.f32 %v3008_v6, %v3301_v5  ;;  %v964_v11 = vadd.f32 %v3301_v5, %v963_v7  ;;  %v1219_v12 = vpop.f32.mrb[27].mxu1 }
 0x11a   : > { %v2535_v14 = vpack.c.bf16 %v972_v4, %v969_v3  ;;  %v1220_v15 = vadd.f32 %v3301_v5, %v1219_v12 }
 0x11b   : > { %v2695_v16 = vpack.c.bf16 %v1228_v10, %v1225_v8  ;;  %v2530_v17 = vpack.c.bf16 %v964_v11, %v961_v9 }
 0x11c   : > { %2799 = vst [vmem:[%s3312_s25 + $0x68] sm:$0xff] %v2535_v14   ;;  %v2690_v18 = vpack.c.bf16 %v1220_v15, %v1217_v13 }
 0x11d   : > { %2831 = vst [vmem:[%s3312_s25 + $0x168] sm:$0xff] %v2695_v16   ;;  %2798 = vst [vmem:[%s3312_s25 + $0x60] sm:$0xff] %v2530_v17   ;;  %v2947_v19 = vpop.f32.mrb[28].mxu0 }
 0x11e   : > { %2830 = vst [vmem:[%s3312_s25 + $0x160] sm:$0xff] %v2690_v18   ;;  %v3011_v20 = vpop.f32.mrb[28].mxu1  ;;  %v976_v21 = vpop.f32.mrb[29].mxu0  ;;  %v985_v24 = vadd.f32 %v2947_v19, %v3301_v5 }
 0x11f   : > { %v1232_v22 = vpop.f32.mrb[29].mxu1  ;;  %v2948_v23 = vpop.f32.mrb[30].mxu0  ;;  %v1241_v28 = vadd.f32 %v3011_v20, %v3301_v5  ;;  %v977_v29 = vadd.f32 %v3301_v5, %v976_v21 }
 0x120   : > { %v988_v25 = vadd.f32 %v2948_v23, %v3301_v5  ;;  %v3012_v26 = vpop.f32.mrb[30].mxu1  ;;  %v979_v27 = vpop.f32.mrb[31].mxu0  ;;  %v1233_v33 = vadd.f32 %v3301_v5, %v1232_v22 }
 0x121   : > { %v1244_v30 = vadd.f32 %v3012_v26, %v3301_v5  ;;  %v980_v31 = vadd.f32 %v3301_v5, %v979_v27  ;;  %v1235_v32 = vpop.f32.mrb[31].mxu1 }
 0x122   : > { %v2545_v34 = vpack.c.bf16 %v988_v25, %v985_v24  ;;  %v1236_v35 = vadd.f32 %v3301_v5, %v1235_v32 }
 0x123   : > { %v2705_v36 = vpack.c.bf16 %v1244_v30, %v1241_v28  ;;  %v2540_v37 = vpack.c.bf16 %v980_v31, %v977_v29 }
 0x124   : > { %2801 = vst [vmem:[%s3312_s25 + $0x78] sm:$0xff] %v2545_v34   ;;  %v2700_v38 = vpack.c.bf16 %v1236_v35, %v1233_v33 }
 0x125   : > { %2833 = vst [vmem:[%s3312_s25 + $0x178] sm:$0xff] %v2705_v36   ;;  %2800 = vst [vmem:[%s3312_s25 + $0x70] sm:$0xff] %v2540_v37   ;;  %v2951_v39 = vpop.f32.mrb[32].mxu0 }
 0x126   : > { %2832 = vst [vmem:[%s3312_s25 + $0x170] sm:$0xff] %v2700_v38   ;;  %v3015_v40 = vpop.f32.mrb[32].mxu1  ;;  %v992_v41 = vpop.f32.mrb[33].mxu0  ;;  %v1001_v44 = vadd.f32 %v2951_v39, %v3301_v5 }
 0x127   : > { %v1248_v42 = vpop.f32.mrb[33].mxu1  ;;  %v2952_v43 = vpop.f32.mrb[34].mxu0  ;;  %v1257_v48 = vadd.f32 %v3015_v40, %v3301_v5  ;;  %v993_v49 = vadd.f32 %v3301_v5, %v992_v41 }
 0x128   : > { %v1004_v45 = vadd.f32 %v2952_v43, %v3301_v5  ;;  %v3016_v46 = vpop.f32.mrb[34].mxu1  ;;  %v995_v47 = vpop.f32.mrb[35].mxu0  ;;  %v1249_v53 = vadd.f32 %v3301_v5, %v1248_v42 }
 0x129   : > { %v1260_v50 = vadd.f32 %v3016_v46, %v3301_v5  ;;  %v996_v51 = vadd.f32 %v3301_v5, %v995_v47  ;;  %v1251_v52 = vpop.f32.mrb[35].mxu1 }
 0x12a   : > { %v2555_v54 = vpack.c.bf16 %v1004_v45, %v1001_v44  ;;  %v1252_v55 = vadd.f32 %v3301_v5, %v1251_v52 }
 0x12b   : > { %v2715_v56 = vpack.c.bf16 %v1260_v50, %v1257_v48  ;;  %v2550_v57 = vpack.c.bf16 %v996_v51, %v993_v49 }
 0x12c   : > { %2803 = vst [vmem:[%s3312_s25 + $0x88] sm:$0xff] %v2555_v54   ;;  %v2710_v58 = vpack.c.bf16 %v1252_v55, %v1249_v53 }
 0x12d   : > { %2835 = vst [vmem:[%s3312_s25 + $0x188] sm:$0xff] %v2715_v56   ;;  %2802 = vst [vmem:[%s3312_s25 + $0x80] sm:$0xff] %v2550_v57   ;;  %v2955_v59 = vpop.f32.mrb[36].mxu0 }
 0x12e   : > { %2834 = vst [vmem:[%s3312_s25 + $0x180] sm:$0xff] %v2710_v58   ;;  %v3019_v60 = vpop.f32.mrb[36].mxu1  ;;  %v1008_v61 = vpop.f32.mrb[37].mxu0  ;;  %v1017_v0 = vadd.f32 %v2955_v59, %v3301_v5 }
 0x12f   : > { %v1264_v62 = vpop.f32.mrb[37].mxu1  ;;  %v2956_v63 = vpop.f32.mrb[38].mxu0  ;;  %v1273_v4 = vadd.f32 %v3019_v60, %v3301_v5  ;;  %v1009_v6 = vadd.f32 %v3301_v5, %v1008_v61 }
 0x130   : > { %v1020_v1 = vadd.f32 %v2956_v63, %v3301_v5  ;;  %v3020_v2 = vpop.f32.mrb[38].mxu1  ;;  %v1011_v3 = vpop.f32.mrb[39].mxu0  ;;  %v1265_v10 = vadd.f32 %v3301_v5, %v1264_v62 }
 0x131   : > { %v1276_v7 = vadd.f32 %v3020_v2, %v3301_v5  ;;  %v1012_v8 = vadd.f32 %v3301_v5, %v1011_v3  ;;  %v1267_v9 = vpop.f32.mrb[39].mxu1 }
 0x132   : > { %v2565_v11 = vpack.c.bf16 %v1020_v1, %v1017_v0  ;;  %v1268_v12 = vadd.f32 %v3301_v5, %v1267_v9 }
 0x133   : > { %v2725_v13 = vpack.c.bf16 %v1276_v7, %v1273_v4  ;;  %v2560_v14 = vpack.c.bf16 %v1012_v8, %v1009_v6 }
 0x134   : > { %2805 = vst [vmem:[%s3312_s25 + $0x98] sm:$0xff] %v2565_v11   ;;  %v2720_v15 = vpack.c.bf16 %v1268_v12, %v1265_v10 }
 0x135   : > { %2837 = vst [vmem:[%s3312_s25 + $0x198] sm:$0xff] %v2725_v13   ;;  %2804 = vst [vmem:[%s3312_s25 + $0x90] sm:$0xff] %v2560_v14   ;;  %v2959_v16 = vpop.f32.mrb[40].mxu0 }
 0x136   : > { %2836 = vst [vmem:[%s3312_s25 + $0x190] sm:$0xff] %v2720_v15   ;;  %v3023_v17 = vpop.f32.mrb[40].mxu1  ;;  %v1024_v18 = vpop.f32.mrb[41].mxu0  ;;  %v1033_v21 = vadd.f32 %v2959_v16, %v3301_v5 }
 0x137   : > { %v1280_v19 = vpop.f32.mrb[41].mxu1  ;;  %v2960_v20 = vpop.f32.mrb[42].mxu0  ;;  %v1289_v25 = vadd.f32 %v3023_v17, %v3301_v5  ;;  %v1025_v26 = vadd.f32 %v3301_v5, %v1024_v18 }
 0x138   : > { %v1036_v22 = vadd.f32 %v2960_v20, %v3301_v5  ;;  %v3024_v23 = vpop.f32.mrb[42].mxu1  ;;  %v1027_v24 = vpop.f32.mrb[43].mxu0  ;;  %v1281_v30 = vadd.f32 %v3301_v5, %v1280_v19 }
 0x139   : > { %v1292_v27 = vadd.f32 %v3024_v23, %v3301_v5  ;;  %v1028_v28 = vadd.f32 %v3301_v5, %v1027_v24  ;;  %v1283_v29 = vpop.f32.mrb[43].mxu1 }
 0x13a   : > { %v2575_v31 = vpack.c.bf16 %v1036_v22, %v1033_v21  ;;  %v1284_v32 = vadd.f32 %v3301_v5, %v1283_v29 }
 0x13b   : > { %v2735_v33 = vpack.c.bf16 %v1292_v27, %v1289_v25  ;;  %v2570_v34 = vpack.c.bf16 %v1028_v28, %v1025_v26 }
 0x13c   : > { %2807 = vst [vmem:[%s3312_s25 + $0xa8] sm:$0xff] %v2575_v31   ;;  %v2730_v35 = vpack.c.bf16 %v1284_v32, %v1281_v30 }
 0x13d   : > { %2839 = vst [vmem:[%s3312_s25 + $0x1a8] sm:$0xff] %v2735_v33   ;;  %2806 = vst [vmem:[%s3312_s25 + $0xa0] sm:$0xff] %v2570_v34   ;;  %v2963_v36 = vpop.f32.mrb[44].mxu0 }
 0x13e   : > { %2838 = vst [vmem:[%s3312_s25 + $0x1a0] sm:$0xff] %v2730_v35   ;;  %v3027_v37 = vpop.f32.mrb[44].mxu1  ;;  %v1040_v38 = vpop.f32.mrb[45].mxu0  ;;  %v1049_v41 = vadd.f32 %v2963_v36, %v3301_v5 }
 0x13f   : > { %v1296_v39 = vpop.f32.mrb[45].mxu1  ;;  %v2964_v40 = vpop.f32.mrb[46].mxu0  ;;  %v1305_v45 = vadd.f32 %v3027_v37, %v3301_v5  ;;  %v1041_v46 = vadd.f32 %v3301_v5, %v1040_v38 }
 0x140   : > { %v1052_v42 = vadd.f32 %v2964_v40, %v3301_v5  ;;  %v3028_v43 = vpop.f32.mrb[46].mxu1  ;;  %v1043_v44 = vpop.f32.mrb[47].mxu0  ;;  %v1297_v50 = vadd.f32 %v3301_v5, %v1296_v39 }
 0x141   : > { %v1308_v47 = vadd.f32 %v3028_v43, %v3301_v5  ;;  %v1044_v48 = vadd.f32 %v3301_v5, %v1043_v44  ;;  %v1299_v49 = vpop.f32.mrb[47].mxu1 }
 0x142   : > { %v2585_v51 = vpack.c.bf16 %v1052_v42, %v1049_v41  ;;  %v1300_v52 = vadd.f32 %v3301_v5, %v1299_v49 }
 0x143   : > { %v2745_v53 = vpack.c.bf16 %v1308_v47, %v1305_v45  ;;  %v2580_v54 = vpack.c.bf16 %v1044_v48, %v1041_v46 }
 0x144   : > { %2809 = vst [vmem:[%s3312_s25 + $0xb8] sm:$0xff] %v2585_v51   ;;  %v2740_v55 = vpack.c.bf16 %v1300_v52, %v1297_v50 }
 0x145   : > { %2841 = vst [vmem:[%s3312_s25 + $0x1b8] sm:$0xff] %v2745_v53   ;;  %2808 = vst [vmem:[%s3312_s25 + $0xb0] sm:$0xff] %v2580_v54   ;;  %v2967_v56 = vpop.f32.mrb[48].mxu0 }
 0x146   : > { %2840 = vst [vmem:[%s3312_s25 + $0x1b0] sm:$0xff] %v2740_v55   ;;  %v3031_v57 = vpop.f32.mrb[48].mxu1  ;;  %v1056_v58 = vpop.f32.mrb[49].mxu0  ;;  %v1065_v61 = vadd.f32 %v2967_v56, %v3301_v5 }
 0x147   : > { %v1312_v59 = vpop.f32.mrb[49].mxu1  ;;  %v2968_v60 = vpop.f32.mrb[50].mxu0  ;;  %v1321_v1 = vadd.f32 %v3031_v57, %v3301_v5  ;;  %v1057_v2 = vadd.f32 %v3301_v5, %v1056_v58 }
 0x148   : > { %v1068_v62 = vadd.f32 %v2968_v60, %v3301_v5  ;;  %v3032_v63 = vpop.f32.mrb[50].mxu1  ;;  %v1059_v0 = vpop.f32.mrb[51].mxu0  ;;  %v1313_v7 = vadd.f32 %v3301_v5, %v1312_v59 }
 0x149   : > { %v1324_v3 = vadd.f32 %v3032_v63, %v3301_v5  ;;  %v1060_v4 = vadd.f32 %v3301_v5, %v1059_v0  ;;  %v1315_v6 = vpop.f32.mrb[51].mxu1 }
 0x14a   : > { %v2595_v8 = vpack.c.bf16 %v1068_v62, %v1065_v61  ;;  %v1316_v9 = vadd.f32 %v3301_v5, %v1315_v6 }
 0x14b   : > { %v2755_v10 = vpack.c.bf16 %v1324_v3, %v1321_v1  ;;  %v2590_v11 = vpack.c.bf16 %v1060_v4, %v1057_v2 }
 0x14c   : > { %2811 = vst [vmem:[%s3312_s25 + $0xc8] sm:$0xff] %v2595_v8   ;;  %v2750_v12 = vpack.c.bf16 %v1316_v9, %v1313_v7 }
 0x14d   : > { %2843 = vst [vmem:[%s3312_s25 + $0x1c8] sm:$0xff] %v2755_v10   ;;  %2810 = vst [vmem:[%s3312_s25 + $0xc0] sm:$0xff] %v2590_v11   ;;  %v2971_v13 = vpop.f32.mrb[52].mxu0 }
 0x14e   : > { %2842 = vst [vmem:[%s3312_s25 + $0x1c0] sm:$0xff] %v2750_v12   ;;  %v3035_v14 = vpop.f32.mrb[52].mxu1  ;;  %v1072_v15 = vpop.f32.mrb[53].mxu0  ;;  %v1081_v18 = vadd.f32 %v2971_v13, %v3301_v5 }
 0x14f   : > { %v1328_v16 = vpop.f32.mrb[53].mxu1  ;;  %v2972_v17 = vpop.f32.mrb[54].mxu0  ;;  %v1337_v22 = vadd.f32 %v3035_v14, %v3301_v5  ;;  %v1073_v23 = vadd.f32 %v3301_v5, %v1072_v15 }
 0x150   : > { %v1084_v19 = vadd.f32 %v2972_v17, %v3301_v5  ;;  %v3036_v20 = vpop.f32.mrb[54].mxu1  ;;  %v1075_v21 = vpop.f32.mrb[55].mxu0  ;;  %v1329_v27 = vadd.f32 %v3301_v5, %v1328_v16 }
 0x151   : > { %v1340_v24 = vadd.f32 %v3036_v20, %v3301_v5  ;;  %v1076_v25 = vadd.f32 %v3301_v5, %v1075_v21  ;;  %v1331_v26 = vpop.f32.mrb[55].mxu1 }
 0x152   : > { %v2605_v28 = vpack.c.bf16 %v1084_v19, %v1081_v18  ;;  %v1332_v29 = vadd.f32 %v3301_v5, %v1331_v26 }
 0x153   : > { %v2765_v30 = vpack.c.bf16 %v1340_v24, %v1337_v22  ;;  %v2600_v31 = vpack.c.bf16 %v1076_v25, %v1073_v23 }
 0x154   : > { %2813 = vst [vmem:[%s3312_s25 + $0xd8] sm:$0xff] %v2605_v28   ;;  %v2760_v32 = vpack.c.bf16 %v1332_v29, %v1329_v27 }
 0x155   : > { %2845 = vst [vmem:[%s3312_s25 + $0x1d8] sm:$0xff] %v2765_v30   ;;  %2812 = vst [vmem:[%s3312_s25 + $0xd0] sm:$0xff] %v2600_v31   ;;  %v2975_v33 = vpop.f32.mrb[56].mxu0 }
 0x156   : > { %2844 = vst [vmem:[%s3312_s25 + $0x1d0] sm:$0xff] %v2760_v32   ;;  %v3039_v34 = vpop.f32.mrb[56].mxu1  ;;  %v1088_v35 = vpop.f32.mrb[57].mxu0  ;;  %v1097_v38 = vadd.f32 %v2975_v33, %v3301_v5 }
 0x157   : > { %v1344_v36 = vpop.f32.mrb[57].mxu1  ;;  %v2976_v37 = vpop.f32.mrb[58].mxu0  ;;  %v1353_v42 = vadd.f32 %v3039_v34, %v3301_v5  ;;  %v1089_v43 = vadd.f32 %v3301_v5, %v1088_v35 }
 0x158   : > { %v1100_v39 = vadd.f32 %v2976_v37, %v3301_v5  ;;  %v3040_v40 = vpop.f32.mrb[58].mxu1  ;;  %v1091_v41 = vpop.f32.mrb[59].mxu0  ;;  %v1345_v47 = vadd.f32 %v3301_v5, %v1344_v36 }
 0x159   : > { %v1356_v44 = vadd.f32 %v3040_v40, %v3301_v5  ;;  %v1092_v45 = vadd.f32 %v3301_v5, %v1091_v41  ;;  %v1347_v46 = vpop.f32.mrb[59].mxu1 }
 0x15a   : > { %v2615_v48 = vpack.c.bf16 %v1100_v39, %v1097_v38  ;;  %v1348_v49 = vadd.f32 %v3301_v5, %v1347_v46 }
 0x15b   : > { %v2775_v50 = vpack.c.bf16 %v1356_v44, %v1353_v42  ;;  %v2610_v51 = vpack.c.bf16 %v1092_v45, %v1089_v43 }
 0x15c   : > { %2815 = vst [vmem:[%s3312_s25 + $0xe8] sm:$0xff] %v2615_v48   ;;  %v2770_v52 = vpack.c.bf16 %v1348_v49, %v1345_v47 }
 0x15d   : > { %2847 = vst [vmem:[%s3312_s25 + $0x1e8] sm:$0xff] %v2775_v50   ;;  %2814 = vst [vmem:[%s3312_s25 + $0xe0] sm:$0xff] %v2610_v51   ;;  %v2979_v53 = vpop.f32.mrb[60].mxu0 }
 0x15e   : > { %2846 = vst [vmem:[%s3312_s25 + $0x1e0] sm:$0xff] %v2770_v52   ;;  %v3043_v54 = vpop.f32.mrb[60].mxu1  ;;  %v1104_v55 = vpop.f32.mrb[61].mxu0  ;;  %v1113_v58 = vadd.f32 %v2979_v53, %v3301_v5 }
 0x15f   : > { %v1360_v56 = vpop.f32.mrb[61].mxu1  ;;  %v2980_v57 = vpop.f32.mrb[62].mxu0  ;;  %v1369_v62 = vadd.f32 %v3043_v54, %v3301_v5  ;;  %v1105_v63 = vadd.f32 %v3301_v5, %v1104_v55 }
 0x160   : > { %v1116_v59 = vadd.f32 %v2980_v57, %v3301_v5  ;;  %v3044_v60 = vpop.f32.mrb[62].mxu1  ;;  %v1107_v61 = vpop.f32.mrb[63].mxu0  ;;  %v1361_v3 = vadd.f32 %v3301_v5, %v1360_v56 }
 0x161   : > { %v1372_v0 = vadd.f32 %v3044_v60, %v3301_v5  ;;  %v1108_v1 = vadd.f32 %v3301_v5, %v1107_v61  ;;  %v1363_v2 = vpop.f32.mrb[63].mxu1 }
 0x162   : > { %v2625_v4 = vpack.c.bf16 %v1116_v59, %v1113_v58  ;;  %v1364_v6 = vadd.f32 %v3301_v5, %v1363_v2 }
 0x163   : > { %v2785_v7 = vpack.c.bf16 %v1372_v0, %v1369_v62  ;;  %v2620_v8 = vpack.c.bf16 %v1108_v1, %v1105_v63 }
 0x164   : > { %2817 = vst [vmem:[%s3312_s25 + $0xf8] sm:$0xff] %v2625_v4   ;;  %v2780_v9 = vpack.c.bf16 %v1364_v6, %v1361_v3 }
 0x165   : > { %2849 = vst [vmem:[%s3312_s25 + $0x1f8] sm:$0xff] %v2785_v7   ;;  %2816 = vst [vmem:[%s3312_s25 + $0xf0] sm:$0xff] %v2620_v8  }
 0x166   : > { %2848 = vst [vmem:[%s3312_s25 + $0x1f0] sm:$0xff] %v2780_v9  }
 0x167 PF: > { %s13_s12 = sadd.s32 1, %s3126_s12  }
 0x168   : > { %p10_p4 = scmp.ge.s32.totalorder %s13_s12, 10  }
 0x16a   :  { %12 = sbr.rel (!%p10_p4) target bundleno = 1 (0x1), region = 62 }

// kernel: grdn_forward.58
= control target key start
LH: loop header
LB: loop body
LE: loop exit
PB: predicated region body
PF: predicated region fallthrough
CT: control target
= control target key end

     0   :  { %8 = vsyncpa [#allocation3], 0  ;;  %s4096_s0 = inlined_call_operand.hbm [shape: bf16[8192,54], index: 0, kind: input, shape index: {}]   ;;  %s4097_s1 = inlined_call_operand.hbm [shape: bf16[54,128], index: 1, kind: input, shape index: {}]   ;;  %s4098_s2 = inlined_call_operand.hbm [shape: f32[1,128], index: 2, kind: input, shape index: {}]   ;;  %s4099_s3 = inlined_call_operand.vmem [shape: bf16[8192,128], index: 3, kind: output, shape index: {}]  }
   0x1   :  { %10 = vsyncpa [#allocation3 + $0x1], 0 }
   0x2   :  { %11 = vsyncpa [#allocation5], 0  ;;  %s3585_s12 = smov 0   ;;  %s3587_s13 = smov 0  }
   0x3   :  { %s3589_s14 = smov 0   ;;  %s3591_s15 = smov 0  }
   0x4 LB: > { %s2300_s16 = sadd.s32 4294967295, %s3558_s15   ;;  %p37_p0 = scmp.ne.s32.totalorder %s3550_s13, %s3546_s12  ;;  %s3558_s15 = sphi %s3591_s15, %s4115_s15   ;;  %s3554_s14 = sphi %s3589_s14, %s4114_s14   ;;  %s3550_s13 = sphi %s3587_s13, %s4113_s13   ;;  %s3546_s12 = sphi %s3585_s12, %s4112_s12  }
   0x5   : > { %p3607_p1 = scmp.eq.s32.totalorder %s2300_s16, 0  ;;  %p2302_p2 = scmp.ge.s32.totalorder %s3558_s15, 1 }
   0x6   : > { %p116_p3 = scmp.lt.s32.totalorder %s3558_s15, 9  ;;  %s3560_s20 = smov [#allocation4]  }
   0x7   : > { %s4104_s17 = scalar_select %p3607_p1, 1, 0 }
   0x8   : > { %p3615_p4 = por %p3607_p1, %p37_p0  ;;  %p3619_p5 = pnand %p2302_p2, %p116_p3 }
   0x9   : > { %s128_s21 = sshll.u32 %s3560_s20, 4  ;;  %s3561_s23 = smov [#allocation6]   ;;  %s129_s21 = int_to_ptr.vmem [resolvable:$true] %s128_s21 }
   0xa   : > { %s4105_s18 = scalar_select %p3615_p4, 1, 0 }
   0xb   : > { %s4106_s19 = scalar_select %p3619_p5, 1, 0 }
   0xc   : > { %p3314_p6 = pneg %p3619_p5  ;;  %s142_s24 = sshll.u32 %s3561_s23, 4  ;;  %s3631_s24 = int_to_ptr.vmem [resolvable:$true] %s142_s24 }
   0xd   : > { %s3434_s27 = scalar_lea.hbm %s4097_s1, 448 }
   0xe   : > { %p3627_p7 = pnand %p3314_p6, %p3607_p1  ;;  %p3435_p8 = scmp.ne.s32.totalorder %s4097_s1, %s3434_s27 }
   0xf   : > { %p3441_p12 = scmp.lt.u32.totalorder %s3434_s27, %s4097_s1 }
  0x10   : > { %p3436_p9 = pneg %p3627_p7 }
  0x12   : > { %p3437_p10 = pnand %p3436_p9, %p3435_p8 }
  0x14   : > { %p3438_p11 = pneg %p3437_p10 }
  0x16   : > { %p3443_p13 = pnand %p3441_p12, %p3438_p11 }
  0x18   : > { %3446 = shalt.err (!%p3443_p13)
}
  0x19   : > { %s3447_s5 = scalar_lea.vmem %s129_s21, 448  ;;  %p3455_p6 = scmp.lt.s32.totalorder %s129_s21, %s129_s21 }
  0x1a   : > { %p3448_p0 = scmp.ne.s32.totalorder %s129_s21, %s3447_s5  ;;  %p3456_p1 = scmp.lt.s32.totalorder %s3447_s5, %s3447_s5 }
  0x1c   : > { %p3450_p2 = pnand %p3448_p0, %p3436_p9  ;;  %p3457_p4 = por %p3456_p1, %p3455_p6 }
  0x1e   : > { %p3451_p3 = pneg %p3450_p2 }
  0x20   : > { %p3458_p5 = pnand %p3457_p4, %p3451_p3 }
  0x22   : > { %3461 = shalt.err (!%p3458_p5)
}
  0x23   : > { %s3562_s6 = smov 64   ;;  %s3563_s7 = smov 4  }
  0x24   : > { %3317 = dma.hbm_to_vmem [thread:$0]  (!%p3627_p7), %s4097_s1, 448, %s129_s21, [#allocation5], %s3562_s6, %s3562_s6, %s3563_s7  }
  0x25   : > { %s3462_s12 = scalar_lea.hbm %s4098_s2, 16 }
  0x26   : > { %p3463_p1 = scmp.ne.s32.totalorder %s4098_s2, %s3462_s12  ;;  %p3469_p8 = scmp.lt.u32.totalorder %s3462_s12, %s4098_s2 }
  0x28   : > { %p3465_p4 = pnand %p3463_p1, %p3436_p9 }
  0x2a   : > { %p3466_p5 = pneg %p3465_p4 }
  0x2c   : > { %p3471_p10 = pnand %p3469_p8, %p3466_p5 }
  0x2e   : > { %3474 = shalt.err (!%p3471_p10)
}
  0x2f   : > { %s3475_s21 = scalar_lea.vmem %s3631_s24, 16  ;;  %s3482_s27 = scalar_lea.vmem %s3631_s24, 32 }
  0x30   : > { %p3476_p11 = scmp.ne.s32.totalorder %s3631_s24, %s3475_s21  ;;  %p3483_p0 = scmp.lt.s32.totalorder %s3631_s24, %s3631_s24 }
  0x31   : > { %p3484_p2 = scmp.lt.s32.totalorder %s3482_s27, %s3475_s21 }
  0x32   : > { %p3478_p12 = pnand %p3476_p11, %p3436_p9 }
  0x33   : > { %p3485_p3 = por %p3484_p2, %p3483_p0 }
  0x34   : > { %p3479_p13 = pneg %p3478_p12 }
  0x36   : > { %p3486_p6 = pnand %p3485_p3, %p3479_p13 }
  0x38   : > { %3489 = shalt.err (!%p3486_p6)
}
  0x39   : > { %3320 = dma.hbm_to_vmem [thread:$0]  (!%p3627_p7), %s4098_s2, 16, %s3631_s24, [#allocation5]  }
  0x3a   : > { %s3685_s30 = sadd.s32 1, %s3558_s15   ;;  %s24_s4 = sadd.s32 1, %s3554_s14 }
  0x3b   : > { %s21_s22 = ssub.s32 %s3558_s15, %s3685_s30  ;;  %p31_p9 = scmp.ne.s32.totalorder %s3554_s14, %s3550_s13 }
  0x3c   : > { %p22_p1 = scmp.eq.s32.totalorder %s21_s22, 0  ;;  %p32_p4 = scmp.eq.s32.totalorder %s3558_s15, 0 }
  0x3d   : > { %p3327_p5 = scmp.lt.s32.totalorder %s3558_s15, 8  ;;  %s153_s5 = sand.u32 1, %s3554_s14  }
  0x3e   : > { %s3696_s8 = scalar_select %p22_p1, %s3554_s14, %s24_s4  }
  0x3f   : > { %p33_p8 = por %p32_p4, %p31_p9  ;;  %s2306_s9 = sshll.u32 %s153_s5, 9 }
  0x40   : > { %s2578_s10 = sshll.u32 %s3558_s15, 13  ;;  %s157_s24 = scalar_lea.vmem [#allocation2], %s2306_s9 }
  0x41   : > { %s3702_s20 = scalar_lea.hbm %s4096_s0, %s2578_s10  ;;  %s164_s23 = sshll.u32 %s157_s24, 4  ;;  %s3708_s23 = int_to_ptr.vmem [resolvable:$true] %s164_s23 }
  0x42   : > { %p3704_p7 = pnand %p3327_p5, %p33_p8  ;;  %s3710_s26 = scalar_lea.sflag [#allocation3], %s153_s5 }
  0x43   : > { %s3490_s21 = scalar_lea.hbm %s3702_s20, 8192  ;;  %s3495_s29 = scalar_lea.hbm %s4096_s0, 65536 }
  0x44   : > { %p3491_p10 = scmp.ne.s32.totalorder %s3702_s20, %s3490_s21  ;;  %p3492_p11 = pneg %p3704_p7 }
  0x45   : > { %p3496_p0 = scmp.lt.u32.totalorder %s3702_s20, %s4096_s0  ;;  %p3497_p2 = scmp.lt.u32.totalorder %s3495_s29, %s3490_s21 }
  0x46   : > { %p3493_p12 = pnand %p3492_p11, %p3491_p10  ;;  %p3499_p6 = scmp.lt.u32.totalorder %s3490_s21, %s3702_s20 }
  0x47   : > { %p3498_p3 = por %p3497_p2, %p3496_p0 }
  0x48   : > { %p3494_p13 = pneg %p3493_p12 }
  0x49   : > { %p3500_p9 = por %p3499_p6, %p3498_p3 }
  0x4b   : > { %p3501_p1 = pnand %p3500_p9, %p3494_p13 }
  0x4d   : > { %3504 = shalt.err (!%p3501_p1)
}
  0x4e   : > { %s3505_s5 = scalar_lea.vmem %s3708_s23, 8192  ;;  %s3564_s9 = smov [#allocation2]  }
  0x4f   : > { %p3506_p4 = scmp.ne.s32.totalorder %s3708_s23, %s3505_s5  ;;  %s3510_s10 = sshll.u32 %s3564_s9, 4  ;;  %s3511_s10 = int_to_ptr.vmem [resolvable:$false] %s3510_s10 }
  0x50   : > { %s3512_s11 = scalar_lea.vmem %s3511_s10, 16384  ;;  %p3513_p10 = scmp.lt.s32.totalorder %s3708_s23, %s3511_s10 }
  0x51   : > { %p3508_p5 = pnand %p3506_p4, %p3492_p11  ;;  %p3514_p12 = scmp.lt.s32.totalorder %s3512_s11, %s3505_s5 }
  0x53   : > { %p3509_p8 = pneg %p3508_p5  ;;  %p3515_p0 = por %p3514_p12, %p3513_p10 }
  0x55   : > { %p3516_p2 = pnand %p3515_p0, %p3509_p8 }
  0x57   : > { %3519 = shalt.err (!%p3516_p2)
}
  0x58   : > { %3324 = dma.hbm_to_vmem [thread:$0]  (!%p3704_p7), %s3702_s20, 8192, %s3708_s23, %s3710_s26, %s3562_s6, %s3562_s6, %s3563_s7  }
  0x59   : > { %p4109_p11 = scmp.ne.s32.totalorder %s4106_s19, 0 }
  0x5a   : > { %s178_s12 = sand.u32 (!%p4109_p11), 1, %s3550_s13   ;;  %p4110_p13 = scmp.ne.s32.totalorder (!%p4109_p11), %s4105_s18, 0 }
  0x5b   : > { %176 = sbr.rel (%p4109_p11) target bundleno = 461 (0x1cd), region = 32  ;;  %s2310_s24 = sshll.u32 (!%p4109_p11), %s178_s12, 9 }
  0x5c   : > { %s179_s21 = scalar_lea.sflag (!%p4109_p11), [#allocation3], %s178_s12  ;;  %s3744_s27 = scalar_lea.vmem (!%p4109_p11), [#allocation2], %s2310_s24 }
  0x62   : > { %3537 = dma.done.wait (%p4110_p13), %s179_s21, 8192  }
  0x63   : > { %3539 = vsyncadd (%p4110_p13), %s179_s21, 4294959104  ;;  %p4111_p3 = scmp.ne.s32.totalorder %s4104_s17, 0 }
  0x65   : > { %3541 = dma.done.wait (%p4111_p3), [#allocation5], 464  }
  0x66   : > { %3543 = vsyncadd (%p4111_p3), [#allocation5], 4294966832  ;;  %v3366_v0 = vld [vmem:[#allocation4] sm:$0xff]   ;;  %v3367_v1 = vld [vmem:[#allocation4 + $0x8] sm:$0xff]   ;;  %vm704_vm0 = vcmask 441344   ;;  %vm897_vm1 = vcmask 1042432  }
  0x67   : > { %3158 = vmatprep.subr.bf16.mxu0 %v3366_v0  ;;  %3294 = vmatprep.subr.bf16.mxu1 %v3366_v0  ;;  %v3368_v2 = vld [vmem:[#allocation4 + $0x10] sm:$0xff]   ;;  %v3370_v3 = vld [vmem:[%s3744_s27] sm:$0xff]   ;;  %v3369_v5 = vld [vmem:[#allocation4 + $0x18] ss:$0 sps:$4 sm:$0x77]   ;;  %s2313_s17 = sshll.u32 %s2300_s16, 7 }
  0x68   : > { %3159 = vmatpush3.bf16.msra.mxu0 %v3366_v0  ;;  %3298 = vmatpush3.bf16.msra.mxu1 %v3366_v0  ;;  %v3371_v4 = vld [vmem:[%s3744_s27 + $0x100] sm:$0xff]   ;;  %v899_v6 = vsel %vm897_vm1, %v3369_v5, 0  ;;  %v3372_v7 = vld [vmem:[%s3744_s27 + $0x8] sm:$0xff]   ;;  %v3374_v9 = vld [vmem:[%s3744_s27 + $0x10] sm:$0xff]   ;;  %p215_p7 = scmp.lt.s32.totalorder %s2313_s17, 1023 }
  0x69   : > { %3160 = vmatprep.subr.bf16.mxu0 %v3367_v1  ;;  %3295 = vmatprep.subr.bf16.mxu1 %v3367_v1  ;;  %v3373_v8 = vld [vmem:[%s3744_s27 + $0x108] sm:$0xff]   ;;  %v3375_v10 = vld [vmem:[%s3744_s27 + $0x110] sm:$0xff]   ;;  %v3376_v11 = vld [vmem:[%s3744_s27 + $0x18] sm:$0xff]  }
  0x6a   : > { %3166 = vmatprep.mubr.msk.bf16.mxu0 %vm704_vm0, %v3370_v3  ;;  %3230 = vmatprep.mubr.msk.bf16.mxu1 %vm704_vm0, %v3371_v4  ;;  %v3377_v12 = vld [vmem:[%s3744_s27 + $0x118] sm:$0xff]   ;;  %v3378_v13 = vld [vmem:[%s3744_s27 + $0x20] sm:$0xff]   ;;  %v3380_v15 = vld [vmem:[%s3744_s27 + $0x28] sm:$0xff]   ;;  %s4117_s17 = smov (!%p215_p7, %s2313_s17), 1023 }
  0x6b   : > { %v3379_v14 = vld [vmem:[%s3744_s27 + $0x120] sm:$0xff]   ;;  %v3381_v16 = vld [vmem:[%s3744_s27 + $0x128] sm:$0xff]   ;;  %v3382_v17 = vld [vmem:[%s3744_s27 + $0x30] sm:$0xff]   ;;  %s2314_s15 = sshll.u32 %s4117_s17, 2 }
  0x6c   : > { %3161 = vmatpush3.bf16.msra.mxu0 %v3367_v1  ;;  %3299 = vmatpush3.bf16.msra.mxu1 %v3367_v1  ;;  %v3383_v18 = vld [vmem:[%s3744_s27 + $0x130] sm:$0xff]   ;;  %v3384_v19 = vld [vmem:[%s3744_s27 + $0x38] sm:$0xff]   ;;  %v3386_v21 = vld [vmem:[%s3744_s27 + $0x40] sm:$0xff]   ;;  %s3897_s19 = scalar_lea.vmem %s4099_s3, %s2314_s15 }
  0x6d   : > { %3162 = vmatprep.subr.bf16.mxu0 %v3368_v2  ;;  %3296 = vmatprep.subr.bf16.mxu1 %v3368_v2  ;;  %v3385_v20 = vld [vmem:[%s3744_s27 + $0x138] sm:$0xff]   ;;  %v3387_v22 = vld [vmem:[%s3744_s27 + $0x140] sm:$0xff]   ;;  %v3388_v23 = vld [vmem:[%s3744_s27 + $0x48] sm:$0xff]  }
  0x6e   : > { %v3389_v24 = vld [vmem:[%s3744_s27 + $0x148] sm:$0xff]   ;;  %v3390_v25 = vld [vmem:[%s3744_s27 + $0x50] sm:$0xff]   ;;  %v3392_v27 = vld [vmem:[%s3744_s27 + $0x58] sm:$0xff]  }
  0x6f   : > { %v3391_v26 = vld [vmem:[%s3744_s27 + $0x150] sm:$0xff]   ;;  %v3393_v28 = vld [vmem:[%s3744_s27 + $0x158] sm:$0xff]   ;;  %v3394_v29 = vld [vmem:[%s3744_s27 + $0x60] sm:$0xff]  }
  0x70   : > { %3163 = vmatpush3.bf16.msra.mxu0 %v3368_v2  ;;  %3300 = vmatpush3.bf16.msra.mxu1 %v3368_v2  ;;  %v3395_v30 = vld [vmem:[%s3744_s27 + $0x160] sm:$0xff]   ;;  %v3396_v31 = vld [vmem:[%s3744_s27 + $0x68] sm:$0xff]   ;;  %v3398_v33 = vld [vmem:[%s3744_s27 + $0x70] sm:$0xff]  }
  0x71   : > { %3302 = vmatprep.subr.msk.bf16.mxu0 %vm897_vm1, %v3369_v5  ;;  %3303 = vmatprep.subr.msk.bf16.mxu1 %vm897_vm1, %v3369_v5  ;;  %v3397_v32 = vld [vmem:[%s3744_s27 + $0x168] sm:$0xff]   ;;  %v3399_v34 = vld [vmem:[%s3744_s27 + $0x170] sm:$0xff]   ;;  %v3400_v35 = vld [vmem:[%s3744_s27 + $0x78] sm:$0xff]  }
  0x72   : > { %v3401_v36 = vld [vmem:[%s3744_s27 + $0x178] sm:$0xff]   ;;  %v3402_v37 = vld [vmem:[%s3744_s27 + $0x80] sm:$0xff]   ;;  %v3404_v39 = vld [vmem:[%s3744_s27 + $0x88] sm:$0xff]  }
  0x73   : > { %v3403_v38 = vld [vmem:[%s3744_s27 + $0x180] sm:$0xff]   ;;  %v3405_v40 = vld [vmem:[%s3744_s27 + $0x188] sm:$0xff]   ;;  %v3406_v41 = vld [vmem:[%s3744_s27 + $0x90] sm:$0xff]  }
  0x74   : > { %3165 = vmatpush3.bf16.msra.mxu0 %v899_v6  ;;  %3301 = vmatpush3.bf16.msra.mxu1 %v899_v6  ;;  %v3407_v42 = vld [vmem:[%s3744_s27 + $0x190] sm:$0xff]   ;;  %v3408_v43 = vld [vmem:[%s3744_s27 + $0x98] sm:$0xff]   ;;  %v3410_v45 = vld [vmem:[%s3744_s27 + $0xa0] sm:$0xff]  }
  0x75   : > { %v3409_v44 = vld [vmem:[%s3744_s27 + $0x198] sm:$0xff]   ;;  %v3411_v46 = vld [vmem:[%s3744_s27 + $0x1a0] sm:$0xff]   ;;  %v3412_v47 = vld [vmem:[%s3744_s27 + $0xa8] sm:$0xff]  }
  0x76   : > { %v3413_v48 = vld [vmem:[%s3744_s27 + $0x1a8] sm:$0xff]   ;;  %v3414_v49 = vld [vmem:[%s3744_s27 + $0xb0] sm:$0xff]   ;;  %v3416_v51 = vld [vmem:[%s3744_s27 + $0xb8] sm:$0xff]  }
  0x77   : > { %3167 = vmatmul.mubr.msk.bf16.vlgmr.msra.gmra.mrb[0].mxu0 %vm704_vm0, %v3372_v7  ;;  %3231 = vmatmul.mubr.msk.bf16.vlgmr.msra.gmra.mrb[0].mxu1 %vm704_vm0, %v3373_v8  ;;  %v3415_v50 = vld [vmem:[%s3744_s27 + $0x1b0] sm:$0xff]   ;;  %v3417_v52 = vld [vmem:[%s3744_s27 + $0x1b8] sm:$0xff]   ;;  %v3418_v53 = vld [vmem:[%s3744_s27 + $0xc0] sm:$0xff]  }
  0x78   : > { %3170 = vmatprep.mubr.msk.bf16.mxu0 %vm704_vm0, %v3374_v9  ;;  %3234 = vmatprep.mubr.msk.bf16.mxu1 %vm704_vm0, %v3375_v10  ;;  %v3419_v54 = vld [vmem:[%s3744_s27 + $0x1c0] sm:$0xff]   ;;  %v3420_v55 = vld [vmem:[%s3744_s27 + $0xc8] sm:$0xff]   ;;  %v3422_v57 = vld [vmem:[%s3744_s27 + $0xd0] sm:$0xff]  }
  0x79   : > { %v3421_v56 = vld [vmem:[%s3744_s27 + $0x1c8] sm:$0xff]   ;;  %v3423_v58 = vld [vmem:[%s3744_s27 + $0x1d0] sm:$0xff]   ;;  %v3424_v59 = vld [vmem:[%s3744_s27 + $0xd8] sm:$0xff]  }
  0x7a   : > { %v3425_v60 = vld [vmem:[%s3744_s27 + $0x1d8] sm:$0xff]   ;;  %v3426_v61 = vld [vmem:[%s3744_s27 + $0xe0] sm:$0xff]   ;;  %v3428_v63 = vld [vmem:[%s3744_s27 + $0xe8] sm:$0xff]  }
  0x7b   : > { %v3427_v62 = vld [vmem:[%s3744_s27 + $0x1e0] sm:$0xff]   ;;  %v3429_v0 = vld [vmem:[%s3744_s27 + $0x1e8] sm:$0xff]   ;;  %v3430_v1 = vld [vmem:[%s3744_s27 + $0xf0] sm:$0xff]  }
  0x7c   : > { %v3431_v2 = vld [vmem:[%s3744_s27 + $0x1f0] sm:$0xff]   ;;  %v3432_v3 = vld [vmem:[%s3744_s27 + $0xf8] sm:$0xff]  }
  0x7d   : > { %v3433_v4 = vld [vmem:[%s3744_s27 + $0x1f8] sm:$0xff]  }
  0x7e   : > { %v3884_v5 = vld [vmem:[#allocation6] ss:$0 sm:$0xff] }
  0x7f   : > { %3171 = vmatmul.mubr.msk.bf16.gmra.mrb[4].mxu0 %vm704_vm0, %v3376_v11  ;;  %3235 = vmatmul.mubr.msk.bf16.gmra.mrb[4].mxu1 %vm704_vm0, %v3377_v12 }
  0x80   : > { %3174 = vmatprep.mubr.msk.bf16.mxu0 %vm704_vm0, %v3378_v13  ;;  %3238 = vmatprep.mubr.msk.bf16.mxu1 %vm704_vm0, %v3379_v14 }
  0x87   : > { %3175 = vmatmul.mubr.msk.bf16.gmra.mrb[8].mxu0 %vm704_vm0, %v3380_v15  ;;  %3239 = vmatmul.mubr.msk.bf16.gmra.mrb[8].mxu1 %vm704_vm0, %v3381_v16 }
  0x88   : > { %3178 = vmatprep.mubr.msk.bf16.mxu0 %vm704_vm0, %v3382_v17  ;;  %3242 = vmatprep.mubr.msk.bf16.mxu1 %vm704_vm0, %v3383_v18 }
  0x8f   : > { %3179 = vmatmul.mubr.msk.bf16.gmra.mrb[12].mxu0 %vm704_vm0, %v3384_v19  ;;  %3243 = vmatmul.mubr.msk.bf16.gmra.mrb[12].mxu1 %vm704_vm0, %v3385_v20 }
  0x90   : > { %3182 = vmatprep.mubr.msk.bf16.mxu0 %vm704_vm0, %v3386_v21  ;;  %3246 = vmatprep.mubr.msk.bf16.mxu1 %vm704_vm0, %v3387_v22 }
  0x97   : > { %3183 = vmatmul.mubr.msk.bf16.gmra.mrb[16].mxu0 %vm704_vm0, %v3388_v23  ;;  %3247 = vmatmul.mubr.msk.bf16.gmra.mrb[16].mxu1 %vm704_vm0, %v3389_v24 }
  0x98   : > { %3186 = vmatprep.mubr.msk.bf16.mxu0 %vm704_vm0, %v3390_v25  ;;  %3250 = vmatprep.mubr.msk.bf16.mxu1 %vm704_vm0, %v3391_v26 }
  0x9f   : > { %3187 = vmatmul.mubr.msk.bf16.gmra.mrb[20].mxu0 %vm704_vm0, %v3392_v27  ;;  %3251 = vmatmul.mubr.msk.bf16.gmra.mrb[20].mxu1 %vm704_vm0, %v3393_v28 }
  0xa0   : > { %3190 = vmatprep.mubr.msk.bf16.mxu0 %vm704_vm0, %v3394_v29  ;;  %3254 = vmatprep.mubr.msk.bf16.mxu1 %vm704_vm0, %v3395_v30 }
  0xa7   : > { %3191 = vmatmul.mubr.msk.bf16.gmra.mrb[24].mxu0 %vm704_vm0, %v3396_v31  ;;  %3255 = vmatmul.mubr.msk.bf16.gmra.mrb[24].mxu1 %vm704_vm0, %v3397_v32 }
  0xa8   : > { %3194 = vmatprep.mubr.msk.bf16.mxu0 %vm704_vm0, %v3398_v33  ;;  %3258 = vmatprep.mubr.msk.bf16.mxu1 %vm704_vm0, %v3399_v34 }
  0xaf   : > { %3195 = vmatmul.mubr.msk.bf16.gmra.mrb[28].mxu0 %vm704_vm0, %v3400_v35  ;;  %3259 = vmatmul.mubr.msk.bf16.gmra.mrb[28].mxu1 %vm704_vm0, %v3401_v36 }
  0xb0   : > { %3198 = vmatprep.mubr.msk.bf16.mxu0 %vm704_vm0, %v3402_v37  ;;  %3262 = vmatprep.mubr.msk.bf16.mxu1 %vm704_vm0, %v3403_v38 }
  0xb7   : > { %3199 = vmatmul.mubr.msk.bf16.gmra.mrb[32].mxu0 %vm704_vm0, %v3404_v39  ;;  %3263 = vmatmul.mubr.msk.bf16.gmra.mrb[32].mxu1 %vm704_vm0, %v3405_v40 }
  0xb8   : > { %3202 = vmatprep.mubr.msk.bf16.mxu0 %vm704_vm0, %v3406_v41  ;;  %3266 = vmatprep.mubr.msk.bf16.mxu1 %vm704_vm0, %v3407_v42 }
  0xbf   : > { %3203 = vmatmul.mubr.msk.bf16.gmra.mrb[36].mxu0 %vm704_vm0, %v3408_v43  ;;  %3267 = vmatmul.mubr.msk.bf16.gmra.mrb[36].mxu1 %vm704_vm0, %v3409_v44 }
  0xc0   : > { %3206 = vmatprep.mubr.msk.bf16.mxu0 %vm704_vm0, %v3410_v45  ;;  %3270 = vmatprep.mubr.msk.bf16.mxu1 %vm704_vm0, %v3411_v46 }
  0xc7   : > { %3207 = vmatmul.mubr.msk.bf16.gmra.mrb[40].mxu0 %vm704_vm0, %v3412_v47  ;;  %3271 = vmatmul.mubr.msk.bf16.gmra.mrb[40].mxu1 %vm704_vm0, %v3413_v48 }
  0xc8   : > { %3210 = vmatprep.mubr.msk.bf16.mxu0 %vm704_vm0, %v3414_v49  ;;  %3274 = vmatprep.mubr.msk.bf16.mxu1 %vm704_vm0, %v3415_v50 }
  0xcf   : > { %3211 = vmatmul.mubr.msk.bf16.gmra.mrb[44].mxu0 %vm704_vm0, %v3416_v51  ;;  %3275 = vmatmul.mubr.msk.bf16.gmra.mrb[44].mxu1 %vm704_vm0, %v3417_v52 }
  0xd0   : > { %3214 = vmatprep.mubr.msk.bf16.mxu0 %vm704_vm0, %v3418_v53  ;;  %3278 = vmatprep.mubr.msk.bf16.mxu1 %vm704_vm0, %v3419_v54 }
  0xd7   : > { %3215 = vmatmul.mubr.msk.bf16.gmra.mrb[48].mxu0 %vm704_vm0, %v3420_v55  ;;  %3279 = vmatmul.mubr.msk.bf16.gmra.mrb[48].mxu1 %vm704_vm0, %v3421_v56 }
  0xd8   : > { %3218 = vmatprep.mubr.msk.bf16.mxu0 %vm704_vm0, %v3422_v57  ;;  %3282 = vmatprep.mubr.msk.bf16.mxu1 %vm704_vm0, %v3423_v58 }
  0xdf   : > { %3219 = vmatmul.mubr.msk.bf16.gmra.mrb[52].mxu0 %vm704_vm0, %v3424_v59  ;;  %3283 = vmatmul.mubr.msk.bf16.gmra.mrb[52].mxu1 %vm704_vm0, %v3425_v60 }
  0xe0   : > { %3222 = vmatprep.mubr.msk.bf16.mxu0 %vm704_vm0, %v3426_v61  ;;  %3286 = vmatprep.mubr.msk.bf16.mxu1 %vm704_vm0, %v3427_v62 }
  0xe7   : > { %3223 = vmatmul.mubr.msk.bf16.gmra.mrb[56].mxu0 %vm704_vm0, %v3428_v63  ;;  %3287 = vmatmul.mubr.msk.bf16.gmra.mrb[56].mxu1 %vm704_vm0, %v3429_v0 }
  0xe8   : > { %3226 = vmatprep.mubr.msk.bf16.mxu0 %vm704_vm0, %v3430_v1  ;;  %3290 = vmatprep.mubr.msk.bf16.mxu1 %vm704_vm0, %v3431_v2 }
  0xef   : > { %3227 = vmatmul.mubr.msk.bf16.gmra.mrb[60].mxu0 %vm704_vm0, %v3432_v3  ;;  %3291 = vmatmul.mubr.msk.bf16.gmra.mrb[60].mxu1 %vm704_vm0, %v3433_v4 }
 0x14a   : > { %v3168_v6 = vpop.f32.mrb[0].mxu0  ;;  %v3232_v7 = vpop.f32.mrb[0].mxu1 }
 0x14b   : > { %v944_v8 = vadd.f32 %v3168_v6, %v3884_v5  ;;  %v1200_v9 = vadd.f32 %v3232_v7, %v3884_v5  ;;  %v935_v10 = vpop.f32.mrb[1].mxu0  ;;  %v1191_v11 = vpop.f32.mrb[1].mxu1 }
 0x14c   : > { %v936_v12 = vadd.f32 %v3884_v5, %v935_v10  ;;  %v1192_v13 = vadd.f32 %v3884_v5, %v1191_v11  ;;  %v3169_v14 = vpop.f32.mrb[2].mxu0  ;;  %v3233_v15 = vpop.f32.mrb[2].mxu1 }
 0x14d   : > { %v947_v16 = vadd.f32 %v3169_v14, %v3884_v5  ;;  %v1203_v17 = vadd.f32 %v3233_v15, %v3884_v5  ;;  %v938_v18 = vpop.f32.mrb[3].mxu0  ;;  %v1194_v19 = vpop.f32.mrb[3].mxu1  ;;  %v1448_v22 = vmax.f32 %v944_v8, 0.0  ;;  %v1512_v23 = vmax.f32 %v1200_v9, 0.0 }
 0x14e   : > { %v939_v20 = vadd.f32 %v3884_v5, %v938_v18  ;;  %v1195_v21 = vadd.f32 %v3884_v5, %v1194_v19  ;;  %v1446_v26 = vmax.f32 %v936_v12, 0.0  ;;  %v1510_v27 = vmax.f32 %v1192_v13, 0.0 }
 0x14f   : > { %v1449_v24 = vmax.f32 %v947_v16, 0.0  ;;  %v1513_v25 = vmax.f32 %v1203_v17, 0.0 }
 0x150   : > { %v1447_v28 = vmax.f32 %v939_v20, 0.0  ;;  %v1511_v29 = vmax.f32 %v1195_v21, 0.0 }
 0x151   : > { %v2715_v30 = vpack.c.bf16 %v1449_v24, %v1448_v22  ;;  %v2875_v31 = vpack.c.bf16 %v1513_v25, %v1512_v23 }
 0x152   : > { %v2710_v32 = vpack.c.bf16 %v1447_v28, %v1446_v26  ;;  %v2870_v33 = vpack.c.bf16 %v1511_v29, %v1510_v27  ;;  %v3172_v34 = vpop.f32.mrb[4].mxu0  ;;  %v3236_v35 = vpop.f32.mrb[4].mxu1 }
 0x153   : > { %3027 = vst [vmem:[%s3897_s19 + $0x8] sm:$0xff] %v2715_v30   ;;  %3059 = vst [vmem:[%s3897_s19 + $0x108] sm:$0xff] %v2875_v31   ;;  %v960_v36 = vadd.f32 %v3172_v34, %v3884_v5  ;;  %v1216_v37 = vadd.f32 %v3236_v35, %v3884_v5  ;;  %v951_v38 = vpop.f32.mrb[5].mxu0  ;;  %v1207_v39 = vpop.f32.mrb[5].mxu1 }
 0x154   : > { %2711 = vst [vmem:[%s3897_s19] sm:$0xff] %v2710_v32   ;;  %3058 = vst [vmem:[%s3897_s19 + $0x100] sm:$0xff] %v2870_v33   ;;  %v952_v40 = vadd.f32 %v3884_v5, %v951_v38  ;;  %v1208_v41 = vadd.f32 %v3884_v5, %v1207_v39  ;;  %v3173_v42 = vpop.f32.mrb[6].mxu0  ;;  %v3237_v43 = vpop.f32.mrb[6].mxu1 }
 0x155   : > { %v963_v44 = vadd.f32 %v3173_v42, %v3884_v5  ;;  %v1219_v45 = vadd.f32 %v3237_v43, %v3884_v5  ;;  %v954_v46 = vpop.f32.mrb[7].mxu0  ;;  %v1210_v47 = vpop.f32.mrb[7].mxu1  ;;  %v1452_v50 = vmax.f32 %v960_v36, 0.0  ;;  %v1516_v51 = vmax.f32 %v1216_v37, 0.0 }
 0x156   : > { %v955_v48 = vadd.f32 %v3884_v5, %v954_v46  ;;  %v1211_v49 = vadd.f32 %v3884_v5, %v1210_v47  ;;  %v1450_v54 = vmax.f32 %v952_v40, 0.0  ;;  %v1514_v55 = vmax.f32 %v1208_v41, 0.0 }
 0x157   : > { %v1453_v52 = vmax.f32 %v963_v44, 0.0  ;;  %v1517_v53 = vmax.f32 %v1219_v45, 0.0 }
 0x158   : > { %v1451_v56 = vmax.f32 %v955_v48, 0.0  ;;  %v1515_v57 = vmax.f32 %v1211_v49, 0.0 }
 0x159   : > { %v2725_v58 = vpack.c.bf16 %v1453_v52, %v1452_v50  ;;  %v2885_v59 = vpack.c.bf16 %v1517_v53, %v1516_v51 }
 0x15a   : > { %v2720_v60 = vpack.c.bf16 %v1451_v56, %v1450_v54  ;;  %v2880_v61 = vpack.c.bf16 %v1515_v57, %v1514_v55  ;;  %v3176_v62 = vpop.f32.mrb[8].mxu0  ;;  %v3240_v63 = vpop.f32.mrb[8].mxu1 }
 0x15b   : > { %3029 = vst [vmem:[%s3897_s19 + $0x18] sm:$0xff] %v2725_v58   ;;  %3061 = vst [vmem:[%s3897_s19 + $0x118] sm:$0xff] %v2885_v59   ;;  %v976_v0 = vadd.f32 %v3176_v62, %v3884_v5  ;;  %v1232_v1 = vadd.f32 %v3240_v63, %v3884_v5  ;;  %v967_v2 = vpop.f32.mrb[9].mxu0  ;;  %v1223_v3 = vpop.f32.mrb[9].mxu1 }
 0x15c   : > { %3028 = vst [vmem:[%s3897_s19 + $0x10] sm:$0xff] %v2720_v60   ;;  %3060 = vst [vmem:[%s3897_s19 + $0x110] sm:$0xff] %v2880_v61   ;;  %v968_v4 = vadd.f32 %v3884_v5, %v967_v2  ;;  %v1224_v6 = vadd.f32 %v3884_v5, %v1223_v3  ;;  %v3177_v7 = vpop.f32.mrb[10].mxu0  ;;  %v3241_v8 = vpop.f32.mrb[10].mxu1 }
 0x15d   : > { %v979_v9 = vadd.f32 %v3177_v7, %v3884_v5  ;;  %v1235_v10 = vadd.f32 %v3241_v8, %v3884_v5  ;;  %v970_v11 = vpop.f32.mrb[11].mxu0  ;;  %v1226_v12 = vpop.f32.mrb[11].mxu1  ;;  %v1456_v15 = vmax.f32 %v976_v0, 0.0  ;;  %v1520_v16 = vmax.f32 %v1232_v1, 0.0 }
 0x15e   : > { %v971_v13 = vadd.f32 %v3884_v5, %v970_v11  ;;  %v1227_v14 = vadd.f32 %v3884_v5, %v1226_v12  ;;  %v1454_v19 = vmax.f32 %v968_v4, 0.0  ;;  %v1518_v20 = vmax.f32 %v1224_v6, 0.0 }
 0x15f   : > { %v1457_v17 = vmax.f32 %v979_v9, 0.0  ;;  %v1521_v18 = vmax.f32 %v1235_v10, 0.0 }
 0x160   : > { %v1455_v21 = vmax.f32 %v971_v13, 0.0  ;;  %v1519_v22 = vmax.f32 %v1227_v14, 0.0 }
 0x161   : > { %v2735_v23 = vpack.c.bf16 %v1457_v17, %v1456_v15  ;;  %v2895_v24 = vpack.c.bf16 %v1521_v18, %v1520_v16 }
 0x162   : > { %v2730_v25 = vpack.c.bf16 %v1455_v21, %v1454_v19  ;;  %v2890_v26 = vpack.c.bf16 %v1519_v22, %v1518_v20  ;;  %v3180_v27 = vpop.f32.mrb[12].mxu0  ;;  %v3244_v28 = vpop.f32.mrb[12].mxu1 }
 0x163   : > { %3031 = vst [vmem:[%s3897_s19 + $0x28] sm:$0xff] %v2735_v23   ;;  %3063 = vst [vmem:[%s3897_s19 + $0x128] sm:$0xff] %v2895_v24   ;;  %v992_v29 = vadd.f32 %v3180_v27, %v3884_v5  ;;  %v1248_v30 = vadd.f32 %v3244_v28, %v3884_v5  ;;  %v983_v31 = vpop.f32.mrb[13].mxu0  ;;  %v1239_v32 = vpop.f32.mrb[13].mxu1 }
 0x164   : > { %3030 = vst [vmem:[%s3897_s19 + $0x20] sm:$0xff] %v2730_v25   ;;  %3062 = vst [vmem:[%s3897_s19 + $0x120] sm:$0xff] %v2890_v26   ;;  %v984_v33 = vadd.f32 %v3884_v5, %v983_v31  ;;  %v1240_v34 = vadd.f32 %v3884_v5, %v1239_v32  ;;  %v3181_v35 = vpop.f32.mrb[14].mxu0  ;;  %v3245_v36 = vpop.f32.mrb[14].mxu1 }
 0x165   : > { %v995_v37 = vadd.f32 %v3181_v35, %v3884_v5  ;;  %v1251_v38 = vadd.f32 %v3245_v36, %v3884_v5  ;;  %v986_v39 = vpop.f32.mrb[15].mxu0  ;;  %v1242_v40 = vpop.f32.mrb[15].mxu1  ;;  %v1460_v43 = vmax.f32 %v992_v29, 0.0  ;;  %v1524_v44 = vmax.f32 %v1248_v30, 0.0 }
 0x166   : > { %v987_v41 = vadd.f32 %v3884_v5, %v986_v39  ;;  %v1243_v42 = vadd.f32 %v3884_v5, %v1242_v40  ;;  %v1458_v47 = vmax.f32 %v984_v33, 0.0  ;;  %v1522_v48 = vmax.f32 %v1240_v34, 0.0 }
 0x167   : > { %v1461_v45 = vmax.f32 %v995_v37, 0.0  ;;  %v1525_v46 = vmax.f32 %v1251_v38, 0.0 }
 0x168   : > { %v1459_v49 = vmax.f32 %v987_v41, 0.0  ;;  %v1523_v50 = vmax.f32 %v1243_v42, 0.0 }
 0x169   : > { %v2745_v51 = vpack.c.bf16 %v1461_v45, %v1460_v43  ;;  %v2905_v52 = vpack.c.bf16 %v1525_v46, %v1524_v44 }
 0x16a   : > { %v2740_v53 = vpack.c.bf16 %v1459_v49, %v1458_v47  ;;  %v2900_v54 = vpack.c.bf16 %v1523_v50, %v1522_v48  ;;  %v3184_v55 = vpop.f32.mrb[16].mxu0  ;;  %v3248_v56 = vpop.f32.mrb[16].mxu1 }
 0x16b   : > { %3033 = vst [vmem:[%s3897_s19 + $0x38] sm:$0xff] %v2745_v51   ;;  %3065 = vst [vmem:[%s3897_s19 + $0x138] sm:$0xff] %v2905_v52   ;;  %v1008_v57 = vadd.f32 %v3184_v55, %v3884_v5  ;;  %v1264_v58 = vadd.f32 %v3248_v56, %v3884_v5  ;;  %v999_v59 = vpop.f32.mrb[17].mxu0  ;;  %v1255_v60 = vpop.f32.mrb[17].mxu1 }
 0x16c   : > { %3032 = vst [vmem:[%s3897_s19 + $0x30] sm:$0xff] %v2740_v53   ;;  %3064 = vst [vmem:[%s3897_s19 + $0x130] sm:$0xff] %v2900_v54   ;;  %v1000_v61 = vadd.f32 %v3884_v5, %v999_v59  ;;  %v1256_v62 = vadd.f32 %v3884_v5, %v1255_v60  ;;  %v3185_v63 = vpop.f32.mrb[18].mxu0  ;;  %v3249_v0 = vpop.f32.mrb[18].mxu1 }
 0x16d   : > { %v1011_v1 = vadd.f32 %v3185_v63, %v3884_v5  ;;  %v1267_v2 = vadd.f32 %v3249_v0, %v3884_v5  ;;  %v1002_v3 = vpop.f32.mrb[19].mxu0  ;;  %v1258_v4 = vpop.f32.mrb[19].mxu1  ;;  %v1464_v8 = vmax.f32 %v1008_v57, 0.0  ;;  %v1528_v9 = vmax.f32 %v1264_v58, 0.0 }
 0x16e   : > { %v1003_v6 = vadd.f32 %v3884_v5, %v1002_v3  ;;  %v1259_v7 = vadd.f32 %v3884_v5, %v1258_v4  ;;  %v1462_v12 = vmax.f32 %v1000_v61, 0.0  ;;  %v1526_v13 = vmax.f32 %v1256_v62, 0.0 }
 0x16f   : > { %v1465_v10 = vmax.f32 %v1011_v1, 0.0  ;;  %v1529_v11 = vmax.f32 %v1267_v2, 0.0 }
 0x170   : > { %v1463_v14 = vmax.f32 %v1003_v6, 0.0  ;;  %v1527_v15 = vmax.f32 %v1259_v7, 0.0 }
 0x171   : > { %v2755_v16 = vpack.c.bf16 %v1465_v10, %v1464_v8  ;;  %v2915_v17 = vpack.c.bf16 %v1529_v11, %v1528_v9 }
 0x172   : > { %v2750_v18 = vpack.c.bf16 %v1463_v14, %v1462_v12  ;;  %v2910_v19 = vpack.c.bf16 %v1527_v15, %v1526_v13  ;;  %v3188_v20 = vpop.f32.mrb[20].mxu0  ;;  %v3252_v21 = vpop.f32.mrb[20].mxu1 }
 0x173   : > { %3035 = vst [vmem:[%s3897_s19 + $0x48] sm:$0xff] %v2755_v16   ;;  %3067 = vst [vmem:[%s3897_s19 + $0x148] sm:$0xff] %v2915_v17   ;;  %v1024_v22 = vadd.f32 %v3188_v20, %v3884_v5  ;;  %v1280_v23 = vadd.f32 %v3252_v21, %v3884_v5  ;;  %v1015_v24 = vpop.f32.mrb[21].mxu0  ;;  %v1271_v25 = vpop.f32.mrb[21].mxu1 }
 0x174   : > { %3034 = vst [vmem:[%s3897_s19 + $0x40] sm:$0xff] %v2750_v18   ;;  %3066 = vst [vmem:[%s3897_s19 + $0x140] sm:$0xff] %v2910_v19   ;;  %v1016_v26 = vadd.f32 %v3884_v5, %v1015_v24  ;;  %v1272_v27 = vadd.f32 %v3884_v5, %v1271_v25  ;;  %v3189_v28 = vpop.f32.mrb[22].mxu0  ;;  %v3253_v29 = vpop.f32.mrb[22].mxu1 }
 0x175   : > { %v1027_v30 = vadd.f32 %v3189_v28, %v3884_v5  ;;  %v1283_v31 = vadd.f32 %v3253_v29, %v3884_v5  ;;  %v1018_v32 = vpop.f32.mrb[23].mxu0  ;;  %v1274_v33 = vpop.f32.mrb[23].mxu1  ;;  %v1468_v36 = vmax.f32 %v1024_v22, 0.0  ;;  %v1532_v37 = vmax.f32 %v1280_v23, 0.0 }
 0x176   : > { %v1019_v34 = vadd.f32 %v3884_v5, %v1018_v32  ;;  %v1275_v35 = vadd.f32 %v3884_v5, %v1274_v33  ;;  %v1466_v40 = vmax.f32 %v1016_v26, 0.0  ;;  %v1530_v41 = vmax.f32 %v1272_v27, 0.0 }
 0x177   : > { %v1469_v38 = vmax.f32 %v1027_v30, 0.0  ;;  %v1533_v39 = vmax.f32 %v1283_v31, 0.0 }
 0x178   : > { %v1467_v42 = vmax.f32 %v1019_v34, 0.0  ;;  %v1531_v43 = vmax.f32 %v1275_v35, 0.0 }
 0x179   : > { %v2765_v44 = vpack.c.bf16 %v1469_v38, %v1468_v36  ;;  %v2925_v45 = vpack.c.bf16 %v1533_v39, %v1532_v37 }
 0x17a   : > { %v2760_v46 = vpack.c.bf16 %v1467_v42, %v1466_v40  ;;  %v2920_v47 = vpack.c.bf16 %v1531_v43, %v1530_v41  ;;  %v3192_v48 = vpop.f32.mrb[24].mxu0  ;;  %v3256_v49 = vpop.f32.mrb[24].mxu1 }
 0x17b   : > { %3037 = vst [vmem:[%s3897_s19 + $0x58] sm:$0xff] %v2765_v44   ;;  %3069 = vst [vmem:[%s3897_s19 + $0x158] sm:$0xff] %v2925_v45   ;;  %v1040_v50 = vadd.f32 %v3192_v48, %v3884_v5  ;;  %v1296_v51 = vadd.f32 %v3256_v49, %v3884_v5  ;;  %v1031_v52 = vpop.f32.mrb[25].mxu0  ;;  %v1287_v53 = vpop.f32.mrb[25].mxu1 }
 0x17c   : > { %3036 = vst [vmem:[%s3897_s19 + $0x50] sm:$0xff] %v2760_v46   ;;  %3068 = vst [vmem:[%s3897_s19 + $0x150] sm:$0xff] %v2920_v47   ;;  %v1032_v54 = vadd.f32 %v3884_v5, %v1031_v52  ;;  %v1288_v55 = vadd.f32 %v3884_v5, %v1287_v53  ;;  %v3193_v56 = vpop.f32.mrb[26].mxu0  ;;  %v3257_v57 = vpop.f32.mrb[26].mxu1 }
 0x17d   : > { %v1043_v58 = vadd.f32 %v3193_v56, %v3884_v5  ;;  %v1299_v59 = vadd.f32 %v3257_v57, %v3884_v5  ;;  %v1034_v60 = vpop.f32.mrb[27].mxu0  ;;  %v1290_v61 = vpop.f32.mrb[27].mxu1  ;;  %v1472_v0 = vmax.f32 %v1040_v50, 0.0  ;;  %v1536_v1 = vmax.f32 %v1296_v51, 0.0 }
 0x17e   : > { %v1035_v62 = vadd.f32 %v3884_v5, %v1034_v60  ;;  %v1291_v63 = vadd.f32 %v3884_v5, %v1290_v61  ;;  %v1470_v4 = vmax.f32 %v1032_v54, 0.0  ;;  %v1534_v6 = vmax.f32 %v1288_v55, 0.0 }
 0x17f   : > { %v1473_v2 = vmax.f32 %v1043_v58, 0.0  ;;  %v1537_v3 = vmax.f32 %v1299_v59, 0.0 }
 0x180   : > { %v1471_v7 = vmax.f32 %v1035_v62, 0.0  ;;  %v1535_v8 = vmax.f32 %v1291_v63, 0.0 }
 0x181   : > { %v2775_v9 = vpack.c.bf16 %v1473_v2, %v1472_v0  ;;  %v2935_v10 = vpack.c.bf16 %v1537_v3, %v1536_v1 }
 0x182   : > { %v2770_v11 = vpack.c.bf16 %v1471_v7, %v1470_v4  ;;  %v2930_v12 = vpack.c.bf16 %v1535_v8, %v1534_v6  ;;  %v3196_v13 = vpop.f32.mrb[28].mxu0  ;;  %v3260_v14 = vpop.f32.mrb[28].mxu1 }
 0x183   : > { %3039 = vst [vmem:[%s3897_s19 + $0x68] sm:$0xff] %v2775_v9   ;;  %3071 = vst [vmem:[%s3897_s19 + $0x168] sm:$0xff] %v2935_v10   ;;  %v1056_v15 = vadd.f32 %v3196_v13, %v3884_v5  ;;  %v1312_v16 = vadd.f32 %v3260_v14, %v3884_v5  ;;  %v1047_v17 = vpop.f32.mrb[29].mxu0  ;;  %v1303_v18 = vpop.f32.mrb[29].mxu1 }
 0x184   : > { %3038 = vst [vmem:[%s3897_s19 + $0x60] sm:$0xff] %v2770_v11   ;;  %3070 = vst [vmem:[%s3897_s19 + $0x160] sm:$0xff] %v2930_v12   ;;  %v1048_v19 = vadd.f32 %v3884_v5, %v1047_v17  ;;  %v1304_v20 = vadd.f32 %v3884_v5, %v1303_v18  ;;  %v3197_v21 = vpop.f32.mrb[30].mxu0  ;;  %v3261_v22 = vpop.f32.mrb[30].mxu1 }
 0x185   : > { %v1059_v23 = vadd.f32 %v3197_v21, %v3884_v5  ;;  %v1315_v24 = vadd.f32 %v3261_v22, %v3884_v5  ;;  %v1050_v25 = vpop.f32.mrb[31].mxu0  ;;  %v1306_v26 = vpop.f32.mrb[31].mxu1  ;;  %v1476_v29 = vmax.f32 %v1056_v15, 0.0  ;;  %v1540_v30 = vmax.f32 %v1312_v16, 0.0 }
 0x186   : > { %v1051_v27 = vadd.f32 %v3884_v5, %v1050_v25  ;;  %v1307_v28 = vadd.f32 %v3884_v5, %v1306_v26  ;;  %v1474_v33 = vmax.f32 %v1048_v19, 0.0  ;;  %v1538_v34 = vmax.f32 %v1304_v20, 0.0 }
 0x187   : > { %v1477_v31 = vmax.f32 %v1059_v23, 0.0  ;;  %v1541_v32 = vmax.f32 %v1315_v24, 0.0 }
 0x188   : > { %v1475_v35 = vmax.f32 %v1051_v27, 0.0  ;;  %v1539_v36 = vmax.f32 %v1307_v28, 0.0 }
 0x189   : > { %v2785_v37 = vpack.c.bf16 %v1477_v31, %v1476_v29  ;;  %v2945_v38 = vpack.c.bf16 %v1541_v32, %v1540_v30 }
 0x18a   : > { %v2780_v39 = vpack.c.bf16 %v1475_v35, %v1474_v33  ;;  %v2940_v40 = vpack.c.bf16 %v1539_v36, %v1538_v34  ;;  %v3200_v41 = vpop.f32.mrb[32].mxu0  ;;  %v3264_v42 = vpop.f32.mrb[32].mxu1 }
 0x18b   : > { %3041 = vst [vmem:[%s3897_s19 + $0x78] sm:$0xff] %v2785_v37   ;;  %3073 = vst [vmem:[%s3897_s19 + $0x178] sm:$0xff] %v2945_v38   ;;  %v1072_v43 = vadd.f32 %v3200_v41, %v3884_v5  ;;  %v1328_v44 = vadd.f32 %v3264_v42, %v3884_v5  ;;  %v1063_v45 = vpop.f32.mrb[33].mxu0  ;;  %v1319_v46 = vpop.f32.mrb[33].mxu1 }
 0x18c   : > { %3040 = vst [vmem:[%s3897_s19 + $0x70] sm:$0xff] %v2780_v39   ;;  %3072 = vst [vmem:[%s3897_s19 + $0x170] sm:$0xff] %v2940_v40   ;;  %v1064_v47 = vadd.f32 %v3884_v5, %v1063_v45  ;;  %v1320_v48 = vadd.f32 %v3884_v5, %v1319_v46  ;;  %v3201_v49 = vpop.f32.mrb[34].mxu0  ;;  %v3265_v50 = vpop.f32.mrb[34].mxu1 }
 0x18d   : > { %v1075_v51 = vadd.f32 %v3201_v49, %v3884_v5  ;;  %v1331_v52 = vadd.f32 %v3265_v50, %v3884_v5  ;;  %v1066_v53 = vpop.f32.mrb[35].mxu0  ;;  %v1322_v54 = vpop.f32.mrb[35].mxu1  ;;  %v1480_v57 = vmax.f32 %v1072_v43, 0.0  ;;  %v1544_v58 = vmax.f32 %v1328_v44, 0.0 }
 0x18e   : > { %v1067_v55 = vadd.f32 %v3884_v5, %v1066_v53  ;;  %v1323_v56 = vadd.f32 %v3884_v5, %v1322_v54  ;;  %v1478_v61 = vmax.f32 %v1064_v47, 0.0  ;;  %v1542_v62 = vmax.f32 %v1320_v48, 0.0 }
 0x18f   : > { %v1481_v59 = vmax.f32 %v1075_v51, 0.0  ;;  %v1545_v60 = vmax.f32 %v1331_v52, 0.0 }
 0x190   : > { %v1479_v63 = vmax.f32 %v1067_v55, 0.0  ;;  %v1543_v0 = vmax.f32 %v1323_v56, 0.0 }
 0x191   : > { %v2795_v1 = vpack.c.bf16 %v1481_v59, %v1480_v57  ;;  %v2955_v2 = vpack.c.bf16 %v1545_v60, %v1544_v58 }
 0x192   : > { %v2790_v3 = vpack.c.bf16 %v1479_v63, %v1478_v61  ;;  %v2950_v4 = vpack.c.bf16 %v1543_v0, %v1542_v62  ;;  %v3204_v6 = vpop.f32.mrb[36].mxu0  ;;  %v3268_v7 = vpop.f32.mrb[36].mxu1 }
 0x193   : > { %3043 = vst [vmem:[%s3897_s19 + $0x88] sm:$0xff] %v2795_v1   ;;  %3075 = vst [vmem:[%s3897_s19 + $0x188] sm:$0xff] %v2955_v2   ;;  %v1088_v8 = vadd.f32 %v3204_v6, %v3884_v5  ;;  %v1344_v9 = vadd.f32 %v3268_v7, %v3884_v5  ;;  %v1079_v10 = vpop.f32.mrb[37].mxu0  ;;  %v1335_v11 = vpop.f32.mrb[37].mxu1 }
 0x194   : > { %3042 = vst [vmem:[%s3897_s19 + $0x80] sm:$0xff] %v2790_v3   ;;  %3074 = vst [vmem:[%s3897_s19 + $0x180] sm:$0xff] %v2950_v4   ;;  %v1080_v12 = vadd.f32 %v3884_v5, %v1079_v10  ;;  %v1336_v13 = vadd.f32 %v3884_v5, %v1335_v11  ;;  %v3205_v14 = vpop.f32.mrb[38].mxu0  ;;  %v3269_v15 = vpop.f32.mrb[38].mxu1 }
 0x195   : > { %v1091_v16 = vadd.f32 %v3205_v14, %v3884_v5  ;;  %v1347_v17 = vadd.f32 %v3269_v15, %v3884_v5  ;;  %v1082_v18 = vpop.f32.mrb[39].mxu0  ;;  %v1338_v19 = vpop.f32.mrb[39].mxu1  ;;  %v1484_v22 = vmax.f32 %v1088_v8, 0.0  ;;  %v1548_v23 = vmax.f32 %v1344_v9, 0.0 }
 0x196   : > { %v1083_v20 = vadd.f32 %v3884_v5, %v1082_v18  ;;  %v1339_v21 = vadd.f32 %v3884_v5, %v1338_v19  ;;  %v1482_v26 = vmax.f32 %v1080_v12, 0.0  ;;  %v1546_v27 = vmax.f32 %v1336_v13, 0.0 }
 0x197   : > { %v1485_v24 = vmax.f32 %v1091_v16, 0.0  ;;  %v1549_v25 = vmax.f32 %v1347_v17, 0.0 }
 0x198   : > { %v1483_v28 = vmax.f32 %v1083_v20, 0.0  ;;  %v1547_v29 = vmax.f32 %v1339_v21, 0.0 }
 0x199   : > { %v2805_v30 = vpack.c.bf16 %v1485_v24, %v1484_v22  ;;  %v2965_v31 = vpack.c.bf16 %v1549_v25, %v1548_v23 }
 0x19a   : > { %v2800_v32 = vpack.c.bf16 %v1483_v28, %v1482_v26  ;;  %v2960_v33 = vpack.c.bf16 %v1547_v29, %v1546_v27  ;;  %v3208_v34 = vpop.f32.mrb[40].mxu0  ;;  %v3272_v35 = vpop.f32.mrb[40].mxu1 }
 0x19b   : > { %3045 = vst [vmem:[%s3897_s19 + $0x98] sm:$0xff] %v2805_v30   ;;  %3077 = vst [vmem:[%s3897_s19 + $0x198] sm:$0xff] %v2965_v31   ;;  %v1104_v36 = vadd.f32 %v3208_v34, %v3884_v5  ;;  %v1360_v37 = vadd.f32 %v3272_v35, %v3884_v5  ;;  %v1095_v38 = vpop.f32.mrb[41].mxu0  ;;  %v1351_v39 = vpop.f32.mrb[41].mxu1 }
 0x19c   : > { %3044 = vst [vmem:[%s3897_s19 + $0x90] sm:$0xff] %v2800_v32   ;;  %3076 = vst [vmem:[%s3897_s19 + $0x190] sm:$0xff] %v2960_v33   ;;  %v1096_v40 = vadd.f32 %v3884_v5, %v1095_v38  ;;  %v1352_v41 = vadd.f32 %v3884_v5, %v1351_v39  ;;  %v3209_v42 = vpop.f32.mrb[42].mxu0  ;;  %v3273_v43 = vpop.f32.mrb[42].mxu1 }
 0x19d   : > { %v1107_v44 = vadd.f32 %v3209_v42, %v3884_v5  ;;  %v1363_v45 = vadd.f32 %v3273_v43, %v3884_v5  ;;  %v1098_v46 = vpop.f32.mrb[43].mxu0  ;;  %v1354_v47 = vpop.f32.mrb[43].mxu1  ;;  %v1488_v50 = vmax.f32 %v1104_v36, 0.0  ;;  %v1552_v51 = vmax.f32 %v1360_v37, 0.0 }
 0x19e   : > { %v1099_v48 = vadd.f32 %v3884_v5, %v1098_v46  ;;  %v1355_v49 = vadd.f32 %v3884_v5, %v1354_v47  ;;  %v1486_v54 = vmax.f32 %v1096_v40, 0.0  ;;  %v1550_v55 = vmax.f32 %v1352_v41, 0.0 }
 0x19f   : > { %v1489_v52 = vmax.f32 %v1107_v44, 0.0  ;;  %v1553_v53 = vmax.f32 %v1363_v45, 0.0 }
 0x1a0   : > { %v1487_v56 = vmax.f32 %v1099_v48, 0.0  ;;  %v1551_v57 = vmax.f32 %v1355_v49, 0.0 }
 0x1a1   : > { %v2815_v58 = vpack.c.bf16 %v1489_v52, %v1488_v50  ;;  %v2975_v59 = vpack.c.bf16 %v1553_v53, %v1552_v51 }
 0x1a2   : > { %v2810_v60 = vpack.c.bf16 %v1487_v56, %v1486_v54  ;;  %v2970_v61 = vpack.c.bf16 %v1551_v57, %v1550_v55  ;;  %v3212_v62 = vpop.f32.mrb[44].mxu0  ;;  %v3276_v63 = vpop.f32.mrb[44].mxu1 }
 0x1a3   : > { %3047 = vst [vmem:[%s3897_s19 + $0xa8] sm:$0xff] %v2815_v58   ;;  %3079 = vst [vmem:[%s3897_s19 + $0x1a8] sm:$0xff] %v2975_v59   ;;  %v1120_v0 = vadd.f32 %v3212_v62, %v3884_v5  ;;  %v1376_v1 = vadd.f32 %v3276_v63, %v3884_v5  ;;  %v1111_v2 = vpop.f32.mrb[45].mxu0  ;;  %v1367_v3 = vpop.f32.mrb[45].mxu1 }
 0x1a4   : > { %3046 = vst [vmem:[%s3897_s19 + $0xa0] sm:$0xff] %v2810_v60   ;;  %3078 = vst [vmem:[%s3897_s19 + $0x1a0] sm:$0xff] %v2970_v61   ;;  %v1112_v4 = vadd.f32 %v3884_v5, %v1111_v2  ;;  %v1368_v6 = vadd.f32 %v3884_v5, %v1367_v3  ;;  %v3213_v7 = vpop.f32.mrb[46].mxu0  ;;  %v3277_v8 = vpop.f32.mrb[46].mxu1 }
 0x1a5   : > { %v1123_v9 = vadd.f32 %v3213_v7, %v3884_v5  ;;  %v1379_v10 = vadd.f32 %v3277_v8, %v3884_v5  ;;  %v1114_v11 = vpop.f32.mrb[47].mxu0  ;;  %v1370_v12 = vpop.f32.mrb[47].mxu1  ;;  %v1492_v15 = vmax.f32 %v1120_v0, 0.0  ;;  %v1556_v16 = vmax.f32 %v1376_v1, 0.0 }
 0x1a6   : > { %v1115_v13 = vadd.f32 %v3884_v5, %v1114_v11  ;;  %v1371_v14 = vadd.f32 %v3884_v5, %v1370_v12  ;;  %v1490_v19 = vmax.f32 %v1112_v4, 0.0  ;;  %v1554_v20 = vmax.f32 %v1368_v6, 0.0 }
 0x1a7   : > { %v1493_v17 = vmax.f32 %v1123_v9, 0.0  ;;  %v1557_v18 = vmax.f32 %v1379_v10, 0.0 }
 0x1a8   : > { %v1491_v21 = vmax.f32 %v1115_v13, 0.0  ;;  %v1555_v22 = vmax.f32 %v1371_v14, 0.0 }
 0x1a9   : > { %v2825_v23 = vpack.c.bf16 %v1493_v17, %v1492_v15  ;;  %v2985_v24 = vpack.c.bf16 %v1557_v18, %v1556_v16 }
 0x1aa   : > { %v2820_v25 = vpack.c.bf16 %v1491_v21, %v1490_v19  ;;  %v2980_v26 = vpack.c.bf16 %v1555_v22, %v1554_v20  ;;  %v3216_v27 = vpop.f32.mrb[48].mxu0  ;;  %v3280_v28 = vpop.f32.mrb[48].mxu1 }
 0x1ab   : > { %3049 = vst [vmem:[%s3897_s19 + $0xb8] sm:$0xff] %v2825_v23   ;;  %3081 = vst [vmem:[%s3897_s19 + $0x1b8] sm:$0xff] %v2985_v24   ;;  %v1136_v29 = vadd.f32 %v3216_v27, %v3884_v5  ;;  %v1392_v30 = vadd.f32 %v3280_v28, %v3884_v5  ;;  %v1127_v31 = vpop.f32.mrb[49].mxu0  ;;  %v1383_v32 = vpop.f32.mrb[49].mxu1 }
 0x1ac   : > { %3048 = vst [vmem:[%s3897_s19 + $0xb0] sm:$0xff] %v2820_v25   ;;  %3080 = vst [vmem:[%s3897_s19 + $0x1b0] sm:$0xff] %v2980_v26   ;;  %v1128_v33 = vadd.f32 %v3884_v5, %v1127_v31  ;;  %v1384_v34 = vadd.f32 %v3884_v5, %v1383_v32  ;;  %v3217_v35 = vpop.f32.mrb[50].mxu0  ;;  %v3281_v36 = vpop.f32.mrb[50].mxu1 }
 0x1ad   : > { %v1139_v37 = vadd.f32 %v3217_v35, %v3884_v5  ;;  %v1395_v38 = vadd.f32 %v3281_v36, %v3884_v5  ;;  %v1130_v39 = vpop.f32.mrb[51].mxu0  ;;  %v1386_v40 = vpop.f32.mrb[51].mxu1  ;;  %v1496_v43 = vmax.f32 %v1136_v29, 0.0  ;;  %v1560_v44 = vmax.f32 %v1392_v30, 0.0 }
 0x1ae   : > { %v1131_v41 = vadd.f32 %v3884_v5, %v1130_v39  ;;  %v1387_v42 = vadd.f32 %v3884_v5, %v1386_v40  ;;  %v1494_v47 = vmax.f32 %v1128_v33, 0.0  ;;  %v1558_v48 = vmax.f32 %v1384_v34, 0.0 }
 0x1af   : > { %v1497_v45 = vmax.f32 %v1139_v37, 0.0  ;;  %v1561_v46 = vmax.f32 %v1395_v38, 0.0 }
 0x1b0   : > { %v1495_v49 = vmax.f32 %v1131_v41, 0.0  ;;  %v1559_v50 = vmax.f32 %v1387_v42, 0.0 }
 0x1b1   : > { %v2835_v51 = vpack.c.bf16 %v1497_v45, %v1496_v43  ;;  %v2995_v52 = vpack.c.bf16 %v1561_v46, %v1560_v44 }
 0x1b2   : > { %v2830_v53 = vpack.c.bf16 %v1495_v49, %v1494_v47  ;;  %v2990_v54 = vpack.c.bf16 %v1559_v50, %v1558_v48  ;;  %v3220_v55 = vpop.f32.mrb[52].mxu0  ;;  %v3284_v56 = vpop.f32.mrb[52].mxu1 }
 0x1b3   : > { %3051 = vst [vmem:[%s3897_s19 + $0xc8] sm:$0xff] %v2835_v51   ;;  %3083 = vst [vmem:[%s3897_s19 + $0x1c8] sm:$0xff] %v2995_v52   ;;  %v1152_v57 = vadd.f32 %v3220_v55, %v3884_v5  ;;  %v1408_v58 = vadd.f32 %v3284_v56, %v3884_v5  ;;  %v1143_v59 = vpop.f32.mrb[53].mxu0  ;;  %v1399_v60 = vpop.f32.mrb[53].mxu1 }
 0x1b4   : > { %3050 = vst [vmem:[%s3897_s19 + $0xc0] sm:$0xff] %v2830_v53   ;;  %3082 = vst [vmem:[%s3897_s19 + $0x1c0] sm:$0xff] %v2990_v54   ;;  %v1144_v61 = vadd.f32 %v3884_v5, %v1143_v59  ;;  %v1400_v62 = vadd.f32 %v3884_v5, %v1399_v60  ;;  %v3221_v63 = vpop.f32.mrb[54].mxu0  ;;  %v3285_v0 = vpop.f32.mrb[54].mxu1 }
 0x1b5   : > { %v1155_v1 = vadd.f32 %v3221_v63, %v3884_v5  ;;  %v1411_v2 = vadd.f32 %v3285_v0, %v3884_v5  ;;  %v1146_v3 = vpop.f32.mrb[55].mxu0  ;;  %v1402_v4 = vpop.f32.mrb[55].mxu1  ;;  %v1500_v8 = vmax.f32 %v1152_v57, 0.0  ;;  %v1564_v9 = vmax.f32 %v1408_v58, 0.0 }
 0x1b6   : > { %v1147_v6 = vadd.f32 %v3884_v5, %v1146_v3  ;;  %v1403_v7 = vadd.f32 %v3884_v5, %v1402_v4  ;;  %v1498_v12 = vmax.f32 %v1144_v61, 0.0  ;;  %v1562_v13 = vmax.f32 %v1400_v62, 0.0 }
 0x1b7   : > { %v1501_v10 = vmax.f32 %v1155_v1, 0.0  ;;  %v1565_v11 = vmax.f32 %v1411_v2, 0.0 }
 0x1b8   : > { %v1499_v14 = vmax.f32 %v1147_v6, 0.0  ;;  %v1563_v15 = vmax.f32 %v1403_v7, 0.0 }
 0x1b9   : > { %v2845_v16 = vpack.c.bf16 %v1501_v10, %v1500_v8  ;;  %v3005_v17 = vpack.c.bf16 %v1565_v11, %v1564_v9 }
 0x1ba   : > { %v2840_v18 = vpack.c.bf16 %v1499_v14, %v1498_v12  ;;  %v3000_v19 = vpack.c.bf16 %v1563_v15, %v1562_v13  ;;  %v3224_v20 = vpop.f32.mrb[56].mxu0  ;;  %v3288_v21 = vpop.f32.mrb[56].mxu1 }
 0x1bb   : > { %3053 = vst [vmem:[%s3897_s19 + $0xd8] sm:$0xff] %v2845_v16   ;;  %3085 = vst [vmem:[%s3897_s19 + $0x1d8] sm:$0xff] %v3005_v17   ;;  %v1168_v22 = vadd.f32 %v3224_v20, %v3884_v5  ;;  %v1424_v23 = vadd.f32 %v3288_v21, %v3884_v5  ;;  %v1159_v24 = vpop.f32.mrb[57].mxu0  ;;  %v1415_v25 = vpop.f32.mrb[57].mxu1 }
 0x1bc   : > { %3052 = vst [vmem:[%s3897_s19 + $0xd0] sm:$0xff] %v2840_v18   ;;  %3084 = vst [vmem:[%s3897_s19 + $0x1d0] sm:$0xff] %v3000_v19   ;;  %v1160_v26 = vadd.f32 %v3884_v5, %v1159_v24  ;;  %v1416_v27 = vadd.f32 %v3884_v5, %v1415_v25  ;;  %v3225_v28 = vpop.f32.mrb[58].mxu0  ;;  %v3289_v29 = vpop.f32.mrb[58].mxu1 }
 0x1bd   : > { %v1171_v30 = vadd.f32 %v3225_v28, %v3884_v5  ;;  %v1427_v31 = vadd.f32 %v3289_v29, %v3884_v5  ;;  %v1162_v32 = vpop.f32.mrb[59].mxu0  ;;  %v1418_v33 = vpop.f32.mrb[59].mxu1  ;;  %v1504_v36 = vmax.f32 %v1168_v22, 0.0  ;;  %v1568_v37 = vmax.f32 %v1424_v23, 0.0 }
 0x1be   : > { %v1163_v34 = vadd.f32 %v3884_v5, %v1162_v32  ;;  %v1419_v35 = vadd.f32 %v3884_v5, %v1418_v33  ;;  %v1502_v40 = vmax.f32 %v1160_v26, 0.0  ;;  %v1566_v41 = vmax.f32 %v1416_v27, 0.0 }
 0x1bf   : > { %v1505_v38 = vmax.f32 %v1171_v30, 0.0  ;;  %v1569_v39 = vmax.f32 %v1427_v31, 0.0 }
 0x1c0   : > { %v1503_v42 = vmax.f32 %v1163_v34, 0.0  ;;  %v1567_v43 = vmax.f32 %v1419_v35, 0.0 }
 0x1c1   : > { %v2855_v44 = vpack.c.bf16 %v1505_v38, %v1504_v36  ;;  %v3015_v45 = vpack.c.bf16 %v1569_v39, %v1568_v37 }
 0x1c2   : > { %v2850_v46 = vpack.c.bf16 %v1503_v42, %v1502_v40  ;;  %v3010_v47 = vpack.c.bf16 %v1567_v43, %v1566_v41  ;;  %v3228_v48 = vpop.f32.mrb[60].mxu0  ;;  %v3292_v49 = vpop.f32.mrb[60].mxu1 }
 0x1c3   : > { %3055 = vst [vmem:[%s3897_s19 + $0xe8] sm:$0xff] %v2855_v44   ;;  %3087 = vst [vmem:[%s3897_s19 + $0x1e8] sm:$0xff] %v3015_v45   ;;  %v1184_v50 = vadd.f32 %v3228_v48, %v3884_v5  ;;  %v1440_v51 = vadd.f32 %v3292_v49, %v3884_v5  ;;  %v1175_v52 = vpop.f32.mrb[61].mxu0  ;;  %v1431_v53 = vpop.f32.mrb[61].mxu1 }
 0x1c4   : > { %3054 = vst [vmem:[%s3897_s19 + $0xe0] sm:$0xff] %v2850_v46   ;;  %3086 = vst [vmem:[%s3897_s19 + $0x1e0] sm:$0xff] %v3010_v47   ;;  %v1176_v54 = vadd.f32 %v3884_v5, %v1175_v52  ;;  %v1432_v55 = vadd.f32 %v3884_v5, %v1431_v53  ;;  %v3229_v56 = vpop.f32.mrb[62].mxu0  ;;  %v3293_v57 = vpop.f32.mrb[62].mxu1 }
 0x1c5   : > { %v1187_v58 = vadd.f32 %v3229_v56, %v3884_v5  ;;  %v1443_v59 = vadd.f32 %v3293_v57, %v3884_v5  ;;  %v1178_v60 = vpop.f32.mrb[63].mxu0  ;;  %v1434_v61 = vpop.f32.mrb[63].mxu1  ;;  %v1508_v0 = vmax.f32 %v1184_v50, 0.0  ;;  %v1572_v1 = vmax.f32 %v1440_v51, 0.0 }
 0x1c6   : > { %v1179_v62 = vadd.f32 %v3884_v5, %v1178_v60  ;;  %v1435_v63 = vadd.f32 %v3884_v5, %v1434_v61  ;;  %v1506_v4 = vmax.f32 %v1176_v54, 0.0  ;;  %v1570_v6 = vmax.f32 %v1432_v55, 0.0 }
 0x1c7   : > { %v1509_v2 = vmax.f32 %v1187_v58, 0.0  ;;  %v1573_v3 = vmax.f32 %v1443_v59, 0.0 }
 0x1c8   : > { %v1507_v7 = vmax.f32 %v1179_v62, 0.0  ;;  %v1571_v8 = vmax.f32 %v1435_v63, 0.0 }
 0x1c9   : > { %v2865_v9 = vpack.c.bf16 %v1509_v2, %v1508_v0  ;;  %v3025_v10 = vpack.c.bf16 %v1573_v3, %v1572_v1 }
 0x1ca   : > { %v2860_v11 = vpack.c.bf16 %v1507_v7, %v1506_v4  ;;  %v3020_v12 = vpack.c.bf16 %v1571_v8, %v1570_v6 }
 0x1cb   : > { %3057 = vst [vmem:[%s3897_s19 + $0xf8] sm:$0xff] %v2865_v9   ;;  %3089 = vst [vmem:[%s3897_s19 + $0x1f8] sm:$0xff] %v3025_v10  }
 0x1cc   : > { %3056 = vst [vmem:[%s3897_s19 + $0xf0] sm:$0xff] %v2860_v11   ;;  %3088 = vst [vmem:[%s3897_s19 + $0x1f0] sm:$0xff] %v3020_v12  }
 0x1cd PF: > { %p14_p6 = scmp.ge.s32.totalorder %s3685_s30, 10   ;;  %s4112_s12 = smov %s3550_s13 }
 0x1ce   : > { %s4113_s13 = smov %s3554_s14  ;;  %s4114_s14 = smov %s3696_s8 }
 0x1cf   : > { %s4115_s15 = smov %s3685_s30  ;;  %16 = sbr.rel (!%p14_p6) target bundleno = 4 (0x4), region = 80 }
 0x1d6   :  { %2236 = vsyncpa [#allocation3], 1 }
 0x1d7   :  { %2238 = vsyncpa [#allocation3 + $0x1], 1 }
 0x1d8   :  { %2239 = vsyncpa [#allocation5], 1 }

// kernel: grdn_forward.60
= control target key start
LH: loop header
LB: loop body
LE: loop exit
PB: predicated region body
PF: predicated region fallthrough
CT: control target
= control target key end

     0   :  { %s1901_s12 = smov 0   ;;  %s2115_s0 = inlined_call_operand.vmem [shape: bf16[1024,108], index: 0, kind: input, shape index: {}]   ;;  %s2116_s1 = inlined_call_operand.vmem [shape: bf16[108,128], index: 1, kind: input, shape index: {}]   ;;  %s2117_s2 = inlined_call_operand.vmem [shape: f32[1,128], index: 2, kind: input, shape index: {}]   ;;  %s2118_s3 = inlined_call_operand.vmem [shape: bf16[1024,128], index: 3, kind: output, shape index: {}]  }
   0x1 LB: > { %s1291_s13 = sadd.s32 4294967295, %s1879_s12   ;;  %p1295_p0 = scmp.ge.s32.totalorder %s1879_s12, 1  ;;  %s1879_s12 = sphi %s1901_s12, %s13_s12  }
   0x2   : > { %p138_p1 = scmp.lt.s32.totalorder %s1879_s12, 3 }
   0x4   : > { %p139_p2 = pnand %p1295_p0, %p138_p1 }
   0x5   : > { %v1834_v0 = vld [vmem:[%s2116_s1] sm:$0xff] (!%p139_p2)   ;;  %v1835_v1 = vld [vmem:[%s2116_s1 + $0x8] sm:$0xff] (!%p139_p2)   ;;  %s1296_s18 = sshll.u32 (!%p139_p2), %s1291_s13, 6  ;;  %v1836_v2 = vld [vmem:[%s2116_s1 + $0x10] sm:$0xff] (!%p139_p2)   ;;  %vm461_vm0 = vcmask (!%p139_p2), 883712   ;;  %vm558_vm1 = vcmask (!%p139_p2), 1045504  }
   0x6   : > { %142 = sbr.rel (%p139_p2) target bundleno = 312 (0x138), region = 32  ;;  %1732 = vmatprep.subr.bf16.mxu0 (!%p139_p2), %v1834_v0  ;;  %1810 = vmatprep.subr.bf16.mxu1 (!%p139_p2), %v1834_v0  ;;  %p163_p3 = scmp.lt.s32.totalorder (!%p139_p2), %s1296_s18, 127  ;;  %v1837_v3 = vld [vmem:[%s2116_s1 + $0x18] sm:$0xff] (!%p139_p2)   ;;  %v1838_v6 = vld [vmem:[%s2116_s1 + $0x20] sm:$0xff] (!%p139_p2)   ;;  %v1839_v7 = vld [vmem:[%s2116_s1 + $0x28] sm:$0xff] (!%p139_p2)  }
   0x7   : > { %1733 = vmatpush3.bf16.msra.mxu0 (!%p139_p2), %v1834_v0  ;;  %1817 = vmatpush3.bf16.msra.mxu1 (!%p139_p2), %v1834_v0  ;;  %v1840_v8 = vld [vmem:[%s2116_s1 + $0x30] sm:$0x3f] (!%p139_p2)   ;;  %v2007_v40 = vld [vmem:[%s2117_s2] ss:$0 sm:$0xff] (!%p139_p2) }
   0x8   : > { %1734 = vmatprep.subr.bf16.mxu0 (!%p139_p2), %v1835_v1  ;;  %1811 = vmatprep.subr.bf16.mxu1 (!%p139_p2), %v1835_v1  ;;  %v560_v9 = vsel (!%p139_p2), %vm558_vm1, %v1840_v8, 0 }
   0xb   : > { %1735 = vmatpush3.bf16.msra.mxu0 (!%p139_p2), %v1835_v1  ;;  %1818 = vmatpush3.bf16.msra.mxu1 (!%p139_p2), %v1835_v1 }
   0xc   : > { %1736 = vmatprep.subr.bf16.mxu0 (!%p139_p2), %v1836_v2  ;;  %1812 = vmatprep.subr.bf16.mxu1 (!%p139_p2), %v1836_v2 }
   0xd   : > { %s2120_s18 = smov (!%p163_p3, %s1296_s18), 127 }
   0xe   : > { %s1297_s21 = sshll.u32 %s2120_s18, 2 }
   0xf   : > { %s1929_s26 = scalar_lea.vmem %s2115_s0, %s1297_s21  ;;  %1737 = vmatpush3.bf16.msra.mxu0 %v1836_v2  ;;  %1819 = vmatpush3.bf16.msra.mxu1 %v1836_v2  ;;  %s2022_s10 = scalar_lea.vmem %s2118_s3, %s1297_s21 }
  0x10   : > { %v1841_v4 = vld [vmem:[%s1929_s26] sm:$0xff]   ;;  %1738 = vmatprep.subr.bf16.mxu0 %v1837_v3  ;;  %1813 = vmatprep.subr.bf16.mxu1 %v1837_v3  ;;  %v1843_v10 = vld [vmem:[%s1929_s26 + $0x8] sm:$0xff]   ;;  %v1845_v12 = vld [vmem:[%s1929_s26 + $0x10] sm:$0xff]  }
  0x11   : > { %v1842_v5 = vld [vmem:[%s1929_s26 + $0x80] sm:$0xff]   ;;  %1746 = vmatprep.mubr.msk.bf16.mxu0 %vm461_vm0, %v1841_v4  ;;  %v1844_v11 = vld [vmem:[%s1929_s26 + $0x88] sm:$0xff]   ;;  %v1846_v13 = vld [vmem:[%s1929_s26 + $0x90] sm:$0xff]  }
  0x12   : > { %1778 = vmatprep.mubr.msk.bf16.mxu1 %vm461_vm0, %v1842_v5  ;;  %v1847_v14 = vld [vmem:[%s1929_s26 + $0x18] sm:$0xff]   ;;  %v1849_v16 = vld [vmem:[%s1929_s26 + $0x20] sm:$0xff]   ;;  %v1851_v18 = vld [vmem:[%s1929_s26 + $0x28] sm:$0xff]  }
  0x13   : > { %1739 = vmatpush3.bf16.msra.mxu0 %v1837_v3  ;;  %1820 = vmatpush3.bf16.msra.mxu1 %v1837_v3  ;;  %v1848_v15 = vld [vmem:[%s1929_s26 + $0x98] sm:$0xff]   ;;  %v1850_v17 = vld [vmem:[%s1929_s26 + $0xa0] sm:$0xff]   ;;  %v1852_v19 = vld [vmem:[%s1929_s26 + $0xa8] sm:$0xff]  }
  0x14   : > { %1740 = vmatprep.subr.bf16.mxu0 %v1838_v6  ;;  %1814 = vmatprep.subr.bf16.mxu1 %v1838_v6  ;;  %v1853_v20 = vld [vmem:[%s1929_s26 + $0x30] sm:$0xff]   ;;  %v1855_v22 = vld [vmem:[%s1929_s26 + $0x38] sm:$0xff]   ;;  %v1857_v24 = vld [vmem:[%s1929_s26 + $0x40] sm:$0xff]  }
  0x15   : > { %v1854_v21 = vld [vmem:[%s1929_s26 + $0xb0] sm:$0xff]   ;;  %v1856_v23 = vld [vmem:[%s1929_s26 + $0xb8] sm:$0xff]   ;;  %v1858_v25 = vld [vmem:[%s1929_s26 + $0xc0] sm:$0xff]  }
  0x16   : > { %v1859_v26 = vld [vmem:[%s1929_s26 + $0x48] sm:$0xff]   ;;  %v1861_v28 = vld [vmem:[%s1929_s26 + $0x50] sm:$0xff]   ;;  %v1863_v30 = vld [vmem:[%s1929_s26 + $0x58] sm:$0xff]  }
  0x17   : > { %1741 = vmatpush3.bf16.msra.mxu0 %v1838_v6  ;;  %1821 = vmatpush3.bf16.msra.mxu1 %v1838_v6  ;;  %v1860_v27 = vld [vmem:[%s1929_s26 + $0xc8] sm:$0xff]   ;;  %v1862_v29 = vld [vmem:[%s1929_s26 + $0xd0] sm:$0xff]   ;;  %v1864_v31 = vld [vmem:[%s1929_s26 + $0xd8] sm:$0xff]  }
  0x18   : > { %1742 = vmatprep.subr.bf16.mxu0 %v1839_v7  ;;  %1815 = vmatprep.subr.bf16.mxu1 %v1839_v7  ;;  %v1865_v32 = vld [vmem:[%s1929_s26 + $0x60] sm:$0xff]   ;;  %v1867_v34 = vld [vmem:[%s1929_s26 + $0x68] sm:$0xff]   ;;  %v1869_v36 = vld [vmem:[%s1929_s26 + $0x70] sm:$0xff]  }
  0x19   : > { %v1866_v33 = vld [vmem:[%s1929_s26 + $0xe0] sm:$0xff]   ;;  %v1868_v35 = vld [vmem:[%s1929_s26 + $0xe8] sm:$0xff]   ;;  %v1870_v37 = vld [vmem:[%s1929_s26 + $0xf0] sm:$0xff]  }
  0x1a   : > { %v1871_v38 = vld [vmem:[%s1929_s26 + $0x78] sm:$0xff]  }
  0x1b   : > { %1743 = vmatpush3.bf16.msra.mxu0 %v1839_v7  ;;  %1822 = vmatpush3.bf16.msra.mxu1 %v1839_v7  ;;  %v1872_v39 = vld [vmem:[%s1929_s26 + $0xf8] sm:$0xff]  }
  0x1c   : > { %1824 = vmatprep.subr.msk.bf16.mxu0 %vm558_vm1, %v1840_v8  ;;  %1825 = vmatprep.subr.msk.bf16.mxu1 %vm558_vm1, %v1840_v8 }
  0x1f   : > { %1745 = vmatpush3.bf16.msra.mxu0 %v560_v9  ;;  %1823 = vmatpush3.bf16.msra.mxu1 %v560_v9 }
  0x22   : > { %1747 = vmatmul.mubr.msk.bf16.vlgmr.msra.gmra.mrb[0].mxu0 %vm461_vm0, %v1843_v10  ;;  %1779 = vmatmul.mubr.msk.bf16.vlgmr.msra.gmra.mrb[0].mxu1 %vm461_vm0, %v1844_v11 }
  0x23   : > { %1750 = vmatprep.mubr.msk.bf16.mxu0 %vm461_vm0, %v1845_v12  ;;  %1782 = vmatprep.mubr.msk.bf16.mxu1 %vm461_vm0, %v1846_v13 }
  0x2a   : > { %1751 = vmatmul.mubr.msk.bf16.gmra.mrb[4].mxu0 %vm461_vm0, %v1847_v14  ;;  %1783 = vmatmul.mubr.msk.bf16.gmra.mrb[4].mxu1 %vm461_vm0, %v1848_v15 }
  0x2b   : > { %1754 = vmatprep.mubr.msk.bf16.mxu0 %vm461_vm0, %v1849_v16  ;;  %1786 = vmatprep.mubr.msk.bf16.mxu1 %vm461_vm0, %v1850_v17 }
  0x32   : > { %1755 = vmatmul.mubr.msk.bf16.gmra.mrb[8].mxu0 %vm461_vm0, %v1851_v18  ;;  %1787 = vmatmul.mubr.msk.bf16.gmra.mrb[8].mxu1 %vm461_vm0, %v1852_v19 }
  0x33   : > { %1758 = vmatprep.mubr.msk.bf16.mxu0 %vm461_vm0, %v1853_v20  ;;  %1790 = vmatprep.mubr.msk.bf16.mxu1 %vm461_vm0, %v1854_v21 }
  0x3a   : > { %1759 = vmatmul.mubr.msk.bf16.gmra.mrb[12].mxu0 %vm461_vm0, %v1855_v22  ;;  %1791 = vmatmul.mubr.msk.bf16.gmra.mrb[12].mxu1 %vm461_vm0, %v1856_v23 }
  0x3b   : > { %1762 = vmatprep.mubr.msk.bf16.mxu0 %vm461_vm0, %v1857_v24  ;;  %1794 = vmatprep.mubr.msk.bf16.mxu1 %vm461_vm0, %v1858_v25 }
  0x42   : > { %1763 = vmatmul.mubr.msk.bf16.gmra.mrb[16].mxu0 %vm461_vm0, %v1859_v26  ;;  %1795 = vmatmul.mubr.msk.bf16.gmra.mrb[16].mxu1 %vm461_vm0, %v1860_v27 }
  0x43   : > { %1766 = vmatprep.mubr.msk.bf16.mxu0 %vm461_vm0, %v1861_v28  ;;  %1798 = vmatprep.mubr.msk.bf16.mxu1 %vm461_vm0, %v1862_v29 }
  0x4a   : > { %1767 = vmatmul.mubr.msk.bf16.gmra.mrb[20].mxu0 %vm461_vm0, %v1863_v30  ;;  %1799 = vmatmul.mubr.msk.bf16.gmra.mrb[20].mxu1 %vm461_vm0, %v1864_v31 }
  0x4b   : > { %1770 = vmatprep.mubr.msk.bf16.mxu0 %vm461_vm0, %v1865_v32  ;;  %1802 = vmatprep.mubr.msk.bf16.mxu1 %vm461_vm0, %v1866_v33 }
  0x52   : > { %1771 = vmatmul.mubr.msk.bf16.gmra.mrb[24].mxu0 %vm461_vm0, %v1867_v34  ;;  %1803 = vmatmul.mubr.msk.bf16.gmra.mrb[24].mxu1 %vm461_vm0, %v1868_v35 }
  0x53   : > { %1774 = vmatprep.mubr.msk.bf16.mxu0 %vm461_vm0, %v1869_v36  ;;  %1806 = vmatprep.mubr.msk.bf16.mxu1 %vm461_vm0, %v1870_v37 }
  0x5a   : > { %1775 = vmatmul.mubr.msk.bf16.gmra.mrb[28].mxu0 %vm461_vm0, %v1871_v38  ;;  %1807 = vmatmul.mubr.msk.bf16.gmra.mrb[28].mxu1 %vm461_vm0, %v1872_v39 }
  0xf5   : > { %v1748_v41 = vpop.f32.mrb[0].mxu0  ;;  %v1780_v42 = vpop.f32.mrb[0].mxu1 }
  0xf6   : > { %v605_v43 = vadd.f32 %v1748_v41, %v2007_v40  ;;  %v733_v44 = vadd.f32 %v1780_v42, %v2007_v40  ;;  %v596_v45 = vpop.f32.mrb[1].mxu0  ;;  %v724_v46 = vpop.f32.mrb[1].mxu1 }
  0xf7   : > { %v597_v47 = vadd.f32 %v2007_v40, %v596_v45  ;;  %v725_v48 = vadd.f32 %v2007_v40, %v724_v46  ;;  %v1749_v49 = vpop.f32.mrb[2].mxu0  ;;  %v1781_v50 = vpop.f32.mrb[2].mxu1 }
  0xf8   : > { %v608_v51 = vadd.f32 %v1749_v49, %v2007_v40  ;;  %v736_v52 = vadd.f32 %v1781_v50, %v2007_v40  ;;  %v599_v53 = vpop.f32.mrb[3].mxu0  ;;  %v727_v54 = vpop.f32.mrb[3].mxu1  ;;  %v853_v57 = vmax.f32 %v605_v43, 0.0  ;;  %v885_v58 = vmax.f32 %v733_v44, 0.0 }
  0xf9   : > { %v600_v55 = vadd.f32 %v2007_v40, %v599_v53  ;;  %v728_v56 = vadd.f32 %v2007_v40, %v727_v54  ;;  %v851_v61 = vmax.f32 %v597_v47, 0.0  ;;  %v883_v62 = vmax.f32 %v725_v48, 0.0 }
  0xfa   : > { %v854_v59 = vmax.f32 %v608_v51, 0.0  ;;  %v886_v60 = vmax.f32 %v736_v52, 0.0 }
  0xfb   : > { %v852_v63 = vmax.f32 %v600_v55, 0.0  ;;  %v884_v0 = vmax.f32 %v728_v56, 0.0 }
  0xfc   : > { %v1510_v1 = vpack.c.bf16 %v854_v59, %v853_v57  ;;  %v1590_v2 = vpack.c.bf16 %v886_v60, %v885_v58 }
  0xfd   : > { %v1505_v3 = vpack.c.bf16 %v852_v63, %v851_v61  ;;  %v1585_v4 = vpack.c.bf16 %v884_v0, %v883_v62  ;;  %v1752_v5 = vpop.f32.mrb[4].mxu0  ;;  %v1784_v6 = vpop.f32.mrb[4].mxu1 }
  0xfe   : > { %1662 = vst [vmem:[%s2022_s10 + $0x8] sm:$0xff] %v1510_v1   ;;  %1678 = vst [vmem:[%s2022_s10 + $0x88] sm:$0xff] %v1590_v2   ;;  %v621_v7 = vadd.f32 %v1752_v5, %v2007_v40  ;;  %v749_v8 = vadd.f32 %v1784_v6, %v2007_v40  ;;  %v612_v9 = vpop.f32.mrb[5].mxu0  ;;  %v740_v10 = vpop.f32.mrb[5].mxu1 }
  0xff   : > { %1506 = vst [vmem:[%s2022_s10] sm:$0xff] %v1505_v3   ;;  %1677 = vst [vmem:[%s2022_s10 + $0x80] sm:$0xff] %v1585_v4   ;;  %v613_v11 = vadd.f32 %v2007_v40, %v612_v9  ;;  %v741_v12 = vadd.f32 %v2007_v40, %v740_v10  ;;  %v1753_v13 = vpop.f32.mrb[6].mxu0  ;;  %v1785_v14 = vpop.f32.mrb[6].mxu1 }
 0x100   : > { %v624_v15 = vadd.f32 %v1753_v13, %v2007_v40  ;;  %v752_v16 = vadd.f32 %v1785_v14, %v2007_v40  ;;  %v615_v17 = vpop.f32.mrb[7].mxu0  ;;  %v743_v18 = vpop.f32.mrb[7].mxu1  ;;  %v857_v21 = vmax.f32 %v621_v7, 0.0  ;;  %v889_v22 = vmax.f32 %v749_v8, 0.0 }
 0x101   : > { %v616_v19 = vadd.f32 %v2007_v40, %v615_v17  ;;  %v744_v20 = vadd.f32 %v2007_v40, %v743_v18  ;;  %v855_v25 = vmax.f32 %v613_v11, 0.0  ;;  %v887_v26 = vmax.f32 %v741_v12, 0.0 }
 0x102   : > { %v858_v23 = vmax.f32 %v624_v15, 0.0  ;;  %v890_v24 = vmax.f32 %v752_v16, 0.0 }
 0x103   : > { %v856_v27 = vmax.f32 %v616_v19, 0.0  ;;  %v888_v28 = vmax.f32 %v744_v20, 0.0 }
 0x104   : > { %v1520_v29 = vpack.c.bf16 %v858_v23, %v857_v21  ;;  %v1600_v30 = vpack.c.bf16 %v890_v24, %v889_v22 }
 0x105   : > { %v1515_v31 = vpack.c.bf16 %v856_v27, %v855_v25  ;;  %v1595_v32 = vpack.c.bf16 %v888_v28, %v887_v26  ;;  %v1756_v33 = vpop.f32.mrb[8].mxu0  ;;  %v1788_v34 = vpop.f32.mrb[8].mxu1 }
 0x106   : > { %1664 = vst [vmem:[%s2022_s10 + $0x18] sm:$0xff] %v1520_v29   ;;  %1680 = vst [vmem:[%s2022_s10 + $0x98] sm:$0xff] %v1600_v30   ;;  %v637_v35 = vadd.f32 %v1756_v33, %v2007_v40  ;;  %v765_v36 = vadd.f32 %v1788_v34, %v2007_v40  ;;  %v628_v37 = vpop.f32.mrb[9].mxu0  ;;  %v756_v38 = vpop.f32.mrb[9].mxu1 }
 0x107   : > { %1663 = vst [vmem:[%s2022_s10 + $0x10] sm:$0xff] %v1515_v31   ;;  %1679 = vst [vmem:[%s2022_s10 + $0x90] sm:$0xff] %v1595_v32   ;;  %v629_v39 = vadd.f32 %v2007_v40, %v628_v37  ;;  %v757_v41 = vadd.f32 %v2007_v40, %v756_v38  ;;  %v1757_v42 = vpop.f32.mrb[10].mxu0  ;;  %v1789_v43 = vpop.f32.mrb[10].mxu1 }
 0x108   : > { %v640_v44 = vadd.f32 %v1757_v42, %v2007_v40  ;;  %v768_v45 = vadd.f32 %v1789_v43, %v2007_v40  ;;  %v631_v46 = vpop.f32.mrb[11].mxu0  ;;  %v759_v47 = vpop.f32.mrb[11].mxu1  ;;  %v861_v50 = vmax.f32 %v637_v35, 0.0  ;;  %v893_v51 = vmax.f32 %v765_v36, 0.0 }
 0x109   : > { %v632_v48 = vadd.f32 %v2007_v40, %v631_v46  ;;  %v760_v49 = vadd.f32 %v2007_v40, %v759_v47  ;;  %v859_v54 = vmax.f32 %v629_v39, 0.0  ;;  %v891_v55 = vmax.f32 %v757_v41, 0.0 }
 0x10a   : > { %v862_v52 = vmax.f32 %v640_v44, 0.0  ;;  %v894_v53 = vmax.f32 %v768_v45, 0.0 }
 0x10b   : > { %v860_v56 = vmax.f32 %v632_v48, 0.0  ;;  %v892_v57 = vmax.f32 %v760_v49, 0.0 }
 0x10c   : > { %v1530_v58 = vpack.c.bf16 %v862_v52, %v861_v50  ;;  %v1610_v59 = vpack.c.bf16 %v894_v53, %v893_v51 }
 0x10d   : > { %v1525_v60 = vpack.c.bf16 %v860_v56, %v859_v54  ;;  %v1605_v61 = vpack.c.bf16 %v892_v57, %v891_v55  ;;  %v1760_v62 = vpop.f32.mrb[12].mxu0  ;;  %v1792_v63 = vpop.f32.mrb[12].mxu1 }
 0x10e   : > { %1666 = vst [vmem:[%s2022_s10 + $0x28] sm:$0xff] %v1530_v58   ;;  %1682 = vst [vmem:[%s2022_s10 + $0xa8] sm:$0xff] %v1610_v59   ;;  %v653_v0 = vadd.f32 %v1760_v62, %v2007_v40  ;;  %v781_v1 = vadd.f32 %v1792_v63, %v2007_v40  ;;  %v644_v2 = vpop.f32.mrb[13].mxu0  ;;  %v772_v3 = vpop.f32.mrb[13].mxu1 }
 0x10f   : > { %1665 = vst [vmem:[%s2022_s10 + $0x20] sm:$0xff] %v1525_v60   ;;  %1681 = vst [vmem:[%s2022_s10 + $0xa0] sm:$0xff] %v1605_v61   ;;  %v645_v4 = vadd.f32 %v2007_v40, %v644_v2  ;;  %v773_v5 = vadd.f32 %v2007_v40, %v772_v3  ;;  %v1761_v6 = vpop.f32.mrb[14].mxu0  ;;  %v1793_v7 = vpop.f32.mrb[14].mxu1 }
 0x110   : > { %v656_v8 = vadd.f32 %v1761_v6, %v2007_v40  ;;  %v784_v9 = vadd.f32 %v1793_v7, %v2007_v40  ;;  %v647_v10 = vpop.f32.mrb[15].mxu0  ;;  %v775_v11 = vpop.f32.mrb[15].mxu1  ;;  %v865_v14 = vmax.f32 %v653_v0, 0.0  ;;  %v897_v15 = vmax.f32 %v781_v1, 0.0 }
 0x111   : > { %v648_v12 = vadd.f32 %v2007_v40, %v647_v10  ;;  %v776_v13 = vadd.f32 %v2007_v40, %v775_v11  ;;  %v863_v18 = vmax.f32 %v645_v4, 0.0  ;;  %v895_v19 = vmax.f32 %v773_v5, 0.0 }
 0x112   : > { %v866_v16 = vmax.f32 %v656_v8, 0.0  ;;  %v898_v17 = vmax.f32 %v784_v9, 0.0 }
 0x113   : > { %v864_v20 = vmax.f32 %v648_v12, 0.0  ;;  %v896_v21 = vmax.f32 %v776_v13, 0.0 }
 0x114   : > { %v1540_v22 = vpack.c.bf16 %v866_v16, %v865_v14  ;;  %v1620_v23 = vpack.c.bf16 %v898_v17, %v897_v15 }
 0x115   : > { %v1535_v24 = vpack.c.bf16 %v864_v20, %v863_v18  ;;  %v1615_v25 = vpack.c.bf16 %v896_v21, %v895_v19  ;;  %v1764_v26 = vpop.f32.mrb[16].mxu0  ;;  %v1796_v27 = vpop.f32.mrb[16].mxu1 }
 0x116   : > { %1668 = vst [vmem:[%s2022_s10 + $0x38] sm:$0xff] %v1540_v22   ;;  %1684 = vst [vmem:[%s2022_s10 + $0xb8] sm:$0xff] %v1620_v23   ;;  %v669_v28 = vadd.f32 %v1764_v26, %v2007_v40  ;;  %v797_v29 = vadd.f32 %v1796_v27, %v2007_v40  ;;  %v660_v30 = vpop.f32.mrb[17].mxu0  ;;  %v788_v31 = vpop.f32.mrb[17].mxu1 }
 0x117   : > { %1667 = vst [vmem:[%s2022_s10 + $0x30] sm:$0xff] %v1535_v24   ;;  %1683 = vst [vmem:[%s2022_s10 + $0xb0] sm:$0xff] %v1615_v25   ;;  %v661_v32 = vadd.f32 %v2007_v40, %v660_v30  ;;  %v789_v33 = vadd.f32 %v2007_v40, %v788_v31  ;;  %v1765_v34 = vpop.f32.mrb[18].mxu0  ;;  %v1797_v35 = vpop.f32.mrb[18].mxu1 }
 0x118   : > { %v672_v36 = vadd.f32 %v1765_v34, %v2007_v40  ;;  %v800_v37 = vadd.f32 %v1797_v35, %v2007_v40  ;;  %v663_v38 = vpop.f32.mrb[19].mxu0  ;;  %v791_v39 = vpop.f32.mrb[19].mxu1  ;;  %v869_v43 = vmax.f32 %v669_v28, 0.0  ;;  %v901_v44 = vmax.f32 %v797_v29, 0.0 }
 0x119   : > { %v664_v41 = vadd.f32 %v2007_v40, %v663_v38  ;;  %v792_v42 = vadd.f32 %v2007_v40, %v791_v39  ;;  %v867_v47 = vmax.f32 %v661_v32, 0.0  ;;  %v899_v48 = vmax.f32 %v789_v33, 0.0 }
 0x11a   : > { %v870_v45 = vmax.f32 %v672_v36, 0.0  ;;  %v902_v46 = vmax.f32 %v800_v37, 0.0 }
 0x11b   : > { %v868_v49 = vmax.f32 %v664_v41, 0.0  ;;  %v900_v50 = vmax.f32 %v792_v42, 0.0 }
 0x11c   : > { %v1550_v51 = vpack.c.bf16 %v870_v45, %v869_v43  ;;  %v1630_v52 = vpack.c.bf16 %v902_v46, %v901_v44 }
 0x11d   : > { %v1545_v53 = vpack.c.bf16 %v868_v49, %v867_v47  ;;  %v1625_v54 = vpack.c.bf16 %v900_v50, %v899_v48  ;;  %v1768_v55 = vpop.f32.mrb[20].mxu0  ;;  %v1800_v56 = vpop.f32.mrb[20].mxu1 }
 0x11e   : > { %1670 = vst [vmem:[%s2022_s10 + $0x48] sm:$0xff] %v1550_v51   ;;  %1686 = vst [vmem:[%s2022_s10 + $0xc8] sm:$0xff] %v1630_v52   ;;  %v685_v57 = vadd.f32 %v1768_v55, %v2007_v40  ;;  %v813_v58 = vadd.f32 %v1800_v56, %v2007_v40  ;;  %v676_v59 = vpop.f32.mrb[21].mxu0  ;;  %v804_v60 = vpop.f32.mrb[21].mxu1 }
 0x11f   : > { %1669 = vst [vmem:[%s2022_s10 + $0x40] sm:$0xff] %v1545_v53   ;;  %1685 = vst [vmem:[%s2022_s10 + $0xc0] sm:$0xff] %v1625_v54   ;;  %v677_v61 = vadd.f32 %v2007_v40, %v676_v59  ;;  %v805_v62 = vadd.f32 %v2007_v40, %v804_v60  ;;  %v1769_v63 = vpop.f32.mrb[22].mxu0  ;;  %v1801_v0 = vpop.f32.mrb[22].mxu1 }
 0x120   : > { %v688_v1 = vadd.f32 %v1769_v63, %v2007_v40  ;;  %v816_v2 = vadd.f32 %v1801_v0, %v2007_v40  ;;  %v679_v3 = vpop.f32.mrb[23].mxu0  ;;  %v807_v4 = vpop.f32.mrb[23].mxu1  ;;  %v873_v7 = vmax.f32 %v685_v57, 0.0  ;;  %v905_v8 = vmax.f32 %v813_v58, 0.0 }
 0x121   : > { %v680_v5 = vadd.f32 %v2007_v40, %v679_v3  ;;  %v808_v6 = vadd.f32 %v2007_v40, %v807_v4  ;;  %v871_v11 = vmax.f32 %v677_v61, 0.0  ;;  %v903_v12 = vmax.f32 %v805_v62, 0.0 }
 0x122   : > { %v874_v9 = vmax.f32 %v688_v1, 0.0  ;;  %v906_v10 = vmax.f32 %v816_v2, 0.0 }
 0x123   : > { %v872_v13 = vmax.f32 %v680_v5, 0.0  ;;  %v904_v14 = vmax.f32 %v808_v6, 0.0 }
 0x124   : > { %v1560_v15 = vpack.c.bf16 %v874_v9, %v873_v7  ;;  %v1640_v16 = vpack.c.bf16 %v906_v10, %v905_v8 }
 0x125   : > { %v1555_v17 = vpack.c.bf16 %v872_v13, %v871_v11  ;;  %v1635_v18 = vpack.c.bf16 %v904_v14, %v903_v12  ;;  %v1772_v19 = vpop.f32.mrb[24].mxu0  ;;  %v1804_v20 = vpop.f32.mrb[24].mxu1 }
 0x126   : > { %1672 = vst [vmem:[%s2022_s10 + $0x58] sm:$0xff] %v1560_v15   ;;  %1688 = vst [vmem:[%s2022_s10 + $0xd8] sm:$0xff] %v1640_v16   ;;  %v701_v21 = vadd.f32 %v1772_v19, %v2007_v40  ;;  %v829_v22 = vadd.f32 %v1804_v20, %v2007_v40  ;;  %v692_v23 = vpop.f32.mrb[25].mxu0  ;;  %v820_v24 = vpop.f32.mrb[25].mxu1 }
 0x127   : > { %1671 = vst [vmem:[%s2022_s10 + $0x50] sm:$0xff] %v1555_v17   ;;  %1687 = vst [vmem:[%s2022_s10 + $0xd0] sm:$0xff] %v1635_v18   ;;  %v693_v25 = vadd.f32 %v2007_v40, %v692_v23  ;;  %v821_v26 = vadd.f32 %v2007_v40, %v820_v24  ;;  %v1773_v27 = vpop.f32.mrb[26].mxu0  ;;  %v1805_v28 = vpop.f32.mrb[26].mxu1 }
 0x128   : > { %v704_v29 = vadd.f32 %v1773_v27, %v2007_v40  ;;  %v832_v30 = vadd.f32 %v1805_v28, %v2007_v40  ;;  %v695_v31 = vpop.f32.mrb[27].mxu0  ;;  %v823_v32 = vpop.f32.mrb[27].mxu1  ;;  %v877_v35 = vmax.f32 %v701_v21, 0.0  ;;  %v909_v36 = vmax.f32 %v829_v22, 0.0 }
 0x129   : > { %v696_v33 = vadd.f32 %v2007_v40, %v695_v31  ;;  %v824_v34 = vadd.f32 %v2007_v40, %v823_v32  ;;  %v875_v39 = vmax.f32 %v693_v25, 0.0  ;;  %v907_v41 = vmax.f32 %v821_v26, 0.0 }
 0x12a   : > { %v878_v37 = vmax.f32 %v704_v29, 0.0  ;;  %v910_v38 = vmax.f32 %v832_v30, 0.0 }
 0x12b   : > { %v876_v42 = vmax.f32 %v696_v33, 0.0  ;;  %v908_v43 = vmax.f32 %v824_v34, 0.0 }
 0x12c   : > { %v1570_v44 = vpack.c.bf16 %v878_v37, %v877_v35  ;;  %v1650_v45 = vpack.c.bf16 %v910_v38, %v909_v36 }
 0x12d   : > { %v1565_v46 = vpack.c.bf16 %v876_v42, %v875_v39  ;;  %v1645_v47 = vpack.c.bf16 %v908_v43, %v907_v41  ;;  %v1776_v48 = vpop.f32.mrb[28].mxu0  ;;  %v1808_v49 = vpop.f32.mrb[28].mxu1 }
 0x12e   : > { %1674 = vst [vmem:[%s2022_s10 + $0x68] sm:$0xff] %v1570_v44   ;;  %1690 = vst [vmem:[%s2022_s10 + $0xe8] sm:$0xff] %v1650_v45   ;;  %v717_v50 = vadd.f32 %v1776_v48, %v2007_v40  ;;  %v845_v51 = vadd.f32 %v1808_v49, %v2007_v40  ;;  %v708_v52 = vpop.f32.mrb[29].mxu0  ;;  %v836_v53 = vpop.f32.mrb[29].mxu1 }
 0x12f   : > { %1673 = vst [vmem:[%s2022_s10 + $0x60] sm:$0xff] %v1565_v46   ;;  %1689 = vst [vmem:[%s2022_s10 + $0xe0] sm:$0xff] %v1645_v47   ;;  %v709_v54 = vadd.f32 %v2007_v40, %v708_v52  ;;  %v837_v55 = vadd.f32 %v2007_v40, %v836_v53  ;;  %v1777_v56 = vpop.f32.mrb[30].mxu0  ;;  %v1809_v57 = vpop.f32.mrb[30].mxu1 }
 0x130   : > { %v720_v58 = vadd.f32 %v1777_v56, %v2007_v40  ;;  %v848_v59 = vadd.f32 %v1809_v57, %v2007_v40  ;;  %v711_v60 = vpop.f32.mrb[31].mxu0  ;;  %v839_v61 = vpop.f32.mrb[31].mxu1  ;;  %v881_v0 = vmax.f32 %v717_v50, 0.0  ;;  %v913_v1 = vmax.f32 %v845_v51, 0.0 }
 0x131   : > { %v712_v62 = vadd.f32 %v2007_v40, %v711_v60  ;;  %v840_v63 = vadd.f32 %v2007_v40, %v839_v61  ;;  %v879_v4 = vmax.f32 %v709_v54, 0.0  ;;  %v911_v5 = vmax.f32 %v837_v55, 0.0 }
 0x132   : > { %v882_v2 = vmax.f32 %v720_v58, 0.0  ;;  %v914_v3 = vmax.f32 %v848_v59, 0.0 }
 0x133   : > { %v880_v6 = vmax.f32 %v712_v62, 0.0  ;;  %v912_v7 = vmax.f32 %v840_v63, 0.0 }
 0x134   : > { %v1580_v8 = vpack.c.bf16 %v882_v2, %v881_v0  ;;  %v1660_v9 = vpack.c.bf16 %v914_v3, %v913_v1 }
 0x135   : > { %v1575_v10 = vpack.c.bf16 %v880_v6, %v879_v4  ;;  %v1655_v11 = vpack.c.bf16 %v912_v7, %v911_v5 }
 0x136   : > { %1676 = vst [vmem:[%s2022_s10 + $0x78] sm:$0xff] %v1580_v8   ;;  %1692 = vst [vmem:[%s2022_s10 + $0xf8] sm:$0xff] %v1660_v9  }
 0x137   : > { %1675 = vst [vmem:[%s2022_s10 + $0x70] sm:$0xff] %v1575_v10   ;;  %1691 = vst [vmem:[%s2022_s10 + $0xf0] sm:$0xff] %v1655_v11  }
 0x138 PF: > { %s13_s12 = sadd.s32 1, %s1879_s12  }
 0x139   : > { %p10_p4 = scmp.ge.s32.totalorder %s13_s12, 4  }
 0x13b   :  { %12 = sbr.rel (!%p10_p4) target bundleno = 1 (0x1), region = 62 }

// kernel: grdn_forward.61
= control target key start
LH: loop header
LB: loop body
LE: loop exit
PB: predicated region body
PF: predicated region fallthrough
CT: control target
= control target key end

     0   :  { %s694_s12 = smov 0   ;;  %s802_s0 = inlined_call_operand.vmem [shape: bf16[128,216], index: 0, kind: input, shape index: {}]   ;;  %s803_s1 = inlined_call_operand.vmem [shape: bf16[216,128], index: 1, kind: input, shape index: {}]   ;;  %s804_s2 = inlined_call_operand.vmem [shape: f32[1,128], index: 2, kind: input, shape index: {}]   ;;  %s805_s3 = inlined_call_operand.vmem [shape: bf16[128,128], index: 3, kind: output, shape index: {}]  }
   0x1 LB: > { %s523_s13 = sadd.s32 4294967295, %s671_s12   ;;  %p527_p0 = scmp.ge.s32.totalorder %s671_s12, 1  ;;  %s671_s12 = sphi %s694_s12, %s13_s12  }
   0x2   : > { %p139_p1 = scmp.lt.s32.totalorder %s671_s12, 3 }
   0x4   : > { %p140_p2 = pnand %p527_p0, %p139_p1 }
   0x5   : > { %v639_v0 = vld [vmem:[%s803_s1] sm:$0xff] (!%p140_p2)   ;;  %v673_v1 = vmov (!%p140_p2), 0   ;;  %v640_v2 = vld [vmem:[%s803_s1 + $0x8] sm:$0xff] (!%p140_p2)   ;;  %s528_s18 = sshll.u32 (!%p140_p2), %s523_s13, 3  ;;  %v641_v3 = vld [vmem:[%s803_s1 + $0x10] sm:$0xff] (!%p140_p2)   ;;  %vm337_vm0 = vcmask (!%p140_p2), 719872  }
   0x6   : > { %143 = sbr.rel (%p140_p2) target bundleno = 291 (0x123), region = 32  ;;  %354 = vmatprep.subr.bf16.mxu0 (!%p140_p2), %v673_v1  ;;  %602 = vmatprep.subr.bf16.mxu1 (!%p140_p2), %v673_v1  ;;  %p165_p3 = scmp.lt.s32.totalorder (!%p140_p2), %s528_s18, 15  ;;  %v642_v4 = vld [vmem:[%s803_s1 + $0x18] sm:$0xff] (!%p140_p2)   ;;  %v643_v5 = vld [vmem:[%s803_s1 + $0x20] sm:$0xff] (!%p140_p2)   ;;  %v644_v8 = vld [vmem:[%s803_s1 + $0x28] sm:$0xff] (!%p140_p2)   ;;  %vm350_vm1 = vcmask (!%p140_p2), 1043456  }
   0x7   : > { %355 = vmatpush1.bf16.msra.mxu0 (!%p140_p2), %v639_v0  ;;  %616 = vmatpush1.bf16.msra.mxu1 (!%p140_p2), %v639_v0  ;;  %v645_v9 = vld [vmem:[%s803_s1 + $0x30] sm:$0xff] (!%p140_p2)   ;;  %v646_v10 = vld [vmem:[%s803_s1 + $0x38] sm:$0xff] (!%p140_p2)   ;;  %v647_v11 = vld [vmem:[%s803_s1 + $0x40] sm:$0xff] (!%p140_p2)  }
   0x8   : > { %356 = vmatprep.subr.bf16.mxu0 (!%p140_p2), %v673_v1  ;;  %603 = vmatprep.subr.bf16.mxu1 (!%p140_p2), %v673_v1  ;;  %v648_v12 = vld [vmem:[%s803_s1 + $0x48] sm:$0xff] (!%p140_p2)   ;;  %v649_v13 = vld [vmem:[%s803_s1 + $0x50] sm:$0xff] (!%p140_p2)   ;;  %v650_v14 = vld [vmem:[%s803_s1 + $0x58] sm:$0xff] (!%p140_p2)  }
   0x9   : > { %v651_v15 = vld [vmem:[%s803_s1 + $0x60] sm:$0xff] (!%p140_p2)   ;;  %v652_v16 = vld [vmem:[%s803_s1 + $0x68] ss:$0 sps:$4 sm:$0xff] (!%p140_p2)  }
   0xa   : > { %v352_v17 = vsel (!%p140_p2), %vm350_vm1, %v652_v16, 0  ;;  %v533_v24 = vld [vmem:[%s804_s2] ss:$0 sm:$0xff] (!%p140_p2) }
   0xb   : > { %357 = vmatpush1.bf16.msra.mxu0 (!%p140_p2), %v640_v2  ;;  %617 = vmatpush1.bf16.msra.mxu1 (!%p140_p2), %v640_v2 }
   0xc   : > { %358 = vmatprep.subr.bf16.mxu0 (!%p140_p2), %v673_v1  ;;  %604 = vmatprep.subr.bf16.mxu1 (!%p140_p2), %v673_v1 }
   0xd   : > { %s807_s18 = smov (!%p165_p3, %s528_s18), 15 }
   0xe   : > { %s570_s21 = sshll.u32 %s807_s18, 3  ;;  %s532_s24 = sshll.u32 %s807_s18, 2 }
   0xf   : > { %359 = vmatpush1.bf16.msra.mxu0 %v641_v3  ;;  %618 = vmatpush1.bf16.msra.mxu1 %v641_v3  ;;  %s728_s26 = scalar_lea.vmem %s802_s0, %s570_s21  ;;  %s175_s27 = scalar_lea.vmem %s805_s3, %s532_s24 }
  0x10   : > { %360 = vmatprep.subr.bf16.mxu0 %v673_v1  ;;  %605 = vmatprep.subr.bf16.mxu1 %v673_v1  ;;  %v655_v6 = vld [vmem:[%s728_s26 + $0x4] ss:$8 sps:$4 sm:$0xff]   ;;  %v653_v18 = vld [vmem:[%s728_s26] ss:$8 sps:$4 sm:$0xff]   ;;  %v659_v20 = vld [vmem:[%s728_s26 + $0x14] ss:$8 sps:$4 sm:$0xff]  }
  0x11   : > { %556 = vmatprep.mubr.msk.bf16.mxu0 %vm337_vm0, %v655_v6  ;;  %v658_v7 = vld [vmem:[%s728_s26 + $0x24] ss:$8 sps:$4 sm:$0xff]   ;;  %v656_v19 = vld [vmem:[%s728_s26 + $0x20] ss:$8 sps:$4 sm:$0xff]   ;;  %v661_v21 = vld [vmem:[%s728_s26 + $0x34] ss:$8 sps:$4 sm:$0xff]  }
  0x12   : > { %558 = vmatprep.mubr.msk.bf16.mxu1 %vm337_vm0, %v658_v7  ;;  %v663_v22 = vld [vmem:[%s728_s26 + $0x10] ss:$8 sps:$4 sm:$0xff]  }
  0x13   : > { %361 = vmatpush1.bf16.msra.mxu0 %v642_v4  ;;  %619 = vmatpush1.bf16.msra.mxu1 %v642_v4  ;;  %v664_v23 = vld [vmem:[%s728_s26 + $0x30] ss:$8 sps:$4 sm:$0xff]  }
  0x14   : > { %362 = vmatprep.subr.bf16.mxu0 %v673_v1  ;;  %606 = vmatprep.subr.bf16.mxu1 %v673_v1 }
  0x17   : > { %363 = vmatpush1.bf16.msra.mxu0 %v643_v5  ;;  %620 = vmatpush1.bf16.msra.mxu1 %v643_v5 }
  0x18   : > { %364 = vmatprep.subr.bf16.mxu0 %v673_v1  ;;  %607 = vmatprep.subr.bf16.mxu1 %v673_v1 }
  0x1b   : > { %365 = vmatpush1.bf16.msra.mxu0 %v644_v8  ;;  %621 = vmatpush1.bf16.msra.mxu1 %v644_v8 }
  0x1c   : > { %366 = vmatprep.subr.bf16.mxu0 %v673_v1  ;;  %608 = vmatprep.subr.bf16.mxu1 %v673_v1 }
  0x1f   : > { %367 = vmatpush1.bf16.msra.mxu0 %v645_v9  ;;  %622 = vmatpush1.bf16.msra.mxu1 %v645_v9 }
  0x20   : > { %368 = vmatprep.subr.bf16.mxu0 %v673_v1  ;;  %609 = vmatprep.subr.bf16.mxu1 %v673_v1 }
  0x23   : > { %369 = vmatpush1.bf16.msra.mxu0 %v646_v10  ;;  %623 = vmatpush1.bf16.msra.mxu1 %v646_v10 }
  0x24   : > { %370 = vmatprep.subr.bf16.mxu0 %v673_v1  ;;  %610 = vmatprep.subr.bf16.mxu1 %v673_v1 }
  0x27   : > { %371 = vmatpush1.bf16.msra.mxu0 %v647_v11  ;;  %624 = vmatpush1.bf16.msra.mxu1 %v647_v11 }
  0x28   : > { %372 = vmatprep.subr.bf16.mxu0 %v673_v1  ;;  %611 = vmatprep.subr.bf16.mxu1 %v673_v1 }
  0x2b   : > { %373 = vmatpush1.bf16.msra.mxu0 %v648_v12  ;;  %625 = vmatpush1.bf16.msra.mxu1 %v648_v12 }
  0x2c   : > { %374 = vmatprep.subr.bf16.mxu0 %v673_v1  ;;  %612 = vmatprep.subr.bf16.mxu1 %v673_v1 }
  0x2f   : > { %375 = vmatpush1.bf16.msra.mxu0 %v649_v13  ;;  %626 = vmatpush1.bf16.msra.mxu1 %v649_v13 }
  0x30   : > { %376 = vmatprep.subr.bf16.mxu0 %v673_v1  ;;  %613 = vmatprep.subr.bf16.mxu1 %v673_v1 }
  0x33   : > { %377 = vmatpush1.bf16.msra.mxu0 %v650_v14  ;;  %627 = vmatpush1.bf16.msra.mxu1 %v650_v14 }
  0x34   : > { %378 = vmatprep.subr.bf16.mxu0 %v673_v1  ;;  %614 = vmatprep.subr.bf16.mxu1 %v673_v1 }
  0x37   : > { %379 = vmatpush1.bf16.msra.mxu0 %v651_v15  ;;  %628 = vmatpush1.bf16.msra.mxu1 %v651_v15 }
  0x38   : > { %380 = vmatprep.subr.bf16.mxu0 %v673_v1  ;;  %615 = vmatprep.subr.bf16.mxu1 %v673_v1 }
  0x3b   : > { %381 = vmatpush1.bf16.msra.mxu0 %v352_v17  ;;  %629 = vmatpush1.bf16.msra.mxu1 %v352_v17 }
  0x3e   : > { %387 = vmatmul.mubr.bf16.vlgmr.msra.gmra.mrb[0].mxu0 %v653_v18  ;;  %403 = vmatmul.mubr.bf16.vlgmr.msra.gmra.mrb[0].mxu1 %v656_v19 }
  0x3f   : > { %557 = vmatprep.mubr.msk.bf16.mxu0 %vm337_vm0, %v659_v20  ;;  %559 = vmatprep.mubr.msk.bf16.mxu1 %vm337_vm0, %v661_v21 }
  0x46   : > { %395 = vmatmul.mubr.bf16.gmra.mrb[4].mxu0 %v663_v22  ;;  %411 = vmatmul.mubr.bf16.gmra.mrb[4].mxu1 %v664_v23 }
 0x111   : > { %v388_v25 = vpop.f32.mrb[0].mxu0  ;;  %v404_v26 = vpop.f32.mrb[0].mxu1 }
 0x112   : > { %v389_v27 = vadd.f32 %v533_v24, %v388_v25  ;;  %v405_v28 = vadd.f32 %v533_v24, %v404_v26  ;;  %v390_v29 = vpop.f32.mrb[1].mxu0  ;;  %v406_v30 = vpop.f32.mrb[1].mxu1 }
 0x113   : > { %v391_v31 = vpop.f32.mrb[2].mxu0  ;;  %v407_v32 = vpop.f32.mrb[2].mxu1 }
 0x114   : > { %v392_v33 = vadd.f32 %v533_v24, %v391_v31  ;;  %v408_v34 = vadd.f32 %v533_v24, %v407_v32  ;;  %v393_v35 = vpop.f32.mrb[3].mxu0  ;;  %v409_v36 = vpop.f32.mrb[3].mxu1  ;;  %v419_v37 = vmax.f32 %v389_v27, 0.0  ;;  %v423_v38 = vmax.f32 %v405_v28, 0.0 }
 0x116   : > { %v420_v39 = vmax.f32 %v392_v33, 0.0  ;;  %v424_v40 = vmax.f32 %v408_v34, 0.0 }
 0x118   : > { %v582_v41 = vpack.c.bf16 %v420_v39, %v419_v37  ;;  %v592_v42 = vpack.c.bf16 %v424_v40, %v423_v38 }
 0x119   : > { %v396_v43 = vpop.f32.mrb[4].mxu0  ;;  %v412_v44 = vpop.f32.mrb[4].mxu1 }
 0x11a   : > { %583 = vst [vmem:[%s175_s27] sm:$0xff] %v582_v41   ;;  %600 = vst [vmem:[%s175_s27 + $0x10] sm:$0xff] %v592_v42   ;;  %v397_v45 = vadd.f32 %v533_v24, %v396_v43  ;;  %v413_v46 = vadd.f32 %v533_v24, %v412_v44  ;;  %v398_v47 = vpop.f32.mrb[5].mxu0  ;;  %v414_v48 = vpop.f32.mrb[5].mxu1 }
 0x11b   : > { %v399_v49 = vpop.f32.mrb[6].mxu0  ;;  %v415_v50 = vpop.f32.mrb[6].mxu1 }
 0x11c   : > { %v400_v51 = vadd.f32 %v533_v24, %v399_v49  ;;  %v416_v52 = vadd.f32 %v533_v24, %v415_v50  ;;  %v401_v53 = vpop.f32.mrb[7].mxu0  ;;  %v417_v54 = vpop.f32.mrb[7].mxu1  ;;  %v421_v55 = vmax.f32 %v397_v45, 0.0  ;;  %v425_v56 = vmax.f32 %v413_v46, 0.0 }
 0x11e   : > { %v422_v57 = vmax.f32 %v400_v51, 0.0  ;;  %v426_v58 = vmax.f32 %v416_v52, 0.0 }
 0x120   : > { %v587_v59 = vpack.c.bf16 %v422_v57, %v421_v55  ;;  %v597_v60 = vpack.c.bf16 %v426_v58, %v425_v56 }
 0x122   : > { %599 = vst [vmem:[%s175_s27 + $0x8] sm:$0xff] %v587_v59   ;;  %601 = vst [vmem:[%s175_s27 + $0x18] sm:$0xff] %v597_v60  }
 0x123 PF: > { %s13_s12 = sadd.s32 1, %s671_s12  }
 0x124   : > { %p10_p4 = scmp.ge.s32.totalorder %s13_s12, 4  }
 0x126   :  { %12 = sbr.rel (!%p10_p4) target bundleno = 1 (0x1), region = 62 }

// kernel: grdn_forward.62
= control target key start
LH: loop header
LB: loop body
LE: loop exit
PB: predicated region body
PF: predicated region fallthrough
CT: control target
= control target key end

     0   :  { %s479_s12 = smov 0   ;;  %s545_s0 = inlined_call_operand.vmem [shape: bf16[16,216], index: 0, kind: input, shape index: {}]   ;;  %s546_s1 = inlined_call_operand.vmem [shape: bf16[216,128], index: 1, kind: input, shape index: {}]   ;;  %s547_s2 = inlined_call_operand.vmem [shape: f32[1,128], index: 2, kind: input, shape index: {}]   ;;  %s548_s3 = inlined_call_operand.vmem [shape: bf16[16,128], index: 3, kind: output, shape index: {}]  }
   0x1 LB: > { %s396_s13 = sadd.s32 4294967295, %s456_s12   ;;  %p400_p0 = scmp.ge.s32.totalorder %s456_s12, 1  ;;  %s456_s12 = sphi %s479_s12, %s13_s12  }
   0x2   : > { %p137_p1 = scmp.lt.s32.totalorder %s456_s12, 3 }
   0x4   : > { %p138_p2 = pnand %p400_p0, %p137_p1 }
   0x5   : > { %v434_v0 = vld [vmem:[%s546_s1] sm:$0xff] (!%p138_p2)   ;;  %v458_v1 = vmov (!%p138_p2), 0   ;;  %v435_v2 = vld [vmem:[%s546_s1 + $0x8] sm:$0xff] (!%p138_p2)   ;;  %p160_p3 = scmp.lt.s32.totalorder (!%p138_p2), %s396_s13, 1  ;;  %v436_v3 = vld [vmem:[%s546_s1 + $0x10] sm:$0xff] (!%p138_p2)   ;;  %vm292_vm0 = vcmask (!%p138_p2), 719872  }
   0x6   : > { %141 = sbr.rel (%p138_p2) target bundleno = 281 (0x119), region = 32  ;;  %300 = vmatprep.subr.bf16.mxu0 (!%p138_p2), %v458_v1  ;;  %v437_v4 = vld [vmem:[%s546_s1 + $0x18] sm:$0xff] (!%p138_p2)   ;;  %v438_v6 = vld [vmem:[%s546_s1 + $0x20] sm:$0xff] (!%p138_p2)   ;;  %v439_v8 = vld [vmem:[%s546_s1 + $0x28] sm:$0xff] (!%p138_p2)   ;;  %vm296_vm1 = vcmask (!%p138_p2), 1043456  }
   0x7   : > { %301 = vmatpush1.bf16.msra.mxu0 (!%p138_p2), %v434_v0  ;;  %v440_v9 = vld [vmem:[%s546_s1 + $0x30] sm:$0xff] (!%p138_p2)   ;;  %v441_v10 = vld [vmem:[%s546_s1 + $0x38] sm:$0xff] (!%p138_p2)   ;;  %v442_v11 = vld [vmem:[%s546_s1 + $0x40] sm:$0xff] (!%p138_p2)  }
   0x8   : > { %302 = vmatprep.subr.bf16.mxu0 (!%p138_p2), %v458_v1  ;;  %v443_v12 = vld [vmem:[%s546_s1 + $0x48] sm:$0xff] (!%p138_p2)   ;;  %v444_v13 = vld [vmem:[%s546_s1 + $0x50] sm:$0xff] (!%p138_p2)   ;;  %v445_v14 = vld [vmem:[%s546_s1 + $0x58] sm:$0xff] (!%p138_p2)  }
   0x9   : > { %v446_v15 = vld [vmem:[%s546_s1 + $0x60] sm:$0xff] (!%p138_p2)   ;;  %v447_v16 = vld [vmem:[%s546_s1 + $0x68] ss:$0 sps:$4 sm:$0xff] (!%p138_p2)  }
   0xa   : > { %v298_v17 = vsel (!%p138_p2), %vm296_vm1, %v447_v16, 0  ;;  %v404_v19 = vld [vmem:[%s547_s2] ss:$0 sm:$0xff] (!%p138_p2) }
   0xb   : > { %303 = vmatpush1.bf16.msra.mxu0 (!%p138_p2), %v435_v2 }
   0xc   : > { %304 = vmatprep.subr.bf16.mxu0 (!%p138_p2), %v458_v1 }
   0xd   : > { %s550_s13 = smov (!%p160_p3, %s396_s13), 1 }
   0xe   : > { %s424_s20 = sshll.u32 %s550_s13, 3  ;;  %s403_s23 = sshll.u32 %s550_s13, 2 }
   0xf   : > { %305 = vmatpush1.bf16.msra.mxu0 %v436_v3  ;;  %s164_s25 = scalar_lea.vmem %s545_s0, %s424_s20  ;;  %s168_s26 = scalar_lea.vmem %s548_s3, %s403_s23 }
  0x10   : > { %306 = vmatprep.subr.bf16.mxu0 %v458_v1  ;;  %v170_v5 = vld [vmem:[%s164_s25] sm:$0xff] }
  0x11   : > { %v406_v7 = vcombine.high %v170_v5, %v170_v5  ;;  %v405_v18 = vcombine.low %v170_v5, %v170_v5 }
  0x13   : > { %307 = vmatpush1.bf16.msra.mxu0 %v437_v4  ;;  %421 = vmatprep.mubr.msk.bf16.mxu0 %vm292_vm0, %v406_v7 }
  0x14   : > { %308 = vmatprep.subr.bf16.mxu0 %v458_v1 }
  0x17   : > { %309 = vmatpush1.bf16.msra.mxu0 %v438_v6 }
  0x18   : > { %310 = vmatprep.subr.bf16.mxu0 %v458_v1 }
  0x1b   : > { %311 = vmatpush1.bf16.msra.mxu0 %v439_v8 }
  0x1c   : > { %312 = vmatprep.subr.bf16.mxu0 %v458_v1 }
  0x1f   : > { %313 = vmatpush1.bf16.msra.mxu0 %v440_v9 }
  0x20   : > { %314 = vmatprep.subr.bf16.mxu0 %v458_v1 }
  0x23   : > { %315 = vmatpush1.bf16.msra.mxu0 %v441_v10 }
  0x24   : > { %316 = vmatprep.subr.bf16.mxu0 %v458_v1 }
  0x27   : > { %317 = vmatpush1.bf16.msra.mxu0 %v442_v11 }
  0x28   : > { %318 = vmatprep.subr.bf16.mxu0 %v458_v1 }
  0x2b   : > { %319 = vmatpush1.bf16.msra.mxu0 %v443_v12 }
  0x2c   : > { %320 = vmatprep.subr.bf16.mxu0 %v458_v1 }
  0x2f   : > { %321 = vmatpush1.bf16.msra.mxu0 %v444_v13 }
  0x30   : > { %322 = vmatprep.subr.bf16.mxu0 %v458_v1 }
  0x33   : > { %323 = vmatpush1.bf16.msra.mxu0 %v445_v14 }
  0x34   : > { %324 = vmatprep.subr.bf16.mxu0 %v458_v1 }
  0x37   : > { %325 = vmatpush1.bf16.msra.mxu0 %v446_v15 }
  0x38   : > { %326 = vmatprep.subr.bf16.mxu0 %v458_v1 }
  0x3b   : > { %327 = vmatpush1.bf16.msra.mxu0 %v298_v17 }
  0x3e   : > { %333 = vmatmul.mubr.bf16.vlgmr.msra.gmra.mrb[0].mxu0 %v405_v18 }
 0x111   : > { %v334_v20 = vpop.f32.mrb[0].mxu0 }
 0x112   : > { %v335_v21 = vadd.f32 %v404_v19, %v334_v20  ;;  %v336_v22 = vpop.f32.mrb[1].mxu0 }
 0x113   : > { %v337_v23 = vpop.f32.mrb[2].mxu0 }
 0x114   : > { %v340_v24 = vmax.f32 %v335_v21, 0.0  ;;  %v338_v25 = vpop.f32.mrb[3].mxu0 }
 0x116   : > { %v341_v26 = vpack.c.bf16 %v340_v24, %v340_v24 }
 0x118   : > { %342 = vst [vmem:[%s168_s26] sm:$0xf] %v341_v26 }
 0x119 PF: > { %s13_s12 = sadd.s32 1, %s456_s12  }
 0x11a   : > { %p10_p4 = scmp.ge.s32.totalorder %s13_s12, 4  }
 0x11c   :  { %12 = sbr.rel (!%p10_p4) target bundleno = 1 (0x1), region = 62 }

// kernel: grdn_forward.63
= control target key start
LH: loop header
LB: loop body
LE: loop exit
PB: predicated region body
PF: predicated region fallthrough
CT: control target
= control target key end

     0   :  { %s682_s12 = smov 0   ;;  %s802_s0 = inlined_call_operand.vmem [shape: bf16[16,432], index: 0, kind: input, shape index: {}]   ;;  %s803_s1 = inlined_call_operand.vmem [shape: bf16[432,128], index: 1, kind: input, shape index: {}]   ;;  %s804_s2 = inlined_call_operand.vmem [shape: f32[1,128], index: 2, kind: input, shape index: {}]   ;;  %s805_s3 = inlined_call_operand.vmem [shape: bf16[16,128], index: 3, kind: output, shape index: {}]  }
   0x1 LB: > { %s547_s13 = sadd.s32 4294967295, %s659_s12   ;;  %p551_p0 = scmp.ge.s32.totalorder %s659_s12, 1  ;;  %s659_s12 = sphi %s682_s12, %s13_s12  }
   0x2   : > { %p137_p1 = scmp.lt.s32.totalorder %s659_s12, 3 }
   0x4   : > { %p138_p2 = pnand %p551_p0, %p137_p1 }
   0x5   : > { %v622_v0 = vld [vmem:[%s803_s1 + $0x80] sm:$0xff] (!%p138_p2)   ;;  %v661_v1 = vmov (!%p138_p2), 0   ;;  %v625_v4 = vld [vmem:[%s803_s1 + $0x88] sm:$0xff] (!%p138_p2)   ;;  %v628_v7 = vld [vmem:[%s803_s1 + $0x90] sm:$0xff] (!%p138_p2)   ;;  %p160_p3 = scmp.lt.s32.totalorder (!%p138_p2), %s547_s13, 1  ;;  %vm408_vm0 = vcmask (!%p138_p2), 392192  }
   0x6   : > { %141 = sbr.rel (%p138_p2) target bundleno = 267 (0x10b), region = 32  ;;  %452 = vmatprep.subr.bf16.mxu1 (!%p138_p2), %v661_v1  ;;  %v623_v2 = vld [vmem:[%s803_s1 + $0x40] sm:$0xff] (!%p138_p2)   ;;  %v626_v5 = vld [vmem:[%s803_s1 + $0x48] sm:$0xff] (!%p138_p2)   ;;  %v629_v8 = vld [vmem:[%s803_s1 + $0x50] sm:$0xff] (!%p138_p2)  }
   0x7   : > { %453 = vmatpush1.bf16.msra.mxu1 (!%p138_p2), %v622_v0  ;;  %v624_v3 = vld [vmem:[%s803_s1] sm:$0xff] (!%p138_p2)   ;;  %591 = vmatprep.subr.bf16.mxu0 (!%p138_p2), %v623_v2  ;;  %v627_v6 = vld [vmem:[%s803_s1 + $0x8] sm:$0xff] (!%p138_p2)   ;;  %v630_v9 = vld [vmem:[%s803_s1 + $0x10] sm:$0xff] (!%p138_p2)  }
   0x8   : > { %454 = vmatprep.subr.bf16.mxu1 (!%p138_p2), %v661_v1  ;;  %592 = vmatpush3.bf16.msra.mxu0 (!%p138_p2), %v624_v3  ;;  %v631_v10 = vld [vmem:[%s803_s1 + $0x98] sm:$0xff] (!%p138_p2)   ;;  %v635_v13 = vld [vmem:[%s803_s1 + $0x60] sm:$0xff] (!%p138_p2)   ;;  %v638_v16 = vld [vmem:[%s803_s1 + $0x68] sm:$0xff] (!%p138_p2)  }
   0x9   : > { %593 = vmatprep.subr.bf16.mxu0 (!%p138_p2), %v626_v5  ;;  %v632_v11 = vld [vmem:[%s803_s1 + $0x58] sm:$0xff] (!%p138_p2)   ;;  %v634_v14 = vld [vmem:[%s803_s1 + $0xa0] sm:$0xff] (!%p138_p2)   ;;  %v637_v17 = vld [vmem:[%s803_s1 + $0xa8] sm:$0xff] (!%p138_p2)  }
   0xa   : > { %v633_v12 = vld [vmem:[%s803_s1 + $0x18] sm:$0xff] (!%p138_p2)   ;;  %v636_v15 = vld [vmem:[%s803_s1 + $0x20] sm:$0xff] (!%p138_p2)   ;;  %v639_v18 = vld [vmem:[%s803_s1 + $0x28] sm:$0xff] (!%p138_p2)  }
   0xb   : > { %455 = vmatpush1.bf16.msra.mxu1 (!%p138_p2), %v625_v4  ;;  %v641_v19 = vld [vmem:[%s803_s1 + $0x70] sm:$0xff] (!%p138_p2)   ;;  %v644_v22 = vld [vmem:[%s803_s1 + $0x78] sm:$0xff] (!%p138_p2)   ;;  %v646_v29 = vld [vmem:[%s803_s1 + $0xc0] sm:$0xff] (!%p138_p2)  }
   0xc   : > { %456 = vmatprep.subr.bf16.mxu1 (!%p138_p2), %v661_v1  ;;  %594 = vmatpush3.bf16.msra.mxu0 (!%p138_p2), %v627_v6  ;;  %v640_v20 = vld [vmem:[%s803_s1 + $0xb0] sm:$0xff] (!%p138_p2)   ;;  %v643_v24 = vld [vmem:[%s803_s1 + $0xb8] sm:$0xff] (!%p138_p2)   ;;  %v649_v31 = vld [vmem:[%s803_s1 + $0xc8] sm:$0xff] (!%p138_p2)  }
   0xd   : > { %595 = vmatprep.subr.bf16.mxu0 %v629_v8  ;;  %s807_s13 = smov (!%p160_p3, %s547_s13), 1  ;;  %v642_v21 = vld [vmem:[%s803_s1 + $0x30] sm:$0xff]   ;;  %v645_v27 = vld [vmem:[%s803_s1 + $0x38] sm:$0xff]   ;;  %v555_v39 = vld [vmem:[%s804_s2] ss:$0 sm:$0xff] }
   0xe   : > { %s590_s23 = sshll.u32 %s807_s13, 4  ;;  %v650_v32 = vld [vmem:[%s803_s1 + $0xd0] sm:$0xff]   ;;  %s554_s24 = sshll.u32 %s807_s13, 2 }
   0xf   : > { %457 = vmatpush1.bf16.msra.mxu1 %v628_v7  ;;  %s164_s5 = scalar_lea.vmem %s802_s0, %s590_s23  ;;  %s168_s27 = scalar_lea.vmem %s805_s3, %s554_s24 }
  0x10   : > { %458 = vmatprep.subr.bf16.mxu1 %v661_v1  ;;  %596 = vmatpush3.bf16.msra.mxu0 %v630_v9  ;;  %v170_v23 = vld [vmem:[%s164_s5] sm:$0xff]  ;;  %v171_v26 = vld [vmem:[%s164_s5 + $0x8] sm:$0xff] }
  0x11   : > { %597 = vmatprep.subr.bf16.mxu0 %v632_v11  ;;  %v557_v25 = vcombine.high %v170_v23, %v170_v23  ;;  %v559_v28 = vcombine.high %v171_v26, %v171_v26  ;;  %v556_v30 = vcombine.low %v170_v23, %v170_v23  ;;  %v558_v33 = vcombine.low %v171_v26, %v171_v26 }
  0x13   : > { %459 = vmatpush1.bf16.msra.mxu1 %v631_v10  ;;  %444 = vmatprep.mubr.bf16.mxu0 %v557_v25 }
  0x14   : > { %460 = vmatprep.subr.bf16.mxu1 %v661_v1  ;;  %598 = vmatpush3.bf16.msra.mxu0 %v633_v12 }
  0x15   : > { %599 = vmatprep.subr.bf16.mxu0 %v635_v13  ;;  %587 = vmatprep.mubr.msk.bf16.mxu1 %vm408_vm0, %v559_v28 }
  0x17   : > { %461 = vmatpush1.bf16.msra.mxu1 %v634_v14 }
  0x18   : > { %462 = vmatprep.subr.bf16.mxu1 %v661_v1  ;;  %600 = vmatpush3.bf16.msra.mxu0 %v636_v15 }
  0x19   : > { %601 = vmatprep.subr.bf16.mxu0 %v638_v16 }
  0x1b   : > { %463 = vmatpush1.bf16.msra.mxu1 %v637_v17 }
  0x1c   : > { %464 = vmatprep.subr.bf16.mxu1 %v661_v1  ;;  %602 = vmatpush3.bf16.msra.mxu0 %v639_v18 }
  0x1d   : > { %603 = vmatprep.subr.bf16.mxu0 %v641_v19 }
  0x1f   : > { %465 = vmatpush1.bf16.msra.mxu1 %v640_v20 }
  0x20   : > { %466 = vmatprep.subr.bf16.mxu1 %v661_v1  ;;  %604 = vmatpush3.bf16.msra.mxu0 %v642_v21 }
  0x21   : > { %605 = vmatprep.subr.bf16.mxu0 %v644_v22 }
  0x23   : > { %467 = vmatpush1.bf16.msra.mxu1 %v643_v24 }
  0x24   : > { %468 = vmatprep.subr.bf16.mxu1 %v661_v1  ;;  %606 = vmatpush3.bf16.msra.mxu0 %v645_v27 }
  0x27   : > { %469 = vmatpush1.bf16.msra.mxu1 %v646_v29  ;;  %445 = vmatmul.mubr.bf16.vlgmr.msra.gmra.mrb[0].mxu0 %v556_v30 }
  0x28   : > { %470 = vmatprep.subr.bf16.mxu1 %v661_v1 }
  0x2b   : > { %471 = vmatpush1.bf16.msra.mxu1 %v649_v31 }
  0x2c   : > { %472 = vmatprep.subr.bf16.mxu1 %v661_v1 }
  0x2f   : > { %473 = vmatpush1.bf16.msra.mxu1 %v650_v32 }
  0x32   : > { %485 = vmatmul.mubr.bf16.vlgmr.msra.gmra.mrb[0].mxu1 %v558_v33 }
  0xfa   : > { %v607_v34 = vpop.f32.mrb[0].mxu0 }
  0xfb   : > { %v608_v35 = vpop.f32.mrb[1].mxu0 }
  0xfc   : > { %v609_v36 = vadd.f32 %v608_v35, %v607_v34  ;;  %v610_v37 = vpop.f32.mrb[2].mxu0 }
  0xfd   : > { %v611_v38 = vpop.f32.mrb[3].mxu0 }
  0xfe   : > { %v447_v40 = vadd.f32 %v609_v36, %v555_v39 }
 0x105   : > { %v486_v41 = vpop.f32.mrb[0].mxu1 }
 0x106   : > { %v487_v42 = vadd.f32 %v486_v41, %v447_v40  ;;  %v488_v43 = vpop.f32.mrb[1].mxu1 }
 0x107   : > { %v489_v44 = vpop.f32.mrb[2].mxu1 }
 0x108   : > { %v492_v45 = vpack.c.bf16 %v487_v42, %v487_v42  ;;  %v490_v46 = vpop.f32.mrb[3].mxu1 }
 0x10a   : > { %493 = vst [vmem:[%s168_s27] sm:$0xf] %v492_v45 }
 0x10b PF: > { %s13_s12 = sadd.s32 1, %s659_s12  }
 0x10c   : > { %p10_p4 = scmp.ge.s32.totalorder %s13_s12, 4  }
 0x10e   :  { %12 = sbr.rel (!%p10_p4) target bundleno = 1 (0x1), region = 62 }

// kernel: grdn_forward.65
= control target key start
LH: loop header
LB: loop body
LE: loop exit
PB: predicated region body
PF: predicated region fallthrough
CT: control target
= control target key end

     0   :  { %s683_s12 = smov 0   ;;  %s803_s0 = inlined_call_operand.vmem [shape: bf16[16,432], index: 0, kind: input, shape index: {}]   ;;  %s804_s1 = inlined_call_operand.vmem [shape: bf16[432,128], index: 1, kind: input, shape index: {}]   ;;  %s805_s2 = inlined_call_operand.vmem [shape: f32[1,128], index: 2, kind: input, shape index: {}]   ;;  %s806_s3 = inlined_call_operand.vmem [shape: bf16[16,128], index: 3, kind: output, shape index: {}]  }
   0x1 LB: > { %s548_s13 = sadd.s32 4294967295, %s660_s12   ;;  %p552_p0 = scmp.ge.s32.totalorder %s660_s12, 1  ;;  %s660_s12 = sphi %s683_s12, %s13_s12  }
   0x2   : > { %p137_p1 = scmp.lt.s32.totalorder %s660_s12, 3 }
   0x4   : > { %p138_p2 = pnand %p552_p0, %p137_p1 }
   0x5   : > { %v623_v0 = vld [vmem:[%s804_s1 + $0x80] sm:$0xff] (!%p138_p2)   ;;  %v662_v1 = vmov (!%p138_p2), 0   ;;  %v626_v4 = vld [vmem:[%s804_s1 + $0x88] sm:$0xff] (!%p138_p2)   ;;  %v629_v7 = vld [vmem:[%s804_s1 + $0x90] sm:$0xff] (!%p138_p2)   ;;  %p160_p3 = scmp.lt.s32.totalorder (!%p138_p2), %s548_s13, 1  ;;  %vm408_vm0 = vcmask (!%p138_p2), 392192  }
   0x6   : > { %141 = sbr.rel (%p138_p2) target bundleno = 269 (0x10d), region = 32  ;;  %452 = vmatprep.subr.bf16.mxu1 (!%p138_p2), %v662_v1  ;;  %v624_v2 = vld [vmem:[%s804_s1 + $0x40] sm:$0xff] (!%p138_p2)   ;;  %v627_v5 = vld [vmem:[%s804_s1 + $0x48] sm:$0xff] (!%p138_p2)   ;;  %v630_v8 = vld [vmem:[%s804_s1 + $0x50] sm:$0xff] (!%p138_p2)  }
   0x7   : > { %453 = vmatpush1.bf16.msra.mxu1 (!%p138_p2), %v623_v0  ;;  %v625_v3 = vld [vmem:[%s804_s1] sm:$0xff] (!%p138_p2)   ;;  %592 = vmatprep.subr.bf16.mxu0 (!%p138_p2), %v624_v2  ;;  %v628_v6 = vld [vmem:[%s804_s1 + $0x8] sm:$0xff] (!%p138_p2)   ;;  %v631_v9 = vld [vmem:[%s804_s1 + $0x10] sm:$0xff] (!%p138_p2)  }
   0x8   : > { %454 = vmatprep.subr.bf16.mxu1 (!%p138_p2), %v662_v1  ;;  %593 = vmatpush3.bf16.msra.mxu0 (!%p138_p2), %v625_v3  ;;  %v632_v10 = vld [vmem:[%s804_s1 + $0x98] sm:$0xff] (!%p138_p2)   ;;  %v636_v13 = vld [vmem:[%s804_s1 + $0x60] sm:$0xff] (!%p138_p2)   ;;  %v639_v16 = vld [vmem:[%s804_s1 + $0x68] sm:$0xff] (!%p138_p2)  }
   0x9   : > { %594 = vmatprep.subr.bf16.mxu0 (!%p138_p2), %v627_v5  ;;  %v633_v11 = vld [vmem:[%s804_s1 + $0x58] sm:$0xff] (!%p138_p2)   ;;  %v635_v14 = vld [vmem:[%s804_s1 + $0xa0] sm:$0xff] (!%p138_p2)   ;;  %v638_v17 = vld [vmem:[%s804_s1 + $0xa8] sm:$0xff] (!%p138_p2)  }
   0xa   : > { %v634_v12 = vld [vmem:[%s804_s1 + $0x18] sm:$0xff] (!%p138_p2)   ;;  %v637_v15 = vld [vmem:[%s804_s1 + $0x20] sm:$0xff] (!%p138_p2)   ;;  %v640_v18 = vld [vmem:[%s804_s1 + $0x28] sm:$0xff] (!%p138_p2)  }
   0xb   : > { %455 = vmatpush1.bf16.msra.mxu1 (!%p138_p2), %v626_v4  ;;  %v642_v19 = vld [vmem:[%s804_s1 + $0x70] sm:$0xff] (!%p138_p2)   ;;  %v645_v22 = vld [vmem:[%s804_s1 + $0x78] sm:$0xff] (!%p138_p2)   ;;  %v647_v29 = vld [vmem:[%s804_s1 + $0xc0] sm:$0xff] (!%p138_p2)  }
   0xc   : > { %456 = vmatprep.subr.bf16.mxu1 (!%p138_p2), %v662_v1  ;;  %595 = vmatpush3.bf16.msra.mxu0 (!%p138_p2), %v628_v6  ;;  %v641_v20 = vld [vmem:[%s804_s1 + $0xb0] sm:$0xff] (!%p138_p2)   ;;  %v644_v24 = vld [vmem:[%s804_s1 + $0xb8] sm:$0xff] (!%p138_p2)   ;;  %v650_v31 = vld [vmem:[%s804_s1 + $0xc8] sm:$0xff] (!%p138_p2)  }
   0xd   : > { %596 = vmatprep.subr.bf16.mxu0 %v630_v8  ;;  %s808_s13 = smov (!%p160_p3, %s548_s13), 1  ;;  %v643_v21 = vld [vmem:[%s804_s1 + $0x30] sm:$0xff]   ;;  %v646_v27 = vld [vmem:[%s804_s1 + $0x38] sm:$0xff]   ;;  %v556_v39 = vld [vmem:[%s805_s2] ss:$0 sm:$0xff] }
   0xe   : > { %s591_s23 = sshll.u32 %s808_s13, 4  ;;  %v651_v32 = vld [vmem:[%s804_s1 + $0xd0] sm:$0xff]   ;;  %s555_s24 = sshll.u32 %s808_s13, 2 }
   0xf   : > { %457 = vmatpush1.bf16.msra.mxu1 %v629_v7  ;;  %s164_s5 = scalar_lea.vmem %s803_s0, %s591_s23  ;;  %s168_s27 = scalar_lea.vmem %s806_s3, %s555_s24 }
  0x10   : > { %458 = vmatprep.subr.bf16.mxu1 %v662_v1  ;;  %597 = vmatpush3.bf16.msra.mxu0 %v631_v9  ;;  %v170_v23 = vld [vmem:[%s164_s5] sm:$0xff]  ;;  %v171_v26 = vld [vmem:[%s164_s5 + $0x8] sm:$0xff] }
  0x11   : > { %598 = vmatprep.subr.bf16.mxu0 %v633_v11  ;;  %v558_v25 = vcombine.high %v170_v23, %v170_v23  ;;  %v560_v28 = vcombine.high %v171_v26, %v171_v26  ;;  %v557_v30 = vcombine.low %v170_v23, %v170_v23  ;;  %v559_v33 = vcombine.low %v171_v26, %v171_v26 }
  0x13   : > { %459 = vmatpush1.bf16.msra.mxu1 %v632_v10  ;;  %444 = vmatprep.mubr.bf16.mxu0 %v558_v25 }
  0x14   : > { %460 = vmatprep.subr.bf16.mxu1 %v662_v1  ;;  %599 = vmatpush3.bf16.msra.mxu0 %v634_v12 }
  0x15   : > { %600 = vmatprep.subr.bf16.mxu0 %v636_v13  ;;  %588 = vmatprep.mubr.msk.bf16.mxu1 %vm408_vm0, %v560_v28 }
  0x17   : > { %461 = vmatpush1.bf16.msra.mxu1 %v635_v14 }
  0x18   : > { %462 = vmatprep.subr.bf16.mxu1 %v662_v1  ;;  %601 = vmatpush3.bf16.msra.mxu0 %v637_v15 }
  0x19   : > { %602 = vmatprep.subr.bf16.mxu0 %v639_v16 }
  0x1b   : > { %463 = vmatpush1.bf16.msra.mxu1 %v638_v17 }
  0x1c   : > { %464 = vmatprep.subr.bf16.mxu1 %v662_v1  ;;  %603 = vmatpush3.bf16.msra.mxu0 %v640_v18 }
  0x1d   : > { %604 = vmatprep.subr.bf16.mxu0 %v642_v19 }
  0x1f   : > { %465 = vmatpush1.bf16.msra.mxu1 %v641_v20 }
  0x20   : > { %466 = vmatprep.subr.bf16.mxu1 %v662_v1  ;;  %605 = vmatpush3.bf16.msra.mxu0 %v643_v21 }
  0x21   : > { %606 = vmatprep.subr.bf16.mxu0 %v645_v22 }
  0x23   : > { %467 = vmatpush1.bf16.msra.mxu1 %v644_v24 }
  0x24   : > { %468 = vmatprep.subr.bf16.mxu1 %v662_v1  ;;  %607 = vmatpush3.bf16.msra.mxu0 %v646_v27 }
  0x27   : > { %469 = vmatpush1.bf16.msra.mxu1 %v647_v29  ;;  %445 = vmatmul.mubr.bf16.vlgmr.msra.gmra.mrb[0].mxu0 %v557_v30 }
  0x28   : > { %470 = vmatprep.subr.bf16.mxu1 %v662_v1 }
  0x2b   : > { %471 = vmatpush1.bf16.msra.mxu1 %v650_v31 }
  0x2c   : > { %472 = vmatprep.subr.bf16.mxu1 %v662_v1 }
  0x2f   : > { %473 = vmatpush1.bf16.msra.mxu1 %v651_v32 }
  0x32   : > { %485 = vmatmul.mubr.bf16.vlgmr.msra.gmra.mrb[0].mxu1 %v559_v33 }
  0xfa   : > { %v608_v34 = vpop.f32.mrb[0].mxu0 }
  0xfb   : > { %v609_v35 = vpop.f32.mrb[1].mxu0 }
  0xfc   : > { %v610_v36 = vadd.f32 %v609_v35, %v608_v34  ;;  %v611_v37 = vpop.f32.mrb[2].mxu0 }
  0xfd   : > { %v612_v38 = vpop.f32.mrb[3].mxu0 }
  0xfe   : > { %v447_v40 = vadd.f32 %v610_v36, %v556_v39 }
 0x105   : > { %v486_v41 = vpop.f32.mrb[0].mxu1 }
 0x106   : > { %v487_v42 = vadd.f32 %v486_v41, %v447_v40  ;;  %v488_v43 = vpop.f32.mrb[1].mxu1 }
 0x107   : > { %v489_v44 = vpop.f32.mrb[2].mxu1 }
 0x108   : > { %v492_v45 = vmax.f32 %v487_v42, 0.0  ;;  %v490_v46 = vpop.f32.mrb[3].mxu1 }
 0x10a   : > { %v493_v47 = vpack.c.bf16 %v492_v45, %v492_v45 }
 0x10c   : > { %494 = vst [vmem:[%s168_s27] sm:$0xf] %v493_v47 }
 0x10d PF: > { %s13_s12 = sadd.s32 1, %s660_s12  }
 0x10e   : > { %p10_p4 = scmp.ge.s32.totalorder %s13_s12, 4  }
 0x110   :  { %12 = sbr.rel (!%p10_p4) target bundleno = 1 (0x1), region = 62 }

// kernel: grdn_forward.66
= control target key start
LH: loop header
LB: loop body
LE: loop exit
PB: predicated region body
PF: predicated region fallthrough
CT: control target
= control target key end

     0   :  { %s421_s15 = smov 0   ;;  %s450_s0 = inlined_call_operand.vmem [shape: bf16[16,24], index: 0, kind: input, shape index: {}]   ;;  %s451_s1 = inlined_call_operand.vmem [shape: bf16[24,128], index: 1, kind: input, shape index: {}]   ;;  %s452_s2 = inlined_call_operand.vmem [shape: f32[1,128], index: 2, kind: input, shape index: {}]   ;;  %s453_s3 = inlined_call_operand.vmem [shape: bf16[16,128], index: 3, kind: input, shape index: {}]   ;;  %s454_s4 = inlined_call_operand.vmem [shape: bf16[16,128], index: 4, kind: output, shape index: {}]  }
   0x1 LB: > { %s349_s16 = sadd.s32 4294967295, %s392_s15   ;;  %p353_p0 = scmp.ge.s32.totalorder %s392_s15, 1  ;;  %s392_s15 = sphi %s421_s15, %s14_s15  }
   0x2   : > { %p170_p1 = scmp.lt.s32.totalorder %s392_s15, 3 }
   0x4   : > { %p171_p2 = pnand %p353_p0, %p170_p1 }
   0x5   : > { %v384_v0 = vld [vmem:[%s451_s1] sm:$0xff] (!%p171_p2)   ;;  %v394_v1 = vmov (!%p171_p2), 0.0   ;;  %v385_v2 = vld [vmem:[%s451_s1 + $0x8] ss:$0 sps:$4 sm:$0xff] (!%p171_p2)   ;;  %vm235_vm0 = vcmask (!%p171_p2), 1043456   ;;  %vm395_vm1 = vmmov (!%p171_p2), 0  }
   0x6   : > { %174 = sbr.rel (%p171_p2) target bundleno = 236 (0xec), region = 36  ;;  %366 = vmatprep.subr.bf16.mxu0 (!%p171_p2), %v394_v1  ;;  %370 = vmatprep.mubr.msk.bf16.mxu0 (!%p171_p2), %vm395_vm1, %v394_v1  ;;  %p198_p3 = scmp.lt.s32.totalorder (!%p171_p2), %s349_s16, 1  ;;  %v237_v3 = vsel (!%p171_p2), %vm235_vm0, %v385_v2, 0  ;;  %vm231_vm2 = vcmask (!%p171_p2), 195584   ;;  %v357_v6 = vld [vmem:[%s452_s2] ss:$0 sm:$0xff] (!%p171_p2) }
   0x7   : > { %367 = vmatpush3.bf16.msra.mxu0 (!%p171_p2), %v384_v0 }
   0x8   : > { %368 = vmatprep.subr.bf16.mxu0 (!%p171_p2), %v394_v1 }
   0xb   : > { %369 = vmatpush3.bf16.msra.mxu0 (!%p171_p2), %v237_v3 }
   0xd   : > { %s456_s16 = smov (!%p198_p3, %s349_s16), 1 }
   0xe   : > { %s354_s21 = sshll.u32 %s456_s16, 2 }
   0xf   : > { %s201_s24 = scalar_lea.vmem %s450_s0, %s354_s21  ;;  %s205_s27 = scalar_lea.vmem %s453_s3, %s354_s21 }
  0x10   : > { %v211_v4 = vld [vmem:[%s201_s24] sm:$0xf]  ;;  %s209_s6 = scalar_lea.vmem %s454_s4, %s354_s21 }
  0x11   : > { %371 = vmatmul.mubr.msk.bf16.vlgmr.msra.gmra.mrb[0].mxu0 %vm231_vm2, %v211_v4  ;;  %v279_v5 = vld [vmem:[%s205_s27] sm:$0xf] }
  0x12   : > { %v280_v7 = vunpack.c.l.bf16 %v279_v5 }
  0xe4   : > { %v273_v8 = vpop.f32.mrb[0].mxu0 }
  0xe5   : > { %v274_v9 = vadd.f32 %v357_v6, %v273_v8  ;;  %v372_v10 = vpop.f32.mrb[1].mxu0 }
  0xe6   : > { %v276_v11 = vpop.f32.mrb[2].mxu0 }
  0xe7   : > { %v281_v12 = vadd.f32 %v280_v7, %v274_v9  ;;  %v373_v13 = vpop.f32.mrb[3].mxu0 }
  0xe9   : > { %v282_v14 = vpack.c.bf16 %v281_v12, %v281_v12 }
  0xeb   : > { %283 = vst [vmem:[%s209_s6] sm:$0xf] %v282_v14 }
  0xec PF: > { %s14_s15 = sadd.s32 1, %s392_s15  }
  0xed   : > { %p11_p4 = scmp.ge.s32.totalorder %s14_s15, 4  }
  0xef   :  { %13 = sbr.rel (!%p11_p4) target bundleno = 1 (0x1), region = 69 }

// kernel: grdn_forward.76
= control target key start
LH: loop header
LB: loop body
LE: loop exit
PB: predicated region body
PF: predicated region fallthrough
CT: control target
= control target key end

     0   :  { %s421_s15 = smov 0   ;;  %s450_s0 = inlined_call_operand.vmem [shape: bf16[16,32], index: 0, kind: input, shape index: {}]   ;;  %s451_s1 = inlined_call_operand.vmem [shape: bf16[32,128], index: 1, kind: input, shape index: {}]   ;;  %s452_s2 = inlined_call_operand.vmem [shape: f32[1,128], index: 2, kind: input, shape index: {}]   ;;  %s453_s3 = inlined_call_operand.vmem [shape: bf16[16,128], index: 3, kind: input, shape index: {}]   ;;  %s454_s4 = inlined_call_operand.vmem [shape: bf16[16,128], index: 4, kind: output, shape index: {}]  }
   0x1 LB: > { %s349_s16 = sadd.s32 4294967295, %s392_s15   ;;  %p353_p0 = scmp.ge.s32.totalorder %s392_s15, 1  ;;  %s392_s15 = sphi %s421_s15, %s14_s15  }
   0x2   : > { %p170_p1 = scmp.lt.s32.totalorder %s392_s15, 3 }
   0x4   : > { %p171_p2 = pnand %p353_p0, %p170_p1 }
   0x5   : > { %v384_v0 = vld [vmem:[%s451_s1] sm:$0xff] (!%p171_p2)   ;;  %v394_v1 = vmov (!%p171_p2), 0.0   ;;  %v385_v2 = vld [vmem:[%s451_s1 + $0x8] sm:$0xff] (!%p171_p2)   ;;  %vm395_vm0 = vmmov (!%p171_p2), 0   ;;  %p198_p3 = scmp.lt.s32.totalorder (!%p171_p2), %s349_s16, 1  ;;  %vm235_vm1 = vcmask (!%p171_p2), 261120  }
   0x6   : > { %174 = sbr.rel (%p171_p2) target bundleno = 236 (0xec), region = 36  ;;  %366 = vmatprep.subr.bf16.mxu0 (!%p171_p2), %v394_v1  ;;  %370 = vmatprep.mubr.msk.bf16.mxu0 (!%p171_p2), %vm395_vm0, %v394_v1  ;;  %v357_v5 = vld [vmem:[%s452_s2] ss:$0 sm:$0xff] (!%p171_p2) }
   0x7   : > { %367 = vmatpush3.bf16.msra.mxu0 (!%p171_p2), %v384_v0 }
   0x8   : > { %368 = vmatprep.subr.bf16.mxu0 (!%p171_p2), %v394_v1 }
   0xb   : > { %369 = vmatpush3.bf16.msra.mxu0 (!%p171_p2), %v385_v2 }
   0xd   : > { %s456_s16 = smov (!%p198_p3, %s349_s16), 1 }
   0xe   : > { %s354_s21 = sshll.u32 %s456_s16, 2 }
   0xf   : > { %s201_s24 = scalar_lea.vmem %s450_s0, %s354_s21  ;;  %s205_s27 = scalar_lea.vmem %s453_s3, %s354_s21 }
  0x10   : > { %v211_v3 = vld [vmem:[%s201_s24] sm:$0xf]  ;;  %s209_s6 = scalar_lea.vmem %s454_s4, %s354_s21 }
  0x11   : > { %371 = vmatmul.mubr.msk.bf16.vlgmr.msra.gmra.mrb[0].mxu0 %vm235_vm1, %v211_v3  ;;  %v279_v4 = vld [vmem:[%s205_s27] sm:$0xf] }
  0x12   : > { %v280_v6 = vunpack.c.l.bf16 %v279_v4 }
  0xe4   : > { %v273_v7 = vpop.f32.mrb[0].mxu0 }
  0xe5   : > { %v274_v8 = vadd.f32 %v357_v5, %v273_v7  ;;  %v372_v9 = vpop.f32.mrb[1].mxu0 }
  0xe6   : > { %v276_v10 = vpop.f32.mrb[2].mxu0 }
  0xe7   : > { %v281_v11 = vadd.f32 %v280_v6, %v274_v8  ;;  %v373_v12 = vpop.f32.mrb[3].mxu0 }
  0xe9   : > { %v282_v13 = vpack.c.bf16 %v281_v11, %v281_v11 }
  0xeb   : > { %283 = vst [vmem:[%s209_s6] sm:$0xf] %v282_v13 }
  0xec PF: > { %s14_s15 = sadd.s32 1, %s392_s15  }
  0xed   : > { %p11_p4 = scmp.ge.s32.totalorder %s14_s15, 4  }
  0xef   :  { %13 = sbr.rel (!%p11_p4) target bundleno = 1 (0x1), region = 69 }

// kernel: grdn_forward.89
= control target key start
LH: loop header
LB: loop body
LE: loop exit
PB: predicated region body
PF: predicated region fallthrough
CT: control target
= control target key end

     0   :  { %9 = vsyncpa [#allocation3], 0  ;;  %s492_s15 = smov 0   ;;  %s557_s0 = inlined_call_operand.vmem [shape: bf16[16,32], index: 0, kind: input, shape index: {}]   ;;  %s558_s1 = inlined_call_operand.vmem [shape: bf16[32,128], index: 1, kind: input, shape index: {}]   ;;  %s559_s2 = inlined_call_operand.hbm [shape: f32[1,128], index: 2, kind: input, shape index: {}]   ;;  %s560_s3 = inlined_call_operand.vmem [shape: bf16[16,128], index: 3, kind: input, shape index: {}]   ;;  %s561_s4 = inlined_call_operand.vmem [shape: bf16[16,128], index: 4, kind: output, shape index: {}]  }
   0x1 LB: > { %s498_s16 = sadd.s32 4294967295, %s462_s15   ;;  %p376_p0 = scmp.ge.s32.totalorder %s462_s15, 1  ;;  %s462_s15 = sphi %s492_s15, %s15_s15  }
   0x2   : > { %p140_p1 = scmp.lt.s32.totalorder %s462_s15, 3  ;;  %p562_p3 = scmp.eq.s32.totalorder %s498_s16, 0 }
   0x3   : > { %s464_s18 = smov [#allocation2]   ;;  %s424_s23 = scalar_lea.hbm %s559_s2, 16 }
   0x4   : > { %p502_p2 = pnand %p376_p0, %p140_p1  ;;  %s156_s19 = sshll.u32 %s464_s18, 4  ;;  %s157_s19 = int_to_ptr.vmem [resolvable:$true] %s156_s19 }
   0x5   : > { %p425_p6 = scmp.ne.s32.totalorder %s559_s2, %s424_s23  ;;  %p431_p10 = scmp.lt.u32.totalorder %s424_s23, %s559_s2 }
   0x6   : > { %s564_s17 = scalar_select %p502_p2, 1, 0 }
   0x7   : > { %p405_p4 = pneg %p502_p2 }
   0x9   : > { %p511_p5 = pnand %p562_p3, %p405_p4 }
   0xb   : > { %p426_p7 = pneg %p511_p5 }
   0xd   : > { %p427_p8 = pnand %p426_p7, %p425_p6 }
   0xf   : > { %p428_p9 = pneg %p427_p8 }
  0x11   : > { %p433_p11 = pnand %p431_p10, %p428_p9 }
  0x13   : > { %436 = shalt.err (!%p433_p11)
}
  0x14   : > { %s437_s28 = scalar_lea.vmem %s157_s19, 16  ;;  %s444_s29 = scalar_lea.vmem %s157_s19, 32 }
  0x15   : > { %p438_p12 = scmp.ne.s32.totalorder %s157_s19, %s437_s28  ;;  %p445_p1 = scmp.lt.s32.totalorder %s157_s19, %s157_s19 }
  0x16   : > { %p446_p4 = scmp.lt.s32.totalorder %s444_s29, %s437_s28 }
  0x17   : > { %p440_p13 = pnand %p438_p12, %p426_p7 }
  0x18   : > { %p447_p3 = por %p446_p4, %p445_p1 }
  0x19   : > { %p441_p0 = pneg %p440_p13 }
  0x1b   : > { %p448_p2 = pnand %p447_p3, %p441_p0 }
  0x1d   : > { %451 = shalt.err (!%p448_p2)
}
  0x1e   : > { %408 = dma.hbm_to_vmem [thread:$0]  (!%p511_p5), %s559_s2, 16, %s157_s19, [#allocation3]  }
  0x1f   : > { %p566_p6 = scmp.ne.s32.totalorder %s564_s17, 0 }
  0x20   : > { %p567_p8 = scmp.eq.s32.totalorder (!%p566_p6), %s498_s16, 0 }
  0x21   : > { %183 = sbr.rel (%p566_p6) target bundleno = 269 (0x10d), region = 36 }
  0x28   : > { %457 = dma.done.wait (%p567_p8), [#allocation3], 16   ;;  %p568_p7 = pmov %p567_p8 }
  0x29   : > { %p211_p9 = scmp.lt.s32.totalorder %s498_s16, 1  ;;  %v465_v0 = vmov 0.0   ;;  %vm466_vm0 = vmmov 0   ;;  %v422_v1 = vld [vmem:[%s558_s1] sm:$0xff]   ;;  %v423_v2 = vld [vmem:[%s558_s1 + $0x8] sm:$0xff]   ;;  %vm248_vm1 = vcmask 261120  }
  0x2a   : > { %459 = vsyncadd (%p568_p7), [#allocation3], 4294967280  ;;  %393 = vmatprep.subr.bf16.mxu0 %v465_v0  ;;  %397 = vmatprep.mubr.msk.bf16.mxu0 %vm466_vm0, %v465_v0  ;;  %v384_v5 = vld [vmem:[#allocation2] ss:$0 sm:$0xff] }
  0x2b   : > { %s570_s16 = smov (!%p211_p9, %s498_s16), 1  ;;  %394 = vmatpush3.bf16.msra.mxu0 %v422_v1 }
  0x2c   : > { %s381_s8 = sshll.u32 %s570_s16, 2  ;;  %395 = vmatprep.subr.bf16.mxu0 %v465_v0 }
  0x2d   : > { %s214_s13 = scalar_lea.vmem %s557_s0, %s381_s8  ;;  %s218_s18 = scalar_lea.vmem %s560_s3, %s381_s8 }
  0x2e   : > { %v224_v3 = vld [vmem:[%s214_s13] sm:$0xf]  ;;  %s222_s20 = scalar_lea.vmem %s561_s4, %s381_s8 }
  0x2f   : > { %396 = vmatpush3.bf16.msra.mxu0 %v423_v2  ;;  %v292_v4 = vld [vmem:[%s218_s18] sm:$0xf] }
  0x30   : > { %v293_v6 = vunpack.c.l.bf16 %v292_v4 }
  0x32   : > { %398 = vmatmul.mubr.msk.bf16.vlgmr.msra.gmra.mrb[0].mxu0 %vm248_vm1, %v224_v3 }
 0x105   : > { %v286_v7 = vpop.f32.mrb[0].mxu0 }
 0x106   : > { %v287_v8 = vadd.f32 %v384_v5, %v286_v7  ;;  %v399_v9 = vpop.f32.mrb[1].mxu0 }
 0x107   : > { %v289_v10 = vpop.f32.mrb[2].mxu0 }
 0x108   : > { %v294_v11 = vadd.f32 %v293_v6, %v287_v8  ;;  %v400_v12 = vpop.f32.mrb[3].mxu0 }
 0x10a   : > { %v295_v13 = vpack.c.bf16 %v294_v11, %v294_v11 }
 0x10c   : > { %296 = vst [vmem:[%s222_s20] sm:$0xf] %v295_v13 }
 0x10d PF: > { %s15_s15 = sadd.s32 1, %s462_s15  }
 0x10e   : > { %p12_p2 = scmp.ge.s32.totalorder %s15_s15, 4  }
 0x110   :  { %14 = sbr.rel (!%p12_p2) target bundleno = 1 (0x1), region = 74 }
 0x117   :  { %316 = vsyncpa [#allocation3], 1 }
 0x118   :  { %318 = vsyncpa [#allocation3 + $0x1], 1 }

// kernel: grdn_forward.103
= control target key start
LH: loop header
LB: loop body
LE: loop exit
PB: predicated region body
PF: predicated region fallthrough
CT: control target
= control target key end

     0   :  { %s478_s12 = smov 0   ;;  %s544_s0 = inlined_call_operand.vmem [shape: bf16[16,216], index: 0, kind: input, shape index: {}]   ;;  %s545_s1 = inlined_call_operand.vmem [shape: bf16[216,128], index: 1, kind: input, shape index: {}]   ;;  %s546_s2 = inlined_call_operand.vmem [shape: f32[1,128], index: 2, kind: input, shape index: {}]   ;;  %s547_s3 = inlined_call_operand.vmem [shape: bf16[16,128], index: 3, kind: output, shape index: {}]  }
   0x1 LB: > { %s395_s13 = sadd.s32 4294967295, %s455_s12   ;;  %p399_p0 = scmp.ge.s32.totalorder %s455_s12, 1  ;;  %s455_s12 = sphi %s478_s12, %s13_s12  }
   0x2   : > { %p137_p1 = scmp.lt.s32.totalorder %s455_s12, 3 }
   0x4   : > { %p138_p2 = pnand %p399_p0, %p137_p1 }
   0x5   : > { %v433_v0 = vld [vmem:[%s545_s1] sm:$0xff] (!%p138_p2)   ;;  %v457_v1 = vmov (!%p138_p2), 0   ;;  %v434_v2 = vld [vmem:[%s545_s1 + $0x8] sm:$0xff] (!%p138_p2)   ;;  %p160_p3 = scmp.lt.s32.totalorder (!%p138_p2), %s395_s13, 1  ;;  %v435_v3 = vld [vmem:[%s545_s1 + $0x10] sm:$0xff] (!%p138_p2)   ;;  %vm292_vm0 = vcmask (!%p138_p2), 719872  }
   0x6   : > { %141 = sbr.rel (%p138_p2) target bundleno = 279 (0x117), region = 32  ;;  %300 = vmatprep.subr.bf16.mxu0 (!%p138_p2), %v457_v1  ;;  %v436_v4 = vld [vmem:[%s545_s1 + $0x18] sm:$0xff] (!%p138_p2)   ;;  %v437_v6 = vld [vmem:[%s545_s1 + $0x20] sm:$0xff] (!%p138_p2)   ;;  %v438_v8 = vld [vmem:[%s545_s1 + $0x28] sm:$0xff] (!%p138_p2)   ;;  %vm296_vm1 = vcmask (!%p138_p2), 1043456  }
   0x7   : > { %301 = vmatpush1.bf16.msra.mxu0 (!%p138_p2), %v433_v0  ;;  %v439_v9 = vld [vmem:[%s545_s1 + $0x30] sm:$0xff] (!%p138_p2)   ;;  %v440_v10 = vld [vmem:[%s545_s1 + $0x38] sm:$0xff] (!%p138_p2)   ;;  %v441_v11 = vld [vmem:[%s545_s1 + $0x40] sm:$0xff] (!%p138_p2)  }
   0x8   : > { %302 = vmatprep.subr.bf16.mxu0 (!%p138_p2), %v457_v1  ;;  %v442_v12 = vld [vmem:[%s545_s1 + $0x48] sm:$0xff] (!%p138_p2)   ;;  %v443_v13 = vld [vmem:[%s545_s1 + $0x50] sm:$0xff] (!%p138_p2)   ;;  %v444_v14 = vld [vmem:[%s545_s1 + $0x58] sm:$0xff] (!%p138_p2)  }
   0x9   : > { %v445_v15 = vld [vmem:[%s545_s1 + $0x60] sm:$0xff] (!%p138_p2)   ;;  %v446_v16 = vld [vmem:[%s545_s1 + $0x68] ss:$0 sps:$4 sm:$0xff] (!%p138_p2)  }
   0xa   : > { %v298_v17 = vsel (!%p138_p2), %vm296_vm1, %v446_v16, 0  ;;  %v403_v19 = vld [vmem:[%s546_s2] ss:$0 sm:$0xff] (!%p138_p2) }
   0xb   : > { %303 = vmatpush1.bf16.msra.mxu0 (!%p138_p2), %v434_v2 }
   0xc   : > { %304 = vmatprep.subr.bf16.mxu0 (!%p138_p2), %v457_v1 }
   0xd   : > { %s549_s13 = smov (!%p160_p3, %s395_s13), 1 }
   0xe   : > { %s423_s20 = sshll.u32 %s549_s13, 3  ;;  %s402_s23 = sshll.u32 %s549_s13, 2 }
   0xf   : > { %305 = vmatpush1.bf16.msra.mxu0 %v435_v3  ;;  %s164_s25 = scalar_lea.vmem %s544_s0, %s423_s20  ;;  %s168_s26 = scalar_lea.vmem %s547_s3, %s402_s23 }
  0x10   : > { %306 = vmatprep.subr.bf16.mxu0 %v457_v1  ;;  %v170_v5 = vld [vmem:[%s164_s25] sm:$0xff] }
  0x11   : > { %v405_v7 = vcombine.high %v170_v5, %v170_v5  ;;  %v404_v18 = vcombine.low %v170_v5, %v170_v5 }
  0x13   : > { %307 = vmatpush1.bf16.msra.mxu0 %v436_v4  ;;  %420 = vmatprep.mubr.msk.bf16.mxu0 %vm292_vm0, %v405_v7 }
  0x14   : > { %308 = vmatprep.subr.bf16.mxu0 %v457_v1 }
  0x17   : > { %309 = vmatpush1.bf16.msra.mxu0 %v437_v6 }
  0x18   : > { %310 = vmatprep.subr.bf16.mxu0 %v457_v1 }
  0x1b   : > { %311 = vmatpush1.bf16.msra.mxu0 %v438_v8 }
  0x1c   : > { %312 = vmatprep.subr.bf16.mxu0 %v457_v1 }
  0x1f   : > { %313 = vmatpush1.bf16.msra.mxu0 %v439_v9 }
  0x20   : > { %314 = vmatprep.subr.bf16.mxu0 %v457_v1 }
  0x23   : > { %315 = vmatpush1.bf16.msra.mxu0 %v440_v10 }
  0x24   : > { %316 = vmatprep.subr.bf16.mxu0 %v457_v1 }
  0x27   : > { %317 = vmatpush1.bf16.msra.mxu0 %v441_v11 }
  0x28   : > { %318 = vmatprep.subr.bf16.mxu0 %v457_v1 }
  0x2b   : > { %319 = vmatpush1.bf16.msra.mxu0 %v442_v12 }
  0x2c   : > { %320 = vmatprep.subr.bf16.mxu0 %v457_v1 }
  0x2f   : > { %321 = vmatpush1.bf16.msra.mxu0 %v443_v13 }
  0x30   : > { %322 = vmatprep.subr.bf16.mxu0 %v457_v1 }
  0x33   : > { %323 = vmatpush1.bf16.msra.mxu0 %v444_v14 }
  0x34   : > { %324 = vmatprep.subr.bf16.mxu0 %v457_v1 }
  0x37   : > { %325 = vmatpush1.bf16.msra.mxu0 %v445_v15 }
  0x38   : > { %326 = vmatprep.subr.bf16.mxu0 %v457_v1 }
  0x3b   : > { %327 = vmatpush1.bf16.msra.mxu0 %v298_v17 }
  0x3e   : > { %333 = vmatmul.mubr.bf16.vlgmr.msra.gmra.mrb[0].mxu0 %v404_v18 }
 0x111   : > { %v334_v20 = vpop.f32.mrb[0].mxu0 }
 0x112   : > { %v335_v21 = vadd.f32 %v403_v19, %v334_v20  ;;  %v336_v22 = vpop.f32.mrb[1].mxu0 }
 0x113   : > { %v337_v23 = vpop.f32.mrb[2].mxu0 }
 0x114   : > { %v340_v24 = vpack.c.bf16 %v335_v21, %v335_v21  ;;  %v338_v25 = vpop.f32.mrb[3].mxu0 }
 0x116   : > { %341 = vst [vmem:[%s168_s26] sm:$0xf] %v340_v24 }
 0x117 PF: > { %s13_s12 = sadd.s32 1, %s455_s12  }
 0x118   : > { %p10_p4 = scmp.ge.s32.totalorder %s13_s12, 4  }
 0x11a   :  { %12 = sbr.rel (!%p10_p4) target bundleno = 1 (0x1), region = 62 }

// kernel: grdn_forward.104
= control target key start
LH: loop header
LB: loop body
LE: loop exit
PB: predicated region body
PF: predicated region fallthrough
CT: control target
= control target key end

     0   :  { %s430_s12 = smov 0   ;;  %s474_s0 = inlined_call_operand.vmem [shape: bf16[16,128], index: 0, kind: input, shape index: {}]   ;;  %s475_s1 = inlined_call_operand.vmem [shape: bf16[128,128], index: 1, kind: input, shape index: {}]   ;;  %s476_s2 = inlined_call_operand.vmem [shape: f32[1,128], index: 2, kind: input, shape index: {}]   ;;  %s477_s3 = inlined_call_operand.vmem [shape: bf16[16,128], index: 3, kind: output, shape index: {}]  }
   0x1 LB: > { %s335_s13 = sadd.s32 4294967295, %s406_s12   ;;  %p339_p0 = scmp.ge.s32.totalorder %s406_s12, 1  ;;  %s406_s12 = sphi %s430_s12, %s13_s12  }
   0x2   : > { %p136_p1 = scmp.lt.s32.totalorder %s406_s12, 3 }
   0x4   : > { %p137_p2 = pnand %p339_p0, %p136_p1 }
   0x5   : > { %v392_v0 = vld [vmem:[%s475_s1] sm:$0xff] (!%p137_p2)   ;;  %v408_v1 = vmov (!%p137_p2), 0.0   ;;  %v393_v2 = vld [vmem:[%s475_s1 + $0x8] sm:$0xff] (!%p137_p2)   ;;  %vm409_vm0 = vmmov (!%p137_p2), 0   ;;  %v394_v3 = vld [vmem:[%s475_s1 + $0x10] sm:$0xff] (!%p137_p2)   ;;  %p158_p3 = scmp.lt.s32.totalorder (!%p137_p2), %s335_s13, 1 }
   0x6   : > { %140 = sbr.rel (%p137_p2) target bundleno = 257 (0x101), region = 32  ;;  %362 = vmatprep.subr.bf16.mxu0 (!%p137_p2), %v408_v1  ;;  %378 = vmatprep.mubr.msk.bf16.mxu0 (!%p137_p2), %vm409_vm0, %v408_v1  ;;  %v395_v4 = vld [vmem:[%s475_s1 + $0x18] sm:$0xff] (!%p137_p2)   ;;  %v396_v5 = vld [vmem:[%s475_s1 + $0x20] sm:$0xff] (!%p137_p2)   ;;  %v397_v6 = vld [vmem:[%s475_s1 + $0x28] sm:$0xff] (!%p137_p2)  }
   0x7   : > { %363 = vmatpush3.bf16.msra.mxu0 (!%p137_p2), %v392_v0  ;;  %v398_v7 = vld [vmem:[%s475_s1 + $0x30] sm:$0xff] (!%p137_p2)   ;;  %v399_v8 = vld [vmem:[%s475_s1 + $0x38] sm:$0xff] (!%p137_p2)   ;;  %v342_v10 = vld [vmem:[%s476_s2] ss:$0 sm:$0xff] (!%p137_p2) }
   0x8   : > { %364 = vmatprep.subr.bf16.mxu0 (!%p137_p2), %v408_v1 }
   0xb   : > { %365 = vmatpush3.bf16.msra.mxu0 (!%p137_p2), %v393_v2 }
   0xc   : > { %366 = vmatprep.subr.bf16.mxu0 (!%p137_p2), %v408_v1 }
   0xd   : > { %s479_s13 = smov (!%p158_p3, %s335_s13), 1 }
   0xe   : > { %s340_s28 = sshll.u32 %s479_s13, 2 }
   0xf   : > { %367 = vmatpush3.bf16.msra.mxu0 %v394_v3  ;;  %s161_s6 = scalar_lea.vmem %s474_s0, %s340_s28  ;;  %s165_s11 = scalar_lea.vmem %s477_s3, %s340_s28 }
  0x10   : > { %368 = vmatprep.subr.bf16.mxu0 %v408_v1  ;;  %v167_v9 = vld [vmem:[%s161_s6] sm:$0xf] }
  0x13   : > { %369 = vmatpush3.bf16.msra.mxu0 %v395_v4 }
  0x14   : > { %370 = vmatprep.subr.bf16.mxu0 %v408_v1 }
  0x17   : > { %371 = vmatpush3.bf16.msra.mxu0 %v396_v5 }
  0x18   : > { %372 = vmatprep.subr.bf16.mxu0 %v408_v1 }
  0x1b   : > { %373 = vmatpush3.bf16.msra.mxu0 %v397_v6 }
  0x1c   : > { %374 = vmatprep.subr.bf16.mxu0 %v408_v1 }
  0x1f   : > { %375 = vmatpush3.bf16.msra.mxu0 %v398_v7 }
  0x20   : > { %376 = vmatprep.subr.bf16.mxu0 %v408_v1 }
  0x23   : > { %377 = vmatpush3.bf16.msra.mxu0 %v399_v8 }
  0x26   : > { %379 = vmatmul.mubr.bf16.vlgmr.msra.gmra.mrb[0].mxu0 %v167_v9 }
  0xf9   : > { %v273_v11 = vpop.f32.mrb[0].mxu0 }
  0xfa   : > { %v274_v12 = vadd.f32 %v342_v10, %v273_v11  ;;  %v380_v13 = vpop.f32.mrb[1].mxu0 }
  0xfb   : > { %v276_v14 = vpop.f32.mrb[2].mxu0 }
  0xfc   : > { %v279_v15 = vmax.f32 %v274_v12, 0.0  ;;  %v381_v16 = vpop.f32.mrb[3].mxu0 }
  0xfe   : > { %v280_v17 = vpack.c.bf16 %v279_v15, %v279_v15 }
 0x100   : > { %281 = vst [vmem:[%s165_s11] sm:$0xf] %v280_v17 }
 0x101 PF: > { %s13_s12 = sadd.s32 1, %s406_s12  }
 0x102   : > { %p10_p4 = scmp.ge.s32.totalorder %s13_s12, 4  }
 0x104   :  { %12 = sbr.rel (!%p10_p4) target bundleno = 1 (0x1), region = 62 }

// kernel: grdn_forward.105
= control target key start
LH: loop header
LB: loop body
LE: loop exit
PB: predicated region body
PF: predicated region fallthrough
CT: control target
= control target key end

     0   :  { %s563_s12 = smov 0   ;;  %s606_s0 = inlined_call_operand.vmem [shape: bf16[128,64], index: 0, kind: input, shape index: {}]   ;;  %s607_s1 = inlined_call_operand.vmem [shape: bf16[64,128], index: 1, kind: input, shape index: {}]   ;;  %s608_s2 = inlined_call_operand.vmem [shape: f32[1,128], index: 2, kind: input, shape index: {}]   ;;  %s609_s3 = inlined_call_operand.vmem [shape: bf16[128,128], index: 3, kind: output, shape index: {}]  }
   0x1 LB: > { %s424_s13 = sadd.s32 4294967295, %s541_s12   ;;  %p428_p0 = scmp.ge.s32.totalorder %s541_s12, 1  ;;  %s541_s12 = sphi %s563_s12, %s13_s12  }
   0x2   : > { %p138_p1 = scmp.lt.s32.totalorder %s541_s12, 3 }
   0x4   : > { %p139_p2 = pnand %p428_p0, %p138_p1 }
   0x5   : > { %v527_v0 = vld [vmem:[%s607_s1] sm:$0xff] (!%p139_p2)   ;;  %s429_s16 = sshll.u32 (!%p139_p2), %s424_s13, 3  ;;  %v528_v1 = vld [vmem:[%s607_s1 + $0x8] sm:$0xff] (!%p139_p2)   ;;  %v529_v2 = vld [vmem:[%s607_s1 + $0x10] sm:$0xff] (!%p139_p2)   ;;  %vm242_vm0 = vcmask (!%p139_p2), 523264  }
   0x6   : > { %142 = sbr.rel (%p139_p2) target bundleno = 244 (0xf4), region = 32  ;;  %p163_p3 = scmp.lt.s32.totalorder (!%p139_p2), %s429_s16, 15  ;;  %495 = vmatprep.subr.bf16.mxu0 (!%p139_p2), %v527_v0  ;;  %511 = vmatprep.subr.bf16.mxu1 (!%p139_p2), %v527_v0  ;;  %v530_v3 = vld [vmem:[%s607_s1 + $0x18] sm:$0xff] (!%p139_p2)   ;;  %v433_v8 = vld [vmem:[%s608_s2] ss:$0 sm:$0xff] (!%p139_p2) }
   0x7   : > { %496 = vmatpush3.bf16.msra.mxu0 (!%p139_p2), %v527_v0  ;;  %515 = vmatpush3.bf16.msra.mxu1 (!%p139_p2), %v527_v0 }
   0x8   : > { %497 = vmatprep.subr.bf16.mxu0 (!%p139_p2), %v528_v1  ;;  %512 = vmatprep.subr.bf16.mxu1 (!%p139_p2), %v528_v1 }
   0xb   : > { %498 = vmatpush3.bf16.msra.mxu0 (!%p139_p2), %v528_v1  ;;  %516 = vmatpush3.bf16.msra.mxu1 (!%p139_p2), %v528_v1 }
   0xc   : > { %499 = vmatprep.subr.bf16.mxu0 (!%p139_p2), %v529_v2  ;;  %513 = vmatprep.subr.bf16.mxu1 (!%p139_p2), %v529_v2 }
   0xd   : > { %s611_s16 = smov (!%p163_p3, %s429_s16), 15 }
   0xe   : > { %s430_s21 = sshll.u32 %s611_s16, 2 }
   0xf   : > { %s166_s26 = scalar_lea.vmem %s606_s0, %s430_s21  ;;  %500 = vmatpush3.bf16.msra.mxu0 %v529_v2  ;;  %517 = vmatpush3.bf16.msra.mxu1 %v529_v2  ;;  %s172_s4 = scalar_lea.vmem %s609_s3, %s430_s21 }
  0x10   : > { %v531_v4 = vld [vmem:[%s166_s26] sm:$0xff]   ;;  %v532_v5 = vld [vmem:[%s166_s26 + $0x10] sm:$0xff]   ;;  %501 = vmatprep.subr.bf16.mxu0 %v530_v3  ;;  %514 = vmatprep.subr.bf16.mxu1 %v530_v3  ;;  %v533_v6 = vld [vmem:[%s166_s26 + $0x8] sm:$0xff]  }
  0x11   : > { %503 = vmatprep.mubr.msk.bf16.mxu0 %vm242_vm0, %v531_v4  ;;  %507 = vmatprep.mubr.msk.bf16.mxu1 %vm242_vm0, %v532_v5  ;;  %v534_v7 = vld [vmem:[%s166_s26 + $0x18] sm:$0xff]  }
  0x13   : > { %502 = vmatpush3.bf16.msra.mxu0 %v530_v3  ;;  %518 = vmatpush3.bf16.msra.mxu1 %v530_v3 }
  0x16   : > { %504 = vmatmul.mubr.msk.bf16.vlgmr.msra.gmra.mrb[0].mxu0 %vm242_vm0, %v533_v6  ;;  %508 = vmatmul.mubr.msk.bf16.vlgmr.msra.gmra.mrb[0].mxu1 %vm242_vm0, %v534_v7 }
  0xe9   : > { %v505_v9 = vpop.f32.mrb[0].mxu0  ;;  %v509_v10 = vpop.f32.mrb[0].mxu1 }
  0xea   : > { %v298_v11 = vadd.f32 %v505_v9, %v433_v8  ;;  %v314_v12 = vadd.f32 %v509_v10, %v433_v8  ;;  %v289_v13 = vpop.f32.mrb[1].mxu0  ;;  %v305_v14 = vpop.f32.mrb[1].mxu1 }
  0xeb   : > { %v290_v15 = vadd.f32 %v433_v8, %v289_v13  ;;  %v306_v16 = vadd.f32 %v433_v8, %v305_v14  ;;  %v506_v17 = vpop.f32.mrb[2].mxu0  ;;  %v510_v18 = vpop.f32.mrb[2].mxu1 }
  0xec   : > { %v301_v19 = vadd.f32 %v506_v17, %v433_v8  ;;  %v317_v20 = vadd.f32 %v510_v18, %v433_v8  ;;  %v292_v21 = vpop.f32.mrb[3].mxu0  ;;  %v308_v22 = vpop.f32.mrb[3].mxu1  ;;  %v322_v25 = vmax.f32 %v298_v11, 0.0  ;;  %v326_v26 = vmax.f32 %v314_v12, 0.0 }
  0xed   : > { %v293_v23 = vadd.f32 %v433_v8, %v292_v21  ;;  %v309_v24 = vadd.f32 %v433_v8, %v308_v22  ;;  %v320_v29 = vmax.f32 %v290_v15, 0.0  ;;  %v324_v30 = vmax.f32 %v306_v16, 0.0 }
  0xee   : > { %v323_v27 = vmax.f32 %v301_v19, 0.0  ;;  %v327_v28 = vmax.f32 %v317_v20, 0.0 }
  0xef   : > { %v321_v31 = vmax.f32 %v293_v23, 0.0  ;;  %v325_v32 = vmax.f32 %v309_v24, 0.0 }
  0xf0   : > { %v472_v33 = vpack.c.bf16 %v323_v27, %v322_v25  ;;  %v482_v34 = vpack.c.bf16 %v327_v28, %v326_v26 }
  0xf1   : > { %v467_v35 = vpack.c.bf16 %v321_v31, %v320_v29  ;;  %v477_v36 = vpack.c.bf16 %v325_v32, %v324_v30 }
  0xf2   : > { %484 = vst [vmem:[%s172_s4 + $0x8] sm:$0xff] %v472_v33   ;;  %486 = vst [vmem:[%s172_s4 + $0x18] sm:$0xff] %v482_v34  }
  0xf3   : > { %468 = vst [vmem:[%s172_s4] sm:$0xff] %v467_v35   ;;  %485 = vst [vmem:[%s172_s4 + $0x10] sm:$0xff] %v477_v36  }
  0xf4 PF: > { %s13_s12 = sadd.s32 1, %s541_s12  }
  0xf5   : > { %p10_p4 = scmp.ge.s32.totalorder %s13_s12, 4  }
  0xf7   :  { %12 = sbr.rel (!%p10_p4) target bundleno = 1 (0x1), region = 62 }

// kernel: grdn_forward.106
= control target key start
LH: loop header
LB: loop body
LE: loop exit
PB: predicated region body
PF: predicated region fallthrough
CT: control target
= control target key end

     0   :  { %s1851_s12 = smov 0   ;;  %s2056_s0 = inlined_call_operand.vmem [shape: bf16[1024,64], index: 0, kind: input, shape index: {}]   ;;  %s2057_s1 = inlined_call_operand.vmem [shape: bf16[64,128], index: 1, kind: input, shape index: {}]   ;;  %s2058_s2 = inlined_call_operand.vmem [shape: f32[1,128], index: 2, kind: input, shape index: {}]   ;;  %s2059_s3 = inlined_call_operand.vmem [shape: bf16[1024,128], index: 3, kind: output, shape index: {}]  }
   0x1 LB: > { %s1264_s13 = sadd.s32 4294967295, %s1829_s12   ;;  %p1268_p0 = scmp.ge.s32.totalorder %s1829_s12, 1  ;;  %s1829_s12 = sphi %s1851_s12, %s13_s12  }
   0x2   : > { %p138_p1 = scmp.lt.s32.totalorder %s1829_s12, 3 }
   0x4   : > { %p139_p2 = pnand %p1268_p0, %p138_p1 }
   0x5   : > { %v1787_v0 = vld [vmem:[%s2057_s1] sm:$0xff] (!%p139_p2)   ;;  %s1269_s16 = sshll.u32 (!%p139_p2), %s1264_s13, 6  ;;  %v1788_v1 = vld [vmem:[%s2057_s1 + $0x8] sm:$0xff] (!%p139_p2)   ;;  %v1789_v2 = vld [vmem:[%s2057_s1 + $0x10] sm:$0xff] (!%p139_p2)   ;;  %vm438_vm0 = vcmask (!%p139_p2), 523264  }
   0x6   : > { %142 = sbr.rel (%p139_p2) target bundleno = 300 (0x12c), region = 32  ;;  %p163_p3 = scmp.lt.s32.totalorder (!%p139_p2), %s1269_s16, 127  ;;  %1699 = vmatprep.subr.bf16.mxu0 (!%p139_p2), %v1787_v0  ;;  %1771 = vmatprep.subr.bf16.mxu1 (!%p139_p2), %v1787_v0  ;;  %v1790_v3 = vld [vmem:[%s2057_s1 + $0x18] sm:$0xff] (!%p139_p2)   ;;  %v1948_v36 = vld [vmem:[%s2058_s2] ss:$0 sm:$0xff] (!%p139_p2) }
   0x7   : > { %1700 = vmatpush3.bf16.msra.mxu0 (!%p139_p2), %v1787_v0  ;;  %1775 = vmatpush3.bf16.msra.mxu1 (!%p139_p2), %v1787_v0 }
   0x8   : > { %1701 = vmatprep.subr.bf16.mxu0 (!%p139_p2), %v1788_v1  ;;  %1772 = vmatprep.subr.bf16.mxu1 (!%p139_p2), %v1788_v1 }
   0xb   : > { %1702 = vmatpush3.bf16.msra.mxu0 (!%p139_p2), %v1788_v1  ;;  %1776 = vmatpush3.bf16.msra.mxu1 (!%p139_p2), %v1788_v1 }
   0xc   : > { %1703 = vmatprep.subr.bf16.mxu0 (!%p139_p2), %v1789_v2  ;;  %1773 = vmatprep.subr.bf16.mxu1 (!%p139_p2), %v1789_v2 }
   0xd   : > { %s2061_s16 = smov (!%p163_p3, %s1269_s16), 127 }
   0xe   : > { %s1270_s21 = sshll.u32 %s2061_s16, 2 }
   0xf   : > { %s1879_s26 = scalar_lea.vmem %s2056_s0, %s1270_s21  ;;  %1704 = vmatpush3.bf16.msra.mxu0 %v1789_v2  ;;  %1777 = vmatpush3.bf16.msra.mxu1 %v1789_v2  ;;  %s1963_s4 = scalar_lea.vmem %s2059_s3, %s1270_s21 }
  0x10   : > { %v1791_v4 = vld [vmem:[%s1879_s26] sm:$0xff]   ;;  %1705 = vmatprep.subr.bf16.mxu0 %v1790_v3  ;;  %1774 = vmatprep.subr.bf16.mxu1 %v1790_v3  ;;  %v1793_v6 = vld [vmem:[%s1879_s26 + $0x8] sm:$0xff]   ;;  %v1795_v8 = vld [vmem:[%s1879_s26 + $0x10] sm:$0xff]  }
  0x11   : > { %v1792_v5 = vld [vmem:[%s1879_s26 + $0x80] sm:$0xff]   ;;  %1707 = vmatprep.mubr.msk.bf16.mxu0 %vm438_vm0, %v1791_v4  ;;  %v1794_v7 = vld [vmem:[%s1879_s26 + $0x88] sm:$0xff]   ;;  %v1796_v9 = vld [vmem:[%s1879_s26 + $0x90] sm:$0xff]  }
  0x12   : > { %1739 = vmatprep.mubr.msk.bf16.mxu1 %vm438_vm0, %v1792_v5  ;;  %v1797_v10 = vld [vmem:[%s1879_s26 + $0x18] sm:$0xff]   ;;  %v1799_v12 = vld [vmem:[%s1879_s26 + $0x20] sm:$0xff]   ;;  %v1801_v14 = vld [vmem:[%s1879_s26 + $0x28] sm:$0xff]  }
  0x13   : > { %1706 = vmatpush3.bf16.msra.mxu0 %v1790_v3  ;;  %1778 = vmatpush3.bf16.msra.mxu1 %v1790_v3  ;;  %v1798_v11 = vld [vmem:[%s1879_s26 + $0x98] sm:$0xff]   ;;  %v1800_v13 = vld [vmem:[%s1879_s26 + $0xa0] sm:$0xff]   ;;  %v1802_v15 = vld [vmem:[%s1879_s26 + $0xa8] sm:$0xff]  }
  0x14   : > { %v1803_v16 = vld [vmem:[%s1879_s26 + $0x30] sm:$0xff]   ;;  %v1805_v18 = vld [vmem:[%s1879_s26 + $0x38] sm:$0xff]   ;;  %v1807_v20 = vld [vmem:[%s1879_s26 + $0x40] sm:$0xff]  }
  0x15   : > { %v1804_v17 = vld [vmem:[%s1879_s26 + $0xb0] sm:$0xff]   ;;  %v1806_v19 = vld [vmem:[%s1879_s26 + $0xb8] sm:$0xff]   ;;  %v1808_v21 = vld [vmem:[%s1879_s26 + $0xc0] sm:$0xff]  }
  0x16   : > { %1708 = vmatmul.mubr.msk.bf16.vlgmr.msra.gmra.mrb[0].mxu0 %vm438_vm0, %v1793_v6  ;;  %1740 = vmatmul.mubr.msk.bf16.vlgmr.msra.gmra.mrb[0].mxu1 %vm438_vm0, %v1794_v7  ;;  %v1809_v22 = vld [vmem:[%s1879_s26 + $0x48] sm:$0xff]   ;;  %v1811_v24 = vld [vmem:[%s1879_s26 + $0x50] sm:$0xff]   ;;  %v1813_v26 = vld [vmem:[%s1879_s26 + $0x58] sm:$0xff]  }
  0x17   : > { %1711 = vmatprep.mubr.msk.bf16.mxu0 %vm438_vm0, %v1795_v8  ;;  %1743 = vmatprep.mubr.msk.bf16.mxu1 %vm438_vm0, %v1796_v9  ;;  %v1810_v23 = vld [vmem:[%s1879_s26 + $0xc8] sm:$0xff]   ;;  %v1812_v25 = vld [vmem:[%s1879_s26 + $0xd0] sm:$0xff]   ;;  %v1814_v27 = vld [vmem:[%s1879_s26 + $0xd8] sm:$0xff]  }
  0x18   : > { %v1815_v28 = vld [vmem:[%s1879_s26 + $0x60] sm:$0xff]   ;;  %v1817_v30 = vld [vmem:[%s1879_s26 + $0x68] sm:$0xff]   ;;  %v1819_v32 = vld [vmem:[%s1879_s26 + $0x70] sm:$0xff]  }
  0x19   : > { %v1816_v29 = vld [vmem:[%s1879_s26 + $0xe0] sm:$0xff]   ;;  %v1818_v31 = vld [vmem:[%s1879_s26 + $0xe8] sm:$0xff]   ;;  %v1820_v33 = vld [vmem:[%s1879_s26 + $0xf0] sm:$0xff]  }
  0x1a   : > { %v1821_v34 = vld [vmem:[%s1879_s26 + $0x78] sm:$0xff]  }
  0x1b   : > { %v1822_v35 = vld [vmem:[%s1879_s26 + $0xf8] sm:$0xff]  }
  0x1e   : > { %1712 = vmatmul.mubr.msk.bf16.gmra.mrb[4].mxu0 %vm438_vm0, %v1797_v10  ;;  %1744 = vmatmul.mubr.msk.bf16.gmra.mrb[4].mxu1 %vm438_vm0, %v1798_v11 }
  0x1f   : > { %1715 = vmatprep.mubr.msk.bf16.mxu0 %vm438_vm0, %v1799_v12  ;;  %1747 = vmatprep.mubr.msk.bf16.mxu1 %vm438_vm0, %v1800_v13 }
  0x26   : > { %1716 = vmatmul.mubr.msk.bf16.gmra.mrb[8].mxu0 %vm438_vm0, %v1801_v14  ;;  %1748 = vmatmul.mubr.msk.bf16.gmra.mrb[8].mxu1 %vm438_vm0, %v1802_v15 }
  0x27   : > { %1719 = vmatprep.mubr.msk.bf16.mxu0 %vm438_vm0, %v1803_v16  ;;  %1751 = vmatprep.mubr.msk.bf16.mxu1 %vm438_vm0, %v1804_v17 }
  0x2e   : > { %1720 = vmatmul.mubr.msk.bf16.gmra.mrb[12].mxu0 %vm438_vm0, %v1805_v18  ;;  %1752 = vmatmul.mubr.msk.bf16.gmra.mrb[12].mxu1 %vm438_vm0, %v1806_v19 }
  0x2f   : > { %1723 = vmatprep.mubr.msk.bf16.mxu0 %vm438_vm0, %v1807_v20  ;;  %1755 = vmatprep.mubr.msk.bf16.mxu1 %vm438_vm0, %v1808_v21 }
  0x36   : > { %1724 = vmatmul.mubr.msk.bf16.gmra.mrb[16].mxu0 %vm438_vm0, %v1809_v22  ;;  %1756 = vmatmul.mubr.msk.bf16.gmra.mrb[16].mxu1 %vm438_vm0, %v1810_v23 }
  0x37   : > { %1727 = vmatprep.mubr.msk.bf16.mxu0 %vm438_vm0, %v1811_v24  ;;  %1759 = vmatprep.mubr.msk.bf16.mxu1 %vm438_vm0, %v1812_v25 }
  0x3e   : > { %1728 = vmatmul.mubr.msk.bf16.gmra.mrb[20].mxu0 %vm438_vm0, %v1813_v26  ;;  %1760 = vmatmul.mubr.msk.bf16.gmra.mrb[20].mxu1 %vm438_vm0, %v1814_v27 }
  0x3f   : > { %1731 = vmatprep.mubr.msk.bf16.mxu0 %vm438_vm0, %v1815_v28  ;;  %1763 = vmatprep.mubr.msk.bf16.mxu1 %vm438_vm0, %v1816_v29 }
  0x46   : > { %1732 = vmatmul.mubr.msk.bf16.gmra.mrb[24].mxu0 %vm438_vm0, %v1817_v30  ;;  %1764 = vmatmul.mubr.msk.bf16.gmra.mrb[24].mxu1 %vm438_vm0, %v1818_v31 }
  0x47   : > { %1735 = vmatprep.mubr.msk.bf16.mxu0 %vm438_vm0, %v1819_v32  ;;  %1767 = vmatprep.mubr.msk.bf16.mxu1 %vm438_vm0, %v1820_v33 }
  0x4e   : > { %1736 = vmatmul.mubr.msk.bf16.gmra.mrb[28].mxu0 %vm438_vm0, %v1821_v34  ;;  %1768 = vmatmul.mubr.msk.bf16.gmra.mrb[28].mxu1 %vm438_vm0, %v1822_v35 }
  0xe9   : > { %v1709_v37 = vpop.f32.mrb[0].mxu0  ;;  %v1741_v38 = vpop.f32.mrb[0].mxu1 }
  0xea   : > { %v578_v39 = vadd.f32 %v1709_v37, %v1948_v36  ;;  %v706_v40 = vadd.f32 %v1741_v38, %v1948_v36  ;;  %v569_v41 = vpop.f32.mrb[1].mxu0  ;;  %v697_v42 = vpop.f32.mrb[1].mxu1 }
  0xeb   : > { %v570_v43 = vadd.f32 %v1948_v36, %v569_v41  ;;  %v698_v44 = vadd.f32 %v1948_v36, %v697_v42  ;;  %v1710_v45 = vpop.f32.mrb[2].mxu0  ;;  %v1742_v46 = vpop.f32.mrb[2].mxu1 }
  0xec   : > { %v581_v47 = vadd.f32 %v1710_v45, %v1948_v36  ;;  %v709_v48 = vadd.f32 %v1742_v46, %v1948_v36  ;;  %v572_v49 = vpop.f32.mrb[3].mxu0  ;;  %v700_v50 = vpop.f32.mrb[3].mxu1  ;;  %v826_v53 = vmax.f32 %v578_v39, 0.0  ;;  %v858_v54 = vmax.f32 %v706_v40, 0.0 }
  0xed   : > { %v573_v51 = vadd.f32 %v1948_v36, %v572_v49  ;;  %v701_v52 = vadd.f32 %v1948_v36, %v700_v50  ;;  %v824_v57 = vmax.f32 %v570_v43, 0.0  ;;  %v856_v58 = vmax.f32 %v698_v44, 0.0 }
  0xee   : > { %v827_v55 = vmax.f32 %v581_v47, 0.0  ;;  %v859_v56 = vmax.f32 %v709_v48, 0.0 }
  0xef   : > { %v825_v59 = vmax.f32 %v573_v51, 0.0  ;;  %v857_v60 = vmax.f32 %v701_v52, 0.0 }
  0xf0   : > { %v1480_v61 = vpack.c.bf16 %v827_v55, %v826_v53  ;;  %v1560_v62 = vpack.c.bf16 %v859_v56, %v858_v54 }
  0xf1   : > { %v1475_v63 = vpack.c.bf16 %v825_v59, %v824_v57  ;;  %v1555_v0 = vpack.c.bf16 %v857_v60, %v856_v58  ;;  %v1713_v1 = vpop.f32.mrb[4].mxu0  ;;  %v1745_v2 = vpop.f32.mrb[4].mxu1 }
  0xf2   : > { %1632 = vst [vmem:[%s1963_s4 + $0x8] sm:$0xff] %v1480_v61   ;;  %1648 = vst [vmem:[%s1963_s4 + $0x88] sm:$0xff] %v1560_v62   ;;  %v594_v3 = vadd.f32 %v1713_v1, %v1948_v36  ;;  %v722_v4 = vadd.f32 %v1745_v2, %v1948_v36  ;;  %v585_v5 = vpop.f32.mrb[5].mxu0  ;;  %v713_v6 = vpop.f32.mrb[5].mxu1 }
  0xf3   : > { %1476 = vst [vmem:[%s1963_s4] sm:$0xff] %v1475_v63   ;;  %1647 = vst [vmem:[%s1963_s4 + $0x80] sm:$0xff] %v1555_v0   ;;  %v586_v7 = vadd.f32 %v1948_v36, %v585_v5  ;;  %v714_v8 = vadd.f32 %v1948_v36, %v713_v6  ;;  %v1714_v9 = vpop.f32.mrb[6].mxu0  ;;  %v1746_v10 = vpop.f32.mrb[6].mxu1 }
  0xf4   : > { %v597_v11 = vadd.f32 %v1714_v9, %v1948_v36  ;;  %v725_v12 = vadd.f32 %v1746_v10, %v1948_v36  ;;  %v588_v13 = vpop.f32.mrb[7].mxu0  ;;  %v716_v14 = vpop.f32.mrb[7].mxu1  ;;  %v830_v17 = vmax.f32 %v594_v3, 0.0  ;;  %v862_v18 = vmax.f32 %v722_v4, 0.0 }
  0xf5   : > { %v589_v15 = vadd.f32 %v1948_v36, %v588_v13  ;;  %v717_v16 = vadd.f32 %v1948_v36, %v716_v14  ;;  %v828_v21 = vmax.f32 %v586_v7, 0.0  ;;  %v860_v22 = vmax.f32 %v714_v8, 0.0 }
  0xf6   : > { %v831_v19 = vmax.f32 %v597_v11, 0.0  ;;  %v863_v20 = vmax.f32 %v725_v12, 0.0 }
  0xf7   : > { %v829_v23 = vmax.f32 %v589_v15, 0.0  ;;  %v861_v24 = vmax.f32 %v717_v16, 0.0 }
  0xf8   : > { %v1490_v25 = vpack.c.bf16 %v831_v19, %v830_v17  ;;  %v1570_v26 = vpack.c.bf16 %v863_v20, %v862_v18 }
  0xf9   : > { %v1485_v27 = vpack.c.bf16 %v829_v23, %v828_v21  ;;  %v1565_v28 = vpack.c.bf16 %v861_v24, %v860_v22  ;;  %v1717_v29 = vpop.f32.mrb[8].mxu0  ;;  %v1749_v30 = vpop.f32.mrb[8].mxu1 }
  0xfa   : > { %1634 = vst [vmem:[%s1963_s4 + $0x18] sm:$0xff] %v1490_v25   ;;  %1650 = vst [vmem:[%s1963_s4 + $0x98] sm:$0xff] %v1570_v26   ;;  %v610_v31 = vadd.f32 %v1717_v29, %v1948_v36  ;;  %v738_v32 = vadd.f32 %v1749_v30, %v1948_v36  ;;  %v601_v33 = vpop.f32.mrb[9].mxu0  ;;  %v729_v34 = vpop.f32.mrb[9].mxu1 }
  0xfb   : > { %1633 = vst [vmem:[%s1963_s4 + $0x10] sm:$0xff] %v1485_v27   ;;  %1649 = vst [vmem:[%s1963_s4 + $0x90] sm:$0xff] %v1565_v28   ;;  %v602_v35 = vadd.f32 %v1948_v36, %v601_v33  ;;  %v730_v37 = vadd.f32 %v1948_v36, %v729_v34  ;;  %v1718_v38 = vpop.f32.mrb[10].mxu0  ;;  %v1750_v39 = vpop.f32.mrb[10].mxu1 }
  0xfc   : > { %v613_v40 = vadd.f32 %v1718_v38, %v1948_v36  ;;  %v741_v41 = vadd.f32 %v1750_v39, %v1948_v36  ;;  %v604_v42 = vpop.f32.mrb[11].mxu0  ;;  %v732_v43 = vpop.f32.mrb[11].mxu1  ;;  %v834_v46 = vmax.f32 %v610_v31, 0.0  ;;  %v866_v47 = vmax.f32 %v738_v32, 0.0 }
  0xfd   : > { %v605_v44 = vadd.f32 %v1948_v36, %v604_v42  ;;  %v733_v45 = vadd.f32 %v1948_v36, %v732_v43  ;;  %v832_v50 = vmax.f32 %v602_v35, 0.0  ;;  %v864_v51 = vmax.f32 %v730_v37, 0.0 }
  0xfe   : > { %v835_v48 = vmax.f32 %v613_v40, 0.0  ;;  %v867_v49 = vmax.f32 %v741_v41, 0.0 }
  0xff   : > { %v833_v52 = vmax.f32 %v605_v44, 0.0  ;;  %v865_v53 = vmax.f32 %v733_v45, 0.0 }
 0x100   : > { %v1500_v54 = vpack.c.bf16 %v835_v48, %v834_v46  ;;  %v1580_v55 = vpack.c.bf16 %v867_v49, %v866_v47 }
 0x101   : > { %v1495_v56 = vpack.c.bf16 %v833_v52, %v832_v50  ;;  %v1575_v57 = vpack.c.bf16 %v865_v53, %v864_v51  ;;  %v1721_v58 = vpop.f32.mrb[12].mxu0  ;;  %v1753_v59 = vpop.f32.mrb[12].mxu1 }
 0x102   : > { %1636 = vst [vmem:[%s1963_s4 + $0x28] sm:$0xff] %v1500_v54   ;;  %1652 = vst [vmem:[%s1963_s4 + $0xa8] sm:$0xff] %v1580_v55   ;;  %v626_v60 = vadd.f32 %v1721_v58, %v1948_v36  ;;  %v754_v61 = vadd.f32 %v1753_v59, %v1948_v36  ;;  %v617_v62 = vpop.f32.mrb[13].mxu0  ;;  %v745_v63 = vpop.f32.mrb[13].mxu1 }
 0x103   : > { %1635 = vst [vmem:[%s1963_s4 + $0x20] sm:$0xff] %v1495_v56   ;;  %1651 = vst [vmem:[%s1963_s4 + $0xa0] sm:$0xff] %v1575_v57   ;;  %v618_v0 = vadd.f32 %v1948_v36, %v617_v62  ;;  %v746_v1 = vadd.f32 %v1948_v36, %v745_v63  ;;  %v1722_v2 = vpop.f32.mrb[14].mxu0  ;;  %v1754_v3 = vpop.f32.mrb[14].mxu1 }
 0x104   : > { %v629_v4 = vadd.f32 %v1722_v2, %v1948_v36  ;;  %v757_v5 = vadd.f32 %v1754_v3, %v1948_v36  ;;  %v620_v6 = vpop.f32.mrb[15].mxu0  ;;  %v748_v7 = vpop.f32.mrb[15].mxu1  ;;  %v838_v10 = vmax.f32 %v626_v60, 0.0  ;;  %v870_v11 = vmax.f32 %v754_v61, 0.0 }
 0x105   : > { %v621_v8 = vadd.f32 %v1948_v36, %v620_v6  ;;  %v749_v9 = vadd.f32 %v1948_v36, %v748_v7  ;;  %v836_v14 = vmax.f32 %v618_v0, 0.0  ;;  %v868_v15 = vmax.f32 %v746_v1, 0.0 }
 0x106   : > { %v839_v12 = vmax.f32 %v629_v4, 0.0  ;;  %v871_v13 = vmax.f32 %v757_v5, 0.0 }
 0x107   : > { %v837_v16 = vmax.f32 %v621_v8, 0.0  ;;  %v869_v17 = vmax.f32 %v749_v9, 0.0 }
 0x108   : > { %v1510_v18 = vpack.c.bf16 %v839_v12, %v838_v10  ;;  %v1590_v19 = vpack.c.bf16 %v871_v13, %v870_v11 }
 0x109   : > { %v1505_v20 = vpack.c.bf16 %v837_v16, %v836_v14  ;;  %v1585_v21 = vpack.c.bf16 %v869_v17, %v868_v15  ;;  %v1725_v22 = vpop.f32.mrb[16].mxu0  ;;  %v1757_v23 = vpop.f32.mrb[16].mxu1 }
 0x10a   : > { %1638 = vst [vmem:[%s1963_s4 + $0x38] sm:$0xff] %v1510_v18   ;;  %1654 = vst [vmem:[%s1963_s4 + $0xb8] sm:$0xff] %v1590_v19   ;;  %v642_v24 = vadd.f32 %v1725_v22, %v1948_v36  ;;  %v770_v25 = vadd.f32 %v1757_v23, %v1948_v36  ;;  %v633_v26 = vpop.f32.mrb[17].mxu0  ;;  %v761_v27 = vpop.f32.mrb[17].mxu1 }
 0x10b   : > { %1637 = vst [vmem:[%s1963_s4 + $0x30] sm:$0xff] %v1505_v20   ;;  %1653 = vst [vmem:[%s1963_s4 + $0xb0] sm:$0xff] %v1585_v21   ;;  %v634_v28 = vadd.f32 %v1948_v36, %v633_v26  ;;  %v762_v29 = vadd.f32 %v1948_v36, %v761_v27  ;;  %v1726_v30 = vpop.f32.mrb[18].mxu0  ;;  %v1758_v31 = vpop.f32.mrb[18].mxu1 }
 0x10c   : > { %v645_v32 = vadd.f32 %v1726_v30, %v1948_v36  ;;  %v773_v33 = vadd.f32 %v1758_v31, %v1948_v36  ;;  %v636_v34 = vpop.f32.mrb[19].mxu0  ;;  %v764_v35 = vpop.f32.mrb[19].mxu1  ;;  %v842_v39 = vmax.f32 %v642_v24, 0.0  ;;  %v874_v40 = vmax.f32 %v770_v25, 0.0 }
 0x10d   : > { %v637_v37 = vadd.f32 %v1948_v36, %v636_v34  ;;  %v765_v38 = vadd.f32 %v1948_v36, %v764_v35  ;;  %v840_v43 = vmax.f32 %v634_v28, 0.0  ;;  %v872_v44 = vmax.f32 %v762_v29, 0.0 }
 0x10e   : > { %v843_v41 = vmax.f32 %v645_v32, 0.0  ;;  %v875_v42 = vmax.f32 %v773_v33, 0.0 }
 0x10f   : > { %v841_v45 = vmax.f32 %v637_v37, 0.0  ;;  %v873_v46 = vmax.f32 %v765_v38, 0.0 }
 0x110   : > { %v1520_v47 = vpack.c.bf16 %v843_v41, %v842_v39  ;;  %v1600_v48 = vpack.c.bf16 %v875_v42, %v874_v40 }
 0x111   : > { %v1515_v49 = vpack.c.bf16 %v841_v45, %v840_v43  ;;  %v1595_v50 = vpack.c.bf16 %v873_v46, %v872_v44  ;;  %v1729_v51 = vpop.f32.mrb[20].mxu0  ;;  %v1761_v52 = vpop.f32.mrb[20].mxu1 }
 0x112   : > { %1640 = vst [vmem:[%s1963_s4 + $0x48] sm:$0xff] %v1520_v47   ;;  %1656 = vst [vmem:[%s1963_s4 + $0xc8] sm:$0xff] %v1600_v48   ;;  %v658_v53 = vadd.f32 %v1729_v51, %v1948_v36  ;;  %v786_v54 = vadd.f32 %v1761_v52, %v1948_v36  ;;  %v649_v55 = vpop.f32.mrb[21].mxu0  ;;  %v777_v56 = vpop.f32.mrb[21].mxu1 }
 0x113   : > { %1639 = vst [vmem:[%s1963_s4 + $0x40] sm:$0xff] %v1515_v49   ;;  %1655 = vst [vmem:[%s1963_s4 + $0xc0] sm:$0xff] %v1595_v50   ;;  %v650_v57 = vadd.f32 %v1948_v36, %v649_v55  ;;  %v778_v58 = vadd.f32 %v1948_v36, %v777_v56  ;;  %v1730_v59 = vpop.f32.mrb[22].mxu0  ;;  %v1762_v60 = vpop.f32.mrb[22].mxu1 }
 0x114   : > { %v661_v61 = vadd.f32 %v1730_v59, %v1948_v36  ;;  %v789_v62 = vadd.f32 %v1762_v60, %v1948_v36  ;;  %v652_v63 = vpop.f32.mrb[23].mxu0  ;;  %v780_v0 = vpop.f32.mrb[23].mxu1  ;;  %v846_v3 = vmax.f32 %v658_v53, 0.0  ;;  %v878_v4 = vmax.f32 %v786_v54, 0.0 }
 0x115   : > { %v653_v1 = vadd.f32 %v1948_v36, %v652_v63  ;;  %v781_v2 = vadd.f32 %v1948_v36, %v780_v0  ;;  %v844_v7 = vmax.f32 %v650_v57, 0.0  ;;  %v876_v8 = vmax.f32 %v778_v58, 0.0 }
 0x116   : > { %v847_v5 = vmax.f32 %v661_v61, 0.0  ;;  %v879_v6 = vmax.f32 %v789_v62, 0.0 }
 0x117   : > { %v845_v9 = vmax.f32 %v653_v1, 0.0  ;;  %v877_v10 = vmax.f32 %v781_v2, 0.0 }
 0x118   : > { %v1530_v11 = vpack.c.bf16 %v847_v5, %v846_v3  ;;  %v1610_v12 = vpack.c.bf16 %v879_v6, %v878_v4 }
 0x119   : > { %v1525_v13 = vpack.c.bf16 %v845_v9, %v844_v7  ;;  %v1605_v14 = vpack.c.bf16 %v877_v10, %v876_v8  ;;  %v1733_v15 = vpop.f32.mrb[24].mxu0  ;;  %v1765_v16 = vpop.f32.mrb[24].mxu1 }
 0x11a   : > { %1642 = vst [vmem:[%s1963_s4 + $0x58] sm:$0xff] %v1530_v11   ;;  %1658 = vst [vmem:[%s1963_s4 + $0xd8] sm:$0xff] %v1610_v12   ;;  %v674_v17 = vadd.f32 %v1733_v15, %v1948_v36  ;;  %v802_v18 = vadd.f32 %v1765_v16, %v1948_v36  ;;  %v665_v19 = vpop.f32.mrb[25].mxu0  ;;  %v793_v20 = vpop.f32.mrb[25].mxu1 }
 0x11b   : > { %1641 = vst [vmem:[%s1963_s4 + $0x50] sm:$0xff] %v1525_v13   ;;  %1657 = vst [vmem:[%s1963_s4 + $0xd0] sm:$0xff] %v1605_v14   ;;  %v666_v21 = vadd.f32 %v1948_v36, %v665_v19  ;;  %v794_v22 = vadd.f32 %v1948_v36, %v793_v20  ;;  %v1734_v23 = vpop.f32.mrb[26].mxu0  ;;  %v1766_v24 = vpop.f32.mrb[26].mxu1 }
 0x11c   : > { %v677_v25 = vadd.f32 %v1734_v23, %v1948_v36  ;;  %v805_v26 = vadd.f32 %v1766_v24, %v1948_v36  ;;  %v668_v27 = vpop.f32.mrb[27].mxu0  ;;  %v796_v28 = vpop.f32.mrb[27].mxu1  ;;  %v850_v31 = vmax.f32 %v674_v17, 0.0  ;;  %v882_v32 = vmax.f32 %v802_v18, 0.0 }
 0x11d   : > { %v669_v29 = vadd.f32 %v1948_v36, %v668_v27  ;;  %v797_v30 = vadd.f32 %v1948_v36, %v796_v28  ;;  %v848_v35 = vmax.f32 %v666_v21, 0.0  ;;  %v880_v37 = vmax.f32 %v794_v22, 0.0 }
 0x11e   : > { %v851_v33 = vmax.f32 %v677_v25, 0.0  ;;  %v883_v34 = vmax.f32 %v805_v26, 0.0 }
 0x11f   : > { %v849_v38 = vmax.f32 %v669_v29, 0.0  ;;  %v881_v39 = vmax.f32 %v797_v30, 0.0 }
 0x120   : > { %v1540_v40 = vpack.c.bf16 %v851_v33, %v850_v31  ;;  %v1620_v41 = vpack.c.bf16 %v883_v34, %v882_v32 }
 0x121   : > { %v1535_v42 = vpack.c.bf16 %v849_v38, %v848_v35  ;;  %v1615_v43 = vpack.c.bf16 %v881_v39, %v880_v37  ;;  %v1737_v44 = vpop.f32.mrb[28].mxu0  ;;  %v1769_v45 = vpop.f32.mrb[28].mxu1 }
 0x122   : > { %1644 = vst [vmem:[%s1963_s4 + $0x68] sm:$0xff] %v1540_v40   ;;  %1660 = vst [vmem:[%s1963_s4 + $0xe8] sm:$0xff] %v1620_v41   ;;  %v690_v46 = vadd.f32 %v1737_v44, %v1948_v36  ;;  %v818_v47 = vadd.f32 %v1769_v45, %v1948_v36  ;;  %v681_v48 = vpop.f32.mrb[29].mxu0  ;;  %v809_v49 = vpop.f32.mrb[29].mxu1 }
 0x123   : > { %1643 = vst [vmem:[%s1963_s4 + $0x60] sm:$0xff] %v1535_v42   ;;  %1659 = vst [vmem:[%s1963_s4 + $0xe0] sm:$0xff] %v1615_v43   ;;  %v682_v50 = vadd.f32 %v1948_v36, %v681_v48  ;;  %v810_v51 = vadd.f32 %v1948_v36, %v809_v49  ;;  %v1738_v52 = vpop.f32.mrb[30].mxu0  ;;  %v1770_v53 = vpop.f32.mrb[30].mxu1 }
 0x124   : > { %v693_v54 = vadd.f32 %v1738_v52, %v1948_v36  ;;  %v821_v55 = vadd.f32 %v1770_v53, %v1948_v36  ;;  %v684_v56 = vpop.f32.mrb[31].mxu0  ;;  %v812_v57 = vpop.f32.mrb[31].mxu1  ;;  %v854_v60 = vmax.f32 %v690_v46, 0.0  ;;  %v886_v61 = vmax.f32 %v818_v47, 0.0 }
 0x125   : > { %v685_v58 = vadd.f32 %v1948_v36, %v684_v56  ;;  %v813_v59 = vadd.f32 %v1948_v36, %v812_v57  ;;  %v852_v0 = vmax.f32 %v682_v50, 0.0  ;;  %v884_v1 = vmax.f32 %v810_v51, 0.0 }
 0x126   : > { %v855_v62 = vmax.f32 %v693_v54, 0.0  ;;  %v887_v63 = vmax.f32 %v821_v55, 0.0 }
 0x127   : > { %v853_v2 = vmax.f32 %v685_v58, 0.0  ;;  %v885_v3 = vmax.f32 %v813_v59, 0.0 }
 0x128   : > { %v1550_v4 = vpack.c.bf16 %v855_v62, %v854_v60  ;;  %v1630_v5 = vpack.c.bf16 %v887_v63, %v886_v61 }
 0x129   : > { %v1545_v6 = vpack.c.bf16 %v853_v2, %v852_v0  ;;  %v1625_v7 = vpack.c.bf16 %v885_v3, %v884_v1 }
 0x12a   : > { %1646 = vst [vmem:[%s1963_s4 + $0x78] sm:$0xff] %v1550_v4   ;;  %1662 = vst [vmem:[%s1963_s4 + $0xf8] sm:$0xff] %v1630_v5  }
 0x12b   : > { %1645 = vst [vmem:[%s1963_s4 + $0x70] sm:$0xff] %v1545_v6   ;;  %1661 = vst [vmem:[%s1963_s4 + $0xf0] sm:$0xff] %v1625_v7  }
 0x12c PF: > { %s13_s12 = sadd.s32 1, %s1829_s12  }
 0x12d   : > { %p10_p4 = scmp.ge.s32.totalorder %s13_s12, 4  }
 0x12f   :  { %12 = sbr.rel (!%p10_p4) target bundleno = 1 (0x1), region = 62 }

// kernel: grdn_forward.107
= control target key start
LH: loop header
LB: loop body
LE: loop exit
PB: predicated region body
PF: predicated region fallthrough
CT: control target
= control target key end

     0   :  { %8 = vsyncpa [#allocation3], 0  ;;  %s4144_s0 = inlined_call_operand.hbm [shape: bf16[8192,108], index: 0, kind: input, shape index: {}]   ;;  %s4145_s1 = inlined_call_operand.hbm [shape: bf16[108,128], index: 1, kind: input, shape index: {}]   ;;  %s4146_s2 = inlined_call_operand.hbm [shape: f32[1,128], index: 2, kind: input, shape index: {}]   ;;  %s4147_s3 = inlined_call_operand.vmem [shape: bf16[8192,128], index: 3, kind: output, shape index: {}]  }
   0x1   :  { %10 = vsyncpa [#allocation3 + $0x1], 0 }
   0x2   :  { %11 = vsyncpa [#allocation5], 0  ;;  %s3633_s12 = smov 0   ;;  %s3635_s13 = smov 0  }
   0x3   :  { %s3637_s14 = smov 0   ;;  %s3639_s15 = smov 0  }
   0x4 LB: > { %s2327_s16 = sadd.s32 4294967295, %s3606_s15   ;;  %p37_p0 = scmp.ne.s32.totalorder %s3598_s13, %s3594_s12  ;;  %s3606_s15 = sphi %s3639_s15, %s4163_s15   ;;  %s3602_s14 = sphi %s3637_s14, %s4162_s14   ;;  %s3598_s13 = sphi %s3635_s13, %s4161_s13   ;;  %s3594_s12 = sphi %s3633_s12, %s4160_s12  }
   0x5   : > { %p3655_p1 = scmp.eq.s32.totalorder %s2327_s16, 0  ;;  %p2329_p2 = scmp.ge.s32.totalorder %s3606_s15, 1 }
   0x6   : > { %p116_p3 = scmp.lt.s32.totalorder %s3606_s15, 9  ;;  %s3608_s20 = smov [#allocation4]  }
   0x7   : > { %s4152_s17 = scalar_select %p3655_p1, 1, 0 }
   0x8   : > { %p3663_p4 = por %p3655_p1, %p37_p0  ;;  %p3667_p5 = pnand %p2329_p2, %p116_p3 }
   0x9   : > { %s128_s21 = sshll.u32 %s3608_s20, 4  ;;  %s3609_s23 = smov [#allocation6]   ;;  %s129_s21 = int_to_ptr.vmem [resolvable:$true] %s128_s21 }
   0xa   : > { %s4153_s18 = scalar_select %p3663_p4, 1, 0 }
   0xb   : > { %s4154_s19 = scalar_select %p3667_p5, 1, 0 }
   0xc   : > { %p3359_p6 = pneg %p3667_p5  ;;  %s142_s24 = sshll.u32 %s3609_s23, 4  ;;  %s3679_s24 = int_to_ptr.vmem [resolvable:$true] %s142_s24 }
   0xd   : > { %s3482_s27 = scalar_lea.hbm %s4145_s1, 896 }
   0xe   : > { %p3675_p7 = pnand %p3359_p6, %p3655_p1  ;;  %p3483_p8 = scmp.ne.s32.totalorder %s4145_s1, %s3482_s27 }
   0xf   : > { %p3489_p12 = scmp.lt.u32.totalorder %s3482_s27, %s4145_s1 }
  0x10   : > { %p3484_p9 = pneg %p3675_p7 }
  0x12   : > { %p3485_p10 = pnand %p3484_p9, %p3483_p8 }
  0x14   : > { %p3486_p11 = pneg %p3485_p10 }
  0x16   : > { %p3491_p13 = pnand %p3489_p12, %p3486_p11 }
  0x18   : > { %3494 = shalt.err (!%p3491_p13)
}
  0x19   : > { %s3495_s5 = scalar_lea.vmem %s129_s21, 896  ;;  %p3503_p6 = scmp.lt.s32.totalorder %s129_s21, %s129_s21 }
  0x1a   : > { %p3496_p0 = scmp.ne.s32.totalorder %s129_s21, %s3495_s5  ;;  %p3504_p1 = scmp.lt.s32.totalorder %s3495_s5, %s3495_s5 }
  0x1c   : > { %p3498_p2 = pnand %p3496_p0, %p3484_p9  ;;  %p3505_p4 = por %p3504_p1, %p3503_p6 }
  0x1e   : > { %p3499_p3 = pneg %p3498_p2 }
  0x20   : > { %p3506_p5 = pnand %p3505_p4, %p3499_p3 }
  0x22   : > { %3509 = shalt.err (!%p3506_p5)
}
  0x23   : > { %s3610_s6 = smov 64   ;;  %s3611_s7 = smov 4  }
  0x24   : > { %3362 = dma.hbm_to_vmem [thread:$0]  (!%p3675_p7), %s4145_s1, 896, %s129_s21, [#allocation5], %s3610_s6, %s3610_s6, %s3611_s7  }
  0x25   : > { %s3510_s12 = scalar_lea.hbm %s4146_s2, 16 }
  0x26   : > { %p3511_p1 = scmp.ne.s32.totalorder %s4146_s2, %s3510_s12  ;;  %p3517_p8 = scmp.lt.u32.totalorder %s3510_s12, %s4146_s2 }
  0x28   : > { %p3513_p4 = pnand %p3511_p1, %p3484_p9 }
  0x2a   : > { %p3514_p5 = pneg %p3513_p4 }
  0x2c   : > { %p3519_p10 = pnand %p3517_p8, %p3514_p5 }
  0x2e   : > { %3522 = shalt.err (!%p3519_p10)
}
  0x2f   : > { %s3523_s21 = scalar_lea.vmem %s3679_s24, 16  ;;  %s3530_s27 = scalar_lea.vmem %s3679_s24, 32 }
  0x30   : > { %p3524_p11 = scmp.ne.s32.totalorder %s3679_s24, %s3523_s21  ;;  %p3531_p0 = scmp.lt.s32.totalorder %s3679_s24, %s3679_s24 }
  0x31   : > { %p3532_p2 = scmp.lt.s32.totalorder %s3530_s27, %s3523_s21 }
  0x32   : > { %p3526_p12 = pnand %p3524_p11, %p3484_p9 }
  0x33   : > { %p3533_p3 = por %p3532_p2, %p3531_p0 }
  0x34   : > { %p3527_p13 = pneg %p3526_p12 }
  0x36   : > { %p3534_p6 = pnand %p3533_p3, %p3527_p13 }
  0x38   : > { %3537 = shalt.err (!%p3534_p6)
}
  0x39   : > { %3365 = dma.hbm_to_vmem [thread:$0]  (!%p3675_p7), %s4146_s2, 16, %s3679_s24, [#allocation5]  }
  0x3a   : > { %s3733_s30 = sadd.s32 1, %s3606_s15   ;;  %s24_s4 = sadd.s32 1, %s3602_s14 }
  0x3b   : > { %s21_s22 = ssub.s32 %s3606_s15, %s3733_s30  ;;  %p31_p9 = scmp.ne.s32.totalorder %s3602_s14, %s3598_s13 }
  0x3c   : > { %p22_p1 = scmp.eq.s32.totalorder %s21_s22, 0  ;;  %p32_p4 = scmp.eq.s32.totalorder %s3606_s15, 0 }
  0x3d   : > { %p3372_p5 = scmp.lt.s32.totalorder %s3606_s15, 8  ;;  %s153_s5 = sand.u32 1, %s3602_s14  }
  0x3e   : > { %s3744_s8 = scalar_select %p22_p1, %s3602_s14, %s24_s4  }
  0x3f   : > { %p33_p8 = por %p32_p4, %p31_p9  ;;  %s2333_s9 = sshll.u32 %s153_s5, 9 }
  0x40   : > { %s2608_s10 = sshll.u32 %s3606_s15, 13  ;;  %s157_s24 = scalar_lea.vmem [#allocation2], %s2333_s9 }
  0x41   : > { %s3750_s20 = scalar_lea.hbm %s4144_s0, %s2608_s10  ;;  %s164_s23 = sshll.u32 %s157_s24, 4  ;;  %s3756_s23 = int_to_ptr.vmem [resolvable:$true] %s164_s23 }
  0x42   : > { %p3752_p7 = pnand %p3372_p5, %p33_p8  ;;  %s3758_s26 = scalar_lea.sflag [#allocation3], %s153_s5 }
  0x43   : > { %s3538_s21 = scalar_lea.hbm %s3750_s20, 8192  ;;  %s3543_s29 = scalar_lea.hbm %s4144_s0, 65536 }
  0x44   : > { %p3539_p10 = scmp.ne.s32.totalorder %s3750_s20, %s3538_s21  ;;  %p3540_p11 = pneg %p3752_p7 }
  0x45   : > { %p3544_p0 = scmp.lt.u32.totalorder %s3750_s20, %s4144_s0  ;;  %p3545_p2 = scmp.lt.u32.totalorder %s3543_s29, %s3538_s21 }
  0x46   : > { %p3541_p12 = pnand %p3540_p11, %p3539_p10  ;;  %p3547_p6 = scmp.lt.u32.totalorder %s3538_s21, %s3750_s20 }
  0x47   : > { %p3546_p3 = por %p3545_p2, %p3544_p0 }
  0x48   : > { %p3542_p13 = pneg %p3541_p12 }
  0x49   : > { %p3548_p9 = por %p3547_p6, %p3546_p3 }
  0x4b   : > { %p3549_p1 = pnand %p3548_p9, %p3542_p13 }
  0x4d   : > { %3552 = shalt.err (!%p3549_p1)
}
  0x4e   : > { %s3553_s5 = scalar_lea.vmem %s3756_s23, 8192  ;;  %s3612_s9 = smov [#allocation2]  }
  0x4f   : > { %p3554_p4 = scmp.ne.s32.totalorder %s3756_s23, %s3553_s5  ;;  %s3558_s10 = sshll.u32 %s3612_s9, 4  ;;  %s3559_s10 = int_to_ptr.vmem [resolvable:$false] %s3558_s10 }
  0x50   : > { %s3560_s11 = scalar_lea.vmem %s3559_s10, 16384  ;;  %p3561_p10 = scmp.lt.s32.totalorder %s3756_s23, %s3559_s10 }
  0x51   : > { %p3556_p5 = pnand %p3554_p4, %p3540_p11  ;;  %p3562_p12 = scmp.lt.s32.totalorder %s3560_s11, %s3553_s5 }
  0x53   : > { %p3557_p8 = pneg %p3556_p5  ;;  %p3563_p0 = por %p3562_p12, %p3561_p10 }
  0x55   : > { %p3564_p2 = pnand %p3563_p0, %p3557_p8 }
  0x57   : > { %3567 = shalt.err (!%p3564_p2)
}
  0x58   : > { %3369 = dma.hbm_to_vmem [thread:$0]  (!%p3752_p7), %s3750_s20, 8192, %s3756_s23, %s3758_s26, %s3610_s6, %s3610_s6, %s3611_s7  }
  0x59   : > { %p4157_p11 = scmp.ne.s32.totalorder %s4154_s19, 0 }
  0x5a   : > { %s178_s12 = sand.u32 (!%p4157_p11), 1, %s3598_s13   ;;  %p4158_p13 = scmp.ne.s32.totalorder (!%p4157_p11), %s4153_s18, 0 }
  0x5b   : > { %176 = sbr.rel (%p4157_p11) target bundleno = 473 (0x1d9), region = 32  ;;  %s2337_s24 = sshll.u32 (!%p4157_p11), %s178_s12, 9 }
  0x5c   : > { %s179_s21 = scalar_lea.sflag (!%p4157_p11), [#allocation3], %s178_s12  ;;  %s3792_s27 = scalar_lea.vmem (!%p4157_p11), [#allocation2], %s2337_s24 }
  0x62   : > { %3585 = dma.done.wait (%p4158_p13), %s179_s21, 8192  }
  0x63   : > { %3587 = vsyncadd (%p4158_p13), %s179_s21, 4294959104  ;;  %p4159_p3 = scmp.ne.s32.totalorder %s4152_s17, 0 }
  0x65   : > { %3589 = dma.done.wait (%p4159_p3), [#allocation5], 912  }
  0x66   : > { %3591 = vsyncadd (%p4159_p3), [#allocation5], 4294966384  ;;  %v3411_v0 = vld [vmem:[#allocation4] sm:$0xff]   ;;  %v3412_v1 = vld [vmem:[#allocation4 + $0x8] sm:$0xff]   ;;  %vm731_vm0 = vcmask 883712   ;;  %vm924_vm1 = vcmask 1045504  }
  0x67   : > { %3191 = vmatprep.subr.bf16.mxu0 %v3411_v0  ;;  %3333 = vmatprep.subr.bf16.mxu1 %v3411_v0  ;;  %v3413_v2 = vld [vmem:[#allocation4 + $0x10] sm:$0xff]   ;;  %v3414_v3 = vld [vmem:[#allocation4 + $0x18] sm:$0xff]   ;;  %v3418_v4 = vld [vmem:[%s3792_s27] sm:$0xff]   ;;  %s2340_s17 = sshll.u32 %s2327_s16, 7 }
  0x68   : > { %3192 = vmatpush3.bf16.msra.mxu0 %v3411_v0  ;;  %3340 = vmatpush3.bf16.msra.mxu1 %v3411_v0  ;;  %v3419_v5 = vld [vmem:[%s3792_s27 + $0x100] sm:$0xff]   ;;  %v3416_v7 = vld [vmem:[#allocation4 + $0x28] sm:$0xff]   ;;  %v3417_v8 = vld [vmem:[#allocation4 + $0x30] sm:$0x3f]   ;;  %p215_p7 = scmp.lt.s32.totalorder %s2340_s17, 1023 }
  0x69   : > { %3193 = vmatprep.subr.bf16.mxu0 %v3412_v1  ;;  %3334 = vmatprep.subr.bf16.mxu1 %v3412_v1  ;;  %v3415_v6 = vld [vmem:[#allocation4 + $0x20] sm:$0xff]   ;;  %v926_v9 = vsel %vm924_vm1, %v3417_v8, 0  ;;  %v3420_v10 = vld [vmem:[%s3792_s27 + $0x8] sm:$0xff]   ;;  %v3422_v12 = vld [vmem:[%s3792_s27 + $0x10] sm:$0xff]  }
  0x6a   : > { %3205 = vmatprep.mubr.msk.bf16.mxu0 %vm731_vm0, %v3418_v4  ;;  %3269 = vmatprep.mubr.msk.bf16.mxu1 %vm731_vm0, %v3419_v5  ;;  %v3421_v11 = vld [vmem:[%s3792_s27 + $0x108] sm:$0xff]   ;;  %v3423_v13 = vld [vmem:[%s3792_s27 + $0x110] sm:$0xff]   ;;  %v3424_v14 = vld [vmem:[%s3792_s27 + $0x18] sm:$0xff]   ;;  %s4165_s17 = smov (!%p215_p7, %s2340_s17), 1023 }
  0x6b   : > { %v3425_v15 = vld [vmem:[%s3792_s27 + $0x118] sm:$0xff]   ;;  %v3426_v16 = vld [vmem:[%s3792_s27 + $0x20] sm:$0xff]   ;;  %v3428_v18 = vld [vmem:[%s3792_s27 + $0x28] sm:$0xff]   ;;  %s2341_s15 = sshll.u32 %s4165_s17, 2 }
  0x6c   : > { %3194 = vmatpush3.bf16.msra.mxu0 %v3412_v1  ;;  %3341 = vmatpush3.bf16.msra.mxu1 %v3412_v1  ;;  %v3427_v17 = vld [vmem:[%s3792_s27 + $0x120] sm:$0xff]   ;;  %v3429_v19 = vld [vmem:[%s3792_s27 + $0x128] sm:$0xff]   ;;  %v3430_v20 = vld [vmem:[%s3792_s27 + $0x30] sm:$0xff]   ;;  %s3945_s19 = scalar_lea.vmem %s4147_s3, %s2341_s15 }
  0x6d   : > { %3195 = vmatprep.subr.bf16.mxu0 %v3413_v2  ;;  %3335 = vmatprep.subr.bf16.mxu1 %v3413_v2  ;;  %v3431_v21 = vld [vmem:[%s3792_s27 + $0x130] sm:$0xff]   ;;  %v3432_v22 = vld [vmem:[%s3792_s27 + $0x38] sm:$0xff]   ;;  %v3434_v24 = vld [vmem:[%s3792_s27 + $0x40] sm:$0xff]  }
  0x6e   : > { %v3433_v23 = vld [vmem:[%s3792_s27 + $0x138] sm:$0xff]   ;;  %v3435_v25 = vld [vmem:[%s3792_s27 + $0x140] sm:$0xff]   ;;  %v3436_v26 = vld [vmem:[%s3792_s27 + $0x48] sm:$0xff]  }
  0x6f   : > { %v3437_v27 = vld [vmem:[%s3792_s27 + $0x148] sm:$0xff]   ;;  %v3438_v28 = vld [vmem:[%s3792_s27 + $0x50] sm:$0xff]   ;;  %v3440_v30 = vld [vmem:[%s3792_s27 + $0x58] sm:$0xff]  }
  0x70   : > { %3196 = vmatpush3.bf16.msra.mxu0 %v3413_v2  ;;  %3342 = vmatpush3.bf16.msra.mxu1 %v3413_v2  ;;  %v3439_v29 = vld [vmem:[%s3792_s27 + $0x150] sm:$0xff]   ;;  %v3441_v31 = vld [vmem:[%s3792_s27 + $0x158] sm:$0xff]   ;;  %v3442_v32 = vld [vmem:[%s3792_s27 + $0x60] sm:$0xff]  }
  0x71   : > { %3197 = vmatprep.subr.bf16.mxu0 %v3414_v3  ;;  %3336 = vmatprep.subr.bf16.mxu1 %v3414_v3  ;;  %v3443_v33 = vld [vmem:[%s3792_s27 + $0x160] sm:$0xff]   ;;  %v3444_v34 = vld [vmem:[%s3792_s27 + $0x68] sm:$0xff]   ;;  %v3446_v36 = vld [vmem:[%s3792_s27 + $0x70] sm:$0xff]  }
  0x72   : > { %v3445_v35 = vld [vmem:[%s3792_s27 + $0x168] sm:$0xff]   ;;  %v3447_v37 = vld [vmem:[%s3792_s27 + $0x170] sm:$0xff]   ;;  %v3448_v38 = vld [vmem:[%s3792_s27 + $0x78] sm:$0xff]  }
  0x73   : > { %v3449_v39 = vld [vmem:[%s3792_s27 + $0x178] sm:$0xff]   ;;  %v3450_v40 = vld [vmem:[%s3792_s27 + $0x80] sm:$0xff]   ;;  %v3452_v42 = vld [vmem:[%s3792_s27 + $0x88] sm:$0xff]  }
  0x74   : > { %3198 = vmatpush3.bf16.msra.mxu0 %v3414_v3  ;;  %3343 = vmatpush3.bf16.msra.mxu1 %v3414_v3  ;;  %v3451_v41 = vld [vmem:[%s3792_s27 + $0x180] sm:$0xff]   ;;  %v3453_v43 = vld [vmem:[%s3792_s27 + $0x188] sm:$0xff]   ;;  %v3454_v44 = vld [vmem:[%s3792_s27 + $0x90] sm:$0xff]  }
  0x75   : > { %3199 = vmatprep.subr.bf16.mxu0 %v3415_v6  ;;  %3337 = vmatprep.subr.bf16.mxu1 %v3415_v6  ;;  %v3455_v45 = vld [vmem:[%s3792_s27 + $0x190] sm:$0xff]   ;;  %v3456_v46 = vld [vmem:[%s3792_s27 + $0x98] sm:$0xff]   ;;  %v3458_v48 = vld [vmem:[%s3792_s27 + $0xa0] sm:$0xff]  }
  0x76   : > { %v3457_v47 = vld [vmem:[%s3792_s27 + $0x198] sm:$0xff]   ;;  %v3459_v49 = vld [vmem:[%s3792_s27 + $0x1a0] sm:$0xff]   ;;  %v3460_v50 = vld [vmem:[%s3792_s27 + $0xa8] sm:$0xff]  }
  0x77   : > { %v3461_v51 = vld [vmem:[%s3792_s27 + $0x1a8] sm:$0xff]   ;;  %v3462_v52 = vld [vmem:[%s3792_s27 + $0xb0] sm:$0xff]   ;;  %v3464_v54 = vld [vmem:[%s3792_s27 + $0xb8] sm:$0xff]  }
  0x78   : > { %3200 = vmatpush3.bf16.msra.mxu0 %v3415_v6  ;;  %3344 = vmatpush3.bf16.msra.mxu1 %v3415_v6  ;;  %v3463_v53 = vld [vmem:[%s3792_s27 + $0x1b0] sm:$0xff]   ;;  %v3465_v55 = vld [vmem:[%s3792_s27 + $0x1b8] sm:$0xff]   ;;  %v3466_v56 = vld [vmem:[%s3792_s27 + $0xc0] sm:$0xff]  }
  0x79   : > { %3201 = vmatprep.subr.bf16.mxu0 %v3416_v7  ;;  %3338 = vmatprep.subr.bf16.mxu1 %v3416_v7  ;;  %v3467_v57 = vld [vmem:[%s3792_s27 + $0x1c0] sm:$0xff]   ;;  %v3468_v58 = vld [vmem:[%s3792_s27 + $0xc8] sm:$0xff]   ;;  %v3470_v60 = vld [vmem:[%s3792_s27 + $0xd0] sm:$0xff]  }
  0x7a   : > { %v3469_v59 = vld [vmem:[%s3792_s27 + $0x1c8] sm:$0xff]   ;;  %v3471_v61 = vld [vmem:[%s3792_s27 + $0x1d0] sm:$0xff]   ;;  %v3472_v62 = vld [vmem:[%s3792_s27 + $0xd8] sm:$0xff]  }
  0x7b   : > { %v3473_v63 = vld [vmem:[%s3792_s27 + $0x1d8] sm:$0xff]   ;;  %v3474_v0 = vld [vmem:[%s3792_s27 + $0xe0] sm:$0xff]   ;;  %v3476_v2 = vld [vmem:[%s3792_s27 + $0xe8] sm:$0xff]  }
  0x7c   : > { %3202 = vmatpush3.bf16.msra.mxu0 %v3416_v7  ;;  %3345 = vmatpush3.bf16.msra.mxu1 %v3416_v7  ;;  %v3475_v1 = vld [vmem:[%s3792_s27 + $0x1e0] sm:$0xff]   ;;  %v3477_v3 = vld [vmem:[%s3792_s27 + $0x1e8] sm:$0xff]   ;;  %v3478_v4 = vld [vmem:[%s3792_s27 + $0xf0] sm:$0xff]  }
  0x7d   : > { %3347 = vmatprep.subr.msk.bf16.mxu0 %vm924_vm1, %v3417_v8  ;;  %3348 = vmatprep.subr.msk.bf16.mxu1 %vm924_vm1, %v3417_v8  ;;  %v3479_v5 = vld [vmem:[%s3792_s27 + $0x1f0] sm:$0xff]   ;;  %v3480_v6 = vld [vmem:[%s3792_s27 + $0xf8] sm:$0xff]  }
  0x7e   : > { %v3481_v7 = vld [vmem:[%s3792_s27 + $0x1f8] sm:$0xff]  }
  0x7f   : > { %v3932_v8 = vld [vmem:[#allocation6] ss:$0 sm:$0xff] }
  0x80   : > { %3204 = vmatpush3.bf16.msra.mxu0 %v926_v9  ;;  %3346 = vmatpush3.bf16.msra.mxu1 %v926_v9 }
  0x83   : > { %3206 = vmatmul.mubr.msk.bf16.vlgmr.msra.gmra.mrb[0].mxu0 %vm731_vm0, %v3420_v10  ;;  %3270 = vmatmul.mubr.msk.bf16.vlgmr.msra.gmra.mrb[0].mxu1 %vm731_vm0, %v3421_v11 }
  0x84   : > { %3209 = vmatprep.mubr.msk.bf16.mxu0 %vm731_vm0, %v3422_v12  ;;  %3273 = vmatprep.mubr.msk.bf16.mxu1 %vm731_vm0, %v3423_v13 }
  0x8b   : > { %3210 = vmatmul.mubr.msk.bf16.gmra.mrb[4].mxu0 %vm731_vm0, %v3424_v14  ;;  %3274 = vmatmul.mubr.msk.bf16.gmra.mrb[4].mxu1 %vm731_vm0, %v3425_v15 }
  0x8c   : > { %3213 = vmatprep.mubr.msk.bf16.mxu0 %vm731_vm0, %v3426_v16  ;;  %3277 = vmatprep.mubr.msk.bf16.mxu1 %vm731_vm0, %v3427_v17 }
  0x93   : > { %3214 = vmatmul.mubr.msk.bf16.gmra.mrb[8].mxu0 %vm731_vm0, %v3428_v18  ;;  %3278 = vmatmul.mubr.msk.bf16.gmra.mrb[8].mxu1 %vm731_vm0, %v3429_v19 }
  0x94   : > { %3217 = vmatprep.mubr.msk.bf16.mxu0 %vm731_vm0, %v3430_v20  ;;  %3281 = vmatprep.mubr.msk.bf16.mxu1 %vm731_vm0, %v3431_v21 }
  0x9b   : > { %3218 = vmatmul.mubr.msk.bf16.gmra.mrb[12].mxu0 %vm731_vm0, %v3432_v22  ;;  %3282 = vmatmul.mubr.msk.bf16.gmra.mrb[12].mxu1 %vm731_vm0, %v3433_v23 }
  0x9c   : > { %3221 = vmatprep.mubr.msk.bf16.mxu0 %vm731_vm0, %v3434_v24  ;;  %3285 = vmatprep.mubr.msk.bf16.mxu1 %vm731_vm0, %v3435_v25 }
  0xa3   : > { %3222 = vmatmul.mubr.msk.bf16.gmra.mrb[16].mxu0 %vm731_vm0, %v3436_v26  ;;  %3286 = vmatmul.mubr.msk.bf16.gmra.mrb[16].mxu1 %vm731_vm0, %v3437_v27 }
  0xa4   : > { %3225 = vmatprep.mubr.msk.bf16.mxu0 %vm731_vm0, %v3438_v28  ;;  %3289 = vmatprep.mubr.msk.bf16.mxu1 %vm731_vm0, %v3439_v29 }
  0xab   : > { %3226 = vmatmul.mubr.msk.bf16.gmra.mrb[20].mxu0 %vm731_vm0, %v3440_v30  ;;  %3290 = vmatmul.mubr.msk.bf16.gmra.mrb[20].mxu1 %vm731_vm0, %v3441_v31 }
  0xac   : > { %3229 = vmatprep.mubr.msk.bf16.mxu0 %vm731_vm0, %v3442_v32  ;;  %3293 = vmatprep.mubr.msk.bf16.mxu1 %vm731_vm0, %v3443_v33 }
  0xb3   : > { %3230 = vmatmul.mubr.msk.bf16.gmra.mrb[24].mxu0 %vm731_vm0, %v3444_v34  ;;  %3294 = vmatmul.mubr.msk.bf16.gmra.mrb[24].mxu1 %vm731_vm0, %v3445_v35 }
  0xb4   : > { %3233 = vmatprep.mubr.msk.bf16.mxu0 %vm731_vm0, %v3446_v36  ;;  %3297 = vmatprep.mubr.msk.bf16.mxu1 %vm731_vm0, %v3447_v37 }
  0xbb   : > { %3234 = vmatmul.mubr.msk.bf16.gmra.mrb[28].mxu0 %vm731_vm0, %v3448_v38  ;;  %3298 = vmatmul.mubr.msk.bf16.gmra.mrb[28].mxu1 %vm731_vm0, %v3449_v39 }
  0xbc   : > { %3237 = vmatprep.mubr.msk.bf16.mxu0 %vm731_vm0, %v3450_v40  ;;  %3301 = vmatprep.mubr.msk.bf16.mxu1 %vm731_vm0, %v3451_v41 }
  0xc3   : > { %3238 = vmatmul.mubr.msk.bf16.gmra.mrb[32].mxu0 %vm731_vm0, %v3452_v42  ;;  %3302 = vmatmul.mubr.msk.bf16.gmra.mrb[32].mxu1 %vm731_vm0, %v3453_v43 }
  0xc4   : > { %3241 = vmatprep.mubr.msk.bf16.mxu0 %vm731_vm0, %v3454_v44  ;;  %3305 = vmatprep.mubr.msk.bf16.mxu1 %vm731_vm0, %v3455_v45 }
  0xcb   : > { %3242 = vmatmul.mubr.msk.bf16.gmra.mrb[36].mxu0 %vm731_vm0, %v3456_v46  ;;  %3306 = vmatmul.mubr.msk.bf16.gmra.mrb[36].mxu1 %vm731_vm0, %v3457_v47 }
  0xcc   : > { %3245 = vmatprep.mubr.msk.bf16.mxu0 %vm731_vm0, %v3458_v48  ;;  %3309 = vmatprep.mubr.msk.bf16.mxu1 %vm731_vm0, %v3459_v49 }
  0xd3   : > { %3246 = vmatmul.mubr.msk.bf16.gmra.mrb[40].mxu0 %vm731_vm0, %v3460_v50  ;;  %3310 = vmatmul.mubr.msk.bf16.gmra.mrb[40].mxu1 %vm731_vm0, %v3461_v51 }
  0xd4   : > { %3249 = vmatprep.mubr.msk.bf16.mxu0 %vm731_vm0, %v3462_v52  ;;  %3313 = vmatprep.mubr.msk.bf16.mxu1 %vm731_vm0, %v3463_v53 }
  0xdb   : > { %3250 = vmatmul.mubr.msk.bf16.gmra.mrb[44].mxu0 %vm731_vm0, %v3464_v54  ;;  %3314 = vmatmul.mubr.msk.bf16.gmra.mrb[44].mxu1 %vm731_vm0, %v3465_v55 }
  0xdc   : > { %3253 = vmatprep.mubr.msk.bf16.mxu0 %vm731_vm0, %v3466_v56  ;;  %3317 = vmatprep.mubr.msk.bf16.mxu1 %vm731_vm0, %v3467_v57 }
  0xe3   : > { %3254 = vmatmul.mubr.msk.bf16.gmra.mrb[48].mxu0 %vm731_vm0, %v3468_v58  ;;  %3318 = vmatmul.mubr.msk.bf16.gmra.mrb[48].mxu1 %vm731_vm0, %v3469_v59 }
  0xe4   : > { %3257 = vmatprep.mubr.msk.bf16.mxu0 %vm731_vm0, %v3470_v60  ;;  %3321 = vmatprep.mubr.msk.bf16.mxu1 %vm731_vm0, %v3471_v61 }
  0xeb   : > { %3258 = vmatmul.mubr.msk.bf16.gmra.mrb[52].mxu0 %vm731_vm0, %v3472_v62  ;;  %3322 = vmatmul.mubr.msk.bf16.gmra.mrb[52].mxu1 %vm731_vm0, %v3473_v63 }
  0xec   : > { %3261 = vmatprep.mubr.msk.bf16.mxu0 %vm731_vm0, %v3474_v0  ;;  %3325 = vmatprep.mubr.msk.bf16.mxu1 %vm731_vm0, %v3475_v1 }
  0xf3   : > { %3262 = vmatmul.mubr.msk.bf16.gmra.mrb[56].mxu0 %vm731_vm0, %v3476_v2  ;;  %3326 = vmatmul.mubr.msk.bf16.gmra.mrb[56].mxu1 %vm731_vm0, %v3477_v3 }
  0xf4   : > { %3265 = vmatprep.mubr.msk.bf16.mxu0 %vm731_vm0, %v3478_v4  ;;  %3329 = vmatprep.mubr.msk.bf16.mxu1 %vm731_vm0, %v3479_v5 }
  0xfb   : > { %3266 = vmatmul.mubr.msk.bf16.gmra.mrb[60].mxu0 %vm731_vm0, %v3480_v6  ;;  %3330 = vmatmul.mubr.msk.bf16.gmra.mrb[60].mxu1 %vm731_vm0, %v3481_v7 }
 0x156   : > { %v3207_v9 = vpop.f32.mrb[0].mxu0  ;;  %v3271_v10 = vpop.f32.mrb[0].mxu1 }
 0x157   : > { %v971_v11 = vadd.f32 %v3207_v9, %v3932_v8  ;;  %v1227_v12 = vadd.f32 %v3271_v10, %v3932_v8  ;;  %v962_v13 = vpop.f32.mrb[1].mxu0  ;;  %v1218_v14 = vpop.f32.mrb[1].mxu1 }
 0x158   : > { %v963_v15 = vadd.f32 %v3932_v8, %v962_v13  ;;  %v1219_v16 = vadd.f32 %v3932_v8, %v1218_v14  ;;  %v3208_v17 = vpop.f32.mrb[2].mxu0  ;;  %v3272_v18 = vpop.f32.mrb[2].mxu1 }
 0x159   : > { %v974_v19 = vadd.f32 %v3208_v17, %v3932_v8  ;;  %v1230_v20 = vadd.f32 %v3272_v18, %v3932_v8  ;;  %v965_v21 = vpop.f32.mrb[3].mxu0  ;;  %v1221_v22 = vpop.f32.mrb[3].mxu1  ;;  %v1475_v25 = vmax.f32 %v971_v11, 0.0  ;;  %v1539_v26 = vmax.f32 %v1227_v12, 0.0 }
 0x15a   : > { %v966_v23 = vadd.f32 %v3932_v8, %v965_v21  ;;  %v1222_v24 = vadd.f32 %v3932_v8, %v1221_v22  ;;  %v1473_v29 = vmax.f32 %v963_v15, 0.0  ;;  %v1537_v30 = vmax.f32 %v1219_v16, 0.0 }
 0x15b   : > { %v1476_v27 = vmax.f32 %v974_v19, 0.0  ;;  %v1540_v28 = vmax.f32 %v1230_v20, 0.0 }
 0x15c   : > { %v1474_v31 = vmax.f32 %v966_v23, 0.0  ;;  %v1538_v32 = vmax.f32 %v1222_v24, 0.0 }
 0x15d   : > { %v2745_v33 = vpack.c.bf16 %v1476_v27, %v1475_v25  ;;  %v2905_v34 = vpack.c.bf16 %v1540_v28, %v1539_v26 }
 0x15e   : > { %v2740_v35 = vpack.c.bf16 %v1474_v31, %v1473_v29  ;;  %v2900_v36 = vpack.c.bf16 %v1538_v32, %v1537_v30  ;;  %v3211_v37 = vpop.f32.mrb[4].mxu0  ;;  %v3275_v38 = vpop.f32.mrb[4].mxu1 }
 0x15f   : > { %3057 = vst [vmem:[%s3945_s19 + $0x8] sm:$0xff] %v2745_v33   ;;  %3089 = vst [vmem:[%s3945_s19 + $0x108] sm:$0xff] %v2905_v34   ;;  %v987_v39 = vadd.f32 %v3211_v37, %v3932_v8  ;;  %v1243_v40 = vadd.f32 %v3275_v38, %v3932_v8  ;;  %v978_v41 = vpop.f32.mrb[5].mxu0  ;;  %v1234_v42 = vpop.f32.mrb[5].mxu1 }
 0x160   : > { %2741 = vst [vmem:[%s3945_s19] sm:$0xff] %v2740_v35   ;;  %3088 = vst [vmem:[%s3945_s19 + $0x100] sm:$0xff] %v2900_v36   ;;  %v979_v43 = vadd.f32 %v3932_v8, %v978_v41  ;;  %v1235_v44 = vadd.f32 %v3932_v8, %v1234_v42  ;;  %v3212_v45 = vpop.f32.mrb[6].mxu0  ;;  %v3276_v46 = vpop.f32.mrb[6].mxu1 }
 0x161   : > { %v990_v47 = vadd.f32 %v3212_v45, %v3932_v8  ;;  %v1246_v48 = vadd.f32 %v3276_v46, %v3932_v8  ;;  %v981_v49 = vpop.f32.mrb[7].mxu0  ;;  %v1237_v50 = vpop.f32.mrb[7].mxu1  ;;  %v1479_v53 = vmax.f32 %v987_v39, 0.0  ;;  %v1543_v54 = vmax.f32 %v1243_v40, 0.0 }
 0x162   : > { %v982_v51 = vadd.f32 %v3932_v8, %v981_v49  ;;  %v1238_v52 = vadd.f32 %v3932_v8, %v1237_v50  ;;  %v1477_v57 = vmax.f32 %v979_v43, 0.0  ;;  %v1541_v58 = vmax.f32 %v1235_v44, 0.0 }
 0x163   : > { %v1480_v55 = vmax.f32 %v990_v47, 0.0  ;;  %v1544_v56 = vmax.f32 %v1246_v48, 0.0 }
 0x164   : > { %v1478_v59 = vmax.f32 %v982_v51, 0.0  ;;  %v1542_v60 = vmax.f32 %v1238_v52, 0.0 }
 0x165   : > { %v2755_v61 = vpack.c.bf16 %v1480_v55, %v1479_v53  ;;  %v2915_v62 = vpack.c.bf16 %v1544_v56, %v1543_v54 }
 0x166   : > { %v2750_v63 = vpack.c.bf16 %v1478_v59, %v1477_v57  ;;  %v2910_v0 = vpack.c.bf16 %v1542_v60, %v1541_v58  ;;  %v3215_v1 = vpop.f32.mrb[8].mxu0  ;;  %v3279_v2 = vpop.f32.mrb[8].mxu1 }
 0x167   : > { %3059 = vst [vmem:[%s3945_s19 + $0x18] sm:$0xff] %v2755_v61   ;;  %3091 = vst [vmem:[%s3945_s19 + $0x118] sm:$0xff] %v2915_v62   ;;  %v1003_v3 = vadd.f32 %v3215_v1, %v3932_v8  ;;  %v1259_v4 = vadd.f32 %v3279_v2, %v3932_v8  ;;  %v994_v5 = vpop.f32.mrb[9].mxu0  ;;  %v1250_v6 = vpop.f32.mrb[9].mxu1 }
 0x168   : > { %3058 = vst [vmem:[%s3945_s19 + $0x10] sm:$0xff] %v2750_v63   ;;  %3090 = vst [vmem:[%s3945_s19 + $0x110] sm:$0xff] %v2910_v0   ;;  %v995_v7 = vadd.f32 %v3932_v8, %v994_v5  ;;  %v1251_v9 = vadd.f32 %v3932_v8, %v1250_v6  ;;  %v3216_v10 = vpop.f32.mrb[10].mxu0  ;;  %v3280_v11 = vpop.f32.mrb[10].mxu1 }
 0x169   : > { %v1006_v12 = vadd.f32 %v3216_v10, %v3932_v8  ;;  %v1262_v13 = vadd.f32 %v3280_v11, %v3932_v8  ;;  %v997_v14 = vpop.f32.mrb[11].mxu0  ;;  %v1253_v15 = vpop.f32.mrb[11].mxu1  ;;  %v1483_v18 = vmax.f32 %v1003_v3, 0.0  ;;  %v1547_v19 = vmax.f32 %v1259_v4, 0.0 }
 0x16a   : > { %v998_v16 = vadd.f32 %v3932_v8, %v997_v14  ;;  %v1254_v17 = vadd.f32 %v3932_v8, %v1253_v15  ;;  %v1481_v22 = vmax.f32 %v995_v7, 0.0  ;;  %v1545_v23 = vmax.f32 %v1251_v9, 0.0 }
 0x16b   : > { %v1484_v20 = vmax.f32 %v1006_v12, 0.0  ;;  %v1548_v21 = vmax.f32 %v1262_v13, 0.0 }
 0x16c   : > { %v1482_v24 = vmax.f32 %v998_v16, 0.0  ;;  %v1546_v25 = vmax.f32 %v1254_v17, 0.0 }
 0x16d   : > { %v2765_v26 = vpack.c.bf16 %v1484_v20, %v1483_v18  ;;  %v2925_v27 = vpack.c.bf16 %v1548_v21, %v1547_v19 }
 0x16e   : > { %v2760_v28 = vpack.c.bf16 %v1482_v24, %v1481_v22  ;;  %v2920_v29 = vpack.c.bf16 %v1546_v25, %v1545_v23  ;;  %v3219_v30 = vpop.f32.mrb[12].mxu0  ;;  %v3283_v31 = vpop.f32.mrb[12].mxu1 }
 0x16f   : > { %3061 = vst [vmem:[%s3945_s19 + $0x28] sm:$0xff] %v2765_v26   ;;  %3093 = vst [vmem:[%s3945_s19 + $0x128] sm:$0xff] %v2925_v27   ;;  %v1019_v32 = vadd.f32 %v3219_v30, %v3932_v8  ;;  %v1275_v33 = vadd.f32 %v3283_v31, %v3932_v8  ;;  %v1010_v34 = vpop.f32.mrb[13].mxu0  ;;  %v1266_v35 = vpop.f32.mrb[13].mxu1 }
 0x170   : > { %3060 = vst [vmem:[%s3945_s19 + $0x20] sm:$0xff] %v2760_v28   ;;  %3092 = vst [vmem:[%s3945_s19 + $0x120] sm:$0xff] %v2920_v29   ;;  %v1011_v36 = vadd.f32 %v3932_v8, %v1010_v34  ;;  %v1267_v37 = vadd.f32 %v3932_v8, %v1266_v35  ;;  %v3220_v38 = vpop.f32.mrb[14].mxu0  ;;  %v3284_v39 = vpop.f32.mrb[14].mxu1 }
 0x171   : > { %v1022_v40 = vadd.f32 %v3220_v38, %v3932_v8  ;;  %v1278_v41 = vadd.f32 %v3284_v39, %v3932_v8  ;;  %v1013_v42 = vpop.f32.mrb[15].mxu0  ;;  %v1269_v43 = vpop.f32.mrb[15].mxu1  ;;  %v1487_v46 = vmax.f32 %v1019_v32, 0.0  ;;  %v1551_v47 = vmax.f32 %v1275_v33, 0.0 }
 0x172   : > { %v1014_v44 = vadd.f32 %v3932_v8, %v1013_v42  ;;  %v1270_v45 = vadd.f32 %v3932_v8, %v1269_v43  ;;  %v1485_v50 = vmax.f32 %v1011_v36, 0.0  ;;  %v1549_v51 = vmax.f32 %v1267_v37, 0.0 }
 0x173   : > { %v1488_v48 = vmax.f32 %v1022_v40, 0.0  ;;  %v1552_v49 = vmax.f32 %v1278_v41, 0.0 }
 0x174   : > { %v1486_v52 = vmax.f32 %v1014_v44, 0.0  ;;  %v1550_v53 = vmax.f32 %v1270_v45, 0.0 }
 0x175   : > { %v2775_v54 = vpack.c.bf16 %v1488_v48, %v1487_v46  ;;  %v2935_v55 = vpack.c.bf16 %v1552_v49, %v1551_v47 }
 0x176   : > { %v2770_v56 = vpack.c.bf16 %v1486_v52, %v1485_v50  ;;  %v2930_v57 = vpack.c.bf16 %v1550_v53, %v1549_v51  ;;  %v3223_v58 = vpop.f32.mrb[16].mxu0  ;;  %v3287_v59 = vpop.f32.mrb[16].mxu1 }
 0x177   : > { %3063 = vst [vmem:[%s3945_s19 + $0x38] sm:$0xff] %v2775_v54   ;;  %3095 = vst [vmem:[%s3945_s19 + $0x138] sm:$0xff] %v2935_v55   ;;  %v1035_v60 = vadd.f32 %v3223_v58, %v3932_v8  ;;  %v1291_v61 = vadd.f32 %v3287_v59, %v3932_v8  ;;  %v1026_v62 = vpop.f32.mrb[17].mxu0  ;;  %v1282_v63 = vpop.f32.mrb[17].mxu1 }
 0x178   : > { %3062 = vst [vmem:[%s3945_s19 + $0x30] sm:$0xff] %v2770_v56   ;;  %3094 = vst [vmem:[%s3945_s19 + $0x130] sm:$0xff] %v2930_v57   ;;  %v1027_v0 = vadd.f32 %v3932_v8, %v1026_v62  ;;  %v1283_v1 = vadd.f32 %v3932_v8, %v1282_v63  ;;  %v3224_v2 = vpop.f32.mrb[18].mxu0  ;;  %v3288_v3 = vpop.f32.mrb[18].mxu1 }
 0x179   : > { %v1038_v4 = vadd.f32 %v3224_v2, %v3932_v8  ;;  %v1294_v5 = vadd.f32 %v3288_v3, %v3932_v8  ;;  %v1029_v6 = vpop.f32.mrb[19].mxu0  ;;  %v1285_v7 = vpop.f32.mrb[19].mxu1  ;;  %v1491_v11 = vmax.f32 %v1035_v60, 0.0  ;;  %v1555_v12 = vmax.f32 %v1291_v61, 0.0 }
 0x17a   : > { %v1030_v9 = vadd.f32 %v3932_v8, %v1029_v6  ;;  %v1286_v10 = vadd.f32 %v3932_v8, %v1285_v7  ;;  %v1489_v15 = vmax.f32 %v1027_v0, 0.0  ;;  %v1553_v16 = vmax.f32 %v1283_v1, 0.0 }
 0x17b   : > { %v1492_v13 = vmax.f32 %v1038_v4, 0.0  ;;  %v1556_v14 = vmax.f32 %v1294_v5, 0.0 }
 0x17c   : > { %v1490_v17 = vmax.f32 %v1030_v9, 0.0  ;;  %v1554_v18 = vmax.f32 %v1286_v10, 0.0 }
 0x17d   : > { %v2785_v19 = vpack.c.bf16 %v1492_v13, %v1491_v11  ;;  %v2945_v20 = vpack.c.bf16 %v1556_v14, %v1555_v12 }
 0x17e   : > { %v2780_v21 = vpack.c.bf16 %v1490_v17, %v1489_v15  ;;  %v2940_v22 = vpack.c.bf16 %v1554_v18, %v1553_v16  ;;  %v3227_v23 = vpop.f32.mrb[20].mxu0  ;;  %v3291_v24 = vpop.f32.mrb[20].mxu1 }
 0x17f   : > { %3065 = vst [vmem:[%s3945_s19 + $0x48] sm:$0xff] %v2785_v19   ;;  %3097 = vst [vmem:[%s3945_s19 + $0x148] sm:$0xff] %v2945_v20   ;;  %v1051_v25 = vadd.f32 %v3227_v23, %v3932_v8  ;;  %v1307_v26 = vadd.f32 %v3291_v24, %v3932_v8  ;;  %v1042_v27 = vpop.f32.mrb[21].mxu0  ;;  %v1298_v28 = vpop.f32.mrb[21].mxu1 }
 0x180   : > { %3064 = vst [vmem:[%s3945_s19 + $0x40] sm:$0xff] %v2780_v21   ;;  %3096 = vst [vmem:[%s3945_s19 + $0x140] sm:$0xff] %v2940_v22   ;;  %v1043_v29 = vadd.f32 %v3932_v8, %v1042_v27  ;;  %v1299_v30 = vadd.f32 %v3932_v8, %v1298_v28  ;;  %v3228_v31 = vpop.f32.mrb[22].mxu0  ;;  %v3292_v32 = vpop.f32.mrb[22].mxu1 }
 0x181   : > { %v1054_v33 = vadd.f32 %v3228_v31, %v3932_v8  ;;  %v1310_v34 = vadd.f32 %v3292_v32, %v3932_v8  ;;  %v1045_v35 = vpop.f32.mrb[23].mxu0  ;;  %v1301_v36 = vpop.f32.mrb[23].mxu1  ;;  %v1495_v39 = vmax.f32 %v1051_v25, 0.0  ;;  %v1559_v40 = vmax.f32 %v1307_v26, 0.0 }
 0x182   : > { %v1046_v37 = vadd.f32 %v3932_v8, %v1045_v35  ;;  %v1302_v38 = vadd.f32 %v3932_v8, %v1301_v36  ;;  %v1493_v43 = vmax.f32 %v1043_v29, 0.0  ;;  %v1557_v44 = vmax.f32 %v1299_v30, 0.0 }
 0x183   : > { %v1496_v41 = vmax.f32 %v1054_v33, 0.0  ;;  %v1560_v42 = vmax.f32 %v1310_v34, 0.0 }
 0x184   : > { %v1494_v45 = vmax.f32 %v1046_v37, 0.0  ;;  %v1558_v46 = vmax.f32 %v1302_v38, 0.0 }
 0x185   : > { %v2795_v47 = vpack.c.bf16 %v1496_v41, %v1495_v39  ;;  %v2955_v48 = vpack.c.bf16 %v1560_v42, %v1559_v40 }
 0x186   : > { %v2790_v49 = vpack.c.bf16 %v1494_v45, %v1493_v43  ;;  %v2950_v50 = vpack.c.bf16 %v1558_v46, %v1557_v44  ;;  %v3231_v51 = vpop.f32.mrb[24].mxu0  ;;  %v3295_v52 = vpop.f32.mrb[24].mxu1 }
 0x187   : > { %3067 = vst [vmem:[%s3945_s19 + $0x58] sm:$0xff] %v2795_v47   ;;  %3099 = vst [vmem:[%s3945_s19 + $0x158] sm:$0xff] %v2955_v48   ;;  %v1067_v53 = vadd.f32 %v3231_v51, %v3932_v8  ;;  %v1323_v54 = vadd.f32 %v3295_v52, %v3932_v8  ;;  %v1058_v55 = vpop.f32.mrb[25].mxu0  ;;  %v1314_v56 = vpop.f32.mrb[25].mxu1 }
 0x188   : > { %3066 = vst [vmem:[%s3945_s19 + $0x50] sm:$0xff] %v2790_v49   ;;  %3098 = vst [vmem:[%s3945_s19 + $0x150] sm:$0xff] %v2950_v50   ;;  %v1059_v57 = vadd.f32 %v3932_v8, %v1058_v55  ;;  %v1315_v58 = vadd.f32 %v3932_v8, %v1314_v56  ;;  %v3232_v59 = vpop.f32.mrb[26].mxu0  ;;  %v3296_v60 = vpop.f32.mrb[26].mxu1 }
 0x189   : > { %v1070_v61 = vadd.f32 %v3232_v59, %v3932_v8  ;;  %v1326_v62 = vadd.f32 %v3296_v60, %v3932_v8  ;;  %v1061_v63 = vpop.f32.mrb[27].mxu0  ;;  %v1317_v0 = vpop.f32.mrb[27].mxu1  ;;  %v1499_v3 = vmax.f32 %v1067_v53, 0.0  ;;  %v1563_v4 = vmax.f32 %v1323_v54, 0.0 }
 0x18a   : > { %v1062_v1 = vadd.f32 %v3932_v8, %v1061_v63  ;;  %v1318_v2 = vadd.f32 %v3932_v8, %v1317_v0  ;;  %v1497_v7 = vmax.f32 %v1059_v57, 0.0  ;;  %v1561_v9 = vmax.f32 %v1315_v58, 0.0 }
 0x18b   : > { %v1500_v5 = vmax.f32 %v1070_v61, 0.0  ;;  %v1564_v6 = vmax.f32 %v1326_v62, 0.0 }
 0x18c   : > { %v1498_v10 = vmax.f32 %v1062_v1, 0.0  ;;  %v1562_v11 = vmax.f32 %v1318_v2, 0.0 }
 0x18d   : > { %v2805_v12 = vpack.c.bf16 %v1500_v5, %v1499_v3  ;;  %v2965_v13 = vpack.c.bf16 %v1564_v6, %v1563_v4 }
 0x18e   : > { %v2800_v14 = vpack.c.bf16 %v1498_v10, %v1497_v7  ;;  %v2960_v15 = vpack.c.bf16 %v1562_v11, %v1561_v9  ;;  %v3235_v16 = vpop.f32.mrb[28].mxu0  ;;  %v3299_v17 = vpop.f32.mrb[28].mxu1 }
 0x18f   : > { %3069 = vst [vmem:[%s3945_s19 + $0x68] sm:$0xff] %v2805_v12   ;;  %3101 = vst [vmem:[%s3945_s19 + $0x168] sm:$0xff] %v2965_v13   ;;  %v1083_v18 = vadd.f32 %v3235_v16, %v3932_v8  ;;  %v1339_v19 = vadd.f32 %v3299_v17, %v3932_v8  ;;  %v1074_v20 = vpop.f32.mrb[29].mxu0  ;;  %v1330_v21 = vpop.f32.mrb[29].mxu1 }
 0x190   : > { %3068 = vst [vmem:[%s3945_s19 + $0x60] sm:$0xff] %v2800_v14   ;;  %3100 = vst [vmem:[%s3945_s19 + $0x160] sm:$0xff] %v2960_v15   ;;  %v1075_v22 = vadd.f32 %v3932_v8, %v1074_v20  ;;  %v1331_v23 = vadd.f32 %v3932_v8, %v1330_v21  ;;  %v3236_v24 = vpop.f32.mrb[30].mxu0  ;;  %v3300_v25 = vpop.f32.mrb[30].mxu1 }
 0x191   : > { %v1086_v26 = vadd.f32 %v3236_v24, %v3932_v8  ;;  %v1342_v27 = vadd.f32 %v3300_v25, %v3932_v8  ;;  %v1077_v28 = vpop.f32.mrb[31].mxu0  ;;  %v1333_v29 = vpop.f32.mrb[31].mxu1  ;;  %v1503_v32 = vmax.f32 %v1083_v18, 0.0  ;;  %v1567_v33 = vmax.f32 %v1339_v19, 0.0 }
 0x192   : > { %v1078_v30 = vadd.f32 %v3932_v8, %v1077_v28  ;;  %v1334_v31 = vadd.f32 %v3932_v8, %v1333_v29  ;;  %v1501_v36 = vmax.f32 %v1075_v22, 0.0  ;;  %v1565_v37 = vmax.f32 %v1331_v23, 0.0 }
 0x193   : > { %v1504_v34 = vmax.f32 %v1086_v26, 0.0  ;;  %v1568_v35 = vmax.f32 %v1342_v27, 0.0 }
 0x194   : > { %v1502_v38 = vmax.f32 %v1078_v30, 0.0  ;;  %v1566_v39 = vmax.f32 %v1334_v31, 0.0 }
 0x195   : > { %v2815_v40 = vpack.c.bf16 %v1504_v34, %v1503_v32  ;;  %v2975_v41 = vpack.c.bf16 %v1568_v35, %v1567_v33 }
 0x196   : > { %v2810_v42 = vpack.c.bf16 %v1502_v38, %v1501_v36  ;;  %v2970_v43 = vpack.c.bf16 %v1566_v39, %v1565_v37  ;;  %v3239_v44 = vpop.f32.mrb[32].mxu0  ;;  %v3303_v45 = vpop.f32.mrb[32].mxu1 }
 0x197   : > { %3071 = vst [vmem:[%s3945_s19 + $0x78] sm:$0xff] %v2815_v40   ;;  %3103 = vst [vmem:[%s3945_s19 + $0x178] sm:$0xff] %v2975_v41   ;;  %v1099_v46 = vadd.f32 %v3239_v44, %v3932_v8  ;;  %v1355_v47 = vadd.f32 %v3303_v45, %v3932_v8  ;;  %v1090_v48 = vpop.f32.mrb[33].mxu0  ;;  %v1346_v49 = vpop.f32.mrb[33].mxu1 }
 0x198   : > { %3070 = vst [vmem:[%s3945_s19 + $0x70] sm:$0xff] %v2810_v42   ;;  %3102 = vst [vmem:[%s3945_s19 + $0x170] sm:$0xff] %v2970_v43   ;;  %v1091_v50 = vadd.f32 %v3932_v8, %v1090_v48  ;;  %v1347_v51 = vadd.f32 %v3932_v8, %v1346_v49  ;;  %v3240_v52 = vpop.f32.mrb[34].mxu0  ;;  %v3304_v53 = vpop.f32.mrb[34].mxu1 }
 0x199   : > { %v1102_v54 = vadd.f32 %v3240_v52, %v3932_v8  ;;  %v1358_v55 = vadd.f32 %v3304_v53, %v3932_v8  ;;  %v1093_v56 = vpop.f32.mrb[35].mxu0  ;;  %v1349_v57 = vpop.f32.mrb[35].mxu1  ;;  %v1507_v60 = vmax.f32 %v1099_v46, 0.0  ;;  %v1571_v61 = vmax.f32 %v1355_v47, 0.0 }
 0x19a   : > { %v1094_v58 = vadd.f32 %v3932_v8, %v1093_v56  ;;  %v1350_v59 = vadd.f32 %v3932_v8, %v1349_v57  ;;  %v1505_v0 = vmax.f32 %v1091_v50, 0.0  ;;  %v1569_v1 = vmax.f32 %v1347_v51, 0.0 }
 0x19b   : > { %v1508_v62 = vmax.f32 %v1102_v54, 0.0  ;;  %v1572_v63 = vmax.f32 %v1358_v55, 0.0 }
 0x19c   : > { %v1506_v2 = vmax.f32 %v1094_v58, 0.0  ;;  %v1570_v3 = vmax.f32 %v1350_v59, 0.0 }
 0x19d   : > { %v2825_v4 = vpack.c.bf16 %v1508_v62, %v1507_v60  ;;  %v2985_v5 = vpack.c.bf16 %v1572_v63, %v1571_v61 }
 0x19e   : > { %v2820_v6 = vpack.c.bf16 %v1506_v2, %v1505_v0  ;;  %v2980_v7 = vpack.c.bf16 %v1570_v3, %v1569_v1  ;;  %v3243_v9 = vpop.f32.mrb[36].mxu0  ;;  %v3307_v10 = vpop.f32.mrb[36].mxu1 }
 0x19f   : > { %3073 = vst [vmem:[%s3945_s19 + $0x88] sm:$0xff] %v2825_v4   ;;  %3105 = vst [vmem:[%s3945_s19 + $0x188] sm:$0xff] %v2985_v5   ;;  %v1115_v11 = vadd.f32 %v3243_v9, %v3932_v8  ;;  %v1371_v12 = vadd.f32 %v3307_v10, %v3932_v8  ;;  %v1106_v13 = vpop.f32.mrb[37].mxu0  ;;  %v1362_v14 = vpop.f32.mrb[37].mxu1 }
 0x1a0   : > { %3072 = vst [vmem:[%s3945_s19 + $0x80] sm:$0xff] %v2820_v6   ;;  %3104 = vst [vmem:[%s3945_s19 + $0x180] sm:$0xff] %v2980_v7   ;;  %v1107_v15 = vadd.f32 %v3932_v8, %v1106_v13  ;;  %v1363_v16 = vadd.f32 %v3932_v8, %v1362_v14  ;;  %v3244_v17 = vpop.f32.mrb[38].mxu0  ;;  %v3308_v18 = vpop.f32.mrb[38].mxu1 }
 0x1a1   : > { %v1118_v19 = vadd.f32 %v3244_v17, %v3932_v8  ;;  %v1374_v20 = vadd.f32 %v3308_v18, %v3932_v8  ;;  %v1109_v21 = vpop.f32.mrb[39].mxu0  ;;  %v1365_v22 = vpop.f32.mrb[39].mxu1  ;;  %v1511_v25 = vmax.f32 %v1115_v11, 0.0  ;;  %v1575_v26 = vmax.f32 %v1371_v12, 0.0 }
 0x1a2   : > { %v1110_v23 = vadd.f32 %v3932_v8, %v1109_v21  ;;  %v1366_v24 = vadd.f32 %v3932_v8, %v1365_v22  ;;  %v1509_v29 = vmax.f32 %v1107_v15, 0.0  ;;  %v1573_v30 = vmax.f32 %v1363_v16, 0.0 }
 0x1a3   : > { %v1512_v27 = vmax.f32 %v1118_v19, 0.0  ;;  %v1576_v28 = vmax.f32 %v1374_v20, 0.0 }
 0x1a4   : > { %v1510_v31 = vmax.f32 %v1110_v23, 0.0  ;;  %v1574_v32 = vmax.f32 %v1366_v24, 0.0 }
 0x1a5   : > { %v2835_v33 = vpack.c.bf16 %v1512_v27, %v1511_v25  ;;  %v2995_v34 = vpack.c.bf16 %v1576_v28, %v1575_v26 }
 0x1a6   : > { %v2830_v35 = vpack.c.bf16 %v1510_v31, %v1509_v29  ;;  %v2990_v36 = vpack.c.bf16 %v1574_v32, %v1573_v30  ;;  %v3247_v37 = vpop.f32.mrb[40].mxu0  ;;  %v3311_v38 = vpop.f32.mrb[40].mxu1 }
 0x1a7   : > { %3075 = vst [vmem:[%s3945_s19 + $0x98] sm:$0xff] %v2835_v33   ;;  %3107 = vst [vmem:[%s3945_s19 + $0x198] sm:$0xff] %v2995_v34   ;;  %v1131_v39 = vadd.f32 %v3247_v37, %v3932_v8  ;;  %v1387_v40 = vadd.f32 %v3311_v38, %v3932_v8  ;;  %v1122_v41 = vpop.f32.mrb[41].mxu0  ;;  %v1378_v42 = vpop.f32.mrb[41].mxu1 }
 0x1a8   : > { %3074 = vst [vmem:[%s3945_s19 + $0x90] sm:$0xff] %v2830_v35   ;;  %3106 = vst [vmem:[%s3945_s19 + $0x190] sm:$0xff] %v2990_v36   ;;  %v1123_v43 = vadd.f32 %v3932_v8, %v1122_v41  ;;  %v1379_v44 = vadd.f32 %v3932_v8, %v1378_v42  ;;  %v3248_v45 = vpop.f32.mrb[42].mxu0  ;;  %v3312_v46 = vpop.f32.mrb[42].mxu1 }
 0x1a9   : > { %v1134_v47 = vadd.f32 %v3248_v45, %v3932_v8  ;;  %v1390_v48 = vadd.f32 %v3312_v46, %v3932_v8  ;;  %v1125_v49 = vpop.f32.mrb[43].mxu0  ;;  %v1381_v50 = vpop.f32.mrb[43].mxu1  ;;  %v1515_v53 = vmax.f32 %v1131_v39, 0.0  ;;  %v1579_v54 = vmax.f32 %v1387_v40, 0.0 }
 0x1aa   : > { %v1126_v51 = vadd.f32 %v3932_v8, %v1125_v49  ;;  %v1382_v52 = vadd.f32 %v3932_v8, %v1381_v50  ;;  %v1513_v57 = vmax.f32 %v1123_v43, 0.0  ;;  %v1577_v58 = vmax.f32 %v1379_v44, 0.0 }
 0x1ab   : > { %v1516_v55 = vmax.f32 %v1134_v47, 0.0  ;;  %v1580_v56 = vmax.f32 %v1390_v48, 0.0 }
 0x1ac   : > { %v1514_v59 = vmax.f32 %v1126_v51, 0.0  ;;  %v1578_v60 = vmax.f32 %v1382_v52, 0.0 }
 0x1ad   : > { %v2845_v61 = vpack.c.bf16 %v1516_v55, %v1515_v53  ;;  %v3005_v62 = vpack.c.bf16 %v1580_v56, %v1579_v54 }
 0x1ae   : > { %v2840_v63 = vpack.c.bf16 %v1514_v59, %v1513_v57  ;;  %v3000_v0 = vpack.c.bf16 %v1578_v60, %v1577_v58  ;;  %v3251_v1 = vpop.f32.mrb[44].mxu0  ;;  %v3315_v2 = vpop.f32.mrb[44].mxu1 }
 0x1af   : > { %3077 = vst [vmem:[%s3945_s19 + $0xa8] sm:$0xff] %v2845_v61   ;;  %3109 = vst [vmem:[%s3945_s19 + $0x1a8] sm:$0xff] %v3005_v62   ;;  %v1147_v3 = vadd.f32 %v3251_v1, %v3932_v8  ;;  %v1403_v4 = vadd.f32 %v3315_v2, %v3932_v8  ;;  %v1138_v5 = vpop.f32.mrb[45].mxu0  ;;  %v1394_v6 = vpop.f32.mrb[45].mxu1 }
 0x1b0   : > { %3076 = vst [vmem:[%s3945_s19 + $0xa0] sm:$0xff] %v2840_v63   ;;  %3108 = vst [vmem:[%s3945_s19 + $0x1a0] sm:$0xff] %v3000_v0   ;;  %v1139_v7 = vadd.f32 %v3932_v8, %v1138_v5  ;;  %v1395_v9 = vadd.f32 %v3932_v8, %v1394_v6  ;;  %v3252_v10 = vpop.f32.mrb[46].mxu0  ;;  %v3316_v11 = vpop.f32.mrb[46].mxu1 }
 0x1b1   : > { %v1150_v12 = vadd.f32 %v3252_v10, %v3932_v8  ;;  %v1406_v13 = vadd.f32 %v3316_v11, %v3932_v8  ;;  %v1141_v14 = vpop.f32.mrb[47].mxu0  ;;  %v1397_v15 = vpop.f32.mrb[47].mxu1  ;;  %v1519_v18 = vmax.f32 %v1147_v3, 0.0  ;;  %v1583_v19 = vmax.f32 %v1403_v4, 0.0 }
 0x1b2   : > { %v1142_v16 = vadd.f32 %v3932_v8, %v1141_v14  ;;  %v1398_v17 = vadd.f32 %v3932_v8, %v1397_v15  ;;  %v1517_v22 = vmax.f32 %v1139_v7, 0.0  ;;  %v1581_v23 = vmax.f32 %v1395_v9, 0.0 }
 0x1b3   : > { %v1520_v20 = vmax.f32 %v1150_v12, 0.0  ;;  %v1584_v21 = vmax.f32 %v1406_v13, 0.0 }
 0x1b4   : > { %v1518_v24 = vmax.f32 %v1142_v16, 0.0  ;;  %v1582_v25 = vmax.f32 %v1398_v17, 0.0 }
 0x1b5   : > { %v2855_v26 = vpack.c.bf16 %v1520_v20, %v1519_v18  ;;  %v3015_v27 = vpack.c.bf16 %v1584_v21, %v1583_v19 }
 0x1b6   : > { %v2850_v28 = vpack.c.bf16 %v1518_v24, %v1517_v22  ;;  %v3010_v29 = vpack.c.bf16 %v1582_v25, %v1581_v23  ;;  %v3255_v30 = vpop.f32.mrb[48].mxu0  ;;  %v3319_v31 = vpop.f32.mrb[48].mxu1 }
 0x1b7   : > { %3079 = vst [vmem:[%s3945_s19 + $0xb8] sm:$0xff] %v2855_v26   ;;  %3111 = vst [vmem:[%s3945_s19 + $0x1b8] sm:$0xff] %v3015_v27   ;;  %v1163_v32 = vadd.f32 %v3255_v30, %v3932_v8  ;;  %v1419_v33 = vadd.f32 %v3319_v31, %v3932_v8  ;;  %v1154_v34 = vpop.f32.mrb[49].mxu0  ;;  %v1410_v35 = vpop.f32.mrb[49].mxu1 }
 0x1b8   : > { %3078 = vst [vmem:[%s3945_s19 + $0xb0] sm:$0xff] %v2850_v28   ;;  %3110 = vst [vmem:[%s3945_s19 + $0x1b0] sm:$0xff] %v3010_v29   ;;  %v1155_v36 = vadd.f32 %v3932_v8, %v1154_v34  ;;  %v1411_v37 = vadd.f32 %v3932_v8, %v1410_v35  ;;  %v3256_v38 = vpop.f32.mrb[50].mxu0  ;;  %v3320_v39 = vpop.f32.mrb[50].mxu1 }
 0x1b9   : > { %v1166_v40 = vadd.f32 %v3256_v38, %v3932_v8  ;;  %v1422_v41 = vadd.f32 %v3320_v39, %v3932_v8  ;;  %v1157_v42 = vpop.f32.mrb[51].mxu0  ;;  %v1413_v43 = vpop.f32.mrb[51].mxu1  ;;  %v1523_v46 = vmax.f32 %v1163_v32, 0.0  ;;  %v1587_v47 = vmax.f32 %v1419_v33, 0.0 }
 0x1ba   : > { %v1158_v44 = vadd.f32 %v3932_v8, %v1157_v42  ;;  %v1414_v45 = vadd.f32 %v3932_v8, %v1413_v43  ;;  %v1521_v50 = vmax.f32 %v1155_v36, 0.0  ;;  %v1585_v51 = vmax.f32 %v1411_v37, 0.0 }
 0x1bb   : > { %v1524_v48 = vmax.f32 %v1166_v40, 0.0  ;;  %v1588_v49 = vmax.f32 %v1422_v41, 0.0 }
 0x1bc   : > { %v1522_v52 = vmax.f32 %v1158_v44, 0.0  ;;  %v1586_v53 = vmax.f32 %v1414_v45, 0.0 }
 0x1bd   : > { %v2865_v54 = vpack.c.bf16 %v1524_v48, %v1523_v46  ;;  %v3025_v55 = vpack.c.bf16 %v1588_v49, %v1587_v47 }
 0x1be   : > { %v2860_v56 = vpack.c.bf16 %v1522_v52, %v1521_v50  ;;  %v3020_v57 = vpack.c.bf16 %v1586_v53, %v1585_v51  ;;  %v3259_v58 = vpop.f32.mrb[52].mxu0  ;;  %v3323_v59 = vpop.f32.mrb[52].mxu1 }
 0x1bf   : > { %3081 = vst [vmem:[%s3945_s19 + $0xc8] sm:$0xff] %v2865_v54   ;;  %3113 = vst [vmem:[%s3945_s19 + $0x1c8] sm:$0xff] %v3025_v55   ;;  %v1179_v60 = vadd.f32 %v3259_v58, %v3932_v8  ;;  %v1435_v61 = vadd.f32 %v3323_v59, %v3932_v8  ;;  %v1170_v62 = vpop.f32.mrb[53].mxu0  ;;  %v1426_v63 = vpop.f32.mrb[53].mxu1 }
 0x1c0   : > { %3080 = vst [vmem:[%s3945_s19 + $0xc0] sm:$0xff] %v2860_v56   ;;  %3112 = vst [vmem:[%s3945_s19 + $0x1c0] sm:$0xff] %v3020_v57   ;;  %v1171_v0 = vadd.f32 %v3932_v8, %v1170_v62  ;;  %v1427_v1 = vadd.f32 %v3932_v8, %v1426_v63  ;;  %v3260_v2 = vpop.f32.mrb[54].mxu0  ;;  %v3324_v3 = vpop.f32.mrb[54].mxu1 }
 0x1c1   : > { %v1182_v4 = vadd.f32 %v3260_v2, %v3932_v8  ;;  %v1438_v5 = vadd.f32 %v3324_v3, %v3932_v8  ;;  %v1173_v6 = vpop.f32.mrb[55].mxu0  ;;  %v1429_v7 = vpop.f32.mrb[55].mxu1  ;;  %v1527_v11 = vmax.f32 %v1179_v60, 0.0  ;;  %v1591_v12 = vmax.f32 %v1435_v61, 0.0 }
 0x1c2   : > { %v1174_v9 = vadd.f32 %v3932_v8, %v1173_v6  ;;  %v1430_v10 = vadd.f32 %v3932_v8, %v1429_v7  ;;  %v1525_v15 = vmax.f32 %v1171_v0, 0.0  ;;  %v1589_v16 = vmax.f32 %v1427_v1, 0.0 }
 0x1c3   : > { %v1528_v13 = vmax.f32 %v1182_v4, 0.0  ;;  %v1592_v14 = vmax.f32 %v1438_v5, 0.0 }
 0x1c4   : > { %v1526_v17 = vmax.f32 %v1174_v9, 0.0  ;;  %v1590_v18 = vmax.f32 %v1430_v10, 0.0 }
 0x1c5   : > { %v2875_v19 = vpack.c.bf16 %v1528_v13, %v1527_v11  ;;  %v3035_v20 = vpack.c.bf16 %v1592_v14, %v1591_v12 }
 0x1c6   : > { %v2870_v21 = vpack.c.bf16 %v1526_v17, %v1525_v15  ;;  %v3030_v22 = vpack.c.bf16 %v1590_v18, %v1589_v16  ;;  %v3263_v23 = vpop.f32.mrb[56].mxu0  ;;  %v3327_v24 = vpop.f32.mrb[56].mxu1 }
 0x1c7   : > { %3083 = vst [vmem:[%s3945_s19 + $0xd8] sm:$0xff] %v2875_v19   ;;  %3115 = vst [vmem:[%s3945_s19 + $0x1d8] sm:$0xff] %v3035_v20   ;;  %v1195_v25 = vadd.f32 %v3263_v23, %v3932_v8  ;;  %v1451_v26 = vadd.f32 %v3327_v24, %v3932_v8  ;;  %v1186_v27 = vpop.f32.mrb[57].mxu0  ;;  %v1442_v28 = vpop.f32.mrb[57].mxu1 }
 0x1c8   : > { %3082 = vst [vmem:[%s3945_s19 + $0xd0] sm:$0xff] %v2870_v21   ;;  %3114 = vst [vmem:[%s3945_s19 + $0x1d0] sm:$0xff] %v3030_v22   ;;  %v1187_v29 = vadd.f32 %v3932_v8, %v1186_v27  ;;  %v1443_v30 = vadd.f32 %v3932_v8, %v1442_v28  ;;  %v3264_v31 = vpop.f32.mrb[58].mxu0  ;;  %v3328_v32 = vpop.f32.mrb[58].mxu1 }
 0x1c9   : > { %v1198_v33 = vadd.f32 %v3264_v31, %v3932_v8  ;;  %v1454_v34 = vadd.f32 %v3328_v32, %v3932_v8  ;;  %v1189_v35 = vpop.f32.mrb[59].mxu0  ;;  %v1445_v36 = vpop.f32.mrb[59].mxu1  ;;  %v1531_v39 = vmax.f32 %v1195_v25, 0.0  ;;  %v1595_v40 = vmax.f32 %v1451_v26, 0.0 }
 0x1ca   : > { %v1190_v37 = vadd.f32 %v3932_v8, %v1189_v35  ;;  %v1446_v38 = vadd.f32 %v3932_v8, %v1445_v36  ;;  %v1529_v43 = vmax.f32 %v1187_v29, 0.0  ;;  %v1593_v44 = vmax.f32 %v1443_v30, 0.0 }
 0x1cb   : > { %v1532_v41 = vmax.f32 %v1198_v33, 0.0  ;;  %v1596_v42 = vmax.f32 %v1454_v34, 0.0 }
 0x1cc   : > { %v1530_v45 = vmax.f32 %v1190_v37, 0.0  ;;  %v1594_v46 = vmax.f32 %v1446_v38, 0.0 }
 0x1cd   : > { %v2885_v47 = vpack.c.bf16 %v1532_v41, %v1531_v39  ;;  %v3045_v48 = vpack.c.bf16 %v1596_v42, %v1595_v40 }
 0x1ce   : > { %v2880_v49 = vpack.c.bf16 %v1530_v45, %v1529_v43  ;;  %v3040_v50 = vpack.c.bf16 %v1594_v46, %v1593_v44  ;;  %v3267_v51 = vpop.f32.mrb[60].mxu0  ;;  %v3331_v52 = vpop.f32.mrb[60].mxu1 }
 0x1cf   : > { %3085 = vst [vmem:[%s3945_s19 + $0xe8] sm:$0xff] %v2885_v47   ;;  %3117 = vst [vmem:[%s3945_s19 + $0x1e8] sm:$0xff] %v3045_v48   ;;  %v1211_v53 = vadd.f32 %v3267_v51, %v3932_v8  ;;  %v1467_v54 = vadd.f32 %v3331_v52, %v3932_v8  ;;  %v1202_v55 = vpop.f32.mrb[61].mxu0  ;;  %v1458_v56 = vpop.f32.mrb[61].mxu1 }
 0x1d0   : > { %3084 = vst [vmem:[%s3945_s19 + $0xe0] sm:$0xff] %v2880_v49   ;;  %3116 = vst [vmem:[%s3945_s19 + $0x1e0] sm:$0xff] %v3040_v50   ;;  %v1203_v57 = vadd.f32 %v3932_v8, %v1202_v55  ;;  %v1459_v58 = vadd.f32 %v3932_v8, %v1458_v56  ;;  %v3268_v59 = vpop.f32.mrb[62].mxu0  ;;  %v3332_v60 = vpop.f32.mrb[62].mxu1 }
 0x1d1   : > { %v1214_v61 = vadd.f32 %v3268_v59, %v3932_v8  ;;  %v1470_v62 = vadd.f32 %v3332_v60, %v3932_v8  ;;  %v1205_v63 = vpop.f32.mrb[63].mxu0  ;;  %v1461_v0 = vpop.f32.mrb[63].mxu1  ;;  %v1535_v3 = vmax.f32 %v1211_v53, 0.0  ;;  %v1599_v4 = vmax.f32 %v1467_v54, 0.0 }
 0x1d2   : > { %v1206_v1 = vadd.f32 %v3932_v8, %v1205_v63  ;;  %v1462_v2 = vadd.f32 %v3932_v8, %v1461_v0  ;;  %v1533_v7 = vmax.f32 %v1203_v57, 0.0  ;;  %v1597_v9 = vmax.f32 %v1459_v58, 0.0 }
 0x1d3   : > { %v1536_v5 = vmax.f32 %v1214_v61, 0.0  ;;  %v1600_v6 = vmax.f32 %v1470_v62, 0.0 }
 0x1d4   : > { %v1534_v10 = vmax.f32 %v1206_v1, 0.0  ;;  %v1598_v11 = vmax.f32 %v1462_v2, 0.0 }
 0x1d5   : > { %v2895_v12 = vpack.c.bf16 %v1536_v5, %v1535_v3  ;;  %v3055_v13 = vpack.c.bf16 %v1600_v6, %v1599_v4 }
 0x1d6   : > { %v2890_v14 = vpack.c.bf16 %v1534_v10, %v1533_v7  ;;  %v3050_v15 = vpack.c.bf16 %v1598_v11, %v1597_v9 }
 0x1d7   : > { %3087 = vst [vmem:[%s3945_s19 + $0xf8] sm:$0xff] %v2895_v12   ;;  %3119 = vst [vmem:[%s3945_s19 + $0x1f8] sm:$0xff] %v3055_v13  }
 0x1d8   : > { %3086 = vst [vmem:[%s3945_s19 + $0xf0] sm:$0xff] %v2890_v14   ;;  %3118 = vst [vmem:[%s3945_s19 + $0x1f0] sm:$0xff] %v3050_v15  }
 0x1d9 PF: > { %p14_p6 = scmp.ge.s32.totalorder %s3733_s30, 10   ;;  %s4160_s12 = smov %s3598_s13 }
 0x1da   : > { %s4161_s13 = smov %s3602_s14  ;;  %s4162_s14 = smov %s3744_s8 }
 0x1db   : > { %s4163_s15 = smov %s3733_s30  ;;  %16 = sbr.rel (!%p14_p6) target bundleno = 4 (0x4), region = 80 }
 0x1e2   :  { %2263 = vsyncpa [#allocation3], 1 }
 0x1e3   :  { %2265 = vsyncpa [#allocation3 + $0x1], 1 }
 0x1e4   :  { %2266 = vsyncpa [#allocation5], 1 }

// kernel: grdn_forward.109
= control target key start
LH: loop header
LB: loop body
LE: loop exit
PB: predicated region body
PF: predicated region fallthrough
CT: control target
= control target key end

     0   :  { %8 = vsyncpa [#allocation3], 0  ;;  %s3968_s0 = inlined_call_operand.hbm [shape: bf16[8192,54], index: 0, kind: input, shape index: {}]   ;;  %s3969_s1 = inlined_call_operand.hbm [shape: bf16[54,128], index: 1, kind: input, shape index: {}]   ;;  %s3970_s2 = inlined_call_operand.hbm [shape: f32[1,128], index: 2, kind: input, shape index: {}]   ;;  %s3971_s3 = inlined_call_operand.vmem [shape: bf16[8192,128], index: 3, kind: output, shape index: {}]  }
   0x1   :  { %10 = vsyncpa [#allocation3 + $0x1], 0 }
   0x2   :  { %11 = vsyncpa [#allocation5], 0  ;;  %s3457_s12 = smov 0   ;;  %s3459_s13 = smov 0  }
   0x3   :  { %s3461_s14 = smov 0   ;;  %s3463_s15 = smov 0  }
   0x4 LB: > { %s2172_s16 = sadd.s32 4294967295, %s3430_s15   ;;  %p37_p0 = scmp.ne.s32.totalorder %s3422_s13, %s3418_s12  ;;  %s3430_s15 = sphi %s3463_s15, %s3987_s15   ;;  %s3426_s14 = sphi %s3461_s14, %s3986_s14   ;;  %s3422_s13 = sphi %s3459_s13, %s3985_s13   ;;  %s3418_s12 = sphi %s3457_s12, %s3984_s12  }
   0x5   : > { %p3479_p1 = scmp.eq.s32.totalorder %s2172_s16, 0  ;;  %p2174_p2 = scmp.ge.s32.totalorder %s3430_s15, 1 }
   0x6   : > { %p116_p3 = scmp.lt.s32.totalorder %s3430_s15, 9  ;;  %s3432_s20 = smov [#allocation4]  }
   0x7   : > { %s3976_s17 = scalar_select %p3479_p1, 1, 0 }
   0x8   : > { %p3487_p4 = por %p3479_p1, %p37_p0  ;;  %p3491_p5 = pnand %p2174_p2, %p116_p3 }
   0x9   : > { %s128_s21 = sshll.u32 %s3432_s20, 4  ;;  %s3433_s23 = smov [#allocation6]   ;;  %s129_s21 = int_to_ptr.vmem [resolvable:$true] %s128_s21 }
   0xa   : > { %s3977_s18 = scalar_select %p3487_p4, 1, 0 }
   0xb   : > { %s3978_s19 = scalar_select %p3491_p5, 1, 0 }
   0xc   : > { %p3186_p6 = pneg %p3491_p5  ;;  %s142_s24 = sshll.u32 %s3433_s23, 4  ;;  %s3503_s24 = int_to_ptr.vmem [resolvable:$true] %s142_s24 }
   0xd   : > { %s3306_s27 = scalar_lea.hbm %s3969_s1, 448 }
   0xe   : > { %p3499_p7 = pnand %p3186_p6, %p3479_p1  ;;  %p3307_p8 = scmp.ne.s32.totalorder %s3969_s1, %s3306_s27 }
   0xf   : > { %p3313_p12 = scmp.lt.u32.totalorder %s3306_s27, %s3969_s1 }
  0x10   : > { %p3308_p9 = pneg %p3499_p7 }
  0x12   : > { %p3309_p10 = pnand %p3308_p9, %p3307_p8 }
  0x14   : > { %p3310_p11 = pneg %p3309_p10 }
  0x16   : > { %p3315_p13 = pnand %p3313_p12, %p3310_p11 }
  0x18   : > { %3318 = shalt.err (!%p3315_p13)
}
  0x19   : > { %s3319_s5 = scalar_lea.vmem %s129_s21, 448  ;;  %p3327_p6 = scmp.lt.s32.totalorder %s129_s21, %s129_s21 }
  0x1a   : > { %p3320_p0 = scmp.ne.s32.totalorder %s129_s21, %s3319_s5  ;;  %p3328_p1 = scmp.lt.s32.totalorder %s3319_s5, %s3319_s5 }
  0x1c   : > { %p3322_p2 = pnand %p3320_p0, %p3308_p9  ;;  %p3329_p4 = por %p3328_p1, %p3327_p6 }
  0x1e   : > { %p3323_p3 = pneg %p3322_p2 }
  0x20   : > { %p3330_p5 = pnand %p3329_p4, %p3323_p3 }
  0x22   : > { %3333 = shalt.err (!%p3330_p5)
}
  0x23   : > { %s3434_s6 = smov 64   ;;  %s3435_s7 = smov 4  }
  0x24   : > { %3189 = dma.hbm_to_vmem [thread:$0]  (!%p3499_p7), %s3969_s1, 448, %s129_s21, [#allocation5], %s3434_s6, %s3434_s6, %s3435_s7  }
  0x25   : > { %s3334_s12 = scalar_lea.hbm %s3970_s2, 16 }
  0x26   : > { %p3335_p1 = scmp.ne.s32.totalorder %s3970_s2, %s3334_s12  ;;  %p3341_p8 = scmp.lt.u32.totalorder %s3334_s12, %s3970_s2 }
  0x28   : > { %p3337_p4 = pnand %p3335_p1, %p3308_p9 }
  0x2a   : > { %p3338_p5 = pneg %p3337_p4 }
  0x2c   : > { %p3343_p10 = pnand %p3341_p8, %p3338_p5 }
  0x2e   : > { %3346 = shalt.err (!%p3343_p10)
}
  0x2f   : > { %s3347_s21 = scalar_lea.vmem %s3503_s24, 16  ;;  %s3354_s27 = scalar_lea.vmem %s3503_s24, 32 }
  0x30   : > { %p3348_p11 = scmp.ne.s32.totalorder %s3503_s24, %s3347_s21  ;;  %p3355_p0 = scmp.lt.s32.totalorder %s3503_s24, %s3503_s24 }
  0x31   : > { %p3356_p2 = scmp.lt.s32.totalorder %s3354_s27, %s3347_s21 }
  0x32   : > { %p3350_p12 = pnand %p3348_p11, %p3308_p9 }
  0x33   : > { %p3357_p3 = por %p3356_p2, %p3355_p0 }
  0x34   : > { %p3351_p13 = pneg %p3350_p12 }
  0x36   : > { %p3358_p6 = pnand %p3357_p3, %p3351_p13 }
  0x38   : > { %3361 = shalt.err (!%p3358_p6)
}
  0x39   : > { %3192 = dma.hbm_to_vmem [thread:$0]  (!%p3499_p7), %s3970_s2, 16, %s3503_s24, [#allocation5]  }
  0x3a   : > { %s3557_s30 = sadd.s32 1, %s3430_s15   ;;  %s24_s4 = sadd.s32 1, %s3426_s14 }
  0x3b   : > { %s21_s22 = ssub.s32 %s3430_s15, %s3557_s30  ;;  %p31_p9 = scmp.ne.s32.totalorder %s3426_s14, %s3422_s13 }
  0x3c   : > { %p22_p1 = scmp.eq.s32.totalorder %s21_s22, 0  ;;  %p32_p4 = scmp.eq.s32.totalorder %s3430_s15, 0 }
  0x3d   : > { %p3199_p5 = scmp.lt.s32.totalorder %s3430_s15, 8  ;;  %s153_s5 = sand.u32 1, %s3426_s14  }
  0x3e   : > { %s3568_s8 = scalar_select %p22_p1, %s3426_s14, %s24_s4  }
  0x3f   : > { %p33_p8 = por %p32_p4, %p31_p9  ;;  %s2178_s9 = sshll.u32 %s153_s5, 9 }
  0x40   : > { %s2450_s10 = sshll.u32 %s3430_s15, 13  ;;  %s157_s24 = scalar_lea.vmem [#allocation2], %s2178_s9 }
  0x41   : > { %s3574_s20 = scalar_lea.hbm %s3968_s0, %s2450_s10  ;;  %s164_s23 = sshll.u32 %s157_s24, 4  ;;  %s3580_s23 = int_to_ptr.vmem [resolvable:$true] %s164_s23 }
  0x42   : > { %p3576_p7 = pnand %p3199_p5, %p33_p8  ;;  %s3582_s26 = scalar_lea.sflag [#allocation3], %s153_s5 }
  0x43   : > { %s3362_s21 = scalar_lea.hbm %s3574_s20, 8192  ;;  %s3367_s29 = scalar_lea.hbm %s3968_s0, 65536 }
  0x44   : > { %p3363_p10 = scmp.ne.s32.totalorder %s3574_s20, %s3362_s21  ;;  %p3364_p11 = pneg %p3576_p7 }
  0x45   : > { %p3368_p0 = scmp.lt.u32.totalorder %s3574_s20, %s3968_s0  ;;  %p3369_p2 = scmp.lt.u32.totalorder %s3367_s29, %s3362_s21 }
  0x46   : > { %p3365_p12 = pnand %p3364_p11, %p3363_p10  ;;  %p3371_p6 = scmp.lt.u32.totalorder %s3362_s21, %s3574_s20 }
  0x47   : > { %p3370_p3 = por %p3369_p2, %p3368_p0 }
  0x48   : > { %p3366_p13 = pneg %p3365_p12 }
  0x49   : > { %p3372_p9 = por %p3371_p6, %p3370_p3 }
  0x4b   : > { %p3373_p1 = pnand %p3372_p9, %p3366_p13 }
  0x4d   : > { %3376 = shalt.err (!%p3373_p1)
}
  0x4e   : > { %s3377_s5 = scalar_lea.vmem %s3580_s23, 8192  ;;  %s3436_s9 = smov [#allocation2]  }
  0x4f   : > { %p3378_p4 = scmp.ne.s32.totalorder %s3580_s23, %s3377_s5  ;;  %s3382_s10 = sshll.u32 %s3436_s9, 4  ;;  %s3383_s10 = int_to_ptr.vmem [resolvable:$false] %s3382_s10 }
  0x50   : > { %s3384_s11 = scalar_lea.vmem %s3383_s10, 16384  ;;  %p3385_p10 = scmp.lt.s32.totalorder %s3580_s23, %s3383_s10 }
  0x51   : > { %p3380_p5 = pnand %p3378_p4, %p3364_p11  ;;  %p3386_p12 = scmp.lt.s32.totalorder %s3384_s11, %s3377_s5 }
  0x53   : > { %p3381_p8 = pneg %p3380_p5  ;;  %p3387_p0 = por %p3386_p12, %p3385_p10 }
  0x55   : > { %p3388_p2 = pnand %p3387_p0, %p3381_p8 }
  0x57   : > { %3391 = shalt.err (!%p3388_p2)
}
  0x58   : > { %3196 = dma.hbm_to_vmem [thread:$0]  (!%p3576_p7), %s3574_s20, 8192, %s3580_s23, %s3582_s26, %s3434_s6, %s3434_s6, %s3435_s7  }
  0x59   : > { %p3981_p11 = scmp.ne.s32.totalorder %s3978_s19, 0 }
  0x5a   : > { %s178_s12 = sand.u32 (!%p3981_p11), 1, %s3422_s13   ;;  %p3982_p13 = scmp.ne.s32.totalorder (!%p3981_p11), %s3977_s18, 0 }
  0x5b   : > { %176 = sbr.rel (%p3981_p11) target bundleno = 459 (0x1cb), region = 32  ;;  %s2182_s24 = sshll.u32 (!%p3981_p11), %s178_s12, 9 }
  0x5c   : > { %s179_s21 = scalar_lea.sflag (!%p3981_p11), [#allocation3], %s178_s12  ;;  %s3616_s27 = scalar_lea.vmem (!%p3981_p11), [#allocation2], %s2182_s24 }
  0x62   : > { %3409 = dma.done.wait (%p3982_p13), %s179_s21, 8192  }
  0x63   : > { %3411 = vsyncadd (%p3982_p13), %s179_s21, 4294959104  ;;  %p3983_p3 = scmp.ne.s32.totalorder %s3976_s17, 0 }
  0x65   : > { %3413 = dma.done.wait (%p3983_p3), [#allocation5], 464  }
  0x66   : > { %3415 = vsyncadd (%p3983_p3), [#allocation5], 4294966832  ;;  %v3238_v0 = vld [vmem:[#allocation4] sm:$0xff]   ;;  %v3239_v1 = vld [vmem:[#allocation4 + $0x8] sm:$0xff]   ;;  %vm704_vm0 = vcmask 441344   ;;  %vm897_vm1 = vcmask 1042432  }
  0x67   : > { %3030 = vmatprep.subr.bf16.mxu0 %v3238_v0  ;;  %3166 = vmatprep.subr.bf16.mxu1 %v3238_v0  ;;  %v3240_v2 = vld [vmem:[#allocation4 + $0x10] sm:$0xff]   ;;  %v3242_v3 = vld [vmem:[%s3616_s27] sm:$0xff]   ;;  %v3241_v5 = vld [vmem:[#allocation4 + $0x18] ss:$0 sps:$4 sm:$0x77]   ;;  %s2185_s17 = sshll.u32 %s2172_s16, 7 }
  0x68   : > { %3031 = vmatpush3.bf16.msra.mxu0 %v3238_v0  ;;  %3170 = vmatpush3.bf16.msra.mxu1 %v3238_v0  ;;  %v3243_v4 = vld [vmem:[%s3616_s27 + $0x100] sm:$0xff]   ;;  %v899_v6 = vsel %vm897_vm1, %v3241_v5, 0  ;;  %v3244_v7 = vld [vmem:[%s3616_s27 + $0x8] sm:$0xff]   ;;  %v3246_v9 = vld [vmem:[%s3616_s27 + $0x10] sm:$0xff]   ;;  %p215_p7 = scmp.lt.s32.totalorder %s2185_s17, 1023 }
  0x69   : > { %3032 = vmatprep.subr.bf16.mxu0 %v3239_v1  ;;  %3167 = vmatprep.subr.bf16.mxu1 %v3239_v1  ;;  %v3245_v8 = vld [vmem:[%s3616_s27 + $0x108] sm:$0xff]   ;;  %v3247_v10 = vld [vmem:[%s3616_s27 + $0x110] sm:$0xff]   ;;  %v3248_v11 = vld [vmem:[%s3616_s27 + $0x18] sm:$0xff]  }
  0x6a   : > { %3038 = vmatprep.mubr.msk.bf16.mxu0 %vm704_vm0, %v3242_v3  ;;  %3102 = vmatprep.mubr.msk.bf16.mxu1 %vm704_vm0, %v3243_v4  ;;  %v3249_v12 = vld [vmem:[%s3616_s27 + $0x118] sm:$0xff]   ;;  %v3250_v13 = vld [vmem:[%s3616_s27 + $0x20] sm:$0xff]   ;;  %v3252_v15 = vld [vmem:[%s3616_s27 + $0x28] sm:$0xff]   ;;  %s3989_s17 = smov (!%p215_p7, %s2185_s17), 1023 }
  0x6b   : > { %v3251_v14 = vld [vmem:[%s3616_s27 + $0x120] sm:$0xff]   ;;  %v3253_v16 = vld [vmem:[%s3616_s27 + $0x128] sm:$0xff]   ;;  %v3254_v17 = vld [vmem:[%s3616_s27 + $0x30] sm:$0xff]   ;;  %s2186_s18 = sshll.u32 %s3989_s17, 2 }
  0x6c   : > { %3033 = vmatpush3.bf16.msra.mxu0 %v3239_v1  ;;  %3171 = vmatpush3.bf16.msra.mxu1 %v3239_v1  ;;  %v3255_v18 = vld [vmem:[%s3616_s27 + $0x130] sm:$0xff]   ;;  %v3256_v19 = vld [vmem:[%s3616_s27 + $0x38] sm:$0xff]   ;;  %v3258_v21 = vld [vmem:[%s3616_s27 + $0x40] sm:$0xff]   ;;  %s3767_s19 = scalar_lea.vmem %s3971_s3, %s2186_s18 }
  0x6d   : > { %3034 = vmatprep.subr.bf16.mxu0 %v3240_v2  ;;  %3168 = vmatprep.subr.bf16.mxu1 %v3240_v2  ;;  %v3257_v20 = vld [vmem:[%s3616_s27 + $0x138] sm:$0xff]   ;;  %v3259_v22 = vld [vmem:[%s3616_s27 + $0x140] sm:$0xff]   ;;  %v3260_v23 = vld [vmem:[%s3616_s27 + $0x48] sm:$0xff]  }
  0x6e   : > { %v3261_v24 = vld [vmem:[%s3616_s27 + $0x148] sm:$0xff]   ;;  %v3262_v25 = vld [vmem:[%s3616_s27 + $0x50] sm:$0xff]   ;;  %v3264_v27 = vld [vmem:[%s3616_s27 + $0x58] sm:$0xff]  }
  0x6f   : > { %v3263_v26 = vld [vmem:[%s3616_s27 + $0x150] sm:$0xff]   ;;  %v3265_v28 = vld [vmem:[%s3616_s27 + $0x158] sm:$0xff]   ;;  %v3266_v29 = vld [vmem:[%s3616_s27 + $0x60] sm:$0xff]  }
  0x70   : > { %3035 = vmatpush3.bf16.msra.mxu0 %v3240_v2  ;;  %3172 = vmatpush3.bf16.msra.mxu1 %v3240_v2  ;;  %v3267_v30 = vld [vmem:[%s3616_s27 + $0x160] sm:$0xff]   ;;  %v3268_v31 = vld [vmem:[%s3616_s27 + $0x68] sm:$0xff]   ;;  %v3270_v33 = vld [vmem:[%s3616_s27 + $0x70] sm:$0xff]  }
  0x71   : > { %3174 = vmatprep.subr.msk.bf16.mxu0 %vm897_vm1, %v3241_v5  ;;  %3175 = vmatprep.subr.msk.bf16.mxu1 %vm897_vm1, %v3241_v5  ;;  %v3269_v32 = vld [vmem:[%s3616_s27 + $0x168] sm:$0xff]   ;;  %v3271_v34 = vld [vmem:[%s3616_s27 + $0x170] sm:$0xff]   ;;  %v3272_v35 = vld [vmem:[%s3616_s27 + $0x78] sm:$0xff]  }
  0x72   : > { %v3273_v36 = vld [vmem:[%s3616_s27 + $0x178] sm:$0xff]   ;;  %v3274_v37 = vld [vmem:[%s3616_s27 + $0x80] sm:$0xff]   ;;  %v3276_v39 = vld [vmem:[%s3616_s27 + $0x88] sm:$0xff]  }
  0x73   : > { %v3275_v38 = vld [vmem:[%s3616_s27 + $0x180] sm:$0xff]   ;;  %v3277_v40 = vld [vmem:[%s3616_s27 + $0x188] sm:$0xff]   ;;  %v3278_v41 = vld [vmem:[%s3616_s27 + $0x90] sm:$0xff]  }
  0x74   : > { %3037 = vmatpush3.bf16.msra.mxu0 %v899_v6  ;;  %3173 = vmatpush3.bf16.msra.mxu1 %v899_v6  ;;  %v3279_v42 = vld [vmem:[%s3616_s27 + $0x190] sm:$0xff]   ;;  %v3280_v43 = vld [vmem:[%s3616_s27 + $0x98] sm:$0xff]   ;;  %v3282_v45 = vld [vmem:[%s3616_s27 + $0xa0] sm:$0xff]  }
  0x75   : > { %v3281_v44 = vld [vmem:[%s3616_s27 + $0x198] sm:$0xff]   ;;  %v3283_v46 = vld [vmem:[%s3616_s27 + $0x1a0] sm:$0xff]   ;;  %v3284_v47 = vld [vmem:[%s3616_s27 + $0xa8] sm:$0xff]  }
  0x76   : > { %v3285_v48 = vld [vmem:[%s3616_s27 + $0x1a8] sm:$0xff]   ;;  %v3286_v49 = vld [vmem:[%s3616_s27 + $0xb0] sm:$0xff]   ;;  %v3288_v51 = vld [vmem:[%s3616_s27 + $0xb8] sm:$0xff]  }
  0x77   : > { %3039 = vmatmul.mubr.msk.bf16.vlgmr.msra.gmra.mrb[0].mxu0 %vm704_vm0, %v3244_v7  ;;  %3103 = vmatmul.mubr.msk.bf16.vlgmr.msra.gmra.mrb[0].mxu1 %vm704_vm0, %v3245_v8  ;;  %v3287_v50 = vld [vmem:[%s3616_s27 + $0x1b0] sm:$0xff]   ;;  %v3289_v52 = vld [vmem:[%s3616_s27 + $0x1b8] sm:$0xff]   ;;  %v3290_v53 = vld [vmem:[%s3616_s27 + $0xc0] sm:$0xff]  }
  0x78   : > { %3042 = vmatprep.mubr.msk.bf16.mxu0 %vm704_vm0, %v3246_v9  ;;  %3106 = vmatprep.mubr.msk.bf16.mxu1 %vm704_vm0, %v3247_v10  ;;  %v3291_v54 = vld [vmem:[%s3616_s27 + $0x1c0] sm:$0xff]   ;;  %v3292_v55 = vld [vmem:[%s3616_s27 + $0xc8] sm:$0xff]   ;;  %v3294_v57 = vld [vmem:[%s3616_s27 + $0xd0] sm:$0xff]  }
  0x79   : > { %v3293_v56 = vld [vmem:[%s3616_s27 + $0x1c8] sm:$0xff]   ;;  %v3295_v58 = vld [vmem:[%s3616_s27 + $0x1d0] sm:$0xff]   ;;  %v3296_v59 = vld [vmem:[%s3616_s27 + $0xd8] sm:$0xff]  }
  0x7a   : > { %v3297_v60 = vld [vmem:[%s3616_s27 + $0x1d8] sm:$0xff]   ;;  %v3298_v61 = vld [vmem:[%s3616_s27 + $0xe0] sm:$0xff]   ;;  %v3300_v63 = vld [vmem:[%s3616_s27 + $0xe8] sm:$0xff]  }
  0x7b   : > { %v3299_v62 = vld [vmem:[%s3616_s27 + $0x1e0] sm:$0xff]   ;;  %v3301_v0 = vld [vmem:[%s3616_s27 + $0x1e8] sm:$0xff]   ;;  %v3302_v1 = vld [vmem:[%s3616_s27 + $0xf0] sm:$0xff]  }
  0x7c   : > { %v3303_v2 = vld [vmem:[%s3616_s27 + $0x1f0] sm:$0xff]   ;;  %v3304_v3 = vld [vmem:[%s3616_s27 + $0xf8] sm:$0xff]  }
  0x7d   : > { %v3305_v4 = vld [vmem:[%s3616_s27 + $0x1f8] sm:$0xff]  }
  0x7e   : > { %v3756_v6 = vld [vmem:[#allocation6] ss:$0 sm:$0xff] }
  0x7f   : > { %3043 = vmatmul.mubr.msk.bf16.gmra.mrb[4].mxu0 %vm704_vm0, %v3248_v11  ;;  %3107 = vmatmul.mubr.msk.bf16.gmra.mrb[4].mxu1 %vm704_vm0, %v3249_v12 }
  0x80   : > { %3046 = vmatprep.mubr.msk.bf16.mxu0 %vm704_vm0, %v3250_v13  ;;  %3110 = vmatprep.mubr.msk.bf16.mxu1 %vm704_vm0, %v3251_v14 }
  0x87   : > { %3047 = vmatmul.mubr.msk.bf16.gmra.mrb[8].mxu0 %vm704_vm0, %v3252_v15  ;;  %3111 = vmatmul.mubr.msk.bf16.gmra.mrb[8].mxu1 %vm704_vm0, %v3253_v16 }
  0x88   : > { %3050 = vmatprep.mubr.msk.bf16.mxu0 %vm704_vm0, %v3254_v17  ;;  %3114 = vmatprep.mubr.msk.bf16.mxu1 %vm704_vm0, %v3255_v18 }
  0x8f   : > { %3051 = vmatmul.mubr.msk.bf16.gmra.mrb[12].mxu0 %vm704_vm0, %v3256_v19  ;;  %3115 = vmatmul.mubr.msk.bf16.gmra.mrb[12].mxu1 %vm704_vm0, %v3257_v20 }
  0x90   : > { %3054 = vmatprep.mubr.msk.bf16.mxu0 %vm704_vm0, %v3258_v21  ;;  %3118 = vmatprep.mubr.msk.bf16.mxu1 %vm704_vm0, %v3259_v22 }
  0x97   : > { %3055 = vmatmul.mubr.msk.bf16.gmra.mrb[16].mxu0 %vm704_vm0, %v3260_v23  ;;  %3119 = vmatmul.mubr.msk.bf16.gmra.mrb[16].mxu1 %vm704_vm0, %v3261_v24 }
  0x98   : > { %3058 = vmatprep.mubr.msk.bf16.mxu0 %vm704_vm0, %v3262_v25  ;;  %3122 = vmatprep.mubr.msk.bf16.mxu1 %vm704_vm0, %v3263_v26 }
  0x9f   : > { %3059 = vmatmul.mubr.msk.bf16.gmra.mrb[20].mxu0 %vm704_vm0, %v3264_v27  ;;  %3123 = vmatmul.mubr.msk.bf16.gmra.mrb[20].mxu1 %vm704_vm0, %v3265_v28 }
  0xa0   : > { %3062 = vmatprep.mubr.msk.bf16.mxu0 %vm704_vm0, %v3266_v29  ;;  %3126 = vmatprep.mubr.msk.bf16.mxu1 %vm704_vm0, %v3267_v30 }
  0xa7   : > { %3063 = vmatmul.mubr.msk.bf16.gmra.mrb[24].mxu0 %vm704_vm0, %v3268_v31  ;;  %3127 = vmatmul.mubr.msk.bf16.gmra.mrb[24].mxu1 %vm704_vm0, %v3269_v32 }
  0xa8   : > { %3066 = vmatprep.mubr.msk.bf16.mxu0 %vm704_vm0, %v3270_v33  ;;  %3130 = vmatprep.mubr.msk.bf16.mxu1 %vm704_vm0, %v3271_v34 }
  0xaf   : > { %3067 = vmatmul.mubr.msk.bf16.gmra.mrb[28].mxu0 %vm704_vm0, %v3272_v35  ;;  %3131 = vmatmul.mubr.msk.bf16.gmra.mrb[28].mxu1 %vm704_vm0, %v3273_v36 }
  0xb0   : > { %3070 = vmatprep.mubr.msk.bf16.mxu0 %vm704_vm0, %v3274_v37  ;;  %3134 = vmatprep.mubr.msk.bf16.mxu1 %vm704_vm0, %v3275_v38 }
  0xb7   : > { %3071 = vmatmul.mubr.msk.bf16.gmra.mrb[32].mxu0 %vm704_vm0, %v3276_v39  ;;  %3135 = vmatmul.mubr.msk.bf16.gmra.mrb[32].mxu1 %vm704_vm0, %v3277_v40 }
  0xb8   : > { %3074 = vmatprep.mubr.msk.bf16.mxu0 %vm704_vm0, %v3278_v41  ;;  %3138 = vmatprep.mubr.msk.bf16.mxu1 %vm704_vm0, %v3279_v42 }
  0xbf   : > { %3075 = vmatmul.mubr.msk.bf16.gmra.mrb[36].mxu0 %vm704_vm0, %v3280_v43  ;;  %3139 = vmatmul.mubr.msk.bf16.gmra.mrb[36].mxu1 %vm704_vm0, %v3281_v44 }
  0xc0   : > { %3078 = vmatprep.mubr.msk.bf16.mxu0 %vm704_vm0, %v3282_v45  ;;  %3142 = vmatprep.mubr.msk.bf16.mxu1 %vm704_vm0, %v3283_v46 }
  0xc7   : > { %3079 = vmatmul.mubr.msk.bf16.gmra.mrb[40].mxu0 %vm704_vm0, %v3284_v47  ;;  %3143 = vmatmul.mubr.msk.bf16.gmra.mrb[40].mxu1 %vm704_vm0, %v3285_v48 }
  0xc8   : > { %3082 = vmatprep.mubr.msk.bf16.mxu0 %vm704_vm0, %v3286_v49  ;;  %3146 = vmatprep.mubr.msk.bf16.mxu1 %vm704_vm0, %v3287_v50 }
  0xcf   : > { %3083 = vmatmul.mubr.msk.bf16.gmra.mrb[44].mxu0 %vm704_vm0, %v3288_v51  ;;  %3147 = vmatmul.mubr.msk.bf16.gmra.mrb[44].mxu1 %vm704_vm0, %v3289_v52 }
  0xd0   : > { %3086 = vmatprep.mubr.msk.bf16.mxu0 %vm704_vm0, %v3290_v53  ;;  %3150 = vmatprep.mubr.msk.bf16.mxu1 %vm704_vm0, %v3291_v54 }
  0xd7   : > { %3087 = vmatmul.mubr.msk.bf16.gmra.mrb[48].mxu0 %vm704_vm0, %v3292_v55  ;;  %3151 = vmatmul.mubr.msk.bf16.gmra.mrb[48].mxu1 %vm704_vm0, %v3293_v56 }
  0xd8   : > { %3090 = vmatprep.mubr.msk.bf16.mxu0 %vm704_vm0, %v3294_v57  ;;  %3154 = vmatprep.mubr.msk.bf16.mxu1 %vm704_vm0, %v3295_v58 }
  0xdf   : > { %3091 = vmatmul.mubr.msk.bf16.gmra.mrb[52].mxu0 %vm704_vm0, %v3296_v59  ;;  %3155 = vmatmul.mubr.msk.bf16.gmra.mrb[52].mxu1 %vm704_vm0, %v3297_v60 }
  0xe0   : > { %3094 = vmatprep.mubr.msk.bf16.mxu0 %vm704_vm0, %v3298_v61  ;;  %3158 = vmatprep.mubr.msk.bf16.mxu1 %vm704_vm0, %v3299_v62 }
  0xe7   : > { %3095 = vmatmul.mubr.msk.bf16.gmra.mrb[56].mxu0 %vm704_vm0, %v3300_v63  ;;  %3159 = vmatmul.mubr.msk.bf16.gmra.mrb[56].mxu1 %vm704_vm0, %v3301_v0 }
  0xe8   : > { %3098 = vmatprep.mubr.msk.bf16.mxu0 %vm704_vm0, %v3302_v1  ;;  %3162 = vmatprep.mubr.msk.bf16.mxu1 %vm704_vm0, %v3303_v2 }
  0xef   : > { %3099 = vmatmul.mubr.msk.bf16.gmra.mrb[60].mxu0 %vm704_vm0, %v3304_v3  ;;  %3163 = vmatmul.mubr.msk.bf16.gmra.mrb[60].mxu1 %vm704_vm0, %v3305_v4 }
 0x14a   : > { %v3040_v5 = vpop.f32.mrb[0].mxu0  ;;  %v3104_v7 = vpop.f32.mrb[0].mxu1 }
 0x14b   : > { %v935_v8 = vpop.f32.mrb[1].mxu0  ;;  %v1191_v9 = vpop.f32.mrb[1].mxu1  ;;  %v944_v12 = vadd.f32 %v3040_v5, %v3756_v6  ;;  %v1200_v13 = vadd.f32 %v3104_v7, %v3756_v6 }
 0x14c   : > { %v3041_v10 = vpop.f32.mrb[2].mxu0  ;;  %v3105_v11 = vpop.f32.mrb[2].mxu1  ;;  %v936_v18 = vadd.f32 %v3756_v6, %v935_v8  ;;  %v1192_v19 = vadd.f32 %v3756_v6, %v1191_v9 }
 0x14d   : > { %v947_v14 = vadd.f32 %v3041_v10, %v3756_v6  ;;  %v1203_v15 = vadd.f32 %v3105_v11, %v3756_v6  ;;  %v938_v16 = vpop.f32.mrb[3].mxu0  ;;  %v1194_v17 = vpop.f32.mrb[3].mxu1 }
 0x14e   : > { %v939_v20 = vadd.f32 %v3756_v6, %v938_v16  ;;  %v1195_v21 = vadd.f32 %v3756_v6, %v1194_v17 }
 0x14f   : > { %v2587_v22 = vpack.c.bf16 %v947_v14, %v944_v12  ;;  %v2747_v23 = vpack.c.bf16 %v1203_v15, %v1200_v13 }
 0x150   : > { %v2582_v24 = vpack.c.bf16 %v939_v20, %v936_v18  ;;  %v2742_v25 = vpack.c.bf16 %v1195_v21, %v1192_v19 }
 0x151   : > { %2899 = vst [vmem:[%s3767_s19 + $0x8] sm:$0xff] %v2587_v22   ;;  %2931 = vst [vmem:[%s3767_s19 + $0x108] sm:$0xff] %v2747_v23  }
 0x152   : > { %2583 = vst [vmem:[%s3767_s19] sm:$0xff] %v2582_v24   ;;  %2930 = vst [vmem:[%s3767_s19 + $0x100] sm:$0xff] %v2742_v25   ;;  %v3044_v26 = vpop.f32.mrb[4].mxu0  ;;  %v3108_v27 = vpop.f32.mrb[4].mxu1 }
 0x153   : > { %v951_v28 = vpop.f32.mrb[5].mxu0  ;;  %v1207_v29 = vpop.f32.mrb[5].mxu1  ;;  %v960_v32 = vadd.f32 %v3044_v26, %v3756_v6  ;;  %v1216_v33 = vadd.f32 %v3108_v27, %v3756_v6 }
 0x154   : > { %v3045_v30 = vpop.f32.mrb[6].mxu0  ;;  %v3109_v31 = vpop.f32.mrb[6].mxu1  ;;  %v952_v38 = vadd.f32 %v3756_v6, %v951_v28  ;;  %v1208_v39 = vadd.f32 %v3756_v6, %v1207_v29 }
 0x155   : > { %v963_v34 = vadd.f32 %v3045_v30, %v3756_v6  ;;  %v1219_v35 = vadd.f32 %v3109_v31, %v3756_v6  ;;  %v954_v36 = vpop.f32.mrb[7].mxu0  ;;  %v1210_v37 = vpop.f32.mrb[7].mxu1 }
 0x156   : > { %v955_v40 = vadd.f32 %v3756_v6, %v954_v36  ;;  %v1211_v41 = vadd.f32 %v3756_v6, %v1210_v37 }
 0x157   : > { %v2597_v42 = vpack.c.bf16 %v963_v34, %v960_v32  ;;  %v2757_v43 = vpack.c.bf16 %v1219_v35, %v1216_v33 }
 0x158   : > { %v2592_v44 = vpack.c.bf16 %v955_v40, %v952_v38  ;;  %v2752_v45 = vpack.c.bf16 %v1211_v41, %v1208_v39 }
 0x159   : > { %2901 = vst [vmem:[%s3767_s19 + $0x18] sm:$0xff] %v2597_v42   ;;  %2933 = vst [vmem:[%s3767_s19 + $0x118] sm:$0xff] %v2757_v43  }
 0x15a   : > { %2900 = vst [vmem:[%s3767_s19 + $0x10] sm:$0xff] %v2592_v44   ;;  %2932 = vst [vmem:[%s3767_s19 + $0x110] sm:$0xff] %v2752_v45   ;;  %v3048_v46 = vpop.f32.mrb[8].mxu0  ;;  %v3112_v47 = vpop.f32.mrb[8].mxu1 }
 0x15b   : > { %v967_v48 = vpop.f32.mrb[9].mxu0  ;;  %v1223_v49 = vpop.f32.mrb[9].mxu1  ;;  %v976_v52 = vadd.f32 %v3048_v46, %v3756_v6  ;;  %v1232_v53 = vadd.f32 %v3112_v47, %v3756_v6 }
 0x15c   : > { %v3049_v50 = vpop.f32.mrb[10].mxu0  ;;  %v3113_v51 = vpop.f32.mrb[10].mxu1  ;;  %v968_v58 = vadd.f32 %v3756_v6, %v967_v48  ;;  %v1224_v59 = vadd.f32 %v3756_v6, %v1223_v49 }
 0x15d   : > { %v979_v54 = vadd.f32 %v3049_v50, %v3756_v6  ;;  %v1235_v55 = vadd.f32 %v3113_v51, %v3756_v6  ;;  %v970_v56 = vpop.f32.mrb[11].mxu0  ;;  %v1226_v57 = vpop.f32.mrb[11].mxu1 }
 0x15e   : > { %v971_v60 = vadd.f32 %v3756_v6, %v970_v56  ;;  %v1227_v61 = vadd.f32 %v3756_v6, %v1226_v57 }
 0x15f   : > { %v2607_v62 = vpack.c.bf16 %v979_v54, %v976_v52  ;;  %v2767_v63 = vpack.c.bf16 %v1235_v55, %v1232_v53 }
 0x160   : > { %v2602_v0 = vpack.c.bf16 %v971_v60, %v968_v58  ;;  %v2762_v1 = vpack.c.bf16 %v1227_v61, %v1224_v59 }
 0x161   : > { %2903 = vst [vmem:[%s3767_s19 + $0x28] sm:$0xff] %v2607_v62   ;;  %2935 = vst [vmem:[%s3767_s19 + $0x128] sm:$0xff] %v2767_v63  }
 0x162   : > { %2902 = vst [vmem:[%s3767_s19 + $0x20] sm:$0xff] %v2602_v0   ;;  %2934 = vst [vmem:[%s3767_s19 + $0x120] sm:$0xff] %v2762_v1   ;;  %v3052_v2 = vpop.f32.mrb[12].mxu0  ;;  %v3116_v3 = vpop.f32.mrb[12].mxu1 }
 0x163   : > { %v983_v4 = vpop.f32.mrb[13].mxu0  ;;  %v1239_v5 = vpop.f32.mrb[13].mxu1  ;;  %v992_v9 = vadd.f32 %v3052_v2, %v3756_v6  ;;  %v1248_v10 = vadd.f32 %v3116_v3, %v3756_v6 }
 0x164   : > { %v3053_v7 = vpop.f32.mrb[14].mxu0  ;;  %v3117_v8 = vpop.f32.mrb[14].mxu1  ;;  %v984_v15 = vadd.f32 %v3756_v6, %v983_v4  ;;  %v1240_v16 = vadd.f32 %v3756_v6, %v1239_v5 }
 0x165   : > { %v995_v11 = vadd.f32 %v3053_v7, %v3756_v6  ;;  %v1251_v12 = vadd.f32 %v3117_v8, %v3756_v6  ;;  %v986_v13 = vpop.f32.mrb[15].mxu0  ;;  %v1242_v14 = vpop.f32.mrb[15].mxu1 }
 0x166   : > { %v987_v17 = vadd.f32 %v3756_v6, %v986_v13  ;;  %v1243_v18 = vadd.f32 %v3756_v6, %v1242_v14 }
 0x167   : > { %v2617_v19 = vpack.c.bf16 %v995_v11, %v992_v9  ;;  %v2777_v20 = vpack.c.bf16 %v1251_v12, %v1248_v10 }
 0x168   : > { %v2612_v21 = vpack.c.bf16 %v987_v17, %v984_v15  ;;  %v2772_v22 = vpack.c.bf16 %v1243_v18, %v1240_v16 }
 0x169   : > { %2905 = vst [vmem:[%s3767_s19 + $0x38] sm:$0xff] %v2617_v19   ;;  %2937 = vst [vmem:[%s3767_s19 + $0x138] sm:$0xff] %v2777_v20  }
 0x16a   : > { %2904 = vst [vmem:[%s3767_s19 + $0x30] sm:$0xff] %v2612_v21   ;;  %2936 = vst [vmem:[%s3767_s19 + $0x130] sm:$0xff] %v2772_v22   ;;  %v3056_v23 = vpop.f32.mrb[16].mxu0  ;;  %v3120_v24 = vpop.f32.mrb[16].mxu1 }
 0x16b   : > { %v999_v25 = vpop.f32.mrb[17].mxu0  ;;  %v1255_v26 = vpop.f32.mrb[17].mxu1  ;;  %v1008_v29 = vadd.f32 %v3056_v23, %v3756_v6  ;;  %v1264_v30 = vadd.f32 %v3120_v24, %v3756_v6 }
 0x16c   : > { %v3057_v27 = vpop.f32.mrb[18].mxu0  ;;  %v3121_v28 = vpop.f32.mrb[18].mxu1  ;;  %v1000_v35 = vadd.f32 %v3756_v6, %v999_v25  ;;  %v1256_v36 = vadd.f32 %v3756_v6, %v1255_v26 }
 0x16d   : > { %v1011_v31 = vadd.f32 %v3057_v27, %v3756_v6  ;;  %v1267_v32 = vadd.f32 %v3121_v28, %v3756_v6  ;;  %v1002_v33 = vpop.f32.mrb[19].mxu0  ;;  %v1258_v34 = vpop.f32.mrb[19].mxu1 }
 0x16e   : > { %v1003_v37 = vadd.f32 %v3756_v6, %v1002_v33  ;;  %v1259_v38 = vadd.f32 %v3756_v6, %v1258_v34 }
 0x16f   : > { %v2627_v39 = vpack.c.bf16 %v1011_v31, %v1008_v29  ;;  %v2787_v40 = vpack.c.bf16 %v1267_v32, %v1264_v30 }
 0x170   : > { %v2622_v41 = vpack.c.bf16 %v1003_v37, %v1000_v35  ;;  %v2782_v42 = vpack.c.bf16 %v1259_v38, %v1256_v36 }
 0x171   : > { %2907 = vst [vmem:[%s3767_s19 + $0x48] sm:$0xff] %v2627_v39   ;;  %2939 = vst [vmem:[%s3767_s19 + $0x148] sm:$0xff] %v2787_v40  }
 0x172   : > { %2906 = vst [vmem:[%s3767_s19 + $0x40] sm:$0xff] %v2622_v41   ;;  %2938 = vst [vmem:[%s3767_s19 + $0x140] sm:$0xff] %v2782_v42   ;;  %v3060_v43 = vpop.f32.mrb[20].mxu0  ;;  %v3124_v44 = vpop.f32.mrb[20].mxu1 }
 0x173   : > { %v1015_v45 = vpop.f32.mrb[21].mxu0  ;;  %v1271_v46 = vpop.f32.mrb[21].mxu1  ;;  %v1024_v49 = vadd.f32 %v3060_v43, %v3756_v6  ;;  %v1280_v50 = vadd.f32 %v3124_v44, %v3756_v6 }
 0x174   : > { %v3061_v47 = vpop.f32.mrb[22].mxu0  ;;  %v3125_v48 = vpop.f32.mrb[22].mxu1  ;;  %v1016_v55 = vadd.f32 %v3756_v6, %v1015_v45  ;;  %v1272_v56 = vadd.f32 %v3756_v6, %v1271_v46 }
 0x175   : > { %v1027_v51 = vadd.f32 %v3061_v47, %v3756_v6  ;;  %v1283_v52 = vadd.f32 %v3125_v48, %v3756_v6  ;;  %v1018_v53 = vpop.f32.mrb[23].mxu0  ;;  %v1274_v54 = vpop.f32.mrb[23].mxu1 }
 0x176   : > { %v1019_v57 = vadd.f32 %v3756_v6, %v1018_v53  ;;  %v1275_v58 = vadd.f32 %v3756_v6, %v1274_v54 }
 0x177   : > { %v2637_v59 = vpack.c.bf16 %v1027_v51, %v1024_v49  ;;  %v2797_v60 = vpack.c.bf16 %v1283_v52, %v1280_v50 }
 0x178   : > { %v2632_v61 = vpack.c.bf16 %v1019_v57, %v1016_v55  ;;  %v2792_v62 = vpack.c.bf16 %v1275_v58, %v1272_v56 }
 0x179   : > { %2909 = vst [vmem:[%s3767_s19 + $0x58] sm:$0xff] %v2637_v59   ;;  %2941 = vst [vmem:[%s3767_s19 + $0x158] sm:$0xff] %v2797_v60  }
 0x17a   : > { %2908 = vst [vmem:[%s3767_s19 + $0x50] sm:$0xff] %v2632_v61   ;;  %2940 = vst [vmem:[%s3767_s19 + $0x150] sm:$0xff] %v2792_v62   ;;  %v3064_v63 = vpop.f32.mrb[24].mxu0  ;;  %v3128_v0 = vpop.f32.mrb[24].mxu1 }
 0x17b   : > { %v1031_v1 = vpop.f32.mrb[25].mxu0  ;;  %v1287_v2 = vpop.f32.mrb[25].mxu1  ;;  %v1040_v5 = vadd.f32 %v3064_v63, %v3756_v6  ;;  %v1296_v7 = vadd.f32 %v3128_v0, %v3756_v6 }
 0x17c   : > { %v3065_v3 = vpop.f32.mrb[26].mxu0  ;;  %v3129_v4 = vpop.f32.mrb[26].mxu1  ;;  %v1032_v12 = vadd.f32 %v3756_v6, %v1031_v1  ;;  %v1288_v13 = vadd.f32 %v3756_v6, %v1287_v2 }
 0x17d   : > { %v1043_v8 = vadd.f32 %v3065_v3, %v3756_v6  ;;  %v1299_v9 = vadd.f32 %v3129_v4, %v3756_v6  ;;  %v1034_v10 = vpop.f32.mrb[27].mxu0  ;;  %v1290_v11 = vpop.f32.mrb[27].mxu1 }
 0x17e   : > { %v1035_v14 = vadd.f32 %v3756_v6, %v1034_v10  ;;  %v1291_v15 = vadd.f32 %v3756_v6, %v1290_v11 }
 0x17f   : > { %v2647_v16 = vpack.c.bf16 %v1043_v8, %v1040_v5  ;;  %v2807_v17 = vpack.c.bf16 %v1299_v9, %v1296_v7 }
 0x180   : > { %v2642_v18 = vpack.c.bf16 %v1035_v14, %v1032_v12  ;;  %v2802_v19 = vpack.c.bf16 %v1291_v15, %v1288_v13 }
 0x181   : > { %2911 = vst [vmem:[%s3767_s19 + $0x68] sm:$0xff] %v2647_v16   ;;  %2943 = vst [vmem:[%s3767_s19 + $0x168] sm:$0xff] %v2807_v17  }
 0x182   : > { %2910 = vst [vmem:[%s3767_s19 + $0x60] sm:$0xff] %v2642_v18   ;;  %2942 = vst [vmem:[%s3767_s19 + $0x160] sm:$0xff] %v2802_v19   ;;  %v3068_v20 = vpop.f32.mrb[28].mxu0  ;;  %v3132_v21 = vpop.f32.mrb[28].mxu1 }
 0x183   : > { %v1047_v22 = vpop.f32.mrb[29].mxu0  ;;  %v1303_v23 = vpop.f32.mrb[29].mxu1  ;;  %v1056_v26 = vadd.f32 %v3068_v20, %v3756_v6  ;;  %v1312_v27 = vadd.f32 %v3132_v21, %v3756_v6 }
 0x184   : > { %v3069_v24 = vpop.f32.mrb[30].mxu0  ;;  %v3133_v25 = vpop.f32.mrb[30].mxu1  ;;  %v1048_v32 = vadd.f32 %v3756_v6, %v1047_v22  ;;  %v1304_v33 = vadd.f32 %v3756_v6, %v1303_v23 }
 0x185   : > { %v1059_v28 = vadd.f32 %v3069_v24, %v3756_v6  ;;  %v1315_v29 = vadd.f32 %v3133_v25, %v3756_v6  ;;  %v1050_v30 = vpop.f32.mrb[31].mxu0  ;;  %v1306_v31 = vpop.f32.mrb[31].mxu1 }
 0x186   : > { %v1051_v34 = vadd.f32 %v3756_v6, %v1050_v30  ;;  %v1307_v35 = vadd.f32 %v3756_v6, %v1306_v31 }
 0x187   : > { %v2657_v36 = vpack.c.bf16 %v1059_v28, %v1056_v26  ;;  %v2817_v37 = vpack.c.bf16 %v1315_v29, %v1312_v27 }
 0x188   : > { %v2652_v38 = vpack.c.bf16 %v1051_v34, %v1048_v32  ;;  %v2812_v39 = vpack.c.bf16 %v1307_v35, %v1304_v33 }
 0x189   : > { %2913 = vst [vmem:[%s3767_s19 + $0x78] sm:$0xff] %v2657_v36   ;;  %2945 = vst [vmem:[%s3767_s19 + $0x178] sm:$0xff] %v2817_v37  }
 0x18a   : > { %2912 = vst [vmem:[%s3767_s19 + $0x70] sm:$0xff] %v2652_v38   ;;  %2944 = vst [vmem:[%s3767_s19 + $0x170] sm:$0xff] %v2812_v39   ;;  %v3072_v40 = vpop.f32.mrb[32].mxu0  ;;  %v3136_v41 = vpop.f32.mrb[32].mxu1 }
 0x18b   : > { %v1063_v42 = vpop.f32.mrb[33].mxu0  ;;  %v1319_v43 = vpop.f32.mrb[33].mxu1  ;;  %v1072_v46 = vadd.f32 %v3072_v40, %v3756_v6  ;;  %v1328_v47 = vadd.f32 %v3136_v41, %v3756_v6 }
 0x18c   : > { %v3073_v44 = vpop.f32.mrb[34].mxu0  ;;  %v3137_v45 = vpop.f32.mrb[34].mxu1  ;;  %v1064_v52 = vadd.f32 %v3756_v6, %v1063_v42  ;;  %v1320_v53 = vadd.f32 %v3756_v6, %v1319_v43 }
 0x18d   : > { %v1075_v48 = vadd.f32 %v3073_v44, %v3756_v6  ;;  %v1331_v49 = vadd.f32 %v3137_v45, %v3756_v6  ;;  %v1066_v50 = vpop.f32.mrb[35].mxu0  ;;  %v1322_v51 = vpop.f32.mrb[35].mxu1 }
 0x18e   : > { %v1067_v54 = vadd.f32 %v3756_v6, %v1066_v50  ;;  %v1323_v55 = vadd.f32 %v3756_v6, %v1322_v51 }
 0x18f   : > { %v2667_v56 = vpack.c.bf16 %v1075_v48, %v1072_v46  ;;  %v2827_v57 = vpack.c.bf16 %v1331_v49, %v1328_v47 }
 0x190   : > { %v2662_v58 = vpack.c.bf16 %v1067_v54, %v1064_v52  ;;  %v2822_v59 = vpack.c.bf16 %v1323_v55, %v1320_v53 }
 0x191   : > { %2915 = vst [vmem:[%s3767_s19 + $0x88] sm:$0xff] %v2667_v56   ;;  %2947 = vst [vmem:[%s3767_s19 + $0x188] sm:$0xff] %v2827_v57  }
 0x192   : > { %2914 = vst [vmem:[%s3767_s19 + $0x80] sm:$0xff] %v2662_v58   ;;  %2946 = vst [vmem:[%s3767_s19 + $0x180] sm:$0xff] %v2822_v59   ;;  %v3076_v60 = vpop.f32.mrb[36].mxu0  ;;  %v3140_v61 = vpop.f32.mrb[36].mxu1 }
 0x193   : > { %v1079_v62 = vpop.f32.mrb[37].mxu0  ;;  %v1335_v63 = vpop.f32.mrb[37].mxu1  ;;  %v1088_v2 = vadd.f32 %v3076_v60, %v3756_v6  ;;  %v1344_v3 = vadd.f32 %v3140_v61, %v3756_v6 }
 0x194   : > { %v3077_v0 = vpop.f32.mrb[38].mxu0  ;;  %v3141_v1 = vpop.f32.mrb[38].mxu1  ;;  %v1080_v9 = vadd.f32 %v3756_v6, %v1079_v62  ;;  %v1336_v10 = vadd.f32 %v3756_v6, %v1335_v63 }
 0x195   : > { %v1091_v4 = vadd.f32 %v3077_v0, %v3756_v6  ;;  %v1347_v5 = vadd.f32 %v3141_v1, %v3756_v6  ;;  %v1082_v7 = vpop.f32.mrb[39].mxu0  ;;  %v1338_v8 = vpop.f32.mrb[39].mxu1 }
 0x196   : > { %v1083_v11 = vadd.f32 %v3756_v6, %v1082_v7  ;;  %v1339_v12 = vadd.f32 %v3756_v6, %v1338_v8 }
 0x197   : > { %v2677_v13 = vpack.c.bf16 %v1091_v4, %v1088_v2  ;;  %v2837_v14 = vpack.c.bf16 %v1347_v5, %v1344_v3 }
 0x198   : > { %v2672_v15 = vpack.c.bf16 %v1083_v11, %v1080_v9  ;;  %v2832_v16 = vpack.c.bf16 %v1339_v12, %v1336_v10 }
 0x199   : > { %2917 = vst [vmem:[%s3767_s19 + $0x98] sm:$0xff] %v2677_v13   ;;  %2949 = vst [vmem:[%s3767_s19 + $0x198] sm:$0xff] %v2837_v14  }
 0x19a   : > { %2916 = vst [vmem:[%s3767_s19 + $0x90] sm:$0xff] %v2672_v15   ;;  %2948 = vst [vmem:[%s3767_s19 + $0x190] sm:$0xff] %v2832_v16   ;;  %v3080_v17 = vpop.f32.mrb[40].mxu0  ;;  %v3144_v18 = vpop.f32.mrb[40].mxu1 }
 0x19b   : > { %v1095_v19 = vpop.f32.mrb[41].mxu0  ;;  %v1351_v20 = vpop.f32.mrb[41].mxu1  ;;  %v1104_v23 = vadd.f32 %v3080_v17, %v3756_v6  ;;  %v1360_v24 = vadd.f32 %v3144_v18, %v3756_v6 }
 0x19c   : > { %v3081_v21 = vpop.f32.mrb[42].mxu0  ;;  %v3145_v22 = vpop.f32.mrb[42].mxu1  ;;  %v1096_v29 = vadd.f32 %v3756_v6, %v1095_v19  ;;  %v1352_v30 = vadd.f32 %v3756_v6, %v1351_v20 }
 0x19d   : > { %v1107_v25 = vadd.f32 %v3081_v21, %v3756_v6  ;;  %v1363_v26 = vadd.f32 %v3145_v22, %v3756_v6  ;;  %v1098_v27 = vpop.f32.mrb[43].mxu0  ;;  %v1354_v28 = vpop.f32.mrb[43].mxu1 }
 0x19e   : > { %v1099_v31 = vadd.f32 %v3756_v6, %v1098_v27  ;;  %v1355_v32 = vadd.f32 %v3756_v6, %v1354_v28 }
 0x19f   : > { %v2687_v33 = vpack.c.bf16 %v1107_v25, %v1104_v23  ;;  %v2847_v34 = vpack.c.bf16 %v1363_v26, %v1360_v24 }
 0x1a0   : > { %v2682_v35 = vpack.c.bf16 %v1099_v31, %v1096_v29  ;;  %v2842_v36 = vpack.c.bf16 %v1355_v32, %v1352_v30 }
 0x1a1   : > { %2919 = vst [vmem:[%s3767_s19 + $0xa8] sm:$0xff] %v2687_v33   ;;  %2951 = vst [vmem:[%s3767_s19 + $0x1a8] sm:$0xff] %v2847_v34  }
 0x1a2   : > { %2918 = vst [vmem:[%s3767_s19 + $0xa0] sm:$0xff] %v2682_v35   ;;  %2950 = vst [vmem:[%s3767_s19 + $0x1a0] sm:$0xff] %v2842_v36   ;;  %v3084_v37 = vpop.f32.mrb[44].mxu0  ;;  %v3148_v38 = vpop.f32.mrb[44].mxu1 }
 0x1a3   : > { %v1111_v39 = vpop.f32.mrb[45].mxu0  ;;  %v1367_v40 = vpop.f32.mrb[45].mxu1  ;;  %v1120_v43 = vadd.f32 %v3084_v37, %v3756_v6  ;;  %v1376_v44 = vadd.f32 %v3148_v38, %v3756_v6 }
 0x1a4   : > { %v3085_v41 = vpop.f32.mrb[46].mxu0  ;;  %v3149_v42 = vpop.f32.mrb[46].mxu1  ;;  %v1112_v49 = vadd.f32 %v3756_v6, %v1111_v39  ;;  %v1368_v50 = vadd.f32 %v3756_v6, %v1367_v40 }
 0x1a5   : > { %v1123_v45 = vadd.f32 %v3085_v41, %v3756_v6  ;;  %v1379_v46 = vadd.f32 %v3149_v42, %v3756_v6  ;;  %v1114_v47 = vpop.f32.mrb[47].mxu0  ;;  %v1370_v48 = vpop.f32.mrb[47].mxu1 }
 0x1a6   : > { %v1115_v51 = vadd.f32 %v3756_v6, %v1114_v47  ;;  %v1371_v52 = vadd.f32 %v3756_v6, %v1370_v48 }
 0x1a7   : > { %v2697_v53 = vpack.c.bf16 %v1123_v45, %v1120_v43  ;;  %v2857_v54 = vpack.c.bf16 %v1379_v46, %v1376_v44 }
 0x1a8   : > { %v2692_v55 = vpack.c.bf16 %v1115_v51, %v1112_v49  ;;  %v2852_v56 = vpack.c.bf16 %v1371_v52, %v1368_v50 }
 0x1a9   : > { %2921 = vst [vmem:[%s3767_s19 + $0xb8] sm:$0xff] %v2697_v53   ;;  %2953 = vst [vmem:[%s3767_s19 + $0x1b8] sm:$0xff] %v2857_v54  }
 0x1aa   : > { %2920 = vst [vmem:[%s3767_s19 + $0xb0] sm:$0xff] %v2692_v55   ;;  %2952 = vst [vmem:[%s3767_s19 + $0x1b0] sm:$0xff] %v2852_v56   ;;  %v3088_v57 = vpop.f32.mrb[48].mxu0  ;;  %v3152_v58 = vpop.f32.mrb[48].mxu1 }
 0x1ab   : > { %v1127_v59 = vpop.f32.mrb[49].mxu0  ;;  %v1383_v60 = vpop.f32.mrb[49].mxu1  ;;  %v1136_v63 = vadd.f32 %v3088_v57, %v3756_v6  ;;  %v1392_v0 = vadd.f32 %v3152_v58, %v3756_v6 }
 0x1ac   : > { %v3089_v61 = vpop.f32.mrb[50].mxu0  ;;  %v3153_v62 = vpop.f32.mrb[50].mxu1  ;;  %v1128_v5 = vadd.f32 %v3756_v6, %v1127_v59  ;;  %v1384_v7 = vadd.f32 %v3756_v6, %v1383_v60 }
 0x1ad   : > { %v1139_v1 = vadd.f32 %v3089_v61, %v3756_v6  ;;  %v1395_v2 = vadd.f32 %v3153_v62, %v3756_v6  ;;  %v1130_v3 = vpop.f32.mrb[51].mxu0  ;;  %v1386_v4 = vpop.f32.mrb[51].mxu1 }
 0x1ae   : > { %v1131_v8 = vadd.f32 %v3756_v6, %v1130_v3  ;;  %v1387_v9 = vadd.f32 %v3756_v6, %v1386_v4 }
 0x1af   : > { %v2707_v10 = vpack.c.bf16 %v1139_v1, %v1136_v63  ;;  %v2867_v11 = vpack.c.bf16 %v1395_v2, %v1392_v0 }
 0x1b0   : > { %v2702_v12 = vpack.c.bf16 %v1131_v8, %v1128_v5  ;;  %v2862_v13 = vpack.c.bf16 %v1387_v9, %v1384_v7 }
 0x1b1   : > { %2923 = vst [vmem:[%s3767_s19 + $0xc8] sm:$0xff] %v2707_v10   ;;  %2955 = vst [vmem:[%s3767_s19 + $0x1c8] sm:$0xff] %v2867_v11  }
 0x1b2   : > { %2922 = vst [vmem:[%s3767_s19 + $0xc0] sm:$0xff] %v2702_v12   ;;  %2954 = vst [vmem:[%s3767_s19 + $0x1c0] sm:$0xff] %v2862_v13   ;;  %v3092_v14 = vpop.f32.mrb[52].mxu0  ;;  %v3156_v15 = vpop.f32.mrb[52].mxu1 }
 0x1b3   : > { %v1143_v16 = vpop.f32.mrb[53].mxu0  ;;  %v1399_v17 = vpop.f32.mrb[53].mxu1  ;;  %v1152_v20 = vadd.f32 %v3092_v14, %v3756_v6  ;;  %v1408_v21 = vadd.f32 %v3156_v15, %v3756_v6 }
 0x1b4   : > { %v3093_v18 = vpop.f32.mrb[54].mxu0  ;;  %v3157_v19 = vpop.f32.mrb[54].mxu1  ;;  %v1144_v26 = vadd.f32 %v3756_v6, %v1143_v16  ;;  %v1400_v27 = vadd.f32 %v3756_v6, %v1399_v17 }
 0x1b5   : > { %v1155_v22 = vadd.f32 %v3093_v18, %v3756_v6  ;;  %v1411_v23 = vadd.f32 %v3157_v19, %v3756_v6  ;;  %v1146_v24 = vpop.f32.mrb[55].mxu0  ;;  %v1402_v25 = vpop.f32.mrb[55].mxu1 }
 0x1b6   : > { %v1147_v28 = vadd.f32 %v3756_v6, %v1146_v24  ;;  %v1403_v29 = vadd.f32 %v3756_v6, %v1402_v25 }
 0x1b7   : > { %v2717_v30 = vpack.c.bf16 %v1155_v22, %v1152_v20  ;;  %v2877_v31 = vpack.c.bf16 %v1411_v23, %v1408_v21 }
 0x1b8   : > { %v2712_v32 = vpack.c.bf16 %v1147_v28, %v1144_v26  ;;  %v2872_v33 = vpack.c.bf16 %v1403_v29, %v1400_v27 }
 0x1b9   : > { %2925 = vst [vmem:[%s3767_s19 + $0xd8] sm:$0xff] %v2717_v30   ;;  %2957 = vst [vmem:[%s3767_s19 + $0x1d8] sm:$0xff] %v2877_v31  }
 0x1ba   : > { %2924 = vst [vmem:[%s3767_s19 + $0xd0] sm:$0xff] %v2712_v32   ;;  %2956 = vst [vmem:[%s3767_s19 + $0x1d0] sm:$0xff] %v2872_v33   ;;  %v3096_v34 = vpop.f32.mrb[56].mxu0  ;;  %v3160_v35 = vpop.f32.mrb[56].mxu1 }
 0x1bb   : > { %v1159_v36 = vpop.f32.mrb[57].mxu0  ;;  %v1415_v37 = vpop.f32.mrb[57].mxu1  ;;  %v1168_v40 = vadd.f32 %v3096_v34, %v3756_v6  ;;  %v1424_v41 = vadd.f32 %v3160_v35, %v3756_v6 }
 0x1bc   : > { %v3097_v38 = vpop.f32.mrb[58].mxu0  ;;  %v3161_v39 = vpop.f32.mrb[58].mxu1  ;;  %v1160_v46 = vadd.f32 %v3756_v6, %v1159_v36  ;;  %v1416_v47 = vadd.f32 %v3756_v6, %v1415_v37 }
 0x1bd   : > { %v1171_v42 = vadd.f32 %v3097_v38, %v3756_v6  ;;  %v1427_v43 = vadd.f32 %v3161_v39, %v3756_v6  ;;  %v1162_v44 = vpop.f32.mrb[59].mxu0  ;;  %v1418_v45 = vpop.f32.mrb[59].mxu1 }
 0x1be   : > { %v1163_v48 = vadd.f32 %v3756_v6, %v1162_v44  ;;  %v1419_v49 = vadd.f32 %v3756_v6, %v1418_v45 }
 0x1bf   : > { %v2727_v50 = vpack.c.bf16 %v1171_v42, %v1168_v40  ;;  %v2887_v51 = vpack.c.bf16 %v1427_v43, %v1424_v41 }
 0x1c0   : > { %v2722_v52 = vpack.c.bf16 %v1163_v48, %v1160_v46  ;;  %v2882_v53 = vpack.c.bf16 %v1419_v49, %v1416_v47 }
 0x1c1   : > { %2927 = vst [vmem:[%s3767_s19 + $0xe8] sm:$0xff] %v2727_v50   ;;  %2959 = vst [vmem:[%s3767_s19 + $0x1e8] sm:$0xff] %v2887_v51  }
 0x1c2   : > { %2926 = vst [vmem:[%s3767_s19 + $0xe0] sm:$0xff] %v2722_v52   ;;  %2958 = vst [vmem:[%s3767_s19 + $0x1e0] sm:$0xff] %v2882_v53   ;;  %v3100_v54 = vpop.f32.mrb[60].mxu0  ;;  %v3164_v55 = vpop.f32.mrb[60].mxu1 }
 0x1c3   : > { %v1175_v56 = vpop.f32.mrb[61].mxu0  ;;  %v1431_v57 = vpop.f32.mrb[61].mxu1  ;;  %v1184_v60 = vadd.f32 %v3100_v54, %v3756_v6  ;;  %v1440_v61 = vadd.f32 %v3164_v55, %v3756_v6 }
 0x1c4   : > { %v3101_v58 = vpop.f32.mrb[62].mxu0  ;;  %v3165_v59 = vpop.f32.mrb[62].mxu1  ;;  %v1176_v2 = vadd.f32 %v3756_v6, %v1175_v56  ;;  %v1432_v3 = vadd.f32 %v3756_v6, %v1431_v57 }
 0x1c5   : > { %v1187_v62 = vadd.f32 %v3101_v58, %v3756_v6  ;;  %v1443_v63 = vadd.f32 %v3165_v59, %v3756_v6  ;;  %v1178_v0 = vpop.f32.mrb[63].mxu0  ;;  %v1434_v1 = vpop.f32.mrb[63].mxu1 }
 0x1c6   : > { %v1179_v4 = vadd.f32 %v3756_v6, %v1178_v0  ;;  %v1435_v5 = vadd.f32 %v3756_v6, %v1434_v1 }
 0x1c7   : > { %v2737_v7 = vpack.c.bf16 %v1187_v62, %v1184_v60  ;;  %v2897_v8 = vpack.c.bf16 %v1443_v63, %v1440_v61 }
 0x1c8   : > { %v2732_v9 = vpack.c.bf16 %v1179_v4, %v1176_v2  ;;  %v2892_v10 = vpack.c.bf16 %v1435_v5, %v1432_v3 }
 0x1c9   : > { %2929 = vst [vmem:[%s3767_s19 + $0xf8] sm:$0xff] %v2737_v7   ;;  %2961 = vst [vmem:[%s3767_s19 + $0x1f8] sm:$0xff] %v2897_v8  }
 0x1ca   : > { %2928 = vst [vmem:[%s3767_s19 + $0xf0] sm:$0xff] %v2732_v9   ;;  %2960 = vst [vmem:[%s3767_s19 + $0x1f0] sm:$0xff] %v2892_v10  }
 0x1cb PF: > { %p14_p6 = scmp.ge.s32.totalorder %s3557_s30, 10   ;;  %s3984_s12 = smov %s3422_s13 }
 0x1cc   : > { %s3985_s13 = smov %s3426_s14  ;;  %s3986_s14 = smov %s3568_s8 }
 0x1cd   : > { %s3987_s15 = smov %s3557_s30  ;;  %16 = sbr.rel (!%p14_p6) target bundleno = 4 (0x4), region = 80 }
 0x1d4   :  { %2108 = vsyncpa [#allocation3], 1 }
 0x1d5   :  { %2110 = vsyncpa [#allocation3 + $0x1], 1 }
 0x1d6   :  { %2111 = vsyncpa [#allocation5], 1 }

// kernel: grdn_forward.110
= control target key start
LH: loop header
LB: loop body
LE: loop exit
PB: predicated region body
PF: predicated region fallthrough
CT: control target
= control target key end

     0   :  { %vm28_vm0 = vcmask 1040384   ;;  %v90_v0 = vmov 0.0   ;;  %vm91_vm1 = vmmov 0   ;;  %vm24_vm2 = vcmask 15360   ;;  %s124_s1 = inlined_call_operand.vmem [shape: bf16[2,128], index: 1, kind: input, shape index: {}]   ;;  %s125_s0 = inlined_call_operand.vmem [shape: bf16[4,2], index: 0, kind: input, shape index: {}]   ;;  %s126_s2 = inlined_call_operand.vmem [shape: f32[1,128], index: 2, kind: input, shape index: {}]   ;;  %s127_s3 = inlined_call_operand.vmem [shape: f32[4,128], index: 3, kind: output, shape index: {}]  }
   0x1   :  { %82 = vmatprep.subr.bf16.mxu0 %v90_v0  ;;  %v16_v1 = vld [vmem:[%s124_s1] sm:$0x1]  ;;  %84 = vmatprep.mubr.msk.bf16.mxu0 %vm91_vm1, %v90_v0 }
   0x2   :  { %v30_v2 = vsel %vm28_vm0, %v16_v1, 0  ;;  %v15_v3 = vld [vmem:[%s125_s0] sm:$0x3] }
   0x3   :  { %83 = vmatpush3.bf16.msra.mxu0 %v30_v2  ;;  %v78_v4 = vld [vmem:[%s126_s2] ss:$0 sm:$0xff] }
   0x6   :  { %85 = vmatmul.mubr.msk.bf16.vlgmr.msra.gmra.mrb[0].mxu0 %vm24_vm2, %v15_v3 }
  0xd9   :  { %v66_v5 = vpop.f32.mrb[0].mxu0 }
  0xda   :  { %v67_v6 = vadd.f32 %v78_v4, %v66_v5  ;;  %v86_v7 = vpop.f32.mrb[1].mxu0 }
  0xdb   :  { %v69_v8 = vpop.f32.mrb[2].mxu0 }
  0xdc   :  { %v72_v9 = vmax.f32 %v67_v6, 0.0  ;;  %v87_v10 = vpop.f32.mrb[3].mxu0 }
  0xde   :  { %73 = vst [vmem:[%s127_s3] sm:$0xf] %v72_v9 }

// kernel: grdn_forward.111
= control target key start
LH: loop header
LB: loop body
LE: loop exit
PB: predicated region body
PF: predicated region fallthrough
CT: control target
= control target key end

     0   :  { %vm28_vm0 = vcmask 1040384   ;;  %v92_v0 = vmov 0.0   ;;  %v93_v2 = vmov 0   ;;  %vm94_vm1 = vmmov 0   ;;  %s127_s1 = inlined_call_operand.vmem [shape: bf16[1,128], index: 1, kind: input, shape index: {}]   ;;  %s128_s0 = inlined_call_operand.vmem [shape: bf16[4,1], index: 0, kind: input, shape index: {}]   ;;  %s129_s2 = inlined_call_operand.vmem [shape: f32[1,128], index: 2, kind: input, shape index: {}]   ;;  %s130_s3 = inlined_call_operand.vmem [shape: f32[4,128], index: 3, kind: output, shape index: {}]  }
   0x1   :  { %83 = vmatprep.subr.bf16.mxu0 %v92_v0  ;;  %v16_v1 = vld [vmem:[%s127_s1] sm:$0x1]  ;;  %v30_v3 = vsel %vm28_vm0, 65535, %v93_v2  ;;  %85 = vmatprep.mubr.msk.bf16.mxu0 %vm94_vm1, %v92_v0  ;;  %vm24_vm2 = vcmask 7168  }
   0x2   :  { %v32_v4 = vand.u32 %v30_v3, %v16_v1  ;;  %v15_v5 = vld [vmem:[%s128_s0] sm:$0x3] }
   0x3   :  { %v79_v6 = vld [vmem:[%s129_s2] ss:$0 sm:$0xff] }
   0x4   :  { %84 = vmatpush3.bf16.msra.mxu0 %v32_v4 }
   0x7   :  { %86 = vmatmul.mubr.msk.bf16.vlgmr.msra.gmra.mrb[0].mxu0 %vm24_vm2, %v15_v5 }
  0xda   :  { %v68_v7 = vpop.f32.mrb[0].mxu0 }
  0xdb   :  { %v69_v8 = vadd.f32 %v79_v6, %v68_v7  ;;  %v87_v9 = vpop.f32.mrb[1].mxu0 }
  0xdc   :  { %v71_v10 = vpop.f32.mrb[2].mxu0 }
  0xdd   :  { %74 = vst [vmem:[%s130_s3] sm:$0xf] %v69_v8  ;;  %v88_v11 = vpop.f32.mrb[3].mxu0 }

// kernel: grdn_forward.112
= control target key start
LH: loop header
LB: loop body
LE: loop exit
PB: predicated region body
PF: predicated region fallthrough
CT: control target
= control target key end

     0   :  { %8 = vsyncpa [#allocation3], 0  ;;  %s3772_s0 = inlined_call_operand.vmem [shape: bf16[8192,54], index: 0, kind: input, shape index: {}]   ;;  %s3773_s1 = inlined_call_operand.hbm [shape: bf16[54,128], index: 1, kind: input, shape index: {}]   ;;  %s3774_s2 = inlined_call_operand.hbm [shape: f32[1,128], index: 2, kind: input, shape index: {}]   ;;  %s3775_s3 = inlined_call_operand.vmem [shape: bf16[8192,128], index: 3, kind: output, shape index: {}]  }
   0x1   :  { %9 = vsyncpa [#allocation5], 0  ;;  %s3342_s12 = smov 0  }
   0x2 LB: > { %s2146_s13 = sadd.s32 4294967295, %s3316_s12   ;;  %p2148_p0 = scmp.ge.s32.totalorder %s3316_s12, 1  ;;  %s3316_s12 = sphi %s3342_s12, %s15_s12  }
   0x3   : > { %p114_p1 = scmp.lt.s32.totalorder %s3316_s12, 9  ;;  %s3318_s14 = smov [#allocation2]  }
   0x4   : > { %s126_s15 = sshll.u32 %s3318_s14, 4  ;;  %p3356_p3 = scmp.eq.s32.totalorder %s2146_s13, 0  ;;  %s127_s15 = int_to_ptr.vmem [resolvable:$true] %s126_s15 }
   0x5   : > { %p3350_p2 = pnand %p2148_p0, %p114_p1  ;;  %s3319_s18 = smov [#allocation4]  }
   0x6   : > { %s3780_s17 = scalar_select %p3356_p3, 1, 0 }
   0x7   : > { %s3779_s16 = scalar_select %p3350_p2, 1, 0 }
   0x8   : > { %p3155_p4 = pneg %p3350_p2  ;;  %s140_s19 = sshll.u32 %s3319_s18, 4  ;;  %s3368_s19 = int_to_ptr.vmem [resolvable:$true] %s140_s19 }
   0x9   : > { %s3246_s23 = scalar_lea.hbm %s3773_s1, 448 }
   0xa   : > { %p3364_p5 = pnand %p3356_p3, %p3155_p4  ;;  %p3247_p6 = scmp.ne.s32.totalorder %s3773_s1, %s3246_s23 }
   0xb   : > { %p3253_p10 = scmp.lt.u32.totalorder %s3246_s23, %s3773_s1 }
   0xc   : > { %p3248_p7 = pneg %p3364_p5 }
   0xe   : > { %p3249_p8 = pnand %p3248_p7, %p3247_p6 }
  0x10   : > { %p3250_p9 = pneg %p3249_p8 }
  0x12   : > { %p3255_p11 = pnand %p3253_p10, %p3250_p9 }
  0x14   : > { %3258 = shalt.err (!%p3255_p11)
}
  0x15   : > { %s3259_s28 = scalar_lea.vmem %s127_s15, 448  ;;  %p3267_p1 = scmp.lt.s32.totalorder %s127_s15, %s127_s15 }
  0x16   : > { %p3260_p12 = scmp.ne.s32.totalorder %s127_s15, %s3259_s28  ;;  %p3268_p4 = scmp.lt.s32.totalorder %s3259_s28, %s3259_s28 }
  0x18   : > { %p3262_p13 = pnand %p3260_p12, %p3248_p7  ;;  %p3269_p3 = por %p3268_p4, %p3267_p1 }
  0x1a   : > { %p3263_p0 = pneg %p3262_p13 }
  0x1c   : > { %p3270_p2 = pnand %p3269_p3, %p3263_p0 }
  0x1e   : > { %3273 = shalt.err (!%p3270_p2)
}
  0x1f   : > { %s3320_s29 = smov 64   ;;  %s3321_s30 = smov 4  }
  0x20   : > { %3158 = dma.hbm_to_vmem [thread:$0]  (!%p3364_p5), %s3773_s1, 448, %s127_s15, [#allocation3], %s3320_s29, %s3320_s29, %s3321_s30  }
  0x21   : > { %s3274_s8 = scalar_lea.hbm %s3774_s2, 16 }
  0x22   : > { %p3275_p6 = scmp.ne.s32.totalorder %s3774_s2, %s3274_s8  ;;  %p3281_p8 = scmp.lt.u32.totalorder %s3274_s8, %s3774_s2 }
  0x24   : > { %p3277_p2 = pnand %p3275_p6, %p3248_p7 }
  0x26   : > { %p3278_p3 = pneg %p3277_p2 }
  0x28   : > { %p3283_p9 = pnand %p3281_p8, %p3278_p3 }
  0x2a   : > { %3286 = shalt.err (!%p3283_p9)
}
  0x2b   : > { %s3287_s15 = scalar_lea.vmem %s3368_s19, 16  ;;  %s3294_s18 = scalar_lea.vmem %s3368_s19, 32 }
  0x2c   : > { %p3288_p10 = scmp.ne.s32.totalorder %s3368_s19, %s3287_s15  ;;  %p3295_p13 = scmp.lt.s32.totalorder %s3368_s19, %s3368_s19 }
  0x2d   : > { %p3296_p0 = scmp.lt.s32.totalorder %s3294_s18, %s3287_s15 }
  0x2e   : > { %p3290_p11 = pnand %p3288_p10, %p3248_p7 }
  0x2f   : > { %p3297_p1 = por %p3296_p0, %p3295_p13 }
  0x30   : > { %p3291_p12 = pneg %p3290_p11 }
  0x32   : > { %p3298_p4 = pnand %p3297_p1, %p3291_p12 }
  0x34   : > { %3301 = shalt.err (!%p3298_p4)
}
  0x35   : > { %3161 = dma.hbm_to_vmem [thread:$0]  (!%p3364_p5), %s3774_s2, 16, %s3368_s19, [#allocation5]  }
  0x36   : > { %p3782_p6 = scmp.ne.s32.totalorder %s3779_s16, 0 }
  0x37   : > { %p3783_p7 = scmp.ne.s32.totalorder (!%p3782_p6), %s3780_s17, 0 }
  0x38   : > { %162 = sbr.rel (%p3782_p6) target bundleno = 423 (0x1a7), region = 32 }
  0x3f   : > { %3307 = dma.done.wait (%p3783_p7), [#allocation3], 448  }
  0x40   : > { %3309 = vsyncadd (%p3783_p7), [#allocation3], 4294966848 }
  0x41   : > { %3311 = dma.done.wait (%p3783_p7), [#allocation5], 16  }
  0x42   : > { %3313 = vsyncadd (%p3783_p7), [#allocation5], 4294967280  ;;  %s2155_s20 = sshll.u32 %s2146_s13, 7  ;;  %v3178_v0 = vld [vmem:[#allocation2] sm:$0xff]   ;;  %v3179_v1 = vld [vmem:[#allocation2 + $0x8] sm:$0xff]   ;;  %vm686_vm0 = vcmask 441344  }
  0x43   : > { %p191_p2 = scmp.lt.s32.totalorder %s2155_s20, 1023  ;;  %3001 = vmatprep.subr.bf16.mxu0 %v3178_v0  ;;  %3137 = vmatprep.subr.bf16.mxu1 %v3178_v0  ;;  %v3180_v2 = vld [vmem:[#allocation2 + $0x10] sm:$0xff]   ;;  %v3181_v5 = vld [vmem:[#allocation2 + $0x18] ss:$0 sps:$4 sm:$0x77]   ;;  %vm879_vm1 = vcmask 1042432  }
  0x44   : > { %3002 = vmatpush3.bf16.msra.mxu0 %v3178_v0  ;;  %3141 = vmatpush3.bf16.msra.mxu1 %v3178_v0  ;;  %v881_v6 = vsel %vm879_vm1, %v3181_v5, 0 }
  0x45   : > { %s3785_s20 = smov (!%p191_p2, %s2155_s20), 1023  ;;  %3003 = vmatprep.subr.bf16.mxu0 %v3179_v1  ;;  %3138 = vmatprep.subr.bf16.mxu1 %v3179_v1 }
  0x46   : > { %s2156_s16 = sshll.u32 %s3785_s20, 2 }
  0x47   : > { %s3438_s24 = scalar_lea.vmem %s3772_s0, %s2156_s16  ;;  %s3581_s25 = scalar_lea.vmem %s3775_s3, %s2156_s16 }
  0x48   : > { %v3182_v3 = vld [vmem:[%s3438_s24] sm:$0xff]   ;;  %3004 = vmatpush3.bf16.msra.mxu0 %v3179_v1  ;;  %3142 = vmatpush3.bf16.msra.mxu1 %v3179_v1  ;;  %v3184_v7 = vld [vmem:[%s3438_s24 + $0x8] sm:$0xff]   ;;  %v3186_v9 = vld [vmem:[%s3438_s24 + $0x10] sm:$0xff]  }
  0x49   : > { %3009 = vmatprep.mubr.msk.bf16.mxu0 %vm686_vm0, %v3182_v3  ;;  %v3183_v4 = vld [vmem:[%s3438_s24 + $0x100] sm:$0xff]   ;;  %3005 = vmatprep.subr.bf16.mxu0 %v3180_v2  ;;  %v3185_v8 = vld [vmem:[%s3438_s24 + $0x108] sm:$0xff]   ;;  %v3187_v10 = vld [vmem:[%s3438_s24 + $0x110] sm:$0xff]  }
  0x4a   : > { %3139 = vmatprep.subr.bf16.mxu1 %v3180_v2  ;;  %3073 = vmatprep.mubr.msk.bf16.mxu1 %vm686_vm0, %v3183_v4  ;;  %v3188_v11 = vld [vmem:[%s3438_s24 + $0x18] sm:$0xff]   ;;  %v3190_v13 = vld [vmem:[%s3438_s24 + $0x20] sm:$0xff]   ;;  %v3192_v15 = vld [vmem:[%s3438_s24 + $0x28] sm:$0xff]  }
  0x4b   : > { %v3189_v12 = vld [vmem:[%s3438_s24 + $0x118] sm:$0xff]   ;;  %v3191_v14 = vld [vmem:[%s3438_s24 + $0x120] sm:$0xff]   ;;  %v3193_v16 = vld [vmem:[%s3438_s24 + $0x128] sm:$0xff]  }
  0x4c   : > { %3006 = vmatpush3.bf16.msra.mxu0 %v3180_v2  ;;  %3143 = vmatpush3.bf16.msra.mxu1 %v3180_v2  ;;  %v3194_v17 = vld [vmem:[%s3438_s24 + $0x30] sm:$0xff]   ;;  %v3196_v19 = vld [vmem:[%s3438_s24 + $0x38] sm:$0xff]   ;;  %v3198_v21 = vld [vmem:[%s3438_s24 + $0x40] sm:$0xff]  }
  0x4d   : > { %3145 = vmatprep.subr.msk.bf16.mxu0 %vm879_vm1, %v3181_v5  ;;  %3146 = vmatprep.subr.msk.bf16.mxu1 %vm879_vm1, %v3181_v5  ;;  %v3195_v18 = vld [vmem:[%s3438_s24 + $0x130] sm:$0xff]   ;;  %v3197_v20 = vld [vmem:[%s3438_s24 + $0x138] sm:$0xff]   ;;  %v3199_v22 = vld [vmem:[%s3438_s24 + $0x140] sm:$0xff]  }
  0x4e   : > { %v3200_v23 = vld [vmem:[%s3438_s24 + $0x48] sm:$0xff]   ;;  %v3202_v25 = vld [vmem:[%s3438_s24 + $0x50] sm:$0xff]   ;;  %v3204_v27 = vld [vmem:[%s3438_s24 + $0x58] sm:$0xff]  }
  0x4f   : > { %v3201_v24 = vld [vmem:[%s3438_s24 + $0x148] sm:$0xff]   ;;  %v3203_v26 = vld [vmem:[%s3438_s24 + $0x150] sm:$0xff]   ;;  %v3205_v28 = vld [vmem:[%s3438_s24 + $0x158] sm:$0xff]  }
  0x50   : > { %3008 = vmatpush3.bf16.msra.mxu0 %v881_v6  ;;  %3144 = vmatpush3.bf16.msra.mxu1 %v881_v6  ;;  %v3206_v29 = vld [vmem:[%s3438_s24 + $0x60] sm:$0xff]   ;;  %v3208_v31 = vld [vmem:[%s3438_s24 + $0x68] sm:$0xff]   ;;  %v3210_v33 = vld [vmem:[%s3438_s24 + $0x70] sm:$0xff]  }
  0x51   : > { %v3207_v30 = vld [vmem:[%s3438_s24 + $0x160] sm:$0xff]   ;;  %v3209_v32 = vld [vmem:[%s3438_s24 + $0x168] sm:$0xff]   ;;  %v3211_v34 = vld [vmem:[%s3438_s24 + $0x170] sm:$0xff]  }
  0x52   : > { %v3212_v35 = vld [vmem:[%s3438_s24 + $0x78] sm:$0xff]   ;;  %v3214_v37 = vld [vmem:[%s3438_s24 + $0x80] sm:$0xff]   ;;  %v3216_v39 = vld [vmem:[%s3438_s24 + $0x88] sm:$0xff]  }
  0x53   : > { %3010 = vmatmul.mubr.msk.bf16.vlgmr.msra.gmra.mrb[0].mxu0 %vm686_vm0, %v3184_v7  ;;  %3074 = vmatmul.mubr.msk.bf16.vlgmr.msra.gmra.mrb[0].mxu1 %vm686_vm0, %v3185_v8  ;;  %v3213_v36 = vld [vmem:[%s3438_s24 + $0x178] sm:$0xff]   ;;  %v3215_v38 = vld [vmem:[%s3438_s24 + $0x180] sm:$0xff]   ;;  %v3217_v40 = vld [vmem:[%s3438_s24 + $0x188] sm:$0xff]  }
  0x54   : > { %3013 = vmatprep.mubr.msk.bf16.mxu0 %vm686_vm0, %v3186_v9  ;;  %3077 = vmatprep.mubr.msk.bf16.mxu1 %vm686_vm0, %v3187_v10  ;;  %v3218_v41 = vld [vmem:[%s3438_s24 + $0x90] sm:$0xff]   ;;  %v3220_v43 = vld [vmem:[%s3438_s24 + $0x98] sm:$0xff]   ;;  %v3222_v45 = vld [vmem:[%s3438_s24 + $0xa0] sm:$0xff]  }
  0x55   : > { %v3219_v42 = vld [vmem:[%s3438_s24 + $0x190] sm:$0xff]   ;;  %v3221_v44 = vld [vmem:[%s3438_s24 + $0x198] sm:$0xff]   ;;  %v3223_v46 = vld [vmem:[%s3438_s24 + $0x1a0] sm:$0xff]  }
  0x56   : > { %v3224_v47 = vld [vmem:[%s3438_s24 + $0xa8] sm:$0xff]   ;;  %v3226_v49 = vld [vmem:[%s3438_s24 + $0xb0] sm:$0xff]   ;;  %v3228_v51 = vld [vmem:[%s3438_s24 + $0xb8] sm:$0xff]  }
  0x57   : > { %v3225_v48 = vld [vmem:[%s3438_s24 + $0x1a8] sm:$0xff]   ;;  %v3227_v50 = vld [vmem:[%s3438_s24 + $0x1b0] sm:$0xff]   ;;  %v3229_v52 = vld [vmem:[%s3438_s24 + $0x1b8] sm:$0xff]  }
  0x58   : > { %v3230_v53 = vld [vmem:[%s3438_s24 + $0xc0] sm:$0xff]   ;;  %v3232_v55 = vld [vmem:[%s3438_s24 + $0xc8] sm:$0xff]   ;;  %v3234_v57 = vld [vmem:[%s3438_s24 + $0xd0] sm:$0xff]  }
  0x59   : > { %v3231_v54 = vld [vmem:[%s3438_s24 + $0x1c0] sm:$0xff]   ;;  %v3233_v56 = vld [vmem:[%s3438_s24 + $0x1c8] sm:$0xff]   ;;  %v3235_v58 = vld [vmem:[%s3438_s24 + $0x1d0] sm:$0xff]  }
  0x5a   : > { %v3236_v59 = vld [vmem:[%s3438_s24 + $0xd8] sm:$0xff]   ;;  %v3238_v61 = vld [vmem:[%s3438_s24 + $0xe0] sm:$0xff]   ;;  %v3240_v63 = vld [vmem:[%s3438_s24 + $0xe8] sm:$0xff]  }
  0x5b   : > { %3014 = vmatmul.mubr.msk.bf16.gmra.mrb[4].mxu0 %vm686_vm0, %v3188_v11  ;;  %3078 = vmatmul.mubr.msk.bf16.gmra.mrb[4].mxu1 %vm686_vm0, %v3189_v12  ;;  %v3237_v60 = vld [vmem:[%s3438_s24 + $0x1d8] sm:$0xff]   ;;  %v3239_v62 = vld [vmem:[%s3438_s24 + $0x1e0] sm:$0xff]   ;;  %v3241_v0 = vld [vmem:[%s3438_s24 + $0x1e8] sm:$0xff]  }
  0x5c   : > { %3017 = vmatprep.mubr.msk.bf16.mxu0 %vm686_vm0, %v3190_v13  ;;  %3081 = vmatprep.mubr.msk.bf16.mxu1 %vm686_vm0, %v3191_v14  ;;  %v3242_v1 = vld [vmem:[%s3438_s24 + $0xf0] sm:$0xff]   ;;  %v3244_v3 = vld [vmem:[%s3438_s24 + $0xf8] sm:$0xff]  }
  0x5d   : > { %v3243_v2 = vld [vmem:[%s3438_s24 + $0x1f0] sm:$0xff]   ;;  %v3245_v4 = vld [vmem:[%s3438_s24 + $0x1f8] sm:$0xff]  }
  0x5e   : > { %v3568_v6 = vld [vmem:[#allocation4] ss:$0 sm:$0xff] }
  0x63   : > { %3018 = vmatmul.mubr.msk.bf16.gmra.mrb[8].mxu0 %vm686_vm0, %v3192_v15  ;;  %3082 = vmatmul.mubr.msk.bf16.gmra.mrb[8].mxu1 %vm686_vm0, %v3193_v16 }
  0x64   : > { %3021 = vmatprep.mubr.msk.bf16.mxu0 %vm686_vm0, %v3194_v17  ;;  %3085 = vmatprep.mubr.msk.bf16.mxu1 %vm686_vm0, %v3195_v18 }
  0x6b   : > { %3022 = vmatmul.mubr.msk.bf16.gmra.mrb[12].mxu0 %vm686_vm0, %v3196_v19  ;;  %3086 = vmatmul.mubr.msk.bf16.gmra.mrb[12].mxu1 %vm686_vm0, %v3197_v20 }
  0x6c   : > { %3025 = vmatprep.mubr.msk.bf16.mxu0 %vm686_vm0, %v3198_v21  ;;  %3089 = vmatprep.mubr.msk.bf16.mxu1 %vm686_vm0, %v3199_v22 }
  0x73   : > { %3026 = vmatmul.mubr.msk.bf16.gmra.mrb[16].mxu0 %vm686_vm0, %v3200_v23  ;;  %3090 = vmatmul.mubr.msk.bf16.gmra.mrb[16].mxu1 %vm686_vm0, %v3201_v24 }
  0x74   : > { %3029 = vmatprep.mubr.msk.bf16.mxu0 %vm686_vm0, %v3202_v25  ;;  %3093 = vmatprep.mubr.msk.bf16.mxu1 %vm686_vm0, %v3203_v26 }
  0x7b   : > { %3030 = vmatmul.mubr.msk.bf16.gmra.mrb[20].mxu0 %vm686_vm0, %v3204_v27  ;;  %3094 = vmatmul.mubr.msk.bf16.gmra.mrb[20].mxu1 %vm686_vm0, %v3205_v28 }
  0x7c   : > { %3033 = vmatprep.mubr.msk.bf16.mxu0 %vm686_vm0, %v3206_v29  ;;  %3097 = vmatprep.mubr.msk.bf16.mxu1 %vm686_vm0, %v3207_v30 }
  0x83   : > { %3034 = vmatmul.mubr.msk.bf16.gmra.mrb[24].mxu0 %vm686_vm0, %v3208_v31  ;;  %3098 = vmatmul.mubr.msk.bf16.gmra.mrb[24].mxu1 %vm686_vm0, %v3209_v32 }
  0x84   : > { %3037 = vmatprep.mubr.msk.bf16.mxu0 %vm686_vm0, %v3210_v33  ;;  %3101 = vmatprep.mubr.msk.bf16.mxu1 %vm686_vm0, %v3211_v34 }
  0x8b   : > { %3038 = vmatmul.mubr.msk.bf16.gmra.mrb[28].mxu0 %vm686_vm0, %v3212_v35  ;;  %3102 = vmatmul.mubr.msk.bf16.gmra.mrb[28].mxu1 %vm686_vm0, %v3213_v36 }
  0x8c   : > { %3041 = vmatprep.mubr.msk.bf16.mxu0 %vm686_vm0, %v3214_v37  ;;  %3105 = vmatprep.mubr.msk.bf16.mxu1 %vm686_vm0, %v3215_v38 }
  0x93   : > { %3042 = vmatmul.mubr.msk.bf16.gmra.mrb[32].mxu0 %vm686_vm0, %v3216_v39  ;;  %3106 = vmatmul.mubr.msk.bf16.gmra.mrb[32].mxu1 %vm686_vm0, %v3217_v40 }
  0x94   : > { %3045 = vmatprep.mubr.msk.bf16.mxu0 %vm686_vm0, %v3218_v41  ;;  %3109 = vmatprep.mubr.msk.bf16.mxu1 %vm686_vm0, %v3219_v42 }
  0x9b   : > { %3046 = vmatmul.mubr.msk.bf16.gmra.mrb[36].mxu0 %vm686_vm0, %v3220_v43  ;;  %3110 = vmatmul.mubr.msk.bf16.gmra.mrb[36].mxu1 %vm686_vm0, %v3221_v44 }
  0x9c   : > { %3049 = vmatprep.mubr.msk.bf16.mxu0 %vm686_vm0, %v3222_v45  ;;  %3113 = vmatprep.mubr.msk.bf16.mxu1 %vm686_vm0, %v3223_v46 }
  0xa3   : > { %3050 = vmatmul.mubr.msk.bf16.gmra.mrb[40].mxu0 %vm686_vm0, %v3224_v47  ;;  %3114 = vmatmul.mubr.msk.bf16.gmra.mrb[40].mxu1 %vm686_vm0, %v3225_v48 }
  0xa4   : > { %3053 = vmatprep.mubr.msk.bf16.mxu0 %vm686_vm0, %v3226_v49  ;;  %3117 = vmatprep.mubr.msk.bf16.mxu1 %vm686_vm0, %v3227_v50 }
  0xab   : > { %3054 = vmatmul.mubr.msk.bf16.gmra.mrb[44].mxu0 %vm686_vm0, %v3228_v51  ;;  %3118 = vmatmul.mubr.msk.bf16.gmra.mrb[44].mxu1 %vm686_vm0, %v3229_v52 }
  0xac   : > { %3057 = vmatprep.mubr.msk.bf16.mxu0 %vm686_vm0, %v3230_v53  ;;  %3121 = vmatprep.mubr.msk.bf16.mxu1 %vm686_vm0, %v3231_v54 }
  0xb3   : > { %3058 = vmatmul.mubr.msk.bf16.gmra.mrb[48].mxu0 %vm686_vm0, %v3232_v55  ;;  %3122 = vmatmul.mubr.msk.bf16.gmra.mrb[48].mxu1 %vm686_vm0, %v3233_v56 }
  0xb4   : > { %3061 = vmatprep.mubr.msk.bf16.mxu0 %vm686_vm0, %v3234_v57  ;;  %3125 = vmatprep.mubr.msk.bf16.mxu1 %vm686_vm0, %v3235_v58 }
  0xbb   : > { %3062 = vmatmul.mubr.msk.bf16.gmra.mrb[52].mxu0 %vm686_vm0, %v3236_v59  ;;  %3126 = vmatmul.mubr.msk.bf16.gmra.mrb[52].mxu1 %vm686_vm0, %v3237_v60 }
  0xbc   : > { %3065 = vmatprep.mubr.msk.bf16.mxu0 %vm686_vm0, %v3238_v61  ;;  %3129 = vmatprep.mubr.msk.bf16.mxu1 %vm686_vm0, %v3239_v62 }
  0xc3   : > { %3066 = vmatmul.mubr.msk.bf16.gmra.mrb[56].mxu0 %vm686_vm0, %v3240_v63  ;;  %3130 = vmatmul.mubr.msk.bf16.gmra.mrb[56].mxu1 %vm686_vm0, %v3241_v0 }
  0xc4   : > { %3069 = vmatprep.mubr.msk.bf16.mxu0 %vm686_vm0, %v3242_v1  ;;  %3133 = vmatprep.mubr.msk.bf16.mxu1 %vm686_vm0, %v3243_v2 }
  0xcb   : > { %3070 = vmatmul.mubr.msk.bf16.gmra.mrb[60].mxu0 %vm686_vm0, %v3244_v3  ;;  %3134 = vmatmul.mubr.msk.bf16.gmra.mrb[60].mxu1 %vm686_vm0, %v3245_v4 }
 0x126   : > { %v3011_v5 = vpop.f32.mrb[0].mxu0  ;;  %v3075_v7 = vpop.f32.mrb[0].mxu1 }
 0x127   : > { %v917_v8 = vpop.f32.mrb[1].mxu0  ;;  %v1173_v9 = vpop.f32.mrb[1].mxu1  ;;  %v926_v12 = vadd.f32 %v3011_v5, %v3568_v6  ;;  %v1182_v13 = vadd.f32 %v3075_v7, %v3568_v6 }
 0x128   : > { %v3012_v10 = vpop.f32.mrb[2].mxu0  ;;  %v3076_v11 = vpop.f32.mrb[2].mxu1  ;;  %v918_v18 = vadd.f32 %v3568_v6, %v917_v8  ;;  %v1174_v19 = vadd.f32 %v3568_v6, %v1173_v9 }
 0x129   : > { %v929_v14 = vadd.f32 %v3012_v10, %v3568_v6  ;;  %v1185_v15 = vadd.f32 %v3076_v11, %v3568_v6  ;;  %v920_v16 = vpop.f32.mrb[3].mxu0  ;;  %v1176_v17 = vpop.f32.mrb[3].mxu1 }
 0x12a   : > { %v921_v20 = vadd.f32 %v3568_v6, %v920_v16  ;;  %v1177_v21 = vadd.f32 %v3568_v6, %v1176_v17 }
 0x12b   : > { %v2558_v22 = vpack.c.bf16 %v929_v14, %v926_v12  ;;  %v2718_v23 = vpack.c.bf16 %v1185_v15, %v1182_v13 }
 0x12c   : > { %v2553_v24 = vpack.c.bf16 %v921_v20, %v918_v18  ;;  %v2713_v25 = vpack.c.bf16 %v1177_v21, %v1174_v19 }
 0x12d   : > { %2870 = vst [vmem:[%s3581_s25 + $0x8] sm:$0xff] %v2558_v22   ;;  %2902 = vst [vmem:[%s3581_s25 + $0x108] sm:$0xff] %v2718_v23  }
 0x12e   : > { %2554 = vst [vmem:[%s3581_s25] sm:$0xff] %v2553_v24   ;;  %2901 = vst [vmem:[%s3581_s25 + $0x100] sm:$0xff] %v2713_v25   ;;  %v3015_v26 = vpop.f32.mrb[4].mxu0  ;;  %v3079_v27 = vpop.f32.mrb[4].mxu1 }
 0x12f   : > { %v933_v28 = vpop.f32.mrb[5].mxu0  ;;  %v1189_v29 = vpop.f32.mrb[5].mxu1  ;;  %v942_v32 = vadd.f32 %v3015_v26, %v3568_v6  ;;  %v1198_v33 = vadd.f32 %v3079_v27, %v3568_v6 }
 0x130   : > { %v3016_v30 = vpop.f32.mrb[6].mxu0  ;;  %v3080_v31 = vpop.f32.mrb[6].mxu1  ;;  %v934_v38 = vadd.f32 %v3568_v6, %v933_v28  ;;  %v1190_v39 = vadd.f32 %v3568_v6, %v1189_v29 }
 0x131   : > { %v945_v34 = vadd.f32 %v3016_v30, %v3568_v6  ;;  %v1201_v35 = vadd.f32 %v3080_v31, %v3568_v6  ;;  %v936_v36 = vpop.f32.mrb[7].mxu0  ;;  %v1192_v37 = vpop.f32.mrb[7].mxu1 }
 0x132   : > { %v937_v40 = vadd.f32 %v3568_v6, %v936_v36  ;;  %v1193_v41 = vadd.f32 %v3568_v6, %v1192_v37 }
 0x133   : > { %v2568_v42 = vpack.c.bf16 %v945_v34, %v942_v32  ;;  %v2728_v43 = vpack.c.bf16 %v1201_v35, %v1198_v33 }
 0x134   : > { %v2563_v44 = vpack.c.bf16 %v937_v40, %v934_v38  ;;  %v2723_v45 = vpack.c.bf16 %v1193_v41, %v1190_v39 }
 0x135   : > { %2872 = vst [vmem:[%s3581_s25 + $0x18] sm:$0xff] %v2568_v42   ;;  %2904 = vst [vmem:[%s3581_s25 + $0x118] sm:$0xff] %v2728_v43  }
 0x136   : > { %2871 = vst [vmem:[%s3581_s25 + $0x10] sm:$0xff] %v2563_v44   ;;  %2903 = vst [vmem:[%s3581_s25 + $0x110] sm:$0xff] %v2723_v45   ;;  %v3019_v46 = vpop.f32.mrb[8].mxu0  ;;  %v3083_v47 = vpop.f32.mrb[8].mxu1 }
 0x137   : > { %v949_v48 = vpop.f32.mrb[9].mxu0  ;;  %v1205_v49 = vpop.f32.mrb[9].mxu1  ;;  %v958_v52 = vadd.f32 %v3019_v46, %v3568_v6  ;;  %v1214_v53 = vadd.f32 %v3083_v47, %v3568_v6 }
 0x138   : > { %v3020_v50 = vpop.f32.mrb[10].mxu0  ;;  %v3084_v51 = vpop.f32.mrb[10].mxu1  ;;  %v950_v58 = vadd.f32 %v3568_v6, %v949_v48  ;;  %v1206_v59 = vadd.f32 %v3568_v6, %v1205_v49 }
 0x139   : > { %v961_v54 = vadd.f32 %v3020_v50, %v3568_v6  ;;  %v1217_v55 = vadd.f32 %v3084_v51, %v3568_v6  ;;  %v952_v56 = vpop.f32.mrb[11].mxu0  ;;  %v1208_v57 = vpop.f32.mrb[11].mxu1 }
 0x13a   : > { %v953_v60 = vadd.f32 %v3568_v6, %v952_v56  ;;  %v1209_v61 = vadd.f32 %v3568_v6, %v1208_v57 }
 0x13b   : > { %v2578_v62 = vpack.c.bf16 %v961_v54, %v958_v52  ;;  %v2738_v63 = vpack.c.bf16 %v1217_v55, %v1214_v53 }
 0x13c   : > { %v2573_v0 = vpack.c.bf16 %v953_v60, %v950_v58  ;;  %v2733_v1 = vpack.c.bf16 %v1209_v61, %v1206_v59 }
 0x13d   : > { %2874 = vst [vmem:[%s3581_s25 + $0x28] sm:$0xff] %v2578_v62   ;;  %2906 = vst [vmem:[%s3581_s25 + $0x128] sm:$0xff] %v2738_v63  }
 0x13e   : > { %2873 = vst [vmem:[%s3581_s25 + $0x20] sm:$0xff] %v2573_v0   ;;  %2905 = vst [vmem:[%s3581_s25 + $0x120] sm:$0xff] %v2733_v1   ;;  %v3023_v2 = vpop.f32.mrb[12].mxu0  ;;  %v3087_v3 = vpop.f32.mrb[12].mxu1 }
 0x13f   : > { %v965_v4 = vpop.f32.mrb[13].mxu0  ;;  %v1221_v5 = vpop.f32.mrb[13].mxu1  ;;  %v974_v9 = vadd.f32 %v3023_v2, %v3568_v6  ;;  %v1230_v10 = vadd.f32 %v3087_v3, %v3568_v6 }
 0x140   : > { %v3024_v7 = vpop.f32.mrb[14].mxu0  ;;  %v3088_v8 = vpop.f32.mrb[14].mxu1  ;;  %v966_v15 = vadd.f32 %v3568_v6, %v965_v4  ;;  %v1222_v16 = vadd.f32 %v3568_v6, %v1221_v5 }
 0x141   : > { %v977_v11 = vadd.f32 %v3024_v7, %v3568_v6  ;;  %v1233_v12 = vadd.f32 %v3088_v8, %v3568_v6  ;;  %v968_v13 = vpop.f32.mrb[15].mxu0  ;;  %v1224_v14 = vpop.f32.mrb[15].mxu1 }
 0x142   : > { %v969_v17 = vadd.f32 %v3568_v6, %v968_v13  ;;  %v1225_v18 = vadd.f32 %v3568_v6, %v1224_v14 }
 0x143   : > { %v2588_v19 = vpack.c.bf16 %v977_v11, %v974_v9  ;;  %v2748_v20 = vpack.c.bf16 %v1233_v12, %v1230_v10 }
 0x144   : > { %v2583_v21 = vpack.c.bf16 %v969_v17, %v966_v15  ;;  %v2743_v22 = vpack.c.bf16 %v1225_v18, %v1222_v16 }
 0x145   : > { %2876 = vst [vmem:[%s3581_s25 + $0x38] sm:$0xff] %v2588_v19   ;;  %2908 = vst [vmem:[%s3581_s25 + $0x138] sm:$0xff] %v2748_v20  }
 0x146   : > { %2875 = vst [vmem:[%s3581_s25 + $0x30] sm:$0xff] %v2583_v21   ;;  %2907 = vst [vmem:[%s3581_s25 + $0x130] sm:$0xff] %v2743_v22   ;;  %v3027_v23 = vpop.f32.mrb[16].mxu0  ;;  %v3091_v24 = vpop.f32.mrb[16].mxu1 }
 0x147   : > { %v981_v25 = vpop.f32.mrb[17].mxu0  ;;  %v1237_v26 = vpop.f32.mrb[17].mxu1  ;;  %v990_v29 = vadd.f32 %v3027_v23, %v3568_v6  ;;  %v1246_v30 = vadd.f32 %v3091_v24, %v3568_v6 }
 0x148   : > { %v3028_v27 = vpop.f32.mrb[18].mxu0  ;;  %v3092_v28 = vpop.f32.mrb[18].mxu1  ;;  %v982_v35 = vadd.f32 %v3568_v6, %v981_v25  ;;  %v1238_v36 = vadd.f32 %v3568_v6, %v1237_v26 }
 0x149   : > { %v993_v31 = vadd.f32 %v3028_v27, %v3568_v6  ;;  %v1249_v32 = vadd.f32 %v3092_v28, %v3568_v6  ;;  %v984_v33 = vpop.f32.mrb[19].mxu0  ;;  %v1240_v34 = vpop.f32.mrb[19].mxu1 }
 0x14a   : > { %v985_v37 = vadd.f32 %v3568_v6, %v984_v33  ;;  %v1241_v38 = vadd.f32 %v3568_v6, %v1240_v34 }
 0x14b   : > { %v2598_v39 = vpack.c.bf16 %v993_v31, %v990_v29  ;;  %v2758_v40 = vpack.c.bf16 %v1249_v32, %v1246_v30 }
 0x14c   : > { %v2593_v41 = vpack.c.bf16 %v985_v37, %v982_v35  ;;  %v2753_v42 = vpack.c.bf16 %v1241_v38, %v1238_v36 }
 0x14d   : > { %2878 = vst [vmem:[%s3581_s25 + $0x48] sm:$0xff] %v2598_v39   ;;  %2910 = vst [vmem:[%s3581_s25 + $0x148] sm:$0xff] %v2758_v40  }
 0x14e   : > { %2877 = vst [vmem:[%s3581_s25 + $0x40] sm:$0xff] %v2593_v41   ;;  %2909 = vst [vmem:[%s3581_s25 + $0x140] sm:$0xff] %v2753_v42   ;;  %v3031_v43 = vpop.f32.mrb[20].mxu0  ;;  %v3095_v44 = vpop.f32.mrb[20].mxu1 }
 0x14f   : > { %v997_v45 = vpop.f32.mrb[21].mxu0  ;;  %v1253_v46 = vpop.f32.mrb[21].mxu1  ;;  %v1006_v49 = vadd.f32 %v3031_v43, %v3568_v6  ;;  %v1262_v50 = vadd.f32 %v3095_v44, %v3568_v6 }
 0x150   : > { %v3032_v47 = vpop.f32.mrb[22].mxu0  ;;  %v3096_v48 = vpop.f32.mrb[22].mxu1  ;;  %v998_v55 = vadd.f32 %v3568_v6, %v997_v45  ;;  %v1254_v56 = vadd.f32 %v3568_v6, %v1253_v46 }
 0x151   : > { %v1009_v51 = vadd.f32 %v3032_v47, %v3568_v6  ;;  %v1265_v52 = vadd.f32 %v3096_v48, %v3568_v6  ;;  %v1000_v53 = vpop.f32.mrb[23].mxu0  ;;  %v1256_v54 = vpop.f32.mrb[23].mxu1 }
 0x152   : > { %v1001_v57 = vadd.f32 %v3568_v6, %v1000_v53  ;;  %v1257_v58 = vadd.f32 %v3568_v6, %v1256_v54 }
 0x153   : > { %v2608_v59 = vpack.c.bf16 %v1009_v51, %v1006_v49  ;;  %v2768_v60 = vpack.c.bf16 %v1265_v52, %v1262_v50 }
 0x154   : > { %v2603_v61 = vpack.c.bf16 %v1001_v57, %v998_v55  ;;  %v2763_v62 = vpack.c.bf16 %v1257_v58, %v1254_v56 }
 0x155   : > { %2880 = vst [vmem:[%s3581_s25 + $0x58] sm:$0xff] %v2608_v59   ;;  %2912 = vst [vmem:[%s3581_s25 + $0x158] sm:$0xff] %v2768_v60  }
 0x156   : > { %2879 = vst [vmem:[%s3581_s25 + $0x50] sm:$0xff] %v2603_v61   ;;  %2911 = vst [vmem:[%s3581_s25 + $0x150] sm:$0xff] %v2763_v62   ;;  %v3035_v63 = vpop.f32.mrb[24].mxu0  ;;  %v3099_v0 = vpop.f32.mrb[24].mxu1 }
 0x157   : > { %v1013_v1 = vpop.f32.mrb[25].mxu0  ;;  %v1269_v2 = vpop.f32.mrb[25].mxu1  ;;  %v1022_v5 = vadd.f32 %v3035_v63, %v3568_v6  ;;  %v1278_v7 = vadd.f32 %v3099_v0, %v3568_v6 }
 0x158   : > { %v3036_v3 = vpop.f32.mrb[26].mxu0  ;;  %v3100_v4 = vpop.f32.mrb[26].mxu1  ;;  %v1014_v12 = vadd.f32 %v3568_v6, %v1013_v1  ;;  %v1270_v13 = vadd.f32 %v3568_v6, %v1269_v2 }
 0x159   : > { %v1025_v8 = vadd.f32 %v3036_v3, %v3568_v6  ;;  %v1281_v9 = vadd.f32 %v3100_v4, %v3568_v6  ;;  %v1016_v10 = vpop.f32.mrb[27].mxu0  ;;  %v1272_v11 = vpop.f32.mrb[27].mxu1 }
 0x15a   : > { %v1017_v14 = vadd.f32 %v3568_v6, %v1016_v10  ;;  %v1273_v15 = vadd.f32 %v3568_v6, %v1272_v11 }
 0x15b   : > { %v2618_v16 = vpack.c.bf16 %v1025_v8, %v1022_v5  ;;  %v2778_v17 = vpack.c.bf16 %v1281_v9, %v1278_v7 }
 0x15c   : > { %v2613_v18 = vpack.c.bf16 %v1017_v14, %v1014_v12  ;;  %v2773_v19 = vpack.c.bf16 %v1273_v15, %v1270_v13 }
 0x15d   : > { %2882 = vst [vmem:[%s3581_s25 + $0x68] sm:$0xff] %v2618_v16   ;;  %2914 = vst [vmem:[%s3581_s25 + $0x168] sm:$0xff] %v2778_v17  }
 0x15e   : > { %2881 = vst [vmem:[%s3581_s25 + $0x60] sm:$0xff] %v2613_v18   ;;  %2913 = vst [vmem:[%s3581_s25 + $0x160] sm:$0xff] %v2773_v19   ;;  %v3039_v20 = vpop.f32.mrb[28].mxu0  ;;  %v3103_v21 = vpop.f32.mrb[28].mxu1 }
 0x15f   : > { %v1029_v22 = vpop.f32.mrb[29].mxu0  ;;  %v1285_v23 = vpop.f32.mrb[29].mxu1  ;;  %v1038_v26 = vadd.f32 %v3039_v20, %v3568_v6  ;;  %v1294_v27 = vadd.f32 %v3103_v21, %v3568_v6 }
 0x160   : > { %v3040_v24 = vpop.f32.mrb[30].mxu0  ;;  %v3104_v25 = vpop.f32.mrb[30].mxu1  ;;  %v1030_v32 = vadd.f32 %v3568_v6, %v1029_v22  ;;  %v1286_v33 = vadd.f32 %v3568_v6, %v1285_v23 }
 0x161   : > { %v1041_v28 = vadd.f32 %v3040_v24, %v3568_v6  ;;  %v1297_v29 = vadd.f32 %v3104_v25, %v3568_v6  ;;  %v1032_v30 = vpop.f32.mrb[31].mxu0  ;;  %v1288_v31 = vpop.f32.mrb[31].mxu1 }
 0x162   : > { %v1033_v34 = vadd.f32 %v3568_v6, %v1032_v30  ;;  %v1289_v35 = vadd.f32 %v3568_v6, %v1288_v31 }
 0x163   : > { %v2628_v36 = vpack.c.bf16 %v1041_v28, %v1038_v26  ;;  %v2788_v37 = vpack.c.bf16 %v1297_v29, %v1294_v27 }
 0x164   : > { %v2623_v38 = vpack.c.bf16 %v1033_v34, %v1030_v32  ;;  %v2783_v39 = vpack.c.bf16 %v1289_v35, %v1286_v33 }
 0x165   : > { %2884 = vst [vmem:[%s3581_s25 + $0x78] sm:$0xff] %v2628_v36   ;;  %2916 = vst [vmem:[%s3581_s25 + $0x178] sm:$0xff] %v2788_v37  }
 0x166   : > { %2883 = vst [vmem:[%s3581_s25 + $0x70] sm:$0xff] %v2623_v38   ;;  %2915 = vst [vmem:[%s3581_s25 + $0x170] sm:$0xff] %v2783_v39   ;;  %v3043_v40 = vpop.f32.mrb[32].mxu0  ;;  %v3107_v41 = vpop.f32.mrb[32].mxu1 }
 0x167   : > { %v1045_v42 = vpop.f32.mrb[33].mxu0  ;;  %v1301_v43 = vpop.f32.mrb[33].mxu1  ;;  %v1054_v46 = vadd.f32 %v3043_v40, %v3568_v6  ;;  %v1310_v47 = vadd.f32 %v3107_v41, %v3568_v6 }
 0x168   : > { %v3044_v44 = vpop.f32.mrb[34].mxu0  ;;  %v3108_v45 = vpop.f32.mrb[34].mxu1  ;;  %v1046_v52 = vadd.f32 %v3568_v6, %v1045_v42  ;;  %v1302_v53 = vadd.f32 %v3568_v6, %v1301_v43 }
 0x169   : > { %v1057_v48 = vadd.f32 %v3044_v44, %v3568_v6  ;;  %v1313_v49 = vadd.f32 %v3108_v45, %v3568_v6  ;;  %v1048_v50 = vpop.f32.mrb[35].mxu0  ;;  %v1304_v51 = vpop.f32.mrb[35].mxu1 }
 0x16a   : > { %v1049_v54 = vadd.f32 %v3568_v6, %v1048_v50  ;;  %v1305_v55 = vadd.f32 %v3568_v6, %v1304_v51 }
 0x16b   : > { %v2638_v56 = vpack.c.bf16 %v1057_v48, %v1054_v46  ;;  %v2798_v57 = vpack.c.bf16 %v1313_v49, %v1310_v47 }
 0x16c   : > { %v2633_v58 = vpack.c.bf16 %v1049_v54, %v1046_v52  ;;  %v2793_v59 = vpack.c.bf16 %v1305_v55, %v1302_v53 }
 0x16d   : > { %2886 = vst [vmem:[%s3581_s25 + $0x88] sm:$0xff] %v2638_v56   ;;  %2918 = vst [vmem:[%s3581_s25 + $0x188] sm:$0xff] %v2798_v57  }
 0x16e   : > { %2885 = vst [vmem:[%s3581_s25 + $0x80] sm:$0xff] %v2633_v58   ;;  %2917 = vst [vmem:[%s3581_s25 + $0x180] sm:$0xff] %v2793_v59   ;;  %v3047_v60 = vpop.f32.mrb[36].mxu0  ;;  %v3111_v61 = vpop.f32.mrb[36].mxu1 }
 0x16f   : > { %v1061_v62 = vpop.f32.mrb[37].mxu0  ;;  %v1317_v63 = vpop.f32.mrb[37].mxu1  ;;  %v1070_v2 = vadd.f32 %v3047_v60, %v3568_v6  ;;  %v1326_v3 = vadd.f32 %v3111_v61, %v3568_v6 }
 0x170   : > { %v3048_v0 = vpop.f32.mrb[38].mxu0  ;;  %v3112_v1 = vpop.f32.mrb[38].mxu1  ;;  %v1062_v9 = vadd.f32 %v3568_v6, %v1061_v62  ;;  %v1318_v10 = vadd.f32 %v3568_v6, %v1317_v63 }
 0x171   : > { %v1073_v4 = vadd.f32 %v3048_v0, %v3568_v6  ;;  %v1329_v5 = vadd.f32 %v3112_v1, %v3568_v6  ;;  %v1064_v7 = vpop.f32.mrb[39].mxu0  ;;  %v1320_v8 = vpop.f32.mrb[39].mxu1 }
 0x172   : > { %v1065_v11 = vadd.f32 %v3568_v6, %v1064_v7  ;;  %v1321_v12 = vadd.f32 %v3568_v6, %v1320_v8 }
 0x173   : > { %v2648_v13 = vpack.c.bf16 %v1073_v4, %v1070_v2  ;;  %v2808_v14 = vpack.c.bf16 %v1329_v5, %v1326_v3 }
 0x174   : > { %v2643_v15 = vpack.c.bf16 %v1065_v11, %v1062_v9  ;;  %v2803_v16 = vpack.c.bf16 %v1321_v12, %v1318_v10 }
 0x175   : > { %2888 = vst [vmem:[%s3581_s25 + $0x98] sm:$0xff] %v2648_v13   ;;  %2920 = vst [vmem:[%s3581_s25 + $0x198] sm:$0xff] %v2808_v14  }
 0x176   : > { %2887 = vst [vmem:[%s3581_s25 + $0x90] sm:$0xff] %v2643_v15   ;;  %2919 = vst [vmem:[%s3581_s25 + $0x190] sm:$0xff] %v2803_v16   ;;  %v3051_v17 = vpop.f32.mrb[40].mxu0  ;;  %v3115_v18 = vpop.f32.mrb[40].mxu1 }
 0x177   : > { %v1077_v19 = vpop.f32.mrb[41].mxu0  ;;  %v1333_v20 = vpop.f32.mrb[41].mxu1  ;;  %v1086_v23 = vadd.f32 %v3051_v17, %v3568_v6  ;;  %v1342_v24 = vadd.f32 %v3115_v18, %v3568_v6 }
 0x178   : > { %v3052_v21 = vpop.f32.mrb[42].mxu0  ;;  %v3116_v22 = vpop.f32.mrb[42].mxu1  ;;  %v1078_v29 = vadd.f32 %v3568_v6, %v1077_v19  ;;  %v1334_v30 = vadd.f32 %v3568_v6, %v1333_v20 }
 0x179   : > { %v1089_v25 = vadd.f32 %v3052_v21, %v3568_v6  ;;  %v1345_v26 = vadd.f32 %v3116_v22, %v3568_v6  ;;  %v1080_v27 = vpop.f32.mrb[43].mxu0  ;;  %v1336_v28 = vpop.f32.mrb[43].mxu1 }
 0x17a   : > { %v1081_v31 = vadd.f32 %v3568_v6, %v1080_v27  ;;  %v1337_v32 = vadd.f32 %v3568_v6, %v1336_v28 }
 0x17b   : > { %v2658_v33 = vpack.c.bf16 %v1089_v25, %v1086_v23  ;;  %v2818_v34 = vpack.c.bf16 %v1345_v26, %v1342_v24 }
 0x17c   : > { %v2653_v35 = vpack.c.bf16 %v1081_v31, %v1078_v29  ;;  %v2813_v36 = vpack.c.bf16 %v1337_v32, %v1334_v30 }
 0x17d   : > { %2890 = vst [vmem:[%s3581_s25 + $0xa8] sm:$0xff] %v2658_v33   ;;  %2922 = vst [vmem:[%s3581_s25 + $0x1a8] sm:$0xff] %v2818_v34  }
 0x17e   : > { %2889 = vst [vmem:[%s3581_s25 + $0xa0] sm:$0xff] %v2653_v35   ;;  %2921 = vst [vmem:[%s3581_s25 + $0x1a0] sm:$0xff] %v2813_v36   ;;  %v3055_v37 = vpop.f32.mrb[44].mxu0  ;;  %v3119_v38 = vpop.f32.mrb[44].mxu1 }
 0x17f   : > { %v1093_v39 = vpop.f32.mrb[45].mxu0  ;;  %v1349_v40 = vpop.f32.mrb[45].mxu1  ;;  %v1102_v43 = vadd.f32 %v3055_v37, %v3568_v6  ;;  %v1358_v44 = vadd.f32 %v3119_v38, %v3568_v6 }
 0x180   : > { %v3056_v41 = vpop.f32.mrb[46].mxu0  ;;  %v3120_v42 = vpop.f32.mrb[46].mxu1  ;;  %v1094_v49 = vadd.f32 %v3568_v6, %v1093_v39  ;;  %v1350_v50 = vadd.f32 %v3568_v6, %v1349_v40 }
 0x181   : > { %v1105_v45 = vadd.f32 %v3056_v41, %v3568_v6  ;;  %v1361_v46 = vadd.f32 %v3120_v42, %v3568_v6  ;;  %v1096_v47 = vpop.f32.mrb[47].mxu0  ;;  %v1352_v48 = vpop.f32.mrb[47].mxu1 }
 0x182   : > { %v1097_v51 = vadd.f32 %v3568_v6, %v1096_v47  ;;  %v1353_v52 = vadd.f32 %v3568_v6, %v1352_v48 }
 0x183   : > { %v2668_v53 = vpack.c.bf16 %v1105_v45, %v1102_v43  ;;  %v2828_v54 = vpack.c.bf16 %v1361_v46, %v1358_v44 }
 0x184   : > { %v2663_v55 = vpack.c.bf16 %v1097_v51, %v1094_v49  ;;  %v2823_v56 = vpack.c.bf16 %v1353_v52, %v1350_v50 }
 0x185   : > { %2892 = vst [vmem:[%s3581_s25 + $0xb8] sm:$0xff] %v2668_v53   ;;  %2924 = vst [vmem:[%s3581_s25 + $0x1b8] sm:$0xff] %v2828_v54  }
 0x186   : > { %2891 = vst [vmem:[%s3581_s25 + $0xb0] sm:$0xff] %v2663_v55   ;;  %2923 = vst [vmem:[%s3581_s25 + $0x1b0] sm:$0xff] %v2823_v56   ;;  %v3059_v57 = vpop.f32.mrb[48].mxu0  ;;  %v3123_v58 = vpop.f32.mrb[48].mxu1 }
 0x187   : > { %v1109_v59 = vpop.f32.mrb[49].mxu0  ;;  %v1365_v60 = vpop.f32.mrb[49].mxu1  ;;  %v1118_v63 = vadd.f32 %v3059_v57, %v3568_v6  ;;  %v1374_v0 = vadd.f32 %v3123_v58, %v3568_v6 }
 0x188   : > { %v3060_v61 = vpop.f32.mrb[50].mxu0  ;;  %v3124_v62 = vpop.f32.mrb[50].mxu1  ;;  %v1110_v5 = vadd.f32 %v3568_v6, %v1109_v59  ;;  %v1366_v7 = vadd.f32 %v3568_v6, %v1365_v60 }
 0x189   : > { %v1121_v1 = vadd.f32 %v3060_v61, %v3568_v6  ;;  %v1377_v2 = vadd.f32 %v3124_v62, %v3568_v6  ;;  %v1112_v3 = vpop.f32.mrb[51].mxu0  ;;  %v1368_v4 = vpop.f32.mrb[51].mxu1 }
 0x18a   : > { %v1113_v8 = vadd.f32 %v3568_v6, %v1112_v3  ;;  %v1369_v9 = vadd.f32 %v3568_v6, %v1368_v4 }
 0x18b   : > { %v2678_v10 = vpack.c.bf16 %v1121_v1, %v1118_v63  ;;  %v2838_v11 = vpack.c.bf16 %v1377_v2, %v1374_v0 }
 0x18c   : > { %v2673_v12 = vpack.c.bf16 %v1113_v8, %v1110_v5  ;;  %v2833_v13 = vpack.c.bf16 %v1369_v9, %v1366_v7 }
 0x18d   : > { %2894 = vst [vmem:[%s3581_s25 + $0xc8] sm:$0xff] %v2678_v10   ;;  %2926 = vst [vmem:[%s3581_s25 + $0x1c8] sm:$0xff] %v2838_v11  }
 0x18e   : > { %2893 = vst [vmem:[%s3581_s25 + $0xc0] sm:$0xff] %v2673_v12   ;;  %2925 = vst [vmem:[%s3581_s25 + $0x1c0] sm:$0xff] %v2833_v13   ;;  %v3063_v14 = vpop.f32.mrb[52].mxu0  ;;  %v3127_v15 = vpop.f32.mrb[52].mxu1 }
 0x18f   : > { %v1125_v16 = vpop.f32.mrb[53].mxu0  ;;  %v1381_v17 = vpop.f32.mrb[53].mxu1  ;;  %v1134_v20 = vadd.f32 %v3063_v14, %v3568_v6  ;;  %v1390_v21 = vadd.f32 %v3127_v15, %v3568_v6 }
 0x190   : > { %v3064_v18 = vpop.f32.mrb[54].mxu0  ;;  %v3128_v19 = vpop.f32.mrb[54].mxu1  ;;  %v1126_v26 = vadd.f32 %v3568_v6, %v1125_v16  ;;  %v1382_v27 = vadd.f32 %v3568_v6, %v1381_v17 }
 0x191   : > { %v1137_v22 = vadd.f32 %v3064_v18, %v3568_v6  ;;  %v1393_v23 = vadd.f32 %v3128_v19, %v3568_v6  ;;  %v1128_v24 = vpop.f32.mrb[55].mxu0  ;;  %v1384_v25 = vpop.f32.mrb[55].mxu1 }
 0x192   : > { %v1129_v28 = vadd.f32 %v3568_v6, %v1128_v24  ;;  %v1385_v29 = vadd.f32 %v3568_v6, %v1384_v25 }
 0x193   : > { %v2688_v30 = vpack.c.bf16 %v1137_v22, %v1134_v20  ;;  %v2848_v31 = vpack.c.bf16 %v1393_v23, %v1390_v21 }
 0x194   : > { %v2683_v32 = vpack.c.bf16 %v1129_v28, %v1126_v26  ;;  %v2843_v33 = vpack.c.bf16 %v1385_v29, %v1382_v27 }
 0x195   : > { %2896 = vst [vmem:[%s3581_s25 + $0xd8] sm:$0xff] %v2688_v30   ;;  %2928 = vst [vmem:[%s3581_s25 + $0x1d8] sm:$0xff] %v2848_v31  }
 0x196   : > { %2895 = vst [vmem:[%s3581_s25 + $0xd0] sm:$0xff] %v2683_v32   ;;  %2927 = vst [vmem:[%s3581_s25 + $0x1d0] sm:$0xff] %v2843_v33   ;;  %v3067_v34 = vpop.f32.mrb[56].mxu0  ;;  %v3131_v35 = vpop.f32.mrb[56].mxu1 }
 0x197   : > { %v1141_v36 = vpop.f32.mrb[57].mxu0  ;;  %v1397_v37 = vpop.f32.mrb[57].mxu1  ;;  %v1150_v40 = vadd.f32 %v3067_v34, %v3568_v6  ;;  %v1406_v41 = vadd.f32 %v3131_v35, %v3568_v6 }
 0x198   : > { %v3068_v38 = vpop.f32.mrb[58].mxu0  ;;  %v3132_v39 = vpop.f32.mrb[58].mxu1  ;;  %v1142_v46 = vadd.f32 %v3568_v6, %v1141_v36  ;;  %v1398_v47 = vadd.f32 %v3568_v6, %v1397_v37 }
 0x199   : > { %v1153_v42 = vadd.f32 %v3068_v38, %v3568_v6  ;;  %v1409_v43 = vadd.f32 %v3132_v39, %v3568_v6  ;;  %v1144_v44 = vpop.f32.mrb[59].mxu0  ;;  %v1400_v45 = vpop.f32.mrb[59].mxu1 }
 0x19a   : > { %v1145_v48 = vadd.f32 %v3568_v6, %v1144_v44  ;;  %v1401_v49 = vadd.f32 %v3568_v6, %v1400_v45 }
 0x19b   : > { %v2698_v50 = vpack.c.bf16 %v1153_v42, %v1150_v40  ;;  %v2858_v51 = vpack.c.bf16 %v1409_v43, %v1406_v41 }
 0x19c   : > { %v2693_v52 = vpack.c.bf16 %v1145_v48, %v1142_v46  ;;  %v2853_v53 = vpack.c.bf16 %v1401_v49, %v1398_v47 }
 0x19d   : > { %2898 = vst [vmem:[%s3581_s25 + $0xe8] sm:$0xff] %v2698_v50   ;;  %2930 = vst [vmem:[%s3581_s25 + $0x1e8] sm:$0xff] %v2858_v51  }
 0x19e   : > { %2897 = vst [vmem:[%s3581_s25 + $0xe0] sm:$0xff] %v2693_v52   ;;  %2929 = vst [vmem:[%s3581_s25 + $0x1e0] sm:$0xff] %v2853_v53   ;;  %v3071_v54 = vpop.f32.mrb[60].mxu0  ;;  %v3135_v55 = vpop.f32.mrb[60].mxu1 }
 0x19f   : > { %v1157_v56 = vpop.f32.mrb[61].mxu0  ;;  %v1413_v57 = vpop.f32.mrb[61].mxu1  ;;  %v1166_v60 = vadd.f32 %v3071_v54, %v3568_v6  ;;  %v1422_v61 = vadd.f32 %v3135_v55, %v3568_v6 }
 0x1a0   : > { %v3072_v58 = vpop.f32.mrb[62].mxu0  ;;  %v3136_v59 = vpop.f32.mrb[62].mxu1  ;;  %v1158_v2 = vadd.f32 %v3568_v6, %v1157_v56  ;;  %v1414_v3 = vadd.f32 %v3568_v6, %v1413_v57 }
 0x1a1   : > { %v1169_v62 = vadd.f32 %v3072_v58, %v3568_v6  ;;  %v1425_v63 = vadd.f32 %v3136_v59, %v3568_v6  ;;  %v1160_v0 = vpop.f32.mrb[63].mxu0  ;;  %v1416_v1 = vpop.f32.mrb[63].mxu1 }
 0x1a2   : > { %v1161_v4 = vadd.f32 %v3568_v6, %v1160_v0  ;;  %v1417_v5 = vadd.f32 %v3568_v6, %v1416_v1 }
 0x1a3   : > { %v2708_v7 = vpack.c.bf16 %v1169_v62, %v1166_v60  ;;  %v2868_v8 = vpack.c.bf16 %v1425_v63, %v1422_v61 }
 0x1a4   : > { %v2703_v9 = vpack.c.bf16 %v1161_v4, %v1158_v2  ;;  %v2863_v10 = vpack.c.bf16 %v1417_v5, %v1414_v3 }
 0x1a5   : > { %2900 = vst [vmem:[%s3581_s25 + $0xf8] sm:$0xff] %v2708_v7   ;;  %2932 = vst [vmem:[%s3581_s25 + $0x1f8] sm:$0xff] %v2868_v8  }
 0x1a6   : > { %2899 = vst [vmem:[%s3581_s25 + $0xf0] sm:$0xff] %v2703_v9   ;;  %2931 = vst [vmem:[%s3581_s25 + $0x1f0] sm:$0xff] %v2863_v10  }
 0x1a7 PF: > { %s15_s12 = sadd.s32 1, %s3316_s12  }
 0x1a8   : > { %p12_p5 = scmp.ge.s32.totalorder %s15_s12, 10  }
 0x1aa   :  { %14 = sbr.rel (!%p12_p5) target bundleno = 2 (0x2), region = 71 }
 0x1b1   :  { %2090 = vsyncpa [#allocation3], 1 }
 0x1b2   :  { %2092 = vsyncpa [#allocation3 + $0x1], 1 }
 0x1b3   :  { %2093 = vsyncpa [#allocation5], 1 }

// kernel: grdn_forward.113
= control target key start
LH: loop header
LB: loop body
LE: loop exit
PB: predicated region body
PF: predicated region fallthrough
CT: control target
= control target key end

     0   :  { %s3147_s12 = smov 0   ;;  %s3503_s0 = inlined_call_operand.vmem [shape: bf16[8192,2], index: 0, kind: input, shape index: {}]   ;;  %s3504_s1 = inlined_call_operand.vmem [shape: bf16[2,128], index: 1, kind: input, shape index: {}]   ;;  %s3505_s2 = inlined_call_operand.vmem [shape: f32[1,128], index: 2, kind: input, shape index: {}]   ;;  %s3506_s3 = inlined_call_operand.vmem [shape: bf16[8192,128], index: 3, kind: output, shape index: {}]  }
   0x1 LB: > { %s2069_s13 = sadd.s32 4294967295, %s3125_s12   ;;  %p2073_p0 = scmp.ge.s32.totalorder %s3125_s12, 1  ;;  %s3125_s12 = sphi %s3147_s12, %s13_s12  }
   0x2   : > { %p138_p1 = scmp.lt.s32.totalorder %s3125_s12, 9 }
   0x4   : > { %p139_p2 = pnand %p2073_p0, %p138_p1 }
   0x5   : > { %v303_v0 = vld [vmem:[%s3504_s1] sm:$0x1] (!%p139_p2)  ;;  %vm824_vm0 = vcmask (!%p139_p2), 1040384   ;;  %s2074_s16 = sshll.u32 (!%p139_p2), %s2069_s13, 7  ;;  %vm631_vm1 = vcmask (!%p139_p2), 15360  }
   0x6   : > { %142 = sbr.rel (%p139_p2) target bundleno = 359 (0x167), region = 32  ;;  %3045 = vmatprep.subr.msk.bf16.mxu0 (!%p139_p2), %vm824_vm0, %v303_v0  ;;  %3046 = vmatprep.subr.msk.bf16.mxu1 (!%p139_p2), %vm824_vm0, %v303_v0  ;;  %v826_v1 = vsel (!%p139_p2), %vm824_vm0, %v303_v0, 0  ;;  %p163_p3 = scmp.lt.s32.totalorder (!%p139_p2), %s2074_s16, 1023 }
   0x7   : > { %2914 = vmatpush3.bf16.msra.mxu0 (!%p139_p2), %v826_v1  ;;  %3044 = vmatpush3.bf16.msra.mxu1 (!%p139_p2), %v826_v1 }
   0xd   : > { %s3508_s16 = smov (!%p163_p3, %s2074_s16), 1023 }
   0xe   : > { %s2075_s17 = sshll.u32 %s3508_s16, 2 }
   0xf   : > { %s3166_s20 = scalar_lea.vmem %s3503_s0, %s2075_s17  ;;  %s3310_s25 = scalar_lea.vmem %s3506_s3, %s2075_s17 }
  0x10   : > { %v3055_v2 = vld [vmem:[%s3166_s20] sm:$0xff]   ;;  %v3057_v4 = vld [vmem:[%s3166_s20 + $0x8] sm:$0xff]   ;;  %v3059_v6 = vld [vmem:[%s3166_s20 + $0x10] sm:$0xff]  }
  0x11   : > { %v3056_v3 = vld [vmem:[%s3166_s20 + $0x100] sm:$0xff]   ;;  %2915 = vmatprep.mubr.msk.bf16.mxu0 %vm631_vm1, %v3055_v2  ;;  %v3058_v5 = vld [vmem:[%s3166_s20 + $0x108] sm:$0xff]   ;;  %v3060_v7 = vld [vmem:[%s3166_s20 + $0x110] sm:$0xff]  }
  0x12   : > { %2979 = vmatprep.mubr.msk.bf16.mxu1 %vm631_vm1, %v3056_v3  ;;  %2916 = vmatmul.mubr.msk.bf16.vlgmr.msra.gmra.mrb[0].mxu0 %vm631_vm1, %v3057_v4  ;;  %v3061_v8 = vld [vmem:[%s3166_s20 + $0x18] sm:$0xff]   ;;  %v3063_v10 = vld [vmem:[%s3166_s20 + $0x20] sm:$0xff]   ;;  %v3065_v12 = vld [vmem:[%s3166_s20 + $0x28] sm:$0xff]  }
  0x13   : > { %2980 = vmatmul.mubr.msk.bf16.vlgmr.msra.gmra.mrb[0].mxu1 %vm631_vm1, %v3058_v5  ;;  %2919 = vmatprep.mubr.msk.bf16.mxu0 %vm631_vm1, %v3059_v6  ;;  %v3062_v9 = vld [vmem:[%s3166_s20 + $0x118] sm:$0xff]   ;;  %v3064_v11 = vld [vmem:[%s3166_s20 + $0x120] sm:$0xff]   ;;  %v3066_v13 = vld [vmem:[%s3166_s20 + $0x128] sm:$0xff]  }
  0x14   : > { %2983 = vmatprep.mubr.msk.bf16.mxu1 %vm631_vm1, %v3060_v7  ;;  %v3067_v14 = vld [vmem:[%s3166_s20 + $0x30] sm:$0xff]   ;;  %v3069_v16 = vld [vmem:[%s3166_s20 + $0x38] sm:$0xff]   ;;  %v3071_v18 = vld [vmem:[%s3166_s20 + $0x40] sm:$0xff]  }
  0x15   : > { %v3068_v15 = vld [vmem:[%s3166_s20 + $0x130] sm:$0xff]   ;;  %v3070_v17 = vld [vmem:[%s3166_s20 + $0x138] sm:$0xff]   ;;  %v3072_v19 = vld [vmem:[%s3166_s20 + $0x140] sm:$0xff]  }
  0x16   : > { %v3073_v20 = vld [vmem:[%s3166_s20 + $0x48] sm:$0xff]   ;;  %v3075_v22 = vld [vmem:[%s3166_s20 + $0x50] sm:$0xff]   ;;  %v3077_v24 = vld [vmem:[%s3166_s20 + $0x58] sm:$0xff]  }
  0x17   : > { %v3074_v21 = vld [vmem:[%s3166_s20 + $0x148] sm:$0xff]   ;;  %v3076_v23 = vld [vmem:[%s3166_s20 + $0x150] sm:$0xff]   ;;  %v3078_v25 = vld [vmem:[%s3166_s20 + $0x158] sm:$0xff]  }
  0x18   : > { %v3079_v26 = vld [vmem:[%s3166_s20 + $0x60] sm:$0xff]   ;;  %v3081_v28 = vld [vmem:[%s3166_s20 + $0x68] sm:$0xff]   ;;  %v3083_v30 = vld [vmem:[%s3166_s20 + $0x70] sm:$0xff]  }
  0x19   : > { %v3080_v27 = vld [vmem:[%s3166_s20 + $0x160] sm:$0xff]   ;;  %v3082_v29 = vld [vmem:[%s3166_s20 + $0x168] sm:$0xff]   ;;  %v3084_v31 = vld [vmem:[%s3166_s20 + $0x170] sm:$0xff]  }
  0x1a   : > { %2920 = vmatmul.mubr.msk.bf16.gmra.mrb[4].mxu0 %vm631_vm1, %v3061_v8  ;;  %v3085_v32 = vld [vmem:[%s3166_s20 + $0x78] sm:$0xff]   ;;  %v3087_v34 = vld [vmem:[%s3166_s20 + $0x80] sm:$0xff]   ;;  %v3089_v36 = vld [vmem:[%s3166_s20 + $0x88] sm:$0xff]  }
  0x1b   : > { %2984 = vmatmul.mubr.msk.bf16.gmra.mrb[4].mxu1 %vm631_vm1, %v3062_v9  ;;  %2923 = vmatprep.mubr.msk.bf16.mxu0 %vm631_vm1, %v3063_v10  ;;  %v3086_v33 = vld [vmem:[%s3166_s20 + $0x178] sm:$0xff]   ;;  %v3088_v35 = vld [vmem:[%s3166_s20 + $0x180] sm:$0xff]   ;;  %v3090_v37 = vld [vmem:[%s3166_s20 + $0x188] sm:$0xff]  }
  0x1c   : > { %2987 = vmatprep.mubr.msk.bf16.mxu1 %vm631_vm1, %v3064_v11  ;;  %v3091_v38 = vld [vmem:[%s3166_s20 + $0x90] sm:$0xff]   ;;  %v3093_v40 = vld [vmem:[%s3166_s20 + $0x98] sm:$0xff]   ;;  %v3095_v42 = vld [vmem:[%s3166_s20 + $0xa0] sm:$0xff]  }
  0x1d   : > { %v3092_v39 = vld [vmem:[%s3166_s20 + $0x190] sm:$0xff]   ;;  %v3094_v41 = vld [vmem:[%s3166_s20 + $0x198] sm:$0xff]   ;;  %v3096_v43 = vld [vmem:[%s3166_s20 + $0x1a0] sm:$0xff]  }
  0x1e   : > { %v3097_v44 = vld [vmem:[%s3166_s20 + $0xa8] sm:$0xff]   ;;  %v3099_v46 = vld [vmem:[%s3166_s20 + $0xb0] sm:$0xff]   ;;  %v3101_v48 = vld [vmem:[%s3166_s20 + $0xb8] sm:$0xff]  }
  0x1f   : > { %v3098_v45 = vld [vmem:[%s3166_s20 + $0x1a8] sm:$0xff]   ;;  %v3100_v47 = vld [vmem:[%s3166_s20 + $0x1b0] sm:$0xff]   ;;  %v3102_v49 = vld [vmem:[%s3166_s20 + $0x1b8] sm:$0xff]  }
  0x20   : > { %v3103_v50 = vld [vmem:[%s3166_s20 + $0xc0] sm:$0xff]   ;;  %v3105_v52 = vld [vmem:[%s3166_s20 + $0xc8] sm:$0xff]   ;;  %v3107_v54 = vld [vmem:[%s3166_s20 + $0xd0] sm:$0xff]  }
  0x21   : > { %v3104_v51 = vld [vmem:[%s3166_s20 + $0x1c0] sm:$0xff]   ;;  %v3106_v53 = vld [vmem:[%s3166_s20 + $0x1c8] sm:$0xff]   ;;  %v3108_v55 = vld [vmem:[%s3166_s20 + $0x1d0] sm:$0xff]  }
  0x22   : > { %2924 = vmatmul.mubr.msk.bf16.gmra.mrb[8].mxu0 %vm631_vm1, %v3065_v12  ;;  %v3109_v56 = vld [vmem:[%s3166_s20 + $0xd8] sm:$0xff]   ;;  %v3111_v58 = vld [vmem:[%s3166_s20 + $0xe0] sm:$0xff]   ;;  %v3113_v60 = vld [vmem:[%s3166_s20 + $0xe8] sm:$0xff]  }
  0x23   : > { %2988 = vmatmul.mubr.msk.bf16.gmra.mrb[8].mxu1 %vm631_vm1, %v3066_v13  ;;  %2927 = vmatprep.mubr.msk.bf16.mxu0 %vm631_vm1, %v3067_v14  ;;  %v3110_v57 = vld [vmem:[%s3166_s20 + $0x1d8] sm:$0xff]   ;;  %v3112_v59 = vld [vmem:[%s3166_s20 + $0x1e0] sm:$0xff]   ;;  %v3114_v61 = vld [vmem:[%s3166_s20 + $0x1e8] sm:$0xff]  }
  0x24   : > { %2991 = vmatprep.mubr.msk.bf16.mxu1 %vm631_vm1, %v3068_v15  ;;  %v3115_v62 = vld [vmem:[%s3166_s20 + $0xf0] sm:$0xff]   ;;  %v3117_v0 = vld [vmem:[%s3166_s20 + $0xf8] sm:$0xff]   ;;  %v3299_v3 = vld [vmem:[%s3505_s2] ss:$0 sm:$0xff] }
  0x25   : > { %v3116_v63 = vld [vmem:[%s3166_s20 + $0x1f0] sm:$0xff]   ;;  %v3118_v1 = vld [vmem:[%s3166_s20 + $0x1f8] sm:$0xff]  }
  0x2a   : > { %2928 = vmatmul.mubr.msk.bf16.gmra.mrb[12].mxu0 %vm631_vm1, %v3069_v16 }
  0x2b   : > { %2992 = vmatmul.mubr.msk.bf16.gmra.mrb[12].mxu1 %vm631_vm1, %v3070_v17  ;;  %2931 = vmatprep.mubr.msk.bf16.mxu0 %vm631_vm1, %v3071_v18 }
  0x2c   : > { %2995 = vmatprep.mubr.msk.bf16.mxu1 %vm631_vm1, %v3072_v19 }
  0x32   : > { %2932 = vmatmul.mubr.msk.bf16.gmra.mrb[16].mxu0 %vm631_vm1, %v3073_v20 }
  0x33   : > { %2996 = vmatmul.mubr.msk.bf16.gmra.mrb[16].mxu1 %vm631_vm1, %v3074_v21  ;;  %2935 = vmatprep.mubr.msk.bf16.mxu0 %vm631_vm1, %v3075_v22 }
  0x34   : > { %2999 = vmatprep.mubr.msk.bf16.mxu1 %vm631_vm1, %v3076_v23 }
  0x3a   : > { %2936 = vmatmul.mubr.msk.bf16.gmra.mrb[20].mxu0 %vm631_vm1, %v3077_v24 }
  0x3b   : > { %3000 = vmatmul.mubr.msk.bf16.gmra.mrb[20].mxu1 %vm631_vm1, %v3078_v25  ;;  %2939 = vmatprep.mubr.msk.bf16.mxu0 %vm631_vm1, %v3079_v26 }
  0x3c   : > { %3003 = vmatprep.mubr.msk.bf16.mxu1 %vm631_vm1, %v3080_v27 }
  0x42   : > { %2940 = vmatmul.mubr.msk.bf16.gmra.mrb[24].mxu0 %vm631_vm1, %v3081_v28 }
  0x43   : > { %3004 = vmatmul.mubr.msk.bf16.gmra.mrb[24].mxu1 %vm631_vm1, %v3082_v29  ;;  %2943 = vmatprep.mubr.msk.bf16.mxu0 %vm631_vm1, %v3083_v30 }
  0x44   : > { %3007 = vmatprep.mubr.msk.bf16.mxu1 %vm631_vm1, %v3084_v31 }
  0x4a   : > { %2944 = vmatmul.mubr.msk.bf16.gmra.mrb[28].mxu0 %vm631_vm1, %v3085_v32 }
  0x4b   : > { %3008 = vmatmul.mubr.msk.bf16.gmra.mrb[28].mxu1 %vm631_vm1, %v3086_v33  ;;  %2947 = vmatprep.mubr.msk.bf16.mxu0 %vm631_vm1, %v3087_v34 }
  0x4c   : > { %3011 = vmatprep.mubr.msk.bf16.mxu1 %vm631_vm1, %v3088_v35 }
  0x52   : > { %2948 = vmatmul.mubr.msk.bf16.gmra.mrb[32].mxu0 %vm631_vm1, %v3089_v36 }
  0x53   : > { %3012 = vmatmul.mubr.msk.bf16.gmra.mrb[32].mxu1 %vm631_vm1, %v3090_v37  ;;  %2951 = vmatprep.mubr.msk.bf16.mxu0 %vm631_vm1, %v3091_v38 }
  0x54   : > { %3015 = vmatprep.mubr.msk.bf16.mxu1 %vm631_vm1, %v3092_v39 }
  0x5a   : > { %2952 = vmatmul.mubr.msk.bf16.gmra.mrb[36].mxu0 %vm631_vm1, %v3093_v40 }
  0x5b   : > { %3016 = vmatmul.mubr.msk.bf16.gmra.mrb[36].mxu1 %vm631_vm1, %v3094_v41  ;;  %2955 = vmatprep.mubr.msk.bf16.mxu0 %vm631_vm1, %v3095_v42 }
  0x5c   : > { %3019 = vmatprep.mubr.msk.bf16.mxu1 %vm631_vm1, %v3096_v43 }
  0x62   : > { %2956 = vmatmul.mubr.msk.bf16.gmra.mrb[40].mxu0 %vm631_vm1, %v3097_v44 }
  0x63   : > { %3020 = vmatmul.mubr.msk.bf16.gmra.mrb[40].mxu1 %vm631_vm1, %v3098_v45  ;;  %2959 = vmatprep.mubr.msk.bf16.mxu0 %vm631_vm1, %v3099_v46 }
  0x64   : > { %3023 = vmatprep.mubr.msk.bf16.mxu1 %vm631_vm1, %v3100_v47 }
  0x6a   : > { %2960 = vmatmul.mubr.msk.bf16.gmra.mrb[44].mxu0 %vm631_vm1, %v3101_v48 }
  0x6b   : > { %3024 = vmatmul.mubr.msk.bf16.gmra.mrb[44].mxu1 %vm631_vm1, %v3102_v49  ;;  %2963 = vmatprep.mubr.msk.bf16.mxu0 %vm631_vm1, %v3103_v50 }
  0x6c   : > { %3027 = vmatprep.mubr.msk.bf16.mxu1 %vm631_vm1, %v3104_v51 }
  0x72   : > { %2964 = vmatmul.mubr.msk.bf16.gmra.mrb[48].mxu0 %vm631_vm1, %v3105_v52 }
  0x73   : > { %3028 = vmatmul.mubr.msk.bf16.gmra.mrb[48].mxu1 %vm631_vm1, %v3106_v53  ;;  %2967 = vmatprep.mubr.msk.bf16.mxu0 %vm631_vm1, %v3107_v54 }
  0x74   : > { %3031 = vmatprep.mubr.msk.bf16.mxu1 %vm631_vm1, %v3108_v55 }
  0x7a   : > { %2968 = vmatmul.mubr.msk.bf16.gmra.mrb[52].mxu0 %vm631_vm1, %v3109_v56 }
  0x7b   : > { %3032 = vmatmul.mubr.msk.bf16.gmra.mrb[52].mxu1 %vm631_vm1, %v3110_v57  ;;  %2971 = vmatprep.mubr.msk.bf16.mxu0 %vm631_vm1, %v3111_v58 }
  0x7c   : > { %3035 = vmatprep.mubr.msk.bf16.mxu1 %vm631_vm1, %v3112_v59 }
  0x82   : > { %2972 = vmatmul.mubr.msk.bf16.gmra.mrb[56].mxu0 %vm631_vm1, %v3113_v60 }
  0x83   : > { %3036 = vmatmul.mubr.msk.bf16.gmra.mrb[56].mxu1 %vm631_vm1, %v3114_v61  ;;  %2975 = vmatprep.mubr.msk.bf16.mxu0 %vm631_vm1, %v3115_v62 }
  0x84   : > { %3039 = vmatprep.mubr.msk.bf16.mxu1 %vm631_vm1, %v3116_v63 }
  0x8a   : > { %2976 = vmatmul.mubr.msk.bf16.gmra.mrb[60].mxu0 %vm631_vm1, %v3117_v0 }
  0x8b   : > { %3040 = vmatmul.mubr.msk.bf16.gmra.mrb[60].mxu1 %vm631_vm1, %v3118_v1 }
  0xe5   : > { %v2917_v2 = vpop.f32.mrb[0].mxu0 }
  0xe6   : > { %v2981_v4 = vpop.f32.mrb[0].mxu1  ;;  %v862_v5 = vpop.f32.mrb[1].mxu0  ;;  %v871_v8 = vadd.f32 %v2917_v2, %v3299_v3 }
  0xe7   : > { %v1118_v6 = vpop.f32.mrb[1].mxu1  ;;  %v2918_v7 = vpop.f32.mrb[2].mxu0  ;;  %v1127_v12 = vadd.f32 %v2981_v4, %v3299_v3  ;;  %v863_v13 = vadd.f32 %v3299_v3, %v862_v5 }
  0xe8   : > { %v874_v9 = vadd.f32 %v2918_v7, %v3299_v3  ;;  %v2982_v10 = vpop.f32.mrb[2].mxu1  ;;  %v865_v11 = vpop.f32.mrb[3].mxu0  ;;  %v1119_v17 = vadd.f32 %v3299_v3, %v1118_v6 }
  0xe9   : > { %v1130_v14 = vadd.f32 %v2982_v10, %v3299_v3  ;;  %v866_v15 = vadd.f32 %v3299_v3, %v865_v11  ;;  %v1121_v16 = vpop.f32.mrb[3].mxu1 }
  0xea   : > { %v2473_v18 = vpack.c.bf16 %v874_v9, %v871_v8  ;;  %v1122_v19 = vadd.f32 %v3299_v3, %v1121_v16 }
  0xeb   : > { %v2633_v20 = vpack.c.bf16 %v1130_v14, %v1127_v12  ;;  %v2468_v21 = vpack.c.bf16 %v866_v15, %v863_v13 }
  0xec   : > { %2785 = vst [vmem:[%s3310_s25 + $0x8] sm:$0xff] %v2473_v18   ;;  %v2628_v22 = vpack.c.bf16 %v1122_v19, %v1119_v17 }
  0xed   : > { %2817 = vst [vmem:[%s3310_s25 + $0x108] sm:$0xff] %v2633_v20   ;;  %2469 = vst [vmem:[%s3310_s25] sm:$0xff] %v2468_v21   ;;  %v2921_v23 = vpop.f32.mrb[4].mxu0 }
  0xee   : > { %2816 = vst [vmem:[%s3310_s25 + $0x100] sm:$0xff] %v2628_v22   ;;  %v2985_v24 = vpop.f32.mrb[4].mxu1  ;;  %v878_v25 = vpop.f32.mrb[5].mxu0  ;;  %v887_v28 = vadd.f32 %v2921_v23, %v3299_v3 }
  0xef   : > { %v1134_v26 = vpop.f32.mrb[5].mxu1  ;;  %v2922_v27 = vpop.f32.mrb[6].mxu0  ;;  %v1143_v32 = vadd.f32 %v2985_v24, %v3299_v3  ;;  %v879_v33 = vadd.f32 %v3299_v3, %v878_v25 }
  0xf0   : > { %v890_v29 = vadd.f32 %v2922_v27, %v3299_v3  ;;  %v2986_v30 = vpop.f32.mrb[6].mxu1  ;;  %v881_v31 = vpop.f32.mrb[7].mxu0  ;;  %v1135_v37 = vadd.f32 %v3299_v3, %v1134_v26 }
  0xf1   : > { %v1146_v34 = vadd.f32 %v2986_v30, %v3299_v3  ;;  %v882_v35 = vadd.f32 %v3299_v3, %v881_v31  ;;  %v1137_v36 = vpop.f32.mrb[7].mxu1 }
  0xf2   : > { %v2483_v38 = vpack.c.bf16 %v890_v29, %v887_v28  ;;  %v1138_v39 = vadd.f32 %v3299_v3, %v1137_v36 }
  0xf3   : > { %v2643_v40 = vpack.c.bf16 %v1146_v34, %v1143_v32  ;;  %v2478_v41 = vpack.c.bf16 %v882_v35, %v879_v33 }
  0xf4   : > { %2787 = vst [vmem:[%s3310_s25 + $0x18] sm:$0xff] %v2483_v38   ;;  %v2638_v42 = vpack.c.bf16 %v1138_v39, %v1135_v37 }
  0xf5   : > { %2819 = vst [vmem:[%s3310_s25 + $0x118] sm:$0xff] %v2643_v40   ;;  %2786 = vst [vmem:[%s3310_s25 + $0x10] sm:$0xff] %v2478_v41   ;;  %v2925_v43 = vpop.f32.mrb[8].mxu0 }
  0xf6   : > { %2818 = vst [vmem:[%s3310_s25 + $0x110] sm:$0xff] %v2638_v42   ;;  %v2989_v44 = vpop.f32.mrb[8].mxu1  ;;  %v894_v45 = vpop.f32.mrb[9].mxu0  ;;  %v903_v48 = vadd.f32 %v2925_v43, %v3299_v3 }
  0xf7   : > { %v1150_v46 = vpop.f32.mrb[9].mxu1  ;;  %v2926_v47 = vpop.f32.mrb[10].mxu0  ;;  %v1159_v52 = vadd.f32 %v2989_v44, %v3299_v3  ;;  %v895_v53 = vadd.f32 %v3299_v3, %v894_v45 }
  0xf8   : > { %v906_v49 = vadd.f32 %v2926_v47, %v3299_v3  ;;  %v2990_v50 = vpop.f32.mrb[10].mxu1  ;;  %v897_v51 = vpop.f32.mrb[11].mxu0  ;;  %v1151_v57 = vadd.f32 %v3299_v3, %v1150_v46 }
  0xf9   : > { %v1162_v54 = vadd.f32 %v2990_v50, %v3299_v3  ;;  %v898_v55 = vadd.f32 %v3299_v3, %v897_v51  ;;  %v1153_v56 = vpop.f32.mrb[11].mxu1 }
  0xfa   : > { %v2493_v58 = vpack.c.bf16 %v906_v49, %v903_v48  ;;  %v1154_v59 = vadd.f32 %v3299_v3, %v1153_v56 }
  0xfb   : > { %v2653_v60 = vpack.c.bf16 %v1162_v54, %v1159_v52  ;;  %v2488_v61 = vpack.c.bf16 %v898_v55, %v895_v53 }
  0xfc   : > { %2789 = vst [vmem:[%s3310_s25 + $0x28] sm:$0xff] %v2493_v58   ;;  %v2648_v62 = vpack.c.bf16 %v1154_v59, %v1151_v57 }
  0xfd   : > { %2821 = vst [vmem:[%s3310_s25 + $0x128] sm:$0xff] %v2653_v60   ;;  %2788 = vst [vmem:[%s3310_s25 + $0x20] sm:$0xff] %v2488_v61   ;;  %v2929_v63 = vpop.f32.mrb[12].mxu0 }
  0xfe   : > { %2820 = vst [vmem:[%s3310_s25 + $0x120] sm:$0xff] %v2648_v62   ;;  %v2993_v0 = vpop.f32.mrb[12].mxu1  ;;  %v910_v1 = vpop.f32.mrb[13].mxu0  ;;  %v919_v5 = vadd.f32 %v2929_v63, %v3299_v3 }
  0xff   : > { %v1166_v2 = vpop.f32.mrb[13].mxu1  ;;  %v2930_v4 = vpop.f32.mrb[14].mxu0  ;;  %v1175_v9 = vadd.f32 %v2993_v0, %v3299_v3  ;;  %v911_v10 = vadd.f32 %v3299_v3, %v910_v1 }
 0x100   : > { %v922_v6 = vadd.f32 %v2930_v4, %v3299_v3  ;;  %v2994_v7 = vpop.f32.mrb[14].mxu1  ;;  %v913_v8 = vpop.f32.mrb[15].mxu0  ;;  %v1167_v14 = vadd.f32 %v3299_v3, %v1166_v2 }
 0x101   : > { %v1178_v11 = vadd.f32 %v2994_v7, %v3299_v3  ;;  %v914_v12 = vadd.f32 %v3299_v3, %v913_v8  ;;  %v1169_v13 = vpop.f32.mrb[15].mxu1 }
 0x102   : > { %v2503_v15 = vpack.c.bf16 %v922_v6, %v919_v5  ;;  %v1170_v16 = vadd.f32 %v3299_v3, %v1169_v13 }
 0x103   : > { %v2663_v17 = vpack.c.bf16 %v1178_v11, %v1175_v9  ;;  %v2498_v18 = vpack.c.bf16 %v914_v12, %v911_v10 }
 0x104   : > { %2791 = vst [vmem:[%s3310_s25 + $0x38] sm:$0xff] %v2503_v15   ;;  %v2658_v19 = vpack.c.bf16 %v1170_v16, %v1167_v14 }
 0x105   : > { %2823 = vst [vmem:[%s3310_s25 + $0x138] sm:$0xff] %v2663_v17   ;;  %2790 = vst [vmem:[%s3310_s25 + $0x30] sm:$0xff] %v2498_v18   ;;  %v2933_v20 = vpop.f32.mrb[16].mxu0 }
 0x106   : > { %2822 = vst [vmem:[%s3310_s25 + $0x130] sm:$0xff] %v2658_v19   ;;  %v2997_v21 = vpop.f32.mrb[16].mxu1  ;;  %v926_v22 = vpop.f32.mrb[17].mxu0  ;;  %v935_v25 = vadd.f32 %v2933_v20, %v3299_v3 }
 0x107   : > { %v1182_v23 = vpop.f32.mrb[17].mxu1  ;;  %v2934_v24 = vpop.f32.mrb[18].mxu0  ;;  %v1191_v29 = vadd.f32 %v2997_v21, %v3299_v3  ;;  %v927_v30 = vadd.f32 %v3299_v3, %v926_v22 }
 0x108   : > { %v938_v26 = vadd.f32 %v2934_v24, %v3299_v3  ;;  %v2998_v27 = vpop.f32.mrb[18].mxu1  ;;  %v929_v28 = vpop.f32.mrb[19].mxu0  ;;  %v1183_v34 = vadd.f32 %v3299_v3, %v1182_v23 }
 0x109   : > { %v1194_v31 = vadd.f32 %v2998_v27, %v3299_v3  ;;  %v930_v32 = vadd.f32 %v3299_v3, %v929_v28  ;;  %v1185_v33 = vpop.f32.mrb[19].mxu1 }
 0x10a   : > { %v2513_v35 = vpack.c.bf16 %v938_v26, %v935_v25  ;;  %v1186_v36 = vadd.f32 %v3299_v3, %v1185_v33 }
 0x10b   : > { %v2673_v37 = vpack.c.bf16 %v1194_v31, %v1191_v29  ;;  %v2508_v38 = vpack.c.bf16 %v930_v32, %v927_v30 }
 0x10c   : > { %2793 = vst [vmem:[%s3310_s25 + $0x48] sm:$0xff] %v2513_v35   ;;  %v2668_v39 = vpack.c.bf16 %v1186_v36, %v1183_v34 }
 0x10d   : > { %2825 = vst [vmem:[%s3310_s25 + $0x148] sm:$0xff] %v2673_v37   ;;  %2792 = vst [vmem:[%s3310_s25 + $0x40] sm:$0xff] %v2508_v38   ;;  %v2937_v40 = vpop.f32.mrb[20].mxu0 }
 0x10e   : > { %2824 = vst [vmem:[%s3310_s25 + $0x140] sm:$0xff] %v2668_v39   ;;  %v3001_v41 = vpop.f32.mrb[20].mxu1  ;;  %v942_v42 = vpop.f32.mrb[21].mxu0  ;;  %v951_v45 = vadd.f32 %v2937_v40, %v3299_v3 }
 0x10f   : > { %v1198_v43 = vpop.f32.mrb[21].mxu1  ;;  %v2938_v44 = vpop.f32.mrb[22].mxu0  ;;  %v1207_v49 = vadd.f32 %v3001_v41, %v3299_v3  ;;  %v943_v50 = vadd.f32 %v3299_v3, %v942_v42 }
 0x110   : > { %v954_v46 = vadd.f32 %v2938_v44, %v3299_v3  ;;  %v3002_v47 = vpop.f32.mrb[22].mxu1  ;;  %v945_v48 = vpop.f32.mrb[23].mxu0  ;;  %v1199_v54 = vadd.f32 %v3299_v3, %v1198_v43 }
 0x111   : > { %v1210_v51 = vadd.f32 %v3002_v47, %v3299_v3  ;;  %v946_v52 = vadd.f32 %v3299_v3, %v945_v48  ;;  %v1201_v53 = vpop.f32.mrb[23].mxu1 }
 0x112   : > { %v2523_v55 = vpack.c.bf16 %v954_v46, %v951_v45  ;;  %v1202_v56 = vadd.f32 %v3299_v3, %v1201_v53 }
 0x113   : > { %v2683_v57 = vpack.c.bf16 %v1210_v51, %v1207_v49  ;;  %v2518_v58 = vpack.c.bf16 %v946_v52, %v943_v50 }
 0x114   : > { %2795 = vst [vmem:[%s3310_s25 + $0x58] sm:$0xff] %v2523_v55   ;;  %v2678_v59 = vpack.c.bf16 %v1202_v56, %v1199_v54 }
 0x115   : > { %2827 = vst [vmem:[%s3310_s25 + $0x158] sm:$0xff] %v2683_v57   ;;  %2794 = vst [vmem:[%s3310_s25 + $0x50] sm:$0xff] %v2518_v58   ;;  %v2941_v60 = vpop.f32.mrb[24].mxu0 }
 0x116   : > { %2826 = vst [vmem:[%s3310_s25 + $0x150] sm:$0xff] %v2678_v59   ;;  %v3005_v61 = vpop.f32.mrb[24].mxu1  ;;  %v958_v62 = vpop.f32.mrb[25].mxu0  ;;  %v967_v1 = vadd.f32 %v2941_v60, %v3299_v3 }
 0x117   : > { %v1214_v63 = vpop.f32.mrb[25].mxu1  ;;  %v2942_v0 = vpop.f32.mrb[26].mxu0  ;;  %v1223_v6 = vadd.f32 %v3005_v61, %v3299_v3  ;;  %v959_v7 = vadd.f32 %v3299_v3, %v958_v62 }
 0x118   : > { %v970_v2 = vadd.f32 %v2942_v0, %v3299_v3  ;;  %v3006_v4 = vpop.f32.mrb[26].mxu1  ;;  %v961_v5 = vpop.f32.mrb[27].mxu0  ;;  %v1215_v11 = vadd.f32 %v3299_v3, %v1214_v63 }
 0x119   : > { %v1226_v8 = vadd.f32 %v3006_v4, %v3299_v3  ;;  %v962_v9 = vadd.f32 %v3299_v3, %v961_v5  ;;  %v1217_v10 = vpop.f32.mrb[27].mxu1 }
 0x11a   : > { %v2533_v12 = vpack.c.bf16 %v970_v2, %v967_v1  ;;  %v1218_v13 = vadd.f32 %v3299_v3, %v1217_v10 }
 0x11b   : > { %v2693_v14 = vpack.c.bf16 %v1226_v8, %v1223_v6  ;;  %v2528_v15 = vpack.c.bf16 %v962_v9, %v959_v7 }
 0x11c   : > { %2797 = vst [vmem:[%s3310_s25 + $0x68] sm:$0xff] %v2533_v12   ;;  %v2688_v16 = vpack.c.bf16 %v1218_v13, %v1215_v11 }
 0x11d   : > { %2829 = vst [vmem:[%s3310_s25 + $0x168] sm:$0xff] %v2693_v14   ;;  %2796 = vst [vmem:[%s3310_s25 + $0x60] sm:$0xff] %v2528_v15   ;;  %v2945_v17 = vpop.f32.mrb[28].mxu0 }
 0x11e   : > { %2828 = vst [vmem:[%s3310_s25 + $0x160] sm:$0xff] %v2688_v16   ;;  %v3009_v18 = vpop.f32.mrb[28].mxu1  ;;  %v974_v19 = vpop.f32.mrb[29].mxu0  ;;  %v983_v22 = vadd.f32 %v2945_v17, %v3299_v3 }
 0x11f   : > { %v1230_v20 = vpop.f32.mrb[29].mxu1  ;;  %v2946_v21 = vpop.f32.mrb[30].mxu0  ;;  %v1239_v26 = vadd.f32 %v3009_v18, %v3299_v3  ;;  %v975_v27 = vadd.f32 %v3299_v3, %v974_v19 }
 0x120   : > { %v986_v23 = vadd.f32 %v2946_v21, %v3299_v3  ;;  %v3010_v24 = vpop.f32.mrb[30].mxu1  ;;  %v977_v25 = vpop.f32.mrb[31].mxu0  ;;  %v1231_v31 = vadd.f32 %v3299_v3, %v1230_v20 }
 0x121   : > { %v1242_v28 = vadd.f32 %v3010_v24, %v3299_v3  ;;  %v978_v29 = vadd.f32 %v3299_v3, %v977_v25  ;;  %v1233_v30 = vpop.f32.mrb[31].mxu1 }
 0x122   : > { %v2543_v32 = vpack.c.bf16 %v986_v23, %v983_v22  ;;  %v1234_v33 = vadd.f32 %v3299_v3, %v1233_v30 }
 0x123   : > { %v2703_v34 = vpack.c.bf16 %v1242_v28, %v1239_v26  ;;  %v2538_v35 = vpack.c.bf16 %v978_v29, %v975_v27 }
 0x124   : > { %2799 = vst [vmem:[%s3310_s25 + $0x78] sm:$0xff] %v2543_v32   ;;  %v2698_v36 = vpack.c.bf16 %v1234_v33, %v1231_v31 }
 0x125   : > { %2831 = vst [vmem:[%s3310_s25 + $0x178] sm:$0xff] %v2703_v34   ;;  %2798 = vst [vmem:[%s3310_s25 + $0x70] sm:$0xff] %v2538_v35   ;;  %v2949_v37 = vpop.f32.mrb[32].mxu0 }
 0x126   : > { %2830 = vst [vmem:[%s3310_s25 + $0x170] sm:$0xff] %v2698_v36   ;;  %v3013_v38 = vpop.f32.mrb[32].mxu1  ;;  %v990_v39 = vpop.f32.mrb[33].mxu0  ;;  %v999_v42 = vadd.f32 %v2949_v37, %v3299_v3 }
 0x127   : > { %v1246_v40 = vpop.f32.mrb[33].mxu1  ;;  %v2950_v41 = vpop.f32.mrb[34].mxu0  ;;  %v1255_v46 = vadd.f32 %v3013_v38, %v3299_v3  ;;  %v991_v47 = vadd.f32 %v3299_v3, %v990_v39 }
 0x128   : > { %v1002_v43 = vadd.f32 %v2950_v41, %v3299_v3  ;;  %v3014_v44 = vpop.f32.mrb[34].mxu1  ;;  %v993_v45 = vpop.f32.mrb[35].mxu0  ;;  %v1247_v51 = vadd.f32 %v3299_v3, %v1246_v40 }
 0x129   : > { %v1258_v48 = vadd.f32 %v3014_v44, %v3299_v3  ;;  %v994_v49 = vadd.f32 %v3299_v3, %v993_v45  ;;  %v1249_v50 = vpop.f32.mrb[35].mxu1 }
 0x12a   : > { %v2553_v52 = vpack.c.bf16 %v1002_v43, %v999_v42  ;;  %v1250_v53 = vadd.f32 %v3299_v3, %v1249_v50 }
 0x12b   : > { %v2713_v54 = vpack.c.bf16 %v1258_v48, %v1255_v46  ;;  %v2548_v55 = vpack.c.bf16 %v994_v49, %v991_v47 }
 0x12c   : > { %2801 = vst [vmem:[%s3310_s25 + $0x88] sm:$0xff] %v2553_v52   ;;  %v2708_v56 = vpack.c.bf16 %v1250_v53, %v1247_v51 }
 0x12d   : > { %2833 = vst [vmem:[%s3310_s25 + $0x188] sm:$0xff] %v2713_v54   ;;  %2800 = vst [vmem:[%s3310_s25 + $0x80] sm:$0xff] %v2548_v55   ;;  %v2953_v57 = vpop.f32.mrb[36].mxu0 }
 0x12e   : > { %2832 = vst [vmem:[%s3310_s25 + $0x180] sm:$0xff] %v2708_v56   ;;  %v3017_v58 = vpop.f32.mrb[36].mxu1  ;;  %v1006_v59 = vpop.f32.mrb[37].mxu0  ;;  %v1015_v62 = vadd.f32 %v2953_v57, %v3299_v3 }
 0x12f   : > { %v1262_v60 = vpop.f32.mrb[37].mxu1  ;;  %v2954_v61 = vpop.f32.mrb[38].mxu0  ;;  %v1271_v2 = vadd.f32 %v3017_v58, %v3299_v3  ;;  %v1007_v4 = vadd.f32 %v3299_v3, %v1006_v59 }
 0x130   : > { %v1018_v63 = vadd.f32 %v2954_v61, %v3299_v3  ;;  %v3018_v0 = vpop.f32.mrb[38].mxu1  ;;  %v1009_v1 = vpop.f32.mrb[39].mxu0  ;;  %v1263_v8 = vadd.f32 %v3299_v3, %v1262_v60 }
 0x131   : > { %v1274_v5 = vadd.f32 %v3018_v0, %v3299_v3  ;;  %v1010_v6 = vadd.f32 %v3299_v3, %v1009_v1  ;;  %v1265_v7 = vpop.f32.mrb[39].mxu1 }
 0x132   : > { %v2563_v9 = vpack.c.bf16 %v1018_v63, %v1015_v62  ;;  %v1266_v10 = vadd.f32 %v3299_v3, %v1265_v7 }
 0x133   : > { %v2723_v11 = vpack.c.bf16 %v1274_v5, %v1271_v2  ;;  %v2558_v12 = vpack.c.bf16 %v1010_v6, %v1007_v4 }
 0x134   : > { %2803 = vst [vmem:[%s3310_s25 + $0x98] sm:$0xff] %v2563_v9   ;;  %v2718_v13 = vpack.c.bf16 %v1266_v10, %v1263_v8 }
 0x135   : > { %2835 = vst [vmem:[%s3310_s25 + $0x198] sm:$0xff] %v2723_v11   ;;  %2802 = vst [vmem:[%s3310_s25 + $0x90] sm:$0xff] %v2558_v12   ;;  %v2957_v14 = vpop.f32.mrb[40].mxu0 }
 0x136   : > { %2834 = vst [vmem:[%s3310_s25 + $0x190] sm:$0xff] %v2718_v13   ;;  %v3021_v15 = vpop.f32.mrb[40].mxu1  ;;  %v1022_v16 = vpop.f32.mrb[41].mxu0  ;;  %v1031_v19 = vadd.f32 %v2957_v14, %v3299_v3 }
 0x137   : > { %v1278_v17 = vpop.f32.mrb[41].mxu1  ;;  %v2958_v18 = vpop.f32.mrb[42].mxu0  ;;  %v1287_v23 = vadd.f32 %v3021_v15, %v3299_v3  ;;  %v1023_v24 = vadd.f32 %v3299_v3, %v1022_v16 }
 0x138   : > { %v1034_v20 = vadd.f32 %v2958_v18, %v3299_v3  ;;  %v3022_v21 = vpop.f32.mrb[42].mxu1  ;;  %v1025_v22 = vpop.f32.mrb[43].mxu0  ;;  %v1279_v28 = vadd.f32 %v3299_v3, %v1278_v17 }
 0x139   : > { %v1290_v25 = vadd.f32 %v3022_v21, %v3299_v3  ;;  %v1026_v26 = vadd.f32 %v3299_v3, %v1025_v22  ;;  %v1281_v27 = vpop.f32.mrb[43].mxu1 }
 0x13a   : > { %v2573_v29 = vpack.c.bf16 %v1034_v20, %v1031_v19  ;;  %v1282_v30 = vadd.f32 %v3299_v3, %v1281_v27 }
 0x13b   : > { %v2733_v31 = vpack.c.bf16 %v1290_v25, %v1287_v23  ;;  %v2568_v32 = vpack.c.bf16 %v1026_v26, %v1023_v24 }
 0x13c   : > { %2805 = vst [vmem:[%s3310_s25 + $0xa8] sm:$0xff] %v2573_v29   ;;  %v2728_v33 = vpack.c.bf16 %v1282_v30, %v1279_v28 }
 0x13d   : > { %2837 = vst [vmem:[%s3310_s25 + $0x1a8] sm:$0xff] %v2733_v31   ;;  %2804 = vst [vmem:[%s3310_s25 + $0xa0] sm:$0xff] %v2568_v32   ;;  %v2961_v34 = vpop.f32.mrb[44].mxu0 }
 0x13e   : > { %2836 = vst [vmem:[%s3310_s25 + $0x1a0] sm:$0xff] %v2728_v33   ;;  %v3025_v35 = vpop.f32.mrb[44].mxu1  ;;  %v1038_v36 = vpop.f32.mrb[45].mxu0  ;;  %v1047_v39 = vadd.f32 %v2961_v34, %v3299_v3 }
 0x13f   : > { %v1294_v37 = vpop.f32.mrb[45].mxu1  ;;  %v2962_v38 = vpop.f32.mrb[46].mxu0  ;;  %v1303_v43 = vadd.f32 %v3025_v35, %v3299_v3  ;;  %v1039_v44 = vadd.f32 %v3299_v3, %v1038_v36 }
 0x140   : > { %v1050_v40 = vadd.f32 %v2962_v38, %v3299_v3  ;;  %v3026_v41 = vpop.f32.mrb[46].mxu1  ;;  %v1041_v42 = vpop.f32.mrb[47].mxu0  ;;  %v1295_v48 = vadd.f32 %v3299_v3, %v1294_v37 }
 0x141   : > { %v1306_v45 = vadd.f32 %v3026_v41, %v3299_v3  ;;  %v1042_v46 = vadd.f32 %v3299_v3, %v1041_v42  ;;  %v1297_v47 = vpop.f32.mrb[47].mxu1 }
 0x142   : > { %v2583_v49 = vpack.c.bf16 %v1050_v40, %v1047_v39  ;;  %v1298_v50 = vadd.f32 %v3299_v3, %v1297_v47 }
 0x143   : > { %v2743_v51 = vpack.c.bf16 %v1306_v45, %v1303_v43  ;;  %v2578_v52 = vpack.c.bf16 %v1042_v46, %v1039_v44 }
 0x144   : > { %2807 = vst [vmem:[%s3310_s25 + $0xb8] sm:$0xff] %v2583_v49   ;;  %v2738_v53 = vpack.c.bf16 %v1298_v50, %v1295_v48 }
 0x145   : > { %2839 = vst [vmem:[%s3310_s25 + $0x1b8] sm:$0xff] %v2743_v51   ;;  %2806 = vst [vmem:[%s3310_s25 + $0xb0] sm:$0xff] %v2578_v52   ;;  %v2965_v54 = vpop.f32.mrb[48].mxu0 }
 0x146   : > { %2838 = vst [vmem:[%s3310_s25 + $0x1b0] sm:$0xff] %v2738_v53   ;;  %v3029_v55 = vpop.f32.mrb[48].mxu1  ;;  %v1054_v56 = vpop.f32.mrb[49].mxu0  ;;  %v1063_v59 = vadd.f32 %v2965_v54, %v3299_v3 }
 0x147   : > { %v1310_v57 = vpop.f32.mrb[49].mxu1  ;;  %v2966_v58 = vpop.f32.mrb[50].mxu0  ;;  %v1319_v63 = vadd.f32 %v3029_v55, %v3299_v3  ;;  %v1055_v0 = vadd.f32 %v3299_v3, %v1054_v56 }
 0x148   : > { %v1066_v60 = vadd.f32 %v2966_v58, %v3299_v3  ;;  %v3030_v61 = vpop.f32.mrb[50].mxu1  ;;  %v1057_v62 = vpop.f32.mrb[51].mxu0  ;;  %v1311_v5 = vadd.f32 %v3299_v3, %v1310_v57 }
 0x149   : > { %v1322_v1 = vadd.f32 %v3030_v61, %v3299_v3  ;;  %v1058_v2 = vadd.f32 %v3299_v3, %v1057_v62  ;;  %v1313_v4 = vpop.f32.mrb[51].mxu1 }
 0x14a   : > { %v2593_v6 = vpack.c.bf16 %v1066_v60, %v1063_v59  ;;  %v1314_v7 = vadd.f32 %v3299_v3, %v1313_v4 }
 0x14b   : > { %v2753_v8 = vpack.c.bf16 %v1322_v1, %v1319_v63  ;;  %v2588_v9 = vpack.c.bf16 %v1058_v2, %v1055_v0 }
 0x14c   : > { %2809 = vst [vmem:[%s3310_s25 + $0xc8] sm:$0xff] %v2593_v6   ;;  %v2748_v10 = vpack.c.bf16 %v1314_v7, %v1311_v5 }
 0x14d   : > { %2841 = vst [vmem:[%s3310_s25 + $0x1c8] sm:$0xff] %v2753_v8   ;;  %2808 = vst [vmem:[%s3310_s25 + $0xc0] sm:$0xff] %v2588_v9   ;;  %v2969_v11 = vpop.f32.mrb[52].mxu0 }
 0x14e   : > { %2840 = vst [vmem:[%s3310_s25 + $0x1c0] sm:$0xff] %v2748_v10   ;;  %v3033_v12 = vpop.f32.mrb[52].mxu1  ;;  %v1070_v13 = vpop.f32.mrb[53].mxu0  ;;  %v1079_v16 = vadd.f32 %v2969_v11, %v3299_v3 }
 0x14f   : > { %v1326_v14 = vpop.f32.mrb[53].mxu1  ;;  %v2970_v15 = vpop.f32.mrb[54].mxu0  ;;  %v1335_v20 = vadd.f32 %v3033_v12, %v3299_v3  ;;  %v1071_v21 = vadd.f32 %v3299_v3, %v1070_v13 }
 0x150   : > { %v1082_v17 = vadd.f32 %v2970_v15, %v3299_v3  ;;  %v3034_v18 = vpop.f32.mrb[54].mxu1  ;;  %v1073_v19 = vpop.f32.mrb[55].mxu0  ;;  %v1327_v25 = vadd.f32 %v3299_v3, %v1326_v14 }
 0x151   : > { %v1338_v22 = vadd.f32 %v3034_v18, %v3299_v3  ;;  %v1074_v23 = vadd.f32 %v3299_v3, %v1073_v19  ;;  %v1329_v24 = vpop.f32.mrb[55].mxu1 }
 0x152   : > { %v2603_v26 = vpack.c.bf16 %v1082_v17, %v1079_v16  ;;  %v1330_v27 = vadd.f32 %v3299_v3, %v1329_v24 }
 0x153   : > { %v2763_v28 = vpack.c.bf16 %v1338_v22, %v1335_v20  ;;  %v2598_v29 = vpack.c.bf16 %v1074_v23, %v1071_v21 }
 0x154   : > { %2811 = vst [vmem:[%s3310_s25 + $0xd8] sm:$0xff] %v2603_v26   ;;  %v2758_v30 = vpack.c.bf16 %v1330_v27, %v1327_v25 }
 0x155   : > { %2843 = vst [vmem:[%s3310_s25 + $0x1d8] sm:$0xff] %v2763_v28   ;;  %2810 = vst [vmem:[%s3310_s25 + $0xd0] sm:$0xff] %v2598_v29   ;;  %v2973_v31 = vpop.f32.mrb[56].mxu0 }
 0x156   : > { %2842 = vst [vmem:[%s3310_s25 + $0x1d0] sm:$0xff] %v2758_v30   ;;  %v3037_v32 = vpop.f32.mrb[56].mxu1  ;;  %v1086_v33 = vpop.f32.mrb[57].mxu0  ;;  %v1095_v36 = vadd.f32 %v2973_v31, %v3299_v3 }
 0x157   : > { %v1342_v34 = vpop.f32.mrb[57].mxu1  ;;  %v2974_v35 = vpop.f32.mrb[58].mxu0  ;;  %v1351_v40 = vadd.f32 %v3037_v32, %v3299_v3  ;;  %v1087_v41 = vadd.f32 %v3299_v3, %v1086_v33 }
 0x158   : > { %v1098_v37 = vadd.f32 %v2974_v35, %v3299_v3  ;;  %v3038_v38 = vpop.f32.mrb[58].mxu1  ;;  %v1089_v39 = vpop.f32.mrb[59].mxu0  ;;  %v1343_v45 = vadd.f32 %v3299_v3, %v1342_v34 }
 0x159   : > { %v1354_v42 = vadd.f32 %v3038_v38, %v3299_v3  ;;  %v1090_v43 = vadd.f32 %v3299_v3, %v1089_v39  ;;  %v1345_v44 = vpop.f32.mrb[59].mxu1 }
 0x15a   : > { %v2613_v46 = vpack.c.bf16 %v1098_v37, %v1095_v36  ;;  %v1346_v47 = vadd.f32 %v3299_v3, %v1345_v44 }
 0x15b   : > { %v2773_v48 = vpack.c.bf16 %v1354_v42, %v1351_v40  ;;  %v2608_v49 = vpack.c.bf16 %v1090_v43, %v1087_v41 }
 0x15c   : > { %2813 = vst [vmem:[%s3310_s25 + $0xe8] sm:$0xff] %v2613_v46   ;;  %v2768_v50 = vpack.c.bf16 %v1346_v47, %v1343_v45 }
 0x15d   : > { %2845 = vst [vmem:[%s3310_s25 + $0x1e8] sm:$0xff] %v2773_v48   ;;  %2812 = vst [vmem:[%s3310_s25 + $0xe0] sm:$0xff] %v2608_v49   ;;  %v2977_v51 = vpop.f32.mrb[60].mxu0 }
 0x15e   : > { %2844 = vst [vmem:[%s3310_s25 + $0x1e0] sm:$0xff] %v2768_v50   ;;  %v3041_v52 = vpop.f32.mrb[60].mxu1  ;;  %v1102_v53 = vpop.f32.mrb[61].mxu0  ;;  %v1111_v56 = vadd.f32 %v2977_v51, %v3299_v3 }
 0x15f   : > { %v1358_v54 = vpop.f32.mrb[61].mxu1  ;;  %v2978_v55 = vpop.f32.mrb[62].mxu0  ;;  %v1367_v60 = vadd.f32 %v3041_v52, %v3299_v3  ;;  %v1103_v61 = vadd.f32 %v3299_v3, %v1102_v53 }
 0x160   : > { %v1114_v57 = vadd.f32 %v2978_v55, %v3299_v3  ;;  %v3042_v58 = vpop.f32.mrb[62].mxu1  ;;  %v1105_v59 = vpop.f32.mrb[63].mxu0  ;;  %v1359_v1 = vadd.f32 %v3299_v3, %v1358_v54 }
 0x161   : > { %v1370_v62 = vadd.f32 %v3042_v58, %v3299_v3  ;;  %v1106_v63 = vadd.f32 %v3299_v3, %v1105_v59  ;;  %v1361_v0 = vpop.f32.mrb[63].mxu1 }
 0x162   : > { %v2623_v2 = vpack.c.bf16 %v1114_v57, %v1111_v56  ;;  %v1362_v4 = vadd.f32 %v3299_v3, %v1361_v0 }
 0x163   : > { %v2783_v5 = vpack.c.bf16 %v1370_v62, %v1367_v60  ;;  %v2618_v6 = vpack.c.bf16 %v1106_v63, %v1103_v61 }
 0x164   : > { %2815 = vst [vmem:[%s3310_s25 + $0xf8] sm:$0xff] %v2623_v2   ;;  %v2778_v7 = vpack.c.bf16 %v1362_v4, %v1359_v1 }
 0x165   : > { %2847 = vst [vmem:[%s3310_s25 + $0x1f8] sm:$0xff] %v2783_v5   ;;  %2814 = vst [vmem:[%s3310_s25 + $0xf0] sm:$0xff] %v2618_v6  }
 0x166   : > { %2846 = vst [vmem:[%s3310_s25 + $0x1f0] sm:$0xff] %v2778_v7  }
 0x167 PF: > { %s13_s12 = sadd.s32 1, %s3125_s12  }
 0x168   : > { %p10_p4 = scmp.ge.s32.totalorder %s13_s12, 10  }
 0x16a   :  { %12 = sbr.rel (!%p10_p4) target bundleno = 1 (0x1), region = 62 }

</bundles_post_ra>
